<compile_context>
chip_gen: v5e
topology: v5e:2x2
jax: 0.10.0
libtpu: 0.0.40
codegen_flags: <defaults>
</compile_context>

<pallas_src>
import jax
import jax.numpy as jnp
from jax.experimental import pallas as pl
from jax.experimental.pallas import tpu as pltpu

FEAT = 64              # fused feature width (fc1 expects 64 inputs)
PACK = 2 * FEAT        # 128: lane-packed modality width
HID = 30               # fc1 / LayerNorm width
NB_CLASSES = 2
OUT_PAD = 128          # lane-dense output block width
LN_EPS = 1e-5


def cross_oa_op_kernel(att_ref,               # SMEM f32[32] (4 att modules x 8 scalars)
                       x12_ref,               # VMEM (tb, 128)  [x1 | x2] lane-packed
                       fc1_w_ref, fc1_b_ref,  # (FEAT, HID), (1, HID)
                       ln_g_ref, ln_b_ref,    # (1, HID), (1, HID)
                       out_w_ref, out_b_ref,  # (HID, OUT_PAD), (1, OUT_PAD) zero-padded
                       o_ref):                # (tb, OUT_PAD)
    x12 = x12_ref[...]                        # (tb, 128)
    x1 = x12[:, :FEAT]                        # (tb, 64)
    x2 = x12[:, FEAT:]                        # (tb, 64)

    # ---------------- OA attentions (att1, att2), lane-packed ----------------
    # scores s[b,i,j] = q[b,i] + k[b,j]: softmax over j cancels q, so each OA
    # module reduces to a per-batch scalar  wo * sum_j softmax_j(k_j) v_j + bo.
    # lanes [0, FEAT): att2 (kv = x1);  lanes [FEAT, 2F): att1 (kv = x2).
    lane_r = jax.lax.broadcasted_iota(jnp.int32, (1, PACK), 1)
    lo_r = lane_r < FEAT
    oak_s = jnp.where(lo_r, att_ref[10], att_ref[2])   # wk2 | wk1
    oak_b = jnp.where(lo_r, att_ref[11], att_ref[3])   # bk2 | bk1
    oav_s = jnp.where(lo_r, att_ref[12], att_ref[4])   # wv2 | wv1
    oav_b = jnp.where(lo_r, att_ref[13], att_ref[5])   # bv2 | bv1

    k_oa = oak_s * x12 + oak_b                # one full-lane pass for both modules
    v_oa = oav_s * x12 + oav_b
    # Single stabilizer (max over both halves) is a valid shift for each half's
    # softmax: the common factor cancels in num/den.
    m_oa = jnp.max(k_oa, axis=-1, keepdims=True)
    p_oa = jnp.exp(k_oa - m_oa)               # full-lane EUP exp
    pv_oa = p_oa * v_oa
    den2 = jnp.sum(p_oa[:, :FEAT], axis=-1, keepdims=True)
    den1 = jnp.sum(p_oa, axis=-1, keepdims=True) - den2
    num2 = jnp.sum(pv_oa[:, :FEAT], axis=-1, keepdims=True)
    num1 = jnp.sum(pv_oa, axis=-1, keepdims=True) - num2
    ctx1 = num1 * pl.reciprocal(den1, approx=True)      # att1(x1, x2)
    ctx2 = num2 * pl.reciprocal(den2, approx=True)      # att2(x2, x1)
    oa_sum = ((att_ref[6] * ctx1 + att_ref[7])
              + (att_ref[14] * ctx2 + att_ref[15]))     # (tb, 1)

    # ---------------- OP attentions (att3, att4), lane-packed scores ---------
    # att3(x1, x2): q from x1, k/v from x2 -> lanes [0, FEAT)
    # att4(x2, x1): q from x2, k/v from x1 -> lanes [FEAT, 2F)
    q3 = att_ref[16] * x1 + att_ref[17]
    k3 = att_ref[18] * x2 + att_ref[19]
    v3 = att_ref[20] * x2 + att_ref[21]
    q4 = att_ref[24] * x2 + att_ref[25]
    k4 = att_ref[26] * x1 + att_ref[27]
    v4 = att_ref[28] * x1 + att_ref[29]

    def rowmax(q, k):
        # analytic max_j (q_i * k_j) from two tiny (tb,1) reductions
        kmax = jnp.max(k, axis=-1, keepdims=True)
        kmin = jnp.min(k, axis=-1, keepdims=True)
        return jnp.where(q >= 0.0, q * kmax, q * kmin)   # (tb, FEAT)

    # Shared stabilizer for both lane halves (ratios unchanged, args <= 0).
    m_both = jnp.maximum(rowmax(q3, k3), rowmax(q4, k4))  # (tb, FEAT)

    k_pack = jnp.concatenate([k3, k4], axis=-1)[:, None, :]   # (tb, 1, 128)
    v_pack = jnp.concatenate([v3, v4], axis=-1)[:, None, :]

    lane3 = jax.lax.broadcasted_iota(jnp.int32, (1, 1, PACK), 2)
    lo3 = lane3 < FEAT
    q_sel = jnp.where(lo3, q3[:, :, None], q4[:, :, None])    # (tb, FEAT, 128)
    p = jnp.exp(q_sel * k_pack - m_both[:, :, None])          # full-lane EUP exp
    prod = p * v_pack                                         # single big product

    # Low-half (offset-0) slice sums; high half by subtraction from full sums.
    num3 = jnp.sum(prod[:, :, :FEAT], axis=-1)                # (tb, FEAT)
    num4 = jnp.sum(prod, axis=-1) - num3
    den3 = jnp.sum(p[:, :, :FEAT], axis=-1)
    den4 = jnp.sum(p, axis=-1) - den3
    # TODO(synk): den3/den4 could be offloaded to the idle MXU via a constant
    # (128, 2) 0/1 selector matmul; skipped to avoid a lane-sparse last-dim-2
    # result relayout without being able to measure the trade-off.
    # TODO(synk): on v6e/v7x a bf16 cast of p/prod would halve ld/st traffic;
    # kept in f32 pending an accuracy check against the reference.

    out3 = att_ref[22] * (num3 * pl.reciprocal(den3, approx=True)) + att_ref[23]
    out4 = att_ref[30] * (num4 * pl.reciprocal(den4, approx=True)) + att_ref[31]

    # torch.sum(torch.stack([...]), dim=0) == elementwise sum of the six tensors
    # (the two OA terms are constant over the feature axis -> broadcast add).
    fused = (out3 + out4) + (x1 + x2) + oa_sum                # (tb, FEAT)

    # fc1: (tb, 64) @ (64, 30) + b  -- tiny MXU matmul
    h = jnp.dot(fused, fc1_w_ref[...], preferred_element_type=jnp.float32) + fc1_b_ref[...]

    # LayerNorm(30) with affine (cannot be folded into layer_out: ReLU follows)
    mu = jnp.mean(h, axis=-1, keepdims=True)
    var = jnp.mean((h - mu) ** 2, axis=-1, keepdims=True)
    hn = (h - mu) * jax.lax.rsqrt(var + LN_EPS)
    hn = hn * ln_g_ref[...] + ln_b_ref[...]

    # Dropout(p=0.01) is identity at inference time.
    # TODO(synk): add stochastic-dropout path (pltpu.prng_random_bits) for training.
    hr = jnp.maximum(hn, 0.0)                                 # ReLU

    # layer_out: (tb, 30) @ (30, 128) + b  -- zero-padded weights give a
    # lane-dense (tb, 128) store (no masked vst of a 2-wide block).
    o_ref[...] = (jnp.dot(hr, out_w_ref[...], preferred_element_type=jnp.float32)
                  + out_b_ref[...])


def _round_up(x, m):
    return ((x + m - 1) // m) * m


def _vmem_capacity_bytes():
    try:
        info = pltpu.get_tpu_info()
        for name in ("vmem_capacity_bytes", "vmem_bytes", "vmem_size_bytes"):
            v = getattr(info, name, None)
            if v:
                return int(v)
    except Exception:
        pass
    return 64 * 1024 * 1024    # conservative default (v7x per-TC VMEM)


def cross_oa_op(x1_feat, x2_feat, params, *, tb_max=None):
    """x1_feat, x2_feat: (bs, FEAT) float32 fused-modality features."""
    bs = x1_feat.shape[0]

    # Lane-pack the two 64-wide modality features into one 128-wide stream.
    x12 = jnp.concatenate([x1_feat, x2_feat], axis=-1).astype(jnp.float32)  # (bs, 128)

    # Per-generation tile / scoped-VMEM selection.
    vmem_cap = _vmem_capacity_bytes()
    big_vmem = vmem_cap >= 100 * 1024 * 1024          # v5e / v6e (128 MiB)
    if tb_max is None:
        tb_max = 512 if big_vmem else 256             # v7x: 64 MiB -> smaller tile
    vmem_limit = (96 if big_vmem else 48) * 1024 * 1024

    pad_bs = _round_up(max(bs, 1), 8)
    tb = min(tb_max, pad_bs)
    # Guarantee >= 2 grid steps whenever the batch allows it so the "parallel"
    # batch axis actually shards across both v7x TensorCores (negligible extra
    # per-step overhead on single-TC v5e/v6e).
    if pad_bs >= 16:
        tb = min(tb, max(8, (pad_bs // 2) // 8 * 8))
    pad_bs = _round_up(pad_bs, tb)
    if pad_bs != bs:
        x12 = jnp.pad(x12, ((0, pad_bs - bs), (0, 0)))

    # Zero-pad the classifier weights to a lane-dense 128-wide output block.
    out_w = jnp.zeros((HID, OUT_PAD), jnp.float32).at[:, :NB_CLASSES].set(params["out_w"])
    out_b = jnp.zeros((1, OUT_PAD), jnp.float32).at[:, :NB_CLASSES].set(params["out_b"])

    grid = (pad_bs // tb,)
    smem = pl.BlockSpec(memory_space=pltpu.MemorySpace.SMEM)
    row_spec = pl.BlockSpec((tb, PACK), lambda i: (i, 0))

    def const(shape):
        return pl.BlockSpec(shape, lambda i: (0, 0))

    out = pl.pallas_call(
        cross_oa_op_kernel,
        out_shape=jax.ShapeDtypeStruct((pad_bs, OUT_PAD), jnp.float32),
        grid=grid,
        in_specs=[smem,
                  row_spec,
                  const((FEAT, HID)), const((1, HID)),
                  const((1, HID)), const((1, HID)),
                  const((HID, OUT_PAD)), const((1, OUT_PAD))],
        out_specs=pl.BlockSpec((tb, OUT_PAD), lambda i: (i, 0)),
        compiler_params=pltpu.CompilerParams(
            dimension_semantics=("parallel",),        # dual-TC sharding on v7x
            vmem_limit_bytes=vmem_limit),
    )(params["att"], x12,
      params["fc1_w"], params["fc1_b"],
      params["ln_g"], params["ln_b"],
      out_w, out_b)
    return out[:bs, :NB_CLASSES]


def init_params(key):
    ks = jax.random.split(key, 6)
    return {
        # 4 attention modules x (wq, bq, wk, bk, wv, bv, wo, bo)
        "att":   0.5 * jax.random.normal(ks[0], (32,), jnp.float32),
        # Linear(64, 30): stored pre-transposed as (in, out)
        "fc1_w": 0.1 * jax.random.normal(ks[1], (FEAT, HID), jnp.float32),
        "fc1_b": 0.1 * jax.random.normal(ks[2], (1, HID), jnp.float32),
        # LayerNorm(30)
        "ln_g":  jnp.ones((1, HID), jnp.float32),
        "ln_b":  jnp.zeros((1, HID), jnp.float32),
        # Linear(30, 2)
        "out_w": 0.1 * jax.random.normal(ks[3], (HID, NB_CLASSES), jnp.float32),
        "out_b": 0.1 * jax.random.normal(ks[4], (1, NB_CLASSES), jnp.float32),
    }


if __name__ == "__main__":
    key = jax.random.PRNGKey(0)
    k_params, k_x1, k_x2, k_wimg, k_wehr = jax.random.split(key, 5)

    params = init_params(k_params)

    # Small deterministic inputs consistent with the module's forward:
    #   x1: image tensor (NCHW), x2: EHR tensor with a singleton dim-1.
    bs = 2
    x1 = jax.random.normal(k_x1, (bs, 4, 16, 16), jnp.float32)   # image
    x2 = jax.random.normal(k_x2, (bs, 1, 32), jnp.float32)       # EHR

    # Stand-in backbones (plain-JAX glue): model_image -> (bs, 64),
    # model_EHR -> (bs, 1, 64) which forward then squeezes on dim 1.
    w_img = 0.05 * jax.random.normal(k_wimg, (4 * 16 * 16, FEAT), jnp.float32)
    w_ehr = 0.05 * jax.random.normal(k_wehr, (32, FEAT), jnp.float32)
    x1_feat = x1.reshape(bs, -1) @ w_img                          # (bs, 64)
    x2_feat = jnp.squeeze(x2 @ w_ehr, axis=1)                     # (bs, 64)

    out = cross_oa_op(x1_feat, x2_feat, params)
    out = jax.block_until_ready(out)
    assert out.shape == (bs, NB_CLASSES) and out.dtype == jnp.float32
    print("KERNEL_OK")
</pallas_src>

<mosaic_0001>
module attributes {stable_mosaic.version = 11 : i64} {
  func.func @cross_oa_op_kernel(%arg0: i32, %arg1: memref<32xf32, #tpu.memory_space<smem>>, %arg2: memref<8x128xf32, #tpu.memory_space<vmem>>, %arg3: memref<64x30xf32, #tpu.memory_space<vmem>>, %arg4: memref<1x30xf32, #tpu.memory_space<vmem>>, %arg5: memref<1x30xf32, #tpu.memory_space<vmem>>, %arg6: memref<1x30xf32, #tpu.memory_space<vmem>>, %arg7: memref<30x128xf32, #tpu.memory_space<vmem>>, %arg8: memref<1x128xf32, #tpu.memory_space<vmem>>, %arg9: memref<8x128xf32, #tpu.memory_space<vmem>>) attributes {dimension_semantics = [#tpu.dimension_semantics<parallel>], iteration_bounds = array<i64: 1>, scalar_prefetch = 0 : i64, scratch_operands = 0 : i64, tpu.core_type = #tpu.core_type<tc>, window_params = [{transform_indices = @transform_0, window_bounds = array<i64: 32>}, {transform_indices = @transform_1, window_bounds = array<i64: 8, 128>}, {pipeline_mode = #tpu.pipeline_mode<synchronous>, transform_indices = @transform_2, window_bounds = array<i64: 64, 30>}, {pipeline_mode = #tpu.pipeline_mode<synchronous>, transform_indices = @transform_3, window_bounds = array<i64: 1, 30>}, {pipeline_mode = #tpu.pipeline_mode<synchronous>, transform_indices = @transform_4, window_bounds = array<i64: 1, 30>}, {pipeline_mode = #tpu.pipeline_mode<synchronous>, transform_indices = @transform_5, window_bounds = array<i64: 1, 30>}, {pipeline_mode = #tpu.pipeline_mode<synchronous>, transform_indices = @transform_6, window_bounds = array<i64: 30, 128>}, {pipeline_mode = #tpu.pipeline_mode<synchronous>, transform_indices = @transform_7, window_bounds = array<i64: 1, 128>}, {transform_indices = @transform_8, window_bounds = array<i64: 8, 128>}]} {
    %c0 = arith.constant 0 : index
    %c0_0 = arith.constant 0 : index
    %0 = vector.load %arg2[%c0, %c0_0] : memref<8x128xf32, #tpu.memory_space<vmem>>, vector<8x128xf32>
    %1 = vector.extract_strided_slice %0 {offsets = [0, 0], sizes = [8, 64], strides = [1, 1]} : vector<8x128xf32> to vector<8x64xf32>
    %2 = vector.extract_strided_slice %0 {offsets = [0, 64], sizes = [8, 64], strides = [1, 1]} : vector<8x128xf32> to vector<8x64xf32>
    %3 = tpu.iota {dimensions = array<i32: 1>} : vector<1x128xi32>
    %c64_i32 = arith.constant 64 : i32
    %4 = vector.broadcast %c64_i32 : i32 to vector<1x128xi32>
    %5 = arith.cmpi slt, %3, %4 : vector<1x128xi32>
    %c10 = arith.constant 10 : index
    %6 = memref.load %arg1[%c10] : memref<32xf32, #tpu.memory_space<smem>>
    %c2 = arith.constant 2 : index
    %7 = memref.load %arg1[%c2] : memref<32xf32, #tpu.memory_space<smem>>
    %8 = vector.broadcast %6 : f32 to vector<1x128xf32>
    %9 = vector.broadcast %7 : f32 to vector<1x128xf32>
    %10 = arith.select %5, %8, %9 : vector<1x128xi1>, vector<1x128xf32>
    %c11 = arith.constant 11 : index
    %11 = memref.load %arg1[%c11] : memref<32xf32, #tpu.memory_space<smem>>
    %c3 = arith.constant 3 : index
    %12 = memref.load %arg1[%c3] : memref<32xf32, #tpu.memory_space<smem>>
    %13 = vector.broadcast %11 : f32 to vector<1x128xf32>
    %14 = vector.broadcast %12 : f32 to vector<1x128xf32>
    %15 = arith.select %5, %13, %14 : vector<1x128xi1>, vector<1x128xf32>
    %c12 = arith.constant 12 : index
    %16 = memref.load %arg1[%c12] : memref<32xf32, #tpu.memory_space<smem>>
    %c4 = arith.constant 4 : index
    %17 = memref.load %arg1[%c4] : memref<32xf32, #tpu.memory_space<smem>>
    %18 = vector.broadcast %16 : f32 to vector<1x128xf32>
    %19 = vector.broadcast %17 : f32 to vector<1x128xf32>
    %20 = arith.select %5, %18, %19 : vector<1x128xi1>, vector<1x128xf32>
    %c13 = arith.constant 13 : index
    %21 = memref.load %arg1[%c13] : memref<32xf32, #tpu.memory_space<smem>>
    %c5 = arith.constant 5 : index
    %22 = memref.load %arg1[%c5] : memref<32xf32, #tpu.memory_space<smem>>
    %23 = vector.broadcast %21 : f32 to vector<1x128xf32>
    %24 = vector.broadcast %22 : f32 to vector<1x128xf32>
    %25 = arith.select %5, %23, %24 : vector<1x128xi1>, vector<1x128xf32>
    %26 = vector.broadcast %10 : vector<1x128xf32> to vector<8x128xf32>
    %27 = arith.mulf %26, %0 : vector<8x128xf32>
    %28 = vector.broadcast %15 : vector<1x128xf32> to vector<8x128xf32>
    %29 = arith.addf %27, %28 : vector<8x128xf32>
    %30 = vector.broadcast %20 : vector<1x128xf32> to vector<8x128xf32>
    %31 = arith.mulf %30, %0 : vector<8x128xf32>
    %32 = vector.broadcast %25 : vector<1x128xf32> to vector<8x128xf32>
    %33 = arith.addf %31, %32 : vector<8x128xf32>
    %cst = arith.constant dense<0xFF800000> : vector<8xf32>
    %34 = vector.multi_reduction <maximumf>, %29, %cst [1] : vector<8x128xf32> to vector<8xf32>
    %35 = vector.shape_cast %34 : vector<8xf32> to vector<8x1xf32>
    %36 = vector.broadcast %35 : vector<8x1xf32> to vector<8x128xf32>
    %37 = arith.subf %29, %36 : vector<8x128xf32>
    %38 = math.exp %37 : vector<8x128xf32>
    %39 = arith.mulf %38, %33 : vector<8x128xf32>
    %40 = vector.extract_strided_slice %38 {offsets = [0, 0], sizes = [8, 64], strides = [1, 1]} : vector<8x128xf32> to vector<8x64xf32>
    %cst_1 = arith.constant dense<0.000000e+00> : vector<8xf32>
    %41 = vector.multi_reduction <add>, %40, %cst_1 [1] : vector<8x64xf32> to vector<8xf32>
    %42 = vector.shape_cast %41 : vector<8xf32> to vector<8x1xf32>
    %cst_2 = arith.constant dense<0.000000e+00> : vector<8xf32>
    %43 = vector.multi_reduction <add>, %38, %cst_2 [1] : vector<8x128xf32> to vector<8xf32>
    %44 = vector.shape_cast %43 : vector<8xf32> to vector<8x1xf32>
    %45 = arith.subf %44, %42 : vector<8x1xf32>
    %46 = vector.extract_strided_slice %39 {offsets = [0, 0], sizes = [8, 64], strides = [1, 1]} : vector<8x128xf32> to vector<8x64xf32>
    %cst_3 = arith.constant dense<0.000000e+00> : vector<8xf32>
    %47 = vector.multi_reduction <add>, %46, %cst_3 [1] : vector<8x64xf32> to vector<8xf32>
    %48 = vector.shape_cast %47 : vector<8xf32> to vector<8x1xf32>
    %cst_4 = arith.constant dense<0.000000e+00> : vector<8xf32>
    %49 = vector.multi_reduction <add>, %39, %cst_4 [1] : vector<8x128xf32> to vector<8xf32>
    %50 = vector.shape_cast %49 : vector<8xf32> to vector<8x1xf32>
    %51 = arith.subf %50, %48 : vector<8x1xf32>
    %52 = tpu.reciprocal %45 {approx = true} : vector<8x1xf32> -> vector<8x1xf32>
    %53 = arith.mulf %51, %52 : vector<8x1xf32>
    %54 = tpu.reciprocal %42 {approx = true} : vector<8x1xf32> -> vector<8x1xf32>
    %55 = arith.mulf %48, %54 : vector<8x1xf32>
    %c6 = arith.constant 6 : index
    %56 = memref.load %arg1[%c6] : memref<32xf32, #tpu.memory_space<smem>>
    %57 = vector.broadcast %56 : f32 to vector<8x1xf32>
    %58 = arith.mulf %57, %53 : vector<8x1xf32>
    %c7 = arith.constant 7 : index
    %59 = memref.load %arg1[%c7] : memref<32xf32, #tpu.memory_space<smem>>
    %60 = vector.broadcast %59 : f32 to vector<8x1xf32>
    %61 = arith.addf %58, %60 : vector<8x1xf32>
    %c14 = arith.constant 14 : index
    %62 = memref.load %arg1[%c14] : memref<32xf32, #tpu.memory_space<smem>>
    %63 = vector.broadcast %62 : f32 to vector<8x1xf32>
    %64 = arith.mulf %63, %55 : vector<8x1xf32>
    %c15 = arith.constant 15 : index
    %65 = memref.load %arg1[%c15] : memref<32xf32, #tpu.memory_space<smem>>
    %66 = vector.broadcast %65 : f32 to vector<8x1xf32>
    %67 = arith.addf %64, %66 : vector<8x1xf32>
    %68 = arith.addf %61, %67 : vector<8x1xf32>
    %c16 = arith.constant 16 : index
    %69 = memref.load %arg1[%c16] : memref<32xf32, #tpu.memory_space<smem>>
    %70 = vector.broadcast %69 : f32 to vector<8x64xf32>
    %71 = arith.mulf %70, %1 : vector<8x64xf32>
    %c17 = arith.constant 17 : index
    %72 = memref.load %arg1[%c17] : memref<32xf32, #tpu.memory_space<smem>>
    %73 = vector.broadcast %72 : f32 to vector<8x64xf32>
    %74 = arith.addf %71, %73 : vector<8x64xf32>
    %c18 = arith.constant 18 : index
    %75 = memref.load %arg1[%c18] : memref<32xf32, #tpu.memory_space<smem>>
    %76 = vector.broadcast %75 : f32 to vector<8x64xf32>
    %77 = arith.mulf %76, %2 : vector<8x64xf32>
    %c19 = arith.constant 19 : index
    %78 = memref.load %arg1[%c19] : memref<32xf32, #tpu.memory_space<smem>>
    %79 = vector.broadcast %78 : f32 to vector<8x64xf32>
    %80 = arith.addf %77, %79 : vector<8x64xf32>
    %c20 = arith.constant 20 : index
    %81 = memref.load %arg1[%c20] : memref<32xf32, #tpu.memory_space<smem>>
    %82 = vector.broadcast %81 : f32 to vector<8x64xf32>
    %83 = arith.mulf %82, %2 : vector<8x64xf32>
    %c21 = arith.constant 21 : index
    %84 = memref.load %arg1[%c21] : memref<32xf32, #tpu.memory_space<smem>>
    %85 = vector.broadcast %84 : f32 to vector<8x64xf32>
    %86 = arith.addf %83, %85 : vector<8x64xf32>
    %c24 = arith.constant 24 : index
    %87 = memref.load %arg1[%c24] : memref<32xf32, #tpu.memory_space<smem>>
    %88 = vector.broadcast %87 : f32 to vector<8x64xf32>
    %89 = arith.mulf %88, %2 : vector<8x64xf32>
    %c25 = arith.constant 25 : index
    %90 = memref.load %arg1[%c25] : memref<32xf32, #tpu.memory_space<smem>>
    %91 = vector.broadcast %90 : f32 to vector<8x64xf32>
    %92 = arith.addf %89, %91 : vector<8x64xf32>
    %c26 = arith.constant 26 : index
    %93 = memref.load %arg1[%c26] : memref<32xf32, #tpu.memory_space<smem>>
    %94 = vector.broadcast %93 : f32 to vector<8x64xf32>
    %95 = arith.mulf %94, %1 : vector<8x64xf32>
    %c27 = arith.constant 27 : index
    %96 = memref.load %arg1[%c27] : memref<32xf32, #tpu.memory_space<smem>>
    %97 = vector.broadcast %96 : f32 to vector<8x64xf32>
    %98 = arith.addf %95, %97 : vector<8x64xf32>
    %c28 = arith.constant 28 : index
    %99 = memref.load %arg1[%c28] : memref<32xf32, #tpu.memory_space<smem>>
    %100 = vector.broadcast %99 : f32 to vector<8x64xf32>
    %101 = arith.mulf %100, %1 : vector<8x64xf32>
    %c29 = arith.constant 29 : index
    %102 = memref.load %arg1[%c29] : memref<32xf32, #tpu.memory_space<smem>>
    %103 = vector.broadcast %102 : f32 to vector<8x64xf32>
    %104 = arith.addf %101, %103 : vector<8x64xf32>
    %cst_5 = arith.constant dense<0xFF800000> : vector<8xf32>
    %105 = vector.multi_reduction <maximumf>, %80, %cst_5 [1] : vector<8x64xf32> to vector<8xf32>
    %106 = vector.shape_cast %105 : vector<8xf32> to vector<8x1xf32>
    %cst_6 = arith.constant dense<0x7F800000> : vector<8xf32>
    %107 = vector.multi_reduction <minimumf>, %80, %cst_6 [1] : vector<8x64xf32> to vector<8xf32>
    %108 = vector.shape_cast %107 : vector<8xf32> to vector<8x1xf32>
    %cst_7 = arith.constant 0.000000e+00 : f32
    %109 = vector.broadcast %cst_7 : f32 to vector<8x64xf32>
    %110 = arith.cmpf oge, %74, %109 : vector<8x64xf32>
    %111 = vector.broadcast %106 : vector<8x1xf32> to vector<8x64xf32>
    %112 = arith.mulf %74, %111 : vector<8x64xf32>
    %113 = vector.broadcast %108 : vector<8x1xf32> to vector<8x64xf32>
    %114 = arith.mulf %74, %113 : vector<8x64xf32>
    %115 = arith.select %110, %112, %114 : vector<8x64xi1>, vector<8x64xf32>
    %cst_8 = arith.constant dense<0xFF800000> : vector<8xf32>
    %116 = vector.multi_reduction <maximumf>, %98, %cst_8 [1] : vector<8x64xf32> to vector<8xf32>
    %117 = vector.shape_cast %116 : vector<8xf32> to vector<8x1xf32>
    %cst_9 = arith.constant dense<0x7F800000> : vector<8xf32>
    %118 = vector.multi_reduction <minimumf>, %98, %cst_9 [1] : vector<8x64xf32> to vector<8xf32>
    %119 = vector.shape_cast %118 : vector<8xf32> to vector<8x1xf32>
    %cst_10 = arith.constant 0.000000e+00 : f32
    %120 = vector.broadcast %cst_10 : f32 to vector<8x64xf32>
    %121 = arith.cmpf oge, %92, %120 : vector<8x64xf32>
    %122 = vector.broadcast %117 : vector<8x1xf32> to vector<8x64xf32>
    %123 = arith.mulf %92, %122 : vector<8x64xf32>
    %124 = vector.broadcast %119 : vector<8x1xf32> to vector<8x64xf32>
    %125 = arith.mulf %92, %124 : vector<8x64xf32>
    %126 = arith.select %121, %123, %125 : vector<8x64xi1>, vector<8x64xf32>
    %127 = arith.maximumf %115, %126 : vector<8x64xf32>
    %128 = tpu.concatenate %80, %98 in 1 : vector<8x64xf32>, vector<8x64xf32> -> vector<8x128xf32>
    %129 = vector.shape_cast %128 : vector<8x128xf32> to vector<8x1x128xf32>
    %130 = tpu.concatenate %86, %104 in 1 : vector<8x64xf32>, vector<8x64xf32> -> vector<8x128xf32>
    %131 = vector.shape_cast %130 : vector<8x128xf32> to vector<8x1x128xf32>
    %132 = tpu.iota {dimensions = array<i32: 2>} : vector<1x1x128xi32>
    %c64_i32_11 = arith.constant 64 : i32
    %133 = vector.broadcast %c64_i32_11 : i32 to vector<1x1x128xi32>
    %134 = arith.cmpi slt, %132, %133 : vector<1x1x128xi32>
    %135 = vector.shape_cast %74 : vector<8x64xf32> to vector<8x64x1xf32>
    %136 = vector.shape_cast %92 : vector<8x64xf32> to vector<8x64x1xf32>
    %137 = vector.shape_cast %134 : vector<1x1x128xi1> to vector<1x1x128xi1>
    %138 = vector.broadcast %137 : vector<1x1x128xi1> to vector<8x64x128xi1>
    %139 = vector.shape_cast %135 : vector<8x64x1xf32> to vector<8x64x1xf32>
    %140 = vector.broadcast %139 : vector<8x64x1xf32> to vector<8x64x128xf32>
    %141 = vector.shape_cast %136 : vector<8x64x1xf32> to vector<8x64x1xf32>
    %142 = vector.broadcast %141 : vector<8x64x1xf32> to vector<8x64x128xf32>
    %143 = arith.select %138, %140, %142 : vector<8x64x128xi1>, vector<8x64x128xf32>
    %144 = vector.broadcast %129 : vector<8x1x128xf32> to vector<8x64x128xf32>
    %145 = arith.mulf %143, %144 : vector<8x64x128xf32>
    %146 = vector.shape_cast %127 : vector<8x64xf32> to vector<8x64x1xf32>
    %147 = vector.broadcast %146 : vector<8x64x1xf32> to vector<8x64x128xf32>
    %148 = arith.subf %145, %147 : vector<8x64x128xf32>
    %149 = math.exp %148 : vector<8x64x128xf32>
    %150 = vector.broadcast %131 : vector<8x1x128xf32> to vector<8x64x128xf32>
    %151 = arith.mulf %149, %150 : vector<8x64x128xf32>
    %152 = vector.extract_strided_slice %151 {offsets = [0, 0, 0], sizes = [8, 64, 64], strides = [1, 1, 1]} : vector<8x64x128xf32> to vector<8x64x64xf32>
    %cst_12 = arith.constant dense<0.000000e+00> : vector<8x64xf32>
    %153 = vector.multi_reduction <add>, %152, %cst_12 [2] : vector<8x64x64xf32> to vector<8x64xf32>
    %cst_13 = arith.constant dense<0.000000e+00> : vector<8x64xf32>
    %154 = vector.multi_reduction <add>, %151, %cst_13 [2] : vector<8x64x128xf32> to vector<8x64xf32>
    %155 = arith.subf %154, %153 : vector<8x64xf32>
    %156 = vector.extract_strided_slice %149 {offsets = [0, 0, 0], sizes = [8, 64, 64], strides = [1, 1, 1]} : vector<8x64x128xf32> to vector<8x64x64xf32>
    %cst_14 = arith.constant dense<0.000000e+00> : vector<8x64xf32>
    %157 = vector.multi_reduction <add>, %156, %cst_14 [2] : vector<8x64x64xf32> to vector<8x64xf32>
    %cst_15 = arith.constant dense<0.000000e+00> : vector<8x64xf32>
    %158 = vector.multi_reduction <add>, %149, %cst_15 [2] : vector<8x64x128xf32> to vector<8x64xf32>
    %159 = arith.subf %158, %157 : vector<8x64xf32>
    %c22 = arith.constant 22 : index
    %160 = memref.load %arg1[%c22] : memref<32xf32, #tpu.memory_space<smem>>
    %161 = tpu.reciprocal %157 {approx = true} : vector<8x64xf32> -> vector<8x64xf32>
    %162 = arith.mulf %153, %161 : vector<8x64xf32>
    %163 = vector.broadcast %160 : f32 to vector<8x64xf32>
    %164 = arith.mulf %163, %162 : vector<8x64xf32>
    %c23 = arith.constant 23 : index
    %165 = memref.load %arg1[%c23] : memref<32xf32, #tpu.memory_space<smem>>
    %166 = vector.broadcast %165 : f32 to vector<8x64xf32>
    %167 = arith.addf %164, %166 : vector<8x64xf32>
    %c30 = arith.constant 30 : index
    %168 = memref.load %arg1[%c30] : memref<32xf32, #tpu.memory_space<smem>>
    %169 = tpu.reciprocal %159 {approx = true} : vector<8x64xf32> -> vector<8x64xf32>
    %170 = arith.mulf %155, %169 : vector<8x64xf32>
    %171 = vector.broadcast %168 : f32 to vector<8x64xf32>
    %172 = arith.mulf %171, %170 : vector<8x64xf32>
    %c31 = arith.constant 31 : index
    %173 = memref.load %arg1[%c31] : memref<32xf32, #tpu.memory_space<smem>>
    %174 = vector.broadcast %173 : f32 to vector<8x64xf32>
    %175 = arith.addf %172, %174 : vector<8x64xf32>
    %176 = arith.addf %167, %175 : vector<8x64xf32>
    %177 = arith.addf %1, %2 : vector<8x64xf32>
    %178 = arith.addf %176, %177 : vector<8x64xf32>
    %179 = vector.broadcast %68 : vector<8x1xf32> to vector<8x64xf32>
    %180 = arith.addf %178, %179 : vector<8x64xf32>
    %c0_16 = arith.constant 0 : index
    %c0_17 = arith.constant 0 : index
    %181 = vector.load %arg3[%c0_16, %c0_17] : memref<64x30xf32, #tpu.memory_space<vmem>>, vector<64x30xf32>
    %cst_18 = arith.constant dense<0.000000e+00> : vector<8x30xf32>
    %182 = tpu.matmul %180, %181, %cst_18 {dimension_numbers = #tpu.dot_dimension_numbers<[1], [0], [0], [1], [0, 0, 1, 1], [], []>} : vector<8x64xf32>, vector<64x30xf32>, vector<8x30xf32> -> vector<8x30xf32>
    %c0_19 = arith.constant 0 : index
    %c0_20 = arith.constant 0 : index
    %183 = vector.load %arg4[%c0_19, %c0_20] : memref<1x30xf32, #tpu.memory_space<vmem>>, vector<1x30xf32>
    %184 = vector.broadcast %183 : vector<1x30xf32> to vector<8x30xf32>
    %185 = arith.addf %182, %184 : vector<8x30xf32>
    %cst_21 = arith.constant dense<0.000000e+00> : vector<8xf32>
    %186 = vector.multi_reduction <add>, %185, %cst_21 [1] : vector<8x30xf32> to vector<8xf32>
    %187 = vector.shape_cast %186 : vector<8xf32> to vector<8x1xf32>
    %cst_22 = arith.constant 3.000000e+01 : f32
    %188 = vector.broadcast %cst_22 : f32 to vector<8x1xf32>
    %189 = arith.divf %187, %188 : vector<8x1xf32>
    %190 = vector.broadcast %189 : vector<8x1xf32> to vector<8x30xf32>
    %191 = arith.subf %185, %190 : vector<8x30xf32>
    %192 = arith.mulf %191, %191 : vector<8x30xf32>
    %cst_23 = arith.constant dense<0.000000e+00> : vector<8xf32>
    %193 = vector.multi_reduction <add>, %192, %cst_23 [1] : vector<8x30xf32> to vector<8xf32>
    %194 = vector.shape_cast %193 : vector<8xf32> to vector<8x1xf32>
    %cst_24 = arith.constant 3.000000e+01 : f32
    %195 = vector.broadcast %cst_24 : f32 to vector<8x1xf32>
    %196 = arith.divf %194, %195 : vector<8x1xf32>
    %197 = vector.broadcast %189 : vector<8x1xf32> to vector<8x30xf32>
    %198 = arith.subf %185, %197 : vector<8x30xf32>
    %cst_25 = arith.constant 9.99999974E-6 : f32
    %199 = vector.broadcast %cst_25 : f32 to vector<8x1xf32>
    %200 = arith.addf %196, %199 : vector<8x1xf32>
    %201 = math.rsqrt %200 : vector<8x1xf32>
    %202 = vector.broadcast %201 : vector<8x1xf32> to vector<8x30xf32>
    %203 = arith.mulf %198, %202 : vector<8x30xf32>
    %c0_26 = arith.constant 0 : index
    %c0_27 = arith.constant 0 : index
    %204 = vector.load %arg5[%c0_26, %c0_27] : memref<1x30xf32, #tpu.memory_space<vmem>>, vector<1x30xf32>
    %205 = vector.broadcast %204 : vector<1x30xf32> to vector<8x30xf32>
    %206 = arith.mulf %203, %205 : vector<8x30xf32>
    %c0_28 = arith.constant 0 : index
    %c0_29 = arith.constant 0 : index
    %207 = vector.load %arg6[%c0_28, %c0_29] : memref<1x30xf32, #tpu.memory_space<vmem>>, vector<1x30xf32>
    %208 = vector.broadcast %207 : vector<1x30xf32> to vector<8x30xf32>
    %209 = arith.addf %206, %208 : vector<8x30xf32>
    %cst_30 = arith.constant 0.000000e+00 : f32
    %210 = vector.broadcast %cst_30 : f32 to vector<8x30xf32>
    %211 = arith.maximumf %209, %210 : vector<8x30xf32>
    %c0_31 = arith.constant 0 : index
    %c0_32 = arith.constant 0 : index
    %212 = vector.load %arg7[%c0_31, %c0_32] : memref<30x128xf32, #tpu.memory_space<vmem>>, vector<30x128xf32>
    %cst_33 = arith.constant dense<0.000000e+00> : vector<8x128xf32>
    %213 = tpu.matmul %211, %212, %cst_33 {dimension_numbers = #tpu.dot_dimension_numbers<[1], [0], [0], [1], [0, 0, 1, 1], [], []>} : vector<8x30xf32>, vector<30x128xf32>, vector<8x128xf32> -> vector<8x128xf32>
    %c0_34 = arith.constant 0 : index
    %c0_35 = arith.constant 0 : index
    %214 = vector.load %arg8[%c0_34, %c0_35] : memref<1x128xf32, #tpu.memory_space<vmem>>, vector<1x128xf32>
    %215 = vector.broadcast %214 : vector<1x128xf32> to vector<8x128xf32>
    %216 = arith.addf %213, %215 : vector<8x128xf32>
    %c0_36 = arith.constant 0 : index
    %c0_37 = arith.constant 0 : index
    %217 = vector.load %arg9[%c0_36, %c0_37] : memref<8x128xf32, #tpu.memory_space<vmem>>, vector<8x128xf32>
    tpu.vector_store %arg9[%c0_36, %c0_37], %216 {strides = array<i32>} : memref<8x128xf32, #tpu.memory_space<vmem>>, vector<8x128xf32>,
    return
  }
  func.func @transform_0(%arg0: i32) -> i32 {
    %c0_i32 = arith.constant 0 : i32
    %c0_i32_0 = arith.constant 0 : i32
    return %c0_i32 : i32
  }
  func.func @transform_1(%arg0: i32) -> (i32, i32) {
    %c0_i32 = arith.constant 0 : i32
    %c0_i32_0 = arith.constant 0 : i32
    return %arg0, %c0_i32 : i32, i32
  }
  func.func @transform_2(%arg0: i32) -> (i32, i32) {
    %c0_i32 = arith.constant 0 : i32
    %c0_i32_0 = arith.constant 0 : i32
    %c0_i32_1 = arith.constant 0 : i32
    return %c0_i32, %c0_i32_0 : i32, i32
  }
  func.func @transform_3(%arg0: i32) -> (i32, i32) {
    %c0_i32 = arith.constant 0 : i32
    %c0_i32_0 = arith.constant 0 : i32
    %c0_i32_1 = arith.constant 0 : i32
    return %c0_i32, %c0_i32_0 : i32, i32
  }
  func.func @transform_4(%arg0: i32) -> (i32, i32) {
    %c0_i32 = arith.constant 0 : i32
    %c0_i32_0 = arith.constant 0 : i32
    %c0_i32_1 = arith.constant 0 : i32
    return %c0_i32, %c0_i32_0 : i32, i32
  }
  func.func @transform_5(%arg0: i32) -> (i32, i32) {
    %c0_i32 = arith.constant 0 : i32
    %c0_i32_0 = arith.constant 0 : i32
    %c0_i32_1 = arith.constant 0 : i32
    return %c0_i32, %c0_i32_0 : i32, i32
  }
  func.func @transform_6(%arg0: i32) -> (i32, i32) {
    %c0_i32 = arith.constant 0 : i32
    %c0_i32_0 = arith.constant 0 : i32
    %c0_i32_1 = arith.constant 0 : i32
    return %c0_i32, %c0_i32_0 : i32, i32
  }
  func.func @transform_7(%arg0: i32) -> (i32, i32) {
    %c0_i32 = arith.constant 0 : i32
    %c0_i32_0 = arith.constant 0 : i32
    %c0_i32_1 = arith.constant 0 : i32
    return %c0_i32, %c0_i32_0 : i32, i32
  }
  func.func @transform_8(%arg0: i32) -> (i32, i32) {
    %c0_i32 = arith.constant 0 : i32
    %c0_i32_0 = arith.constant 0 : i32
    return %arg0, %c0_i32 : i32, i32
  }
}

</mosaic_0001>

<bundles_post_ra>
// kernel: tpu_custom_call.1
= control target key start
LH: loop header
LB: loop body
LE: loop exit
PB: predicated region body
PF: predicated region fallthrough
CT: control target
= control target key end

     0   :  { %13 = vsyncpa [#allocation4], 0  ;;  %s9065_s0 = inlined_call_operand.vmem [shape: f32[32], index: 0, kind: input, shape index: {}]   ;;  %s9066_s1 = inlined_call_operand.vmem [shape: f32[8,128], index: 1, kind: input, shape index: {}]   ;;  %s9067_s2 = inlined_call_operand.vmem [shape: f32[64,30], index: 2, kind: input, shape index: {}]   ;;  %s9068_s3 = inlined_call_operand.vmem [shape: f32[1,30], index: 3, kind: input, shape index: {}]   ;;  %s9069_s4 = inlined_call_operand.vmem [shape: f32[1,30], index: 4, kind: input, shape index: {}]   ;;  %s9070_s5 = inlined_call_operand.vmem [shape: f32[1,30], index: 5, kind: input, shape index: {}]   ;;  %s9071_s6 = inlined_call_operand.vmem [shape: f32[30,128], index: 6, kind: input, shape index: {}]   ;;  %s9072_s7 = inlined_call_operand.vmem [shape: f32[1,128], index: 7, kind: input, shape index: {}]   ;;  %s9073_s8 = inlined_call_operand.hbm [shape: f32[8,128], index: 8, kind: output, shape index: {}]  }
   0x1   :  { %14 = vsyncpa [#allocation3], 0  ;;  %s20_s29 = sshll.u32 %s9065_s0, 4  ;;  %s4991_s30 = smov [#allocation2]   ;;  %s21_s29 = int_to_ptr.vmem [resolvable:$true] %s20_s29 }
   0x2   :  { %23 = dma.vmem_to_smem %s21_s29, 16, %s4991_s30, [#allocation4]  }
   0x3   :  { %4987 = dma.done.wait [#allocation4], 16  }
   0x4   :  { %4988 = vsyncadd [#allocation4], 4294967280 }
   0x5   :  { %42 = sfence }
   0x6   :  { %v44_v0 = vlaneseq  ;;  %s4308_s9 = sld [smem:[#allocation2 + $0x1a]]  ;;  %v5050_v2 = vld [vmem:[%s9066_s1] sm:$0xff]  ;;  %vm77_vm0 = vcmask 523264   ;;  %vm143_vm2 = vcmask 1048064   ;;  %s4992_s23 = smov 64   ;;  %vm4027_vm5 = vcmask 130112  }
   0x7   :  { %s4309_s10 = sld [smem:[#allocation2 + $0x1b]]  ;;  %vm4031_vm6 = vcmask 195712   ;;  %vm4035_vm7 = vcmask 261312   ;;  %vm4039_vm8 = vcmask 326912   ;;  %vm4043_vm9 = vcmask 392512  }
   0x8   :  { %v5044_v1 = vshrl.u32 %v44_v0, 7  ;;  %s4302_s11 = sld [smem:[#allocation2 + $0x12]]  ;;  %v5052_v3 = vand.u32 127, %v44_v0  ;;  %vm4047_vm10 = vcmask 458112   ;;  %vm4051_vm11 = vcmask 523712  }
   0x9   :  { %s4303_s12 = sld [smem:[#allocation2 + $0x13]]  ;;  %vm4158_vm12 = vcmask 1041409   ;;  %vm4160_vm13 = vcmask 1042434   ;;  %vm4162_vm14 = vcmask 1043459   ;;  %vm4164_vm15 = vcmask 1044484  }
   0xa   :  { %9352 = vst [vmem:[#allocation8_spill] sm:$0xff] %v5044_v1  ;;  %4324 = vset.pattern.permute.xlu1 %v5044_v1  ;;  %s4288_s0 = sld [smem:[#allocation2 + $0xa]]  ;;  %vm46_vm1 = vcmp.lt.s32.totalorder %v5052_v3, 64  ;;  %v5065_v21 = vadd.s32 16, %v5044_v1  ;;  %v5086_v37 = vadd.s32 24, %v5044_v1  ;;  %v5093_v39 = vadd.s32 40, %v5044_v1 }
   0xb   :  { %9353 = vst [vmem:[#allocation9_spill] sm:$0xff] %v5052_v3  ;;  %s4289_s15 = sld [smem:[#allocation2 + $0x2]]  ;;  %v5096_v40 = vadd.s32 32, %v5044_v1  ;;  %v5103_v41 = vadd.s32 56, %v5044_v1  ;;  %v5113_v43 = vadd.s32 8, %v5044_v1  ;;  %v5127_v47 = vadd.s32 48, %v5044_v1 }
   0xc   :  { %v132_v4 = vstv %s4308_s9  ;;  %s4290_s16 = sld [smem:[#allocation2 + $0xb]]  ;;  %9354 = vst [vmem:[#allocation10_spill] sm:$0xff] %v5065_v21  ;;  %4325 = vset.pattern.permute.xlu2 %v5065_v21  ;;  %v5147_v56 = vadd.s32 88, %v5044_v1  ;;  %v5172_v0 = vadd.s32 64, %v5044_v1 }
   0xd   :  { %v133_v5 = vmul.f32 %v132_v4, %v5050_v2  ;;  %v135_v6 = vstv %s4309_s10  ;;  %s4291_s17 = sld [smem:[#allocation2 + $0x3]]  ;;  %9355 = vst [vmem:[#allocation11_spill] sm:$0xff] %v5086_v37 }
   0xe   :  { %v114_v7 = vstv %s4302_s11  ;;  %s4300_s18 = sld [smem:[#allocation2 + $0x10]]  ;;  %9356 = vst [vmem:[#allocation12_spill] sm:$0xff] %v5093_v39  ;;  %4397 = vset.pattern.permute.xlu0 %v5147_v56 }
   0xf   :  { %v136_v8 = vadd.f32 %v135_v6, %v133_v5  ;;  %v115_v9 = vmul.f32 %v114_v7, %v5050_v2  ;;  %v117_v10 = vstv %s4303_s12  ;;  %s4301_s19 = sld [smem:[#allocation2 + $0x11]]  ;;  %9357 = vst [vmem:[#allocation13_spill] sm:$0xff] %v5096_v40  ;;  %v5184_v5 = vadd.s32 104, %v5044_v1 }
  0x10   :  { %v49_v11 = vstv %s4288_s0  ;;  %s4304_s20 = sld [smem:[#allocation2 + $0x14]]  ;;  %9358 = vst [vmem:[#allocation14_spill] sm:$0xff] %v5103_v41  ;;  %v5191_v6 = vadd.s32 80, %v5044_v1 }
  0x11   :  { %v154_v12 = vsel %vm77_vm0, %v136_v8, -inf  ;;  %v118_v13 = vadd.f32 %v117_v10, %v115_v9  ;;  %v50_v14 = vstv %s4289_s15  ;;  %v157_v23 = vsel %vm77_vm0, %v136_v8, inf  ;;  %s4305_s21 = sld [smem:[#allocation2 + $0x15]]  ;;  %9359 = vst [vmem:[#allocation15_spill] sm:$0xff] %v5113_v43 }
  0x12   :  { %155 = vmax.xlane.f32.xlu1 %v154_v12  ;;  %v51_v15 = vsel %vm46_vm1, %v49_v11, %v50_v14  ;;  %v54_v16 = vstv %s4290_s16  ;;  %s4310_s22 = sld [smem:[#allocation2 + $0x1c]]  ;;  %9360 = vst [vmem:[#allocation16_spill] sm:$0xff] %v5127_v47 }
  0x13   :  { %v144_v17 = vsel %vm143_vm2, %v118_v13, -inf  ;;  %v55_v18 = vstv %s4291_s17  ;;  %v67_v19 = vmul.f32 %v51_v15, %v5050_v2  ;;  %v147_v24 = vsel %vm143_vm2, %v118_v13, inf  ;;  %s4311_s24 = sld [smem:[#allocation2 + $0x1d]] }
  0x14   :  { %145 = vmax.xlane.f32.xlu2 %v144_v17  ;;  %v56_v20 = vsel %vm46_vm1, %v54_v16, %v55_v18  ;;  %v108_v25 = vstv %s4300_s18  ;;  %s4306_s25 = sld [smem:[#allocation2 + $0x18]]  ;;  %v5208_v18 = vadd.s32 120, %v5044_v1  ;;  %vm4168_vm2 = vcmask 1046534  }
  0x15   :  { %v5067_v22 = vadd.f32 %v67_v19, %v56_v20  ;;  %v109_v26 = vmul.f32 %v108_v25, %v5050_v2  ;;  %v111_v27 = vstv %s4301_s19  ;;  %s4307_s26 = sld [smem:[#allocation2 + $0x19]] }
  0x16   :  { %v120_v28 = vstv %s4304_s20  ;;  %s4292_s27 = sld [smem:[#allocation2 + $0xc]] }
  0x17   :  { %71 = vmax.xlane.f32.xlu0 %v5067_v22  ;;  %v5074_v29 = vadd.f32 %v111_v27, %v109_v26  ;;  %v121_v30 = vmul.f32 %v120_v28, %v5050_v2  ;;  %v123_v31 = vstv %s4305_s21  ;;  %s4293_s28 = sld [smem:[#allocation2 + $0x4]]  ;;  %v5247_v27 = vadd.s32 112, %v5044_v1 }
  0x18   :  { %v138_v34 = vstv %s4310_s22  ;;  %s4294_s29 = sld [smem:[#allocation2 + $0xd]]  ;;  %s4995_s22 = smov [#allocation5]  }
  0x19   :  { %v124_v32 = vadd.f32 %v123_v31, %v121_v30  ;;  %v5079_v33 = vperm.slane %v5074_v29, 0  ;;  %v139_v35 = vmul.f32 %v138_v34, %v5050_v2  ;;  %v141_v36 = vstv %s4311_s24  ;;  %s4295_s30 = sld [smem:[#allocation2 + $0x5]] }
  0x1a   :  { %v5108_v42 = vperm.slane %v5074_v29, 1  ;;  %v126_v44 = vstv %s4306_s25  ;;  %v5142_v55 = vperm.slane %v5074_v29, 2  ;;  %v5166_v63 = vperm.slane %v5074_v29, 3  ;;  %s7677_s11 = sld [smem:[#allocation2 + $0xe]] }
  0x1b   :  { %v142_v38 = vadd.f32 %v141_v36, %v139_v35  ;;  %v127_v46 = vmul.f32 %v126_v44, %v5050_v2  ;;  %v129_v48 = vstv %s4307_s26  ;;  %v448_v30 = vperm.slane %v5074_v29, 5  ;;  %s4314_s12 = sld [smem:[#allocation2 + $0x1e]] }
  0x1c   :  { %158 = vmin.xlane.f32.xlu2 %v157_v23  ;;  %v59_v7 = vstv %s4292_s27  ;;  %vm150_vm4 = vcmp.ge.f32.partialorder %v5074_v29, 0.0  ;;  %s7689_s13 = sld [smem:[#allocation2 + $0x7]] }
  0x1d   :  { %v5130_v49 = vadd.f32 %v129_v48, %v127_v46  ;;  %s4312_s14 = sld [smem:[#allocation2 + $0x16]] }
  0x1e   :  { %v64_v11 = vstv %s4294_s29  ;;  %s7694_s0 = sld [smem:[#allocation2 + $0xf]] }
  0x1f   :  { %148 = vmin.xlane.f32.xlu0 %v147_v24  ;;  %vm160_vm3 = vcmp.ge.f32.partialorder %v5130_v49, 0.0  ;;  %v5163_v62 = vperm.slane %v5130_v49, 3  ;;  %v5178_v4 = vperm.slane %v5130_v49, 4  ;;  %v5195_v9 = vperm.slane %v5130_v49, 0  ;;  %s4315_s15 = sld [smem:[#allocation2 + $0x1f]] }
  0x20   :  { %v65_v12 = vstv %s4295_s30  ;;  %v5204_v15 = vperm.slane %v5130_v49, 5  ;;  %v5221_v20 = vperm.slane %v5130_v49, 1  ;;  %v5227_v23 = vperm.slane %v5130_v49, 6  ;;  %s7701_s16 = sld [smem:[#allocation2 + $0x17]] }
  0x21   :  { %v66_v14 = vsel %vm46_vm1, %v64_v11, %v65_v12  ;;  %v5233_v24 = vadd.s32 72, %v5044_v1  ;;  %v5237_v25 = vperm.slane %v5130_v49, 2  ;;  %v5243_v26 = vperm.slane %v5130_v49, 7 }
  0x2b   :  { %170 = vrot.lane.b32.xlu1 %v118_v13, %s4992_s23 }
  0x33   :  { %187 = vrot.lane.b32.xlu0 %v124_v32, %s4992_s23  ;;  %208 = vperm.xlu1 %4324, %v5079_v33  }
  0x34   :  { %174 = vrot.lane.b32.xlu2 %v136_v8, %s4992_s23  ;;  %v60_v8 = vstv %s4293_s28 }
  0x35   :  { %v61_v10 = vsel %vm46_vm1, %v59_v7, %v60_v8 }
  0x36   :  { %v69_v13 = vmul.f32 %v61_v10, %v5050_v2  ;;  %v5216_v2 = vadd.s32 96, %v5044_v1 }
  0x38   :  { %v70_v16 = vadd.f32 %v69_v13, %v66_v14 }
  0x3b   :  { %4326 = vset.pattern.permute.xlu1 %v5086_v37 }
  0x3c   :  { %191 = vrot.lane.b32.xlu2 %v142_v38, %s4992_s23 }
  0x43   :  { %226 = vperm.xlu1 %4326, %v5079_v33  }
  0x44   :  { %220 = vperm.xlu2 %4325, %v5079_v33  }
  0x4b   :  { %4328 = vset.pattern.permute.xlu1 %v5093_v39 }
  0x4c   :  { %4327 = vset.pattern.permute.xlu2 %v5096_v40 }
  0x53   :  { %238 = vperm.xlu1 %4328, %v5079_v33  }
  0x54   :  { %232 = vperm.xlu2 %4327, %v5079_v33  }
  0x5b   :  { %4330 = vset.pattern.permute.xlu1 %v5044_v1 }
  0x5c   :  { %4329 = vset.pattern.permute.xlu2 %v5103_v41 }
  0x63   :  { %257 = vperm.xlu1 %4330, %v5108_v42  }
  0x64   :  { %250 = vperm.xlu2 %4329, %v5079_v33  }
  0x6b   :  { %4332 = vset.pattern.permute.xlu1 %v5065_v21 }
  0x6c   :  { %4331 = vset.pattern.permute.xlu2 %v5113_v43 }
  0x73   :  { %269 = vperm.xlu1 %4332, %v5108_v42  }
  0x74   :  { %263 = vperm.xlu2 %4331, %v5108_v42  }
  0x7b   :  { %4334 = vset.pattern.permute.xlu1 %v5093_v39 }
  0x7c   :  { %4333 = vset.pattern.permute.xlu2 %v5096_v40 }
  0x83   :  { %287 = vperm.xlu1 %4334, %v5108_v42  }
  0x84   :  { %281 = vperm.xlu2 %4333, %v5108_v42  }
  0x85   :  { %v156_v50 = vpop.xlane.xlu1 %155 }
  0x86   :  { %v161_v52 = vmul.f32 %v156_v50, %v5130_v49 }
  0x87   :  { %v5123_v45 = vpop.xlane.xlu2 %145 }
  0x88   :  { %v151_v34 = vmul.f32 %v5123_v45, %v5074_v29  ;;  %v497_v45 = vperm.slane %v5074_v29, 6 }
  0x8a   :  { %v72_v57 = vpop.xlane.xlu0 %71 }
  0x8b   :  { %4336 = vset.pattern.permute.xlu1 %v5103_v41  ;;  %v73_v58 = vsub.f32 %v5067_v22, %v72_v57  ;;  %v399_v22 = vperm.slane %v5074_v29, 4 }
  0x8c   :  { %4335 = vset.pattern.permute.xlu2 %v5127_v47 }
  0x8d   :  { %v74_v59 = vmul.f32 1.442695, %v73_v58 }
  0x8f   :  { %v159_v51 = vpop.xlane.xlu2 %158  ;;  %4556 = vpow2.f32 %v74_v59 }
  0x90   :  { %v162_v53 = vmul.f32 %v159_v51, %v5130_v49 }
  0x92   :  { %v163_v54 = vsel %vm160_vm3, %v161_v52, %v162_v53  ;;  %v149_v28 = vpop.xlane.xlu0 %148  ;;  %vm4170_vm3 = vcmask 1047559  }
  0x93   :  { %165 = vrot.lane.b32.xlu0 %v163_v54, %s4992_s23  ;;  %299 = vperm.xlu1 %4336, %v5108_v42   ;;  %v152_v32 = vmul.f32 %v149_v28, %v5074_v29 }
  0x94   :  { %293 = vperm.xlu2 %4335, %v5108_v42  }
  0x95   :  { %v4557_v60 = vpop.eup %4556  ;;  %v153_v36 = vsel %vm150_vm4, %v151_v34, %v152_v32  ;;  %vm4194_vm4 = vcmask 244736  }
  0x96   :  { %v78_v61 = vsel %vm77_vm0, %v4557_v60, 0.0  ;;  %v76_v17 = vmul.f32 %v4557_v60, %v70_v16 }
  0x98   :  { %v84_v19 = vsel %vm77_vm0, %v76_v17, 0.0 }
  0x9b   :  { %4338 = vset.pattern.permute.xlu1 %v5065_v21 }
  0x9c   :  { %4337 = vset.pattern.permute.xlu2 %v5113_v43 }
  0x9d   :  { %v5368_v52 = vpop.permute.xlu1 %170 }
  0xa3   :  { %318 = vperm.xlu1 %4338, %v5142_v55  }
  0xa4   :  { %312 = vperm.xlu2 %4337, %v5142_v55  }
  0xa5   :  { %v5257_v31 = vpop.permute.xlu0 %187  ;;  %v5374_v53 = vpop.permute.xlu1 %208 }
  0xab   :  { %4340 = vset.pattern.permute.xlu1 %v5096_v40 }
  0xac   :  { %4339 = vset.pattern.permute.xlu2 %v5086_v37 }
  0xb3   :  { %330 = vperm.xlu1 %4340, %v5142_v55  }
  0xb4   :  { %324 = vperm.xlu2 %4339, %v5142_v55  }
  0xb5   :  { %v5379_v54 = vpop.permute.xlu1 %226 }
  0xbb   :  { %4342 = vset.pattern.permute.xlu1 %v5103_v41 }
  0xbc   :  { %4341 = vset.pattern.permute.xlu2 %v5127_v47 }
  0xbd   :  { %79 = vadd.xlane.f32.xlu0 %v78_v61 }
  0xc3   :  { %348 = vperm.xlu1 %4342, %v5142_v55  }
  0xc4   :  { %342 = vperm.xlu2 %4341, %v5142_v55  }
  0xc5   :  { %v5386_v57 = vpop.permute.xlu1 %238 }
  0xc6   :  { %9361 = vst [vmem:[#allocation17_spill] sm:$0xff] %v5386_v57 }
  0xcb   :  { %4344 = vset.pattern.permute.xlu1 %v5113_v43 }
  0xcc   :  { %4343 = vset.pattern.permute.xlu2 %v5044_v1 }
  0xd1   :  { %765 = vperm.xlu0 %4397, %v5163_v62  }
  0xd3   :  { %361 = vperm.xlu1 %4344, %v5166_v63  }
  0xd4   :  { %355 = vperm.xlu2 %4343, %v5166_v63  }
  0xd5   :  { %v5392_v59 = vpop.permute.xlu1 %257 }
  0xd6   :  { %9362 = vst [vmem:[#allocation18_spill] sm:$0xff] %v5392_v59 }
  0xd9   :  { %4402 = vset.pattern.permute.xlu0 %v5172_v0 }
  0xdb   :  { %4346 = vset.pattern.permute.xlu1 %v5096_v40 }
  0xdc   :  { %4345 = vset.pattern.permute.xlu2 %v5086_v37 }
  0xe1   :  { %796 = vperm.xlu0 %4402, %v5178_v4  }
  0xe3   :  { %379 = vperm.xlu1 %4346, %v5166_v63  }
  0xe4   :  { %373 = vperm.xlu2 %4345, %v5166_v63  }
  0xe5   :  { %v5398_v61 = vpop.permute.xlu1 %269 }
  0xe9   :  { %4407 = vset.pattern.permute.xlu0 %v5184_v5 }
  0xeb   :  { %4348 = vset.pattern.permute.xlu1 %v5127_v47 }
  0xec   :  { %4347 = vset.pattern.permute.xlu2 %v5093_v39 }
  0xf1   :  { %826 = vperm.xlu0 %4407, %v5178_v4  }
  0xf5   :  { %v5404_v7 = vpop.permute.xlu1 %287 }
  0xf9   :  { %4408 = vset.pattern.permute.xlu0 %v5191_v6 }
 0x101   :  { %612 = vperm.xlu0 %4408, %v5195_v9  }
 0x105   :  { %v166_v35 = vpop.permute.xlu0 %165 }
 0x106   :  { %v5265_v38 = vmax.f32 %v153_v36, %v166_v35 }
 0x108   :  { %v5269_v44 = vperm.slane %v5265_v38, 3  ;;  %v5280_v46 = vperm.slane %v5265_v38, 4  ;;  %v5302_v48 = vperm.slane %v5265_v38, 0  ;;  %v5329_v49 = vperm.slane %v5265_v38, 6 }
 0x109   :  { %857 = vperm.xlu0 %4408, %v5204_v15   ;;  %v5341_v50 = vperm.slane %v5265_v38, 2  ;;  %v5347_v51 = vperm.slane %v5265_v38, 7 }
 0x10d   :  { %87 = vadd.xlane.f32.xlu2 %v76_v17  ;;  %81 = vadd.xlane.f32.xlu1 %v4557_v60 }
 0x111   :  { %4413 = vset.pattern.permute.xlu0 %v5208_v18 }
 0x115   :  { %85 = vadd.xlane.f32.xlu1 %v84_v19 }
 0x119   :  { %642 = vperm.xlu0 %4413, %v5195_v9  }
 0x121   :  { %887 = vperm.xlu0 %4413, %v5204_v15  }
 0x125   :  { %385 = vperm.xlu2 %4347, %v5166_v63  }
 0x129   :  { %4418 = vset.pattern.permute.xlu0 %v5216_v2 }
 0x12d   :  { %4349 = vset.pattern.permute.xlu2 %v5044_v1 }
 0x12e   :  { %391 = vperm.xlu1 %4348, %v5166_v63  }
 0x131   :  { %673 = vperm.xlu0 %4418, %v5221_v20  }
 0x135   :  { %404 = vperm.xlu2 %4349, %v399_v22  }
 0x136   :  { %4350 = vset.pattern.permute.xlu1 %v5113_v43 }
 0x139   :  { %918 = vperm.xlu0 %4418, %v5227_v23  }
 0x13d   :  { %4351 = vset.pattern.permute.xlu2 %v5065_v21 }
 0x13e   :  { %410 = vperm.xlu1 %4350, %v399_v22  }
 0x141   :  { %4423 = vset.pattern.permute.xlu0 %v5233_v24 }
 0x145   :  { %416 = vperm.xlu2 %4351, %v399_v22  }
 0x146   :  { %4352 = vset.pattern.permute.xlu1 %v5086_v37 }
 0x149   :  { %704 = vperm.xlu0 %4423, %v5237_v25  }
 0x14d   :  { %4353 = vset.pattern.permute.xlu2 %v5093_v39 }
 0x14e   :  { %422 = vperm.xlu1 %4352, %v399_v22  }
 0x151   :  { %949 = vperm.xlu0 %4423, %v5243_v26  }
 0x155   :  { %434 = vperm.xlu2 %4353, %v399_v22  }
 0x156   :  { %4354 = vset.pattern.permute.xlu1 %v5127_v47 }
 0x159   :  { %4428 = vset.pattern.permute.xlu0 %v5247_v27 }
 0x15d   :  { %4355 = vset.pattern.permute.xlu2 %v5103_v41 }
 0x15e   :  { %440 = vperm.xlu1 %4354, %v399_v22  }
 0x161   :  { %734 = vperm.xlu0 %4428, %v5237_v25  }
 0x165   :  { %446 = vperm.xlu2 %4355, %v399_v22  }
 0x166   :  { %4356 = vset.pattern.permute.xlu1 %v5044_v1 }
 0x169   :  { %979 = vperm.xlu0 %4428, %v5243_v26  }
 0x16d   :  { %4357 = vset.pattern.permute.xlu2 %v5065_v21 }
 0x16e   :  { %453 = vperm.xlu1 %4356, %v448_v30  }
 0x171   :  { %4433 = vset.pattern.permute.xlu0 %v5096_v40 }
 0x175   :  { %465 = vperm.xlu2 %4357, %v448_v30  }
 0x176   :  { %4358 = vset.pattern.permute.xlu1 %v5086_v37 }
 0x179   :  { %428 = vperm.xlu0 %4433, %v399_v22  }
 0x17d   :  { %4359 = vset.pattern.permute.xlu2 %v5096_v40 }
 0x17e   :  { %471 = vperm.xlu1 %4358, %v448_v30  }
 0x181   :  { %1309 = vperm.xlu0 %4433, %v5269_v44  }
 0x185   :  { %477 = vperm.xlu2 %4359, %v448_v30  }
 0x186   :  { %4360 = vset.pattern.permute.xlu1 %v5093_v39 }
 0x189   :  { %4458 = vset.pattern.permute.xlu0 %v5113_v43 }
 0x18d   :  { %4361 = vset.pattern.permute.xlu2 %v5103_v41 }
 0x18e   :  { %483 = vperm.xlu1 %4360, %v448_v30  }
 0x191   :  { %214 = vperm.xlu0 %4458, %v5079_v33  }
 0x195   :  { %495 = vperm.xlu2 %4361, %v448_v30  }
 0x196   :  { %4362 = vset.pattern.permute.xlu1 %v5044_v1 }
 0x199   :  { %459 = vperm.xlu0 %4458, %v448_v30  }
 0x19d   :  { %4363 = vset.pattern.permute.xlu2 %v5113_v43 }
 0x19e   :  { %502 = vperm.xlu1 %4362, %v497_v45  }
 0x1a1   :  { %1340 = vperm.xlu0 %4458, %v5280_v46  }
 0x1a5   :  { %508 = vperm.xlu2 %4363, %v497_v45  }
 0x1a6   :  { %4364 = vset.pattern.permute.xlu1 %v5065_v21 }
 0x1a9   :  { %4463 = vset.pattern.permute.xlu0 %v5127_v47 }
 0x1ad   :  { %4365 = vset.pattern.permute.xlu2 %v5096_v40 }
 0x1ae   :  { %514 = vperm.xlu1 %4364, %v497_v45  }
 0x1b1   :  { %244 = vperm.xlu0 %4463, %v5079_v33   ;;  %v5295_v33 = vperm.slane %v5074_v29, 7  ;;  %v5308_v29 = vperm.slane %v5265_v38, 5 }
 0x1b5   :  { %526 = vperm.xlu2 %4365, %v497_v45  }
 0x1b6   :  { %4366 = vset.pattern.permute.xlu1 %v5093_v39 }
 0x1b9   :  { %489 = vperm.xlu0 %4463, %v448_v30  }
 0x1bd   :  { %4367 = vset.pattern.permute.xlu2 %v5127_v47 }
 0x1be   :  { %532 = vperm.xlu1 %4366, %v497_v45  }
 0x1c1   :  { %1370 = vperm.xlu0 %4463, %v5280_v46  }
 0x1c5   :  { %538 = vperm.xlu2 %4367, %v497_v45  }
 0x1c6   :  { %4368 = vset.pattern.permute.xlu1 %v5103_v41 }
 0x1c9   :  { %4468 = vset.pattern.permute.xlu0 %v5086_v37 }
 0x1cd   :  { %4369 = vset.pattern.permute.xlu2 %v5113_v43 }
 0x1ce   :  { %544 = vperm.xlu1 %4368, %v497_v45  }
 0x1d1   :  { %275 = vperm.xlu0 %4468, %v5108_v42   ;;  %v5323_v42 = vperm.slane %v5265_v38, 1 }
 0x1d5   :  { %557 = vperm.xlu2 %4369, %v5295_v33  }
 0x1d6   :  { %4370 = vset.pattern.permute.xlu1 %v5065_v21 }
 0x1d9   :  { %520 = vperm.xlu0 %4468, %v497_v45  }
 0x1dd   :  { %4371 = vset.pattern.permute.xlu2 %v5086_v37 }
 0x1de   :  { %563 = vperm.xlu1 %4370, %v5295_v33  }
 0x1e1   :  { %1156 = vperm.xlu0 %4468, %v5302_v48  }
 0x1e5   :  { %569 = vperm.xlu2 %4371, %v5295_v33  }
 0x1e6   :  { %4372 = vset.pattern.permute.xlu1 %v5096_v40 }
 0x1e9   :  { %1401 = vperm.xlu0 %4468, %v5308_v29  }
 0x1ed   :  { %4373 = vset.pattern.permute.xlu2 %v5127_v47 }
 0x1ee   :  { %575 = vperm.xlu1 %4372, %v5295_v33  }
 0x1f1   :  { %4473 = vset.pattern.permute.xlu0 %v5093_v39 }
 0x1f5   :  { %587 = vperm.xlu2 %4373, %v5295_v33  }
 0x1f6   :  { %4374 = vset.pattern.permute.xlu1 %v5103_v41 }
 0x1f9   :  { %336 = vperm.xlu0 %4473, %v5142_v55  }
 0x1fd   :  { %4375 = vset.pattern.permute.xlu2 %v5172_v0 }
 0x1fe   :  { %593 = vperm.xlu1 %4374, %v5295_v33  }
 0x201   :  { %581 = vperm.xlu0 %4473, %v5295_v33  }
 0x205   :  { %600 = vperm.xlu2 %4375, %v5195_v9  }
 0x206   :  { %4376 = vset.pattern.permute.xlu1 %v5233_v24 }
 0x209   :  { %1217 = vperm.xlu0 %4473, %v5323_v42  }
 0x20d   :  { %4377 = vset.pattern.permute.xlu2 %v5147_v56 }
 0x20e   :  { %606 = vperm.xlu1 %4376, %v5195_v9  }
 0x211   :  { %1462 = vperm.xlu0 %4473, %v5329_v49  }
 0x215   :  { %618 = vperm.xlu2 %4377, %v5195_v9  }
 0x216   :  { %4378 = vset.pattern.permute.xlu1 %v5216_v2 }
 0x219   :  { %4482 = vset.pattern.permute.xlu0 %v5065_v21 }
 0x21d   :  { %4379 = vset.pattern.permute.xlu2 %v5184_v5 }
 0x21e   :  { %624 = vperm.xlu1 %4378, %v5195_v9  }
 0x221   :  { %367 = vperm.xlu0 %4482, %v5166_v63  }
 0x225   :  { %630 = vperm.xlu2 %4379, %v5195_v9  }
 0x226   :  { %4380 = vset.pattern.permute.xlu1 %v5247_v27 }
 0x229   :  { %1248 = vperm.xlu0 %4482, %v5341_v50  }
 0x22d   :  { %4381 = vset.pattern.permute.xlu2 %v5172_v0 }
 0x22e   :  { %636 = vperm.xlu1 %4380, %v5195_v9   ;;  %v5410_v9 = vpop.permute.xlu1 %299 }
 0x22f   :  { %9364 = vst [vmem:[#allocation20_spill] sm:$0xff] %v5410_v9 }
 0x231   :  { %1493 = vperm.xlu0 %4482, %v5347_v51  }
 0x235   :  { %649 = vperm.xlu2 %4381, %v5221_v20  }
 0x236   :  { %4382 = vset.pattern.permute.xlu1 %v5233_v24  ;;  %v5416_v11 = vpop.permute.xlu1 %318 }
 0x237   :  { %9366 = vst [vmem:[#allocation22_spill] sm:$0xff] %v5416_v11 }
 0x239   :  { %4487 = vset.pattern.permute.xlu0 %v5103_v41 }
 0x23d   :  { %4383 = vset.pattern.permute.xlu2 %v5191_v6 }
 0x23e   :  { %655 = vperm.xlu1 %4382, %v5221_v20   ;;  %v5422_v13 = vpop.permute.xlu1 %330 }
 0x23f   :  { %9368 = vst [vmem:[#allocation24_spill] sm:$0xff] %v5422_v13 }
 0x241   :  { %397 = vperm.xlu0 %4487, %v5166_v63  }
 0x245   :  { %661 = vperm.xlu2 %4383, %v5221_v20  }
 0x246   :  { %4384 = vset.pattern.permute.xlu1 %v5147_v56  ;;  %v5428_v16 = vpop.permute.xlu1 %348 }
 0x247   :  { %9370 = vst [vmem:[#allocation26_spill] sm:$0xff] %v5428_v16 }
 0x249   :  { %1278 = vperm.xlu0 %4487, %v5341_v50  }
 0x24d   :  { %4385 = vset.pattern.permute.xlu2 %v5184_v5 }
 0x24e   :  { %667 = vperm.xlu1 %4384, %v5221_v20   ;;  %v5434_v19 = vpop.permute.xlu1 %361 }
 0x251   :  { %1523 = vperm.xlu0 %4487, %v5347_v51  }
 0x255   :  { %679 = vperm.xlu2 %4385, %v5221_v20  }
 0x256   :  { %4386 = vset.pattern.permute.xlu1 %v5247_v27  ;;  %v5440_v22 = vpop.permute.xlu1 %379 }
 0x259   :  { %4492 = vset.pattern.permute.xlu0 %v5044_v1 }
 0x25d   :  { %4387 = vset.pattern.permute.xlu2 %v5208_v18 }
 0x25e   :  { %685 = vperm.xlu1 %4386, %v5221_v20   ;;  %v5446_v28 = vpop.xlane.xlu1 %81 }
 0x25f   :  { %9372 = vst [vmem:[#allocation28_spill] sm:$0xff] %v5446_v28 }
 0x261   :  { %306 = vperm.xlu0 %4492, %v5142_v55   ;;  %v5382_v55 = vpop.permute.xlu2 %174 }
 0x265   :  { %691 = vperm.xlu2 %4387, %v5221_v20  }
 0x266   :  { %4388 = vset.pattern.permute.xlu1 %v5172_v0  ;;  %v5453_v32 = vpop.xlane.xlu1 %85 }
 0x267   :  { %9374 = vst [vmem:[#allocation30_spill] sm:$0xff] %v5453_v32 }
 0x269   :  { %551 = vperm.xlu0 %4492, %v5295_v33   ;;  %v5389_v58 = vpop.permute.xlu2 %191 }
 0x26d   :  { %4389 = vset.pattern.permute.xlu2 %v5191_v6 }
 0x26e   :  { %698 = vperm.xlu1 %4388, %v5237_v25   ;;  %v5459_v35 = vpop.permute.xlu1 %391 }
 0x26f   :  { %9376 = vst [vmem:[#allocation32_spill] sm:$0xff] %v5459_v35  ;;  %v5491_v35 = vpop.xlane.xlu0 %79 }
 0x270   :  { %9383 = vst [vmem:[#allocation39_spill] sm:$0xff] %v5491_v35 }
 0x271   :  { %1187 = vperm.xlu0 %4492, %v5323_v42   ;;  %v5395_v60 = vpop.permute.xlu2 %220 }
 0x275   :  { %710 = vperm.xlu2 %4389, %v5237_v25  }
 0x276   :  { %4390 = vset.pattern.permute.xlu1 %v5147_v56 }
 0x279   :  { %1432 = vperm.xlu0 %4492, %v5329_v49   ;;  %v5401_v63 = vpop.permute.xlu2 %232 }
 0x27a   :  { %9363 = vst [vmem:[#allocation19_spill] sm:$0xff] %v5401_v63 }
 0x27d   :  { %4391 = vset.pattern.permute.xlu2 %v5216_v2 }
 0x27e   :  { %716 = vperm.xlu1 %4390, %v5237_v25  }
 0x281   :  { %v5407_v8 = vpop.permute.xlu2 %250 }
 0x285   :  { %722 = vperm.xlu2 %4391, %v5237_v25  }
 0x286   :  { %4392 = vset.pattern.permute.xlu1 %v5184_v5 }
 0x289   :  { %v5413_v10 = vpop.permute.xlu2 %263 }
 0x28a   :  { %9365 = vst [vmem:[#allocation21_spill] sm:$0xff] %v5413_v10 }
 0x28d   :  { %4393 = vset.pattern.permute.xlu2 %v5208_v18 }
 0x28e   :  { %728 = vperm.xlu1 %4392, %v5237_v25  }
 0x291   :  { %v5419_v12 = vpop.permute.xlu2 %281 }
 0x292   :  { %9367 = vst [vmem:[#allocation23_spill] sm:$0xff] %v5419_v12 }
 0x295   :  { %740 = vperm.xlu2 %4393, %v5237_v25  }
 0x296   :  { %4394 = vset.pattern.permute.xlu1 %v5172_v0 }
 0x299   :  { %v5425_v14 = vpop.permute.xlu2 %293 }
 0x29a   :  { %9369 = vst [vmem:[#allocation25_spill] sm:$0xff] %v5425_v14 }
 0x29d   :  { %4395 = vset.pattern.permute.xlu2 %v5233_v24 }
 0x29e   :  { %747 = vperm.xlu1 %4394, %v5163_v62  }
 0x2a1   :  { %v5431_v17 = vpop.permute.xlu2 %312 }
 0x2a2   :  { %9371 = vst [vmem:[#allocation27_spill] sm:$0xff] %v5431_v17 }
 0x2a5   :  { %753 = vperm.xlu2 %4395, %v5163_v62  }
 0x2a6   :  { %4396 = vset.pattern.permute.xlu1 %v5191_v6 }
 0x2a9   :  { %v5437_v20 = vpop.permute.xlu2 %324 }
 0x2ad   :  { %4398 = vset.pattern.permute.xlu2 %v5216_v2 }
 0x2ae   :  { %759 = vperm.xlu1 %4396, %v5163_v62  }
 0x2b1   :  { %v5443_v25 = vpop.permute.xlu2 %342 }
 0x2b5   :  { %771 = vperm.xlu2 %4398, %v5163_v62  }
 0x2b6   :  { %4399 = vset.pattern.permute.xlu1 %v5184_v5 }
 0x2b9   :  { %v5449_v30 = vpop.permute.xlu2 %355 }
 0x2ba   :  { %9373 = vst [vmem:[#allocation29_spill] sm:$0xff] %v5449_v30 }
 0x2bd   :  { %4400 = vset.pattern.permute.xlu2 %v5247_v27 }
 0x2be   :  { %777 = vperm.xlu1 %4399, %v5163_v62  }
 0x2c1   :  { %v5455_v34 = vpop.permute.xlu2 %373 }
 0x2c2   :  { %9375 = vst [vmem:[#allocation31_spill] sm:$0xff] %v5455_v34 }
 0x2c5   :  { %783 = vperm.xlu2 %4400, %v5163_v62  }
 0x2c6   :  { %4401 = vset.pattern.permute.xlu1 %v5208_v18 }
 0x2c9   :  { %v5461_v36 = vpop.xlane.xlu2 %87 }
 0x2ca   :  { %9377 = vst [vmem:[#allocation33_spill] sm:$0xff] %v5461_v36 }
 0x2cd   :  { %4403 = vset.pattern.permute.xlu2 %v5233_v24 }
 0x2ce   :  { %789 = vperm.xlu1 %4401, %v5163_v62   ;;  %v5465_v62 = vpop.permute.xlu1 %410 }
 0x2cf   :  { %9378 = vst [vmem:[#allocation34_spill] sm:$0xff] %v5465_v62 }
 0x2d1   :  { %v5467_v38 = vpop.permute.xlu2 %385 }
 0x2d2   :  { %9379 = vst [vmem:[#allocation35_spill] sm:$0xff] %v5467_v38 }
 0x2d5   :  { %802 = vperm.xlu2 %4403, %v5178_v4  }
 0x2d6   :  { %4404 = vset.pattern.permute.xlu1 %v5191_v6  ;;  %v5471_v45 = vpop.permute.xlu1 %422 }
 0x2d7   :  { %9380 = vst [vmem:[#allocation36_spill] sm:$0xff] %v5471_v45 }
 0x2d9   :  { %v5475_v33 = vpop.permute.xlu2 %404 }
 0x2da   :  { %9381 = vst [vmem:[#allocation37_spill] sm:$0xff] %v5475_v33  ;;  %v5500_v33 = vpop.permute.xlu0 %765 }
 0x2db   :  { %9386 = vst [vmem:[#allocation42_spill] sm:$0xff] %v5500_v33 }
 0x2dd   :  { %4405 = vset.pattern.permute.xlu2 %v5147_v56 }
 0x2de   :  { %808 = vperm.xlu1 %4404, %v5178_v4   ;;  %v5477_v36 = vpop.permute.xlu1 %440 }
 0x2df   :  { %9382 = vst [vmem:[#allocation38_spill] sm:$0xff] %v5477_v36 }
 0x2e1   :  { %v5481_v32 = vpop.permute.xlu2 %416 }
 0x2e2   :  { %v5508_v35 = vpop.permute.xlu0 %796 }
 0x2e3   :  { %9389 = vst [vmem:[#allocation45_spill] sm:$0xff] %v5508_v35 }
 0x2e5   :  { %814 = vperm.xlu2 %4405, %v5178_v4  }
 0x2e6   :  { %4406 = vset.pattern.permute.xlu1 %v5216_v2  ;;  %v5483_v28 = vpop.permute.xlu1 %453 }
 0x2e9   :  { %v5487_v45 = vpop.permute.xlu2 %434 }
 0x2ea   :  { %v5519_v33 = vpop.permute.xlu0 %826 }
 0x2ed   :  { %4409 = vset.pattern.permute.xlu2 %v5247_v27 }
 0x2ee   :  { %820 = vperm.xlu1 %4406, %v5178_v4   ;;  %v5489_v62 = vpop.permute.xlu1 %471 }
 0x2f1   :  { %v5495_v36 = vpop.permute.xlu2 %446 }
 0x2f2   :  { %9384 = vst [vmem:[#allocation40_spill] sm:$0xff] %v5495_v36 }
 0x2f5   :  { %832 = vperm.xlu2 %4409, %v5178_v4  }
 0x2f6   :  { %4410 = vset.pattern.permute.xlu1 %v5208_v18 }
 0x2f9   :  { %v5503_v34 = vpop.permute.xlu2 %465 }
 0x2fa   :  { %9387 = vst [vmem:[#allocation43_spill] sm:$0xff] %v5503_v34 }
 0x2fd   :  { %4411 = vset.pattern.permute.xlu2 %v5172_v0 }
 0x2fe   :  { %838 = vperm.xlu1 %4410, %v5178_v4   ;;  %v5497_v4 = vpop.permute.xlu1 %483 }
 0x2ff   :  { %9385 = vst [vmem:[#allocation41_spill] sm:$0xff] %v5497_v4 }
 0x301   :  { %v5511_v30 = vpop.permute.xlu2 %477 }
 0x302   :  { %9390 = vst [vmem:[#allocation46_spill] sm:$0xff] %v5511_v30  ;;  %v5529_v30 = vpop.permute.xlu0 %612 }
 0x305   :  { %845 = vperm.xlu2 %4411, %v5204_v15  }
 0x306   :  { %4412 = vset.pattern.permute.xlu1 %v5233_v24  ;;  %v5505_v38 = vpop.permute.xlu1 %502 }
 0x307   :  { %9388 = vst [vmem:[#allocation44_spill] sm:$0xff] %v5505_v38 }
 0x309   :  { %v5517_v4 = vpop.permute.xlu2 %495 }
 0x30a   :  { %9392 = vst [vmem:[#allocation48_spill] sm:$0xff] %v5517_v4  ;;  %v5537_v16 = vpop.permute.xlu0 %857 }
 0x30b   :  { %9397 = vst [vmem:[#allocation53_spill] sm:$0xff] %v5537_v16 }
 0x30d   :  { %4414 = vset.pattern.permute.xlu2 %v5147_v56 }
 0x30e   :  { %851 = vperm.xlu1 %4412, %v5204_v15   ;;  %v5513_v36 = vpop.permute.xlu1 %514 }
 0x30f   :  { %9391 = vst [vmem:[#allocation47_spill] sm:$0xff] %v5513_v36 }
 0x311   :  { %v5525_v38 = vpop.permute.xlu2 %508 }
 0x315   :  { %863 = vperm.xlu2 %4414, %v5204_v15  }
 0x316   :  { %4415 = vset.pattern.permute.xlu1 %v5216_v2  ;;  %v5521_v34 = vpop.permute.xlu1 %532 }
 0x317   :  { %9393 = vst [vmem:[#allocation49_spill] sm:$0xff] %v5521_v34 }
 0x319   :  { %v5533_v36 = vpop.permute.xlu2 %526 }
 0x31a   :  { %9395 = vst [vmem:[#allocation51_spill] sm:$0xff] %v5533_v36 }
 0x31d   :  { %4416 = vset.pattern.permute.xlu2 %v5184_v5 }
 0x31e   :  { %869 = vperm.xlu1 %4415, %v5204_v15   ;;  %v5527_v35 = vpop.permute.xlu1 %544 }
 0x31f   :  { %9394 = vst [vmem:[#allocation50_spill] sm:$0xff] %v5527_v35  ;;  %v5545_v35 = vpop.permute.xlu0 %642 }
 0x325   :  { %875 = vperm.xlu2 %4416, %v5204_v15  }
 0x326   :  { %4417 = vset.pattern.permute.xlu1 %v5247_v27  ;;  %v5535_v4 = vpop.permute.xlu1 %563 }
 0x327   :  { %9396 = vst [vmem:[#allocation52_spill] sm:$0xff] %v5535_v4  ;;  %v5553_v11 = vpop.permute.xlu0 %887 }
 0x328   :  { %9402 = vst [vmem:[#allocation58_spill] sm:$0xff] %v5553_v11 }
 0x32d   :  { %4419 = vset.pattern.permute.xlu2 %v5172_v0 }
 0x32e   :  { %881 = vperm.xlu1 %4417, %v5204_v15   ;;  %v5541_v15 = vpop.permute.xlu2 %538  ;;  %v5543_v34 = vpop.permute.xlu1 %575 }
 0x32f   :  { %9398 = vst [vmem:[#allocation54_spill] sm:$0xff] %v5541_v15 }
 0x330   :  { %9399 = vst [vmem:[#allocation55_spill] sm:$0xff] %v5543_v34  ;;  %v5562_v34 = vpop.permute.xlu0 %673 }
 0x331   :  { %9405 = vst [vmem:[#allocation61_spill] sm:$0xff] %v5562_v34 }
 0x335   :  { %894 = vperm.xlu2 %4419, %v5227_v23  }
 0x336   :  { %4420 = vset.pattern.permute.xlu1 %v5233_v24  ;;  %v5549_v24 = vpop.permute.xlu2 %557  ;;  %v5551_v13 = vpop.permute.xlu1 %593 }
 0x337   :  { %9400 = vst [vmem:[#allocation56_spill] sm:$0xff] %v5549_v24 }
 0x338   :  { %9401 = vst [vmem:[#allocation57_spill] sm:$0xff] %v5551_v13  ;;  %v5570_v13 = vpop.permute.xlu0 %918 }
 0x339   :  { %9408 = vst [vmem:[#allocation64_spill] sm:$0xff] %v5570_v13 }
 0x33d   :  { %4421 = vset.pattern.permute.xlu2 %v5191_v6 }
 0x33e   :  { %900 = vperm.xlu1 %4420, %v5227_v23   ;;  %v5557_v16 = vpop.permute.xlu2 %569  ;;  %v5559_v15 = vpop.permute.xlu1 %606 }
 0x33f   :  { %9403 = vst [vmem:[#allocation59_spill] sm:$0xff] %v5557_v16 }
 0x340   :  { %9404 = vst [vmem:[#allocation60_spill] sm:$0xff] %v5559_v15 }
 0x345   :  { %906 = vperm.xlu2 %4421, %v5227_v23  }
 0x346   :  { %4422 = vset.pattern.permute.xlu1 %v5147_v56  ;;  %v5565_v4 = vpop.permute.xlu2 %587  ;;  %v5567_v24 = vpop.permute.xlu1 %624 }
 0x347   :  { %9406 = vst [vmem:[#allocation62_spill] sm:$0xff] %v5565_v4 }
 0x348   :  { %9407 = vst [vmem:[#allocation63_spill] sm:$0xff] %v5567_v24 }
 0x34d   :  { %4424 = vset.pattern.permute.xlu2 %v5184_v5 }
 0x34e   :  { %912 = vperm.xlu1 %4422, %v5227_v23   ;;  %v5573_v11 = vpop.permute.xlu2 %600  ;;  %v5575_v16 = vpop.permute.xlu1 %636 }
 0x34f   :  { %9409 = vst [vmem:[#allocation65_spill] sm:$0xff] %v5575_v16 }
 0x355   :  { %924 = vperm.xlu2 %4424, %v5227_v23  }
 0x356   :  { %4425 = vset.pattern.permute.xlu1 %v5247_v27  ;;  %v5579_v9 = vpop.permute.xlu2 %618  ;;  %v5581_v27 = vpop.permute.xlu0 %704 }
 0x357   :  { %9410 = vst [vmem:[#allocation66_spill] sm:$0xff] %v5581_v27  ;;  %v5583_v4 = vpop.permute.xlu1 %655 }
 0x358   :  { %9411 = vst [vmem:[#allocation67_spill] sm:$0xff] %v5583_v4 }
 0x35d   :  { %4426 = vset.pattern.permute.xlu2 %v5208_v18 }
 0x35e   :  { %930 = vperm.xlu1 %4425, %v5227_v23   ;;  %v5587_v17 = vpop.permute.xlu2 %630  ;;  %v5589_v12 = vpop.permute.xlu0 %949 }
 0x35f   :  { %9412 = vst [vmem:[#allocation68_spill] sm:$0xff] %v5587_v17  ;;  %v5591_v34 = vpop.permute.xlu1 %667 }
 0x360   :  { %9413 = vst [vmem:[#allocation69_spill] sm:$0xff] %v5589_v12 }
 0x361   :  { %9414 = vst [vmem:[#allocation70_spill] sm:$0xff] %v5591_v34 }
 0x365   :  { %936 = vperm.xlu2 %4426, %v5227_v23  }
 0x366   :  { %4427 = vset.pattern.permute.xlu1 %v5172_v0  ;;  %v5595_v0 = vpop.permute.xlu2 %649  ;;  %v5599_v27 = vpop.permute.xlu0 %734 }
 0x367   :  { %9415 = vst [vmem:[#allocation71_spill] sm:$0xff] %v5595_v0  ;;  %v5597_v23 = vpop.permute.xlu1 %685 }
 0x368   :  { %9416 = vst [vmem:[#allocation72_spill] sm:$0xff] %v5597_v23 }
 0x36d   :  { %4429 = vset.pattern.permute.xlu2 %v5191_v6 }
 0x36e   :  { %943 = vperm.xlu1 %4427, %v5243_v26   ;;  %v5603_v6 = vpop.permute.xlu2 %661  ;;  %v5607_v12 = vpop.permute.xlu0 %979 }
 0x36f   :  { %v5605_v36 = vpop.permute.xlu1 %698  ;;  %9417 = vst [vmem:[#allocation73_spill] sm:$0xff] %v5607_v12 }
 0x375   :  { %955 = vperm.xlu2 %4429, %v5243_v26  }
 0x376   :  { %4430 = vset.pattern.permute.xlu1 %v5147_v56  ;;  %v5611_v56 = vpop.permute.xlu2 %679  ;;  %v5615_v14 = vpop.permute.xlu0 %428 }
 0x377   :  { %v5613_v13 = vpop.permute.xlu1 %716  ;;  %9418 = vst [vmem:[#allocation74_spill] sm:$0xff] %v5615_v14 }
 0x37d   :  { %4431 = vset.pattern.permute.xlu2 %v5216_v2 }
 0x37e   :  { %961 = vperm.xlu1 %4430, %v5243_v26   ;;  %v5619_v2 = vpop.permute.xlu2 %691  ;;  %v5624_v12 = vpop.permute.xlu0 %1309 }
 0x37f   :  { %9419 = vst [vmem:[#allocation75_spill] sm:$0xff] %v5619_v2  ;;  %v5621_v23 = vpop.permute.xlu1 %728 }
 0x380   :  { %9420 = vst [vmem:[#allocation76_spill] sm:$0xff] %v5621_v23 }
 0x385   :  { %967 = vperm.xlu2 %4431, %v5243_v26  }
 0x386   :  { %4432 = vset.pattern.permute.xlu1 %v5184_v5  ;;  %v5627_v5 = vpop.permute.xlu2 %710  ;;  %v5632_v14 = vpop.permute.xlu0 %214 }
 0x387   :  { %9421 = vst [vmem:[#allocation77_spill] sm:$0xff] %v5627_v5  ;;  %v5629_v10 = vpop.permute.xlu1 %747 }
 0x388   :  { %9422 = vst [vmem:[#allocation78_spill] sm:$0xff] %v5629_v10 }
 0x389   :  { %9423 = vst [vmem:[#allocation79_spill] sm:$0xff] %v5632_v14 }
 0x38d   :  { %4434 = vset.pattern.permute.xlu2 %v5208_v18 }
 0x38e   :  { %973 = vperm.xlu1 %4432, %v5243_v26   ;;  %v5635_v18 = vpop.permute.xlu2 %722  ;;  %v5643_v23 = vpop.permute.xlu0 %459 }
 0x38f   :  { %9424 = vst [vmem:[#allocation80_spill] sm:$0xff] %v5635_v18  ;;  %v5637_v2 = vpop.permute.xlu1 %759 }
 0x390   :  { %9425 = vst [vmem:[#allocation81_spill] sm:$0xff] %v5637_v2 }
 0x391   :  { %9427 = vst [vmem:[#allocation83_spill] sm:$0xff] %v5643_v23 }
 0x395   :  { %985 = vperm.xlu2 %4434, %v5243_v26  }
 0x396   :  { %4435 = vset.pattern.permute.xlu1 %v5044_v1  ;;  %v5641_v26 = vpop.permute.xlu2 %740  ;;  %v5653_v18 = vpop.permute.xlu0 %1340 }
 0x397   :  { %9426 = vst [vmem:[#allocation82_spill] sm:$0xff] %v5641_v26  ;;  %v5645_v5 = vpop.permute.xlu1 %777 }
 0x398   :  { %9428 = vst [vmem:[#allocation84_spill] sm:$0xff] %v5645_v5 }
 0x399   :  { %9429 = vst [vmem:[#allocation85_spill] sm:$0xff] %v5653_v18 }
 0x39d   :  { %4436 = vset.pattern.permute.xlu2 %v5113_v43 }
 0x39e   :  { %1138 = vperm.xlu1 %4435, %v5302_v48   ;;  %v5649_v10 = vpop.permute.xlu2 %753  ;;  %v5661_v23 = vpop.permute.xlu0 %244 }
 0x39f   :  { %v5651_v4 = vpop.permute.xlu1 %789  ;;  %9430 = vst [vmem:[#allocation86_spill] sm:$0xff] %v5661_v23 }
 0x3a5   :  { %1144 = vperm.xlu2 %4436, %v5302_v48  }
 0x3a6   :  { %4437 = vset.pattern.permute.xlu1 %v5065_v21  ;;  %v5657_v2 = vpop.permute.xlu2 %771  ;;  %v5669_v16 = vpop.permute.xlu0 %489 }
 0x3a7   :  { %v5659_v26 = vpop.permute.xlu1 %808 }
 0x3ad   :  { %4438 = vset.pattern.permute.xlu2 %v5096_v40 }
 0x3ae   :  { %1150 = vperm.xlu1 %4437, %v5302_v48   ;;  %v5665_v5 = vpop.permute.xlu2 %783  ;;  %v5678_v23 = vpop.permute.xlu0 %1370 }
 0x3af   :  { %9431 = vst [vmem:[#allocation87_spill] sm:$0xff] %v5665_v5  ;;  %v5667_v34 = vpop.permute.xlu1 %820 }
 0x3b0   :  { %9432 = vst [vmem:[#allocation88_spill] sm:$0xff] %v5667_v34 }
 0x3b1   :  { %9435 = vst [vmem:[#allocation91_spill] sm:$0xff] %v5678_v23 }
 0x3b5   :  { %1162 = vperm.xlu2 %4438, %v5302_v48  }
 0x3b6   :  { %4439 = vset.pattern.permute.xlu1 %v5093_v39  ;;  %v5673_v18 = vpop.permute.xlu2 %802  ;;  %v5686_v34 = vpop.permute.xlu0 %275 }
 0x3b7   :  { %9433 = vst [vmem:[#allocation89_spill] sm:$0xff] %v5673_v18  ;;  %v5675_v59 = vpop.permute.xlu1 %838 }
 0x3b8   :  { %9434 = vst [vmem:[#allocation90_spill] sm:$0xff] %v5675_v59 }
 0x3b9   :  { %9438 = vst [vmem:[#allocation94_spill] sm:$0xff] %v5686_v34 }
 0x3bd   :  { %4440 = vset.pattern.permute.xlu2 %v5127_v47 }
 0x3be   :  { %1168 = vperm.xlu1 %4439, %v5302_v48   ;;  %v5681_v0 = vpop.permute.xlu2 %814 }
 0x3bf   :  { %9436 = vst [vmem:[#allocation92_spill] sm:$0xff] %v5681_v0  ;;  %v5683_v5 = vpop.permute.xlu1 %851 }
 0x3c0   :  { %9437 = vst [vmem:[#allocation93_spill] sm:$0xff] %v5683_v5 }
 0x3c5   :  { %1174 = vperm.xlu2 %4440, %v5302_v48  }
 0x3c6   :  { %4441 = vset.pattern.permute.xlu1 %v5103_v41  ;;  %v5689_v63 = vpop.permute.xlu2 %832 }
 0x3c7   :  { %9439 = vst [vmem:[#allocation95_spill] sm:$0xff] %v5689_v63  ;;  %v5691_v18 = vpop.permute.xlu1 %869 }
 0x3c8   :  { %9440 = vst [vmem:[#allocation96_spill] sm:$0xff] %v5691_v18 }
 0x3cd   :  { %4442 = vset.pattern.permute.xlu2 %v5113_v43 }
 0x3ce   :  { %1180 = vperm.xlu1 %4441, %v5302_v48   ;;  %v5695_v59 = vpop.permute.xlu2 %845  ;;  %v5697_v48 = vpop.permute.xlu0 %520 }
 0x3cf   :  { %9441 = vst [vmem:[#allocation97_spill] sm:$0xff] %v5697_v48  ;;  %v5699_v23 = vpop.permute.xlu1 %881 }
 0x3d5   :  { %1193 = vperm.xlu2 %4442, %v5323_v42  }
 0x3d6   :  { %4443 = vset.pattern.permute.xlu1 %v5065_v21  ;;  %v5703_v5 = vpop.permute.xlu2 %863  ;;  %v5707_v63 = vpop.permute.xlu0 %1156 }
 0x3d7   :  { %v5705_v0 = vpop.permute.xlu1 %900  ;;  %9442 = vst [vmem:[#allocation98_spill] sm:$0xff] %v5707_v63 }
 0x3dd   :  { %4444 = vset.pattern.permute.xlu2 %v5086_v37 }
 0x3de   :  { %1199 = vperm.xlu1 %4443, %v5323_v42   ;;  %v5711_v18 = vpop.permute.xlu2 %875  ;;  %v5715_v48 = vpop.permute.xlu0 %1401 }
 0x3df   :  { %9443 = vst [vmem:[#allocation99_spill] sm:$0xff] %v5711_v18  ;;  %v5713_v34 = vpop.permute.xlu1 %912 }
 0x3e0   :  { %9444 = vst [vmem:[#allocation100_spill] sm:$0xff] %v5713_v34 }
 0x3e5   :  { %1205 = vperm.xlu2 %4444, %v5323_v42  }
 0x3e6   :  { %4445 = vset.pattern.permute.xlu1 %v5096_v40  ;;  %v5719_v24 = vpop.permute.xlu2 %894  ;;  %v5723_v17 = vpop.permute.xlu0 %336 }
 0x3e7   :  { %9445 = vst [vmem:[#allocation101_spill] sm:$0xff] %v5719_v24  ;;  %v5721_v57 = vpop.permute.xlu1 %930 }
 0x3e8   :  { %9446 = vst [vmem:[#allocation102_spill] sm:$0xff] %v5721_v57 }
 0x3e9   :  { %9447 = vst [vmem:[#allocation103_spill] sm:$0xff] %v5723_v17 }
 0x3ed   :  { %4446 = vset.pattern.permute.xlu2 %v5127_v47 }
 0x3ee   :  { %1211 = vperm.xlu1 %4445, %v5323_v42   ;;  %v5727_v63 = vpop.permute.xlu2 %906  ;;  %v5732_v34 = vpop.permute.xlu0 %581 }
 0x3ef   :  { %9448 = vst [vmem:[#allocation104_spill] sm:$0xff] %v5727_v63  ;;  %v5729_v18 = vpop.permute.xlu1 %943 }
 0x3f0   :  { %9449 = vst [vmem:[#allocation105_spill] sm:$0xff] %v5729_v18 }
 0x3f1   :  { %9450 = vst [vmem:[#allocation106_spill] sm:$0xff] %v5732_v34 }
 0x3f5   :  { %1223 = vperm.xlu2 %4446, %v5323_v42  }
 0x3f6   :  { %4447 = vset.pattern.permute.xlu1 %v5103_v41  ;;  %v5735_v14 = vpop.permute.xlu2 %924 }
 0x3f7   :  { %9451 = vst [vmem:[#allocation107_spill] sm:$0xff] %v5735_v14  ;;  %v5737_v24 = vpop.permute.xlu1 %961 }
 0x3f8   :  { %9452 = vst [vmem:[#allocation108_spill] sm:$0xff] %v5737_v24  ;;  %v5756_v24 = vsel %vm77_vm0, %v5368_v52, %v5382_v55 }
 0x3f9   :  { %v5765_v17 = vperm.slane %v5756_v24, 0 }
 0x3fd   :  { %4448 = vset.pattern.permute.xlu2 %v5044_v1 }
 0x3fe   :  { %1229 = vperm.xlu1 %4447, %v5323_v42   ;;  %v5741_v57 = vpop.permute.xlu2 %936  ;;  %v5743_v42 = vpop.permute.xlu0 %1217 }
 0x3ff   :  { %9453 = vst [vmem:[#allocation109_spill] sm:$0xff] %v5741_v57 }
 0x400   :  { %v5745_v63 = vpop.permute.xlu1 %973 }
 0x401   :  { %9454 = vst [vmem:[#allocation110_spill] sm:$0xff] %v5745_v63  ;;  %v991_v63 = vsel %vm46_vm1, %v5395_v60, %v5529_v30  ;;  %v5779_v60 = vsel %vm77_vm0, %v5257_v31, %v5389_v58 }
 0x402   :  { %v1071_v57 = vmul.f32 %v5765_v17, %v991_v63  ;;  %v5784_v63 = vperm.slane %v5779_v60, 0 }
 0x404   :  { %9460 = vst [vmem:[#allocation116_spill] sm:$0xff] %v5784_v63 }
 0x405   :  { %1236 = vperm.xlu2 %4448, %v5341_v50  }
 0x406   :  { %4449 = vset.pattern.permute.xlu1 %v5113_v43  ;;  %v5749_v18 = vpop.permute.xlu2 %955  ;;  %v5758_v14 = vpop.permute.xlu0 %1462 }
 0x407   :  { %9455 = vst [vmem:[#allocation111_spill] sm:$0xff] %v5749_v18 }
 0x408   :  { %9456 = vst [vmem:[#allocation112_spill] sm:$0xff] %v5758_v14 }
 0x40d   :  { %4450 = vset.pattern.permute.xlu2 %v5086_v37 }
 0x40e   :  { %1242 = vperm.xlu1 %4449, %v5341_v50   ;;  %v5770_v18 = vpop.permute.xlu2 %967  ;;  %v5772_v15 = vpop.permute.xlu0 %367 }
 0x40f   :  { %9457 = vst [vmem:[#allocation113_spill] sm:$0xff] %v5770_v18 }
 0x410   :  { %v5751_v34 = vpop.permute.xlu1 %1138  ;;  %9458 = vst [vmem:[#allocation114_spill] sm:$0xff] %v5772_v15 }
 0x415   :  { %1254 = vperm.xlu2 %4450, %v5341_v50  }
 0x416   :  { %4451 = vset.pattern.permute.xlu1 %v5096_v40  ;;  %v5781_v30 = vpop.permute.xlu2 %985 }
 0x417   :  { %9459 = vst [vmem:[#allocation115_spill] sm:$0xff] %v5781_v30 }
 0x41d   :  { %4452 = vset.pattern.permute.xlu2 %v5093_v39 }
 0x41e   :  { %1260 = vperm.xlu1 %4451, %v5341_v50   ;;  %v5798_v58 = vpop.permute.xlu2 %1144 }
 0x420   :  { %v1151_v52 = vpop.permute.xlu1 %1150 }
 0x421   :  { %v1527_v55 = vsub.f32 %v1071_v57, %v1151_v52  ;;  %v5788_v57 = vpop.permute.xlu0 %1248 }
 0x422   :  { %9462 = vst [vmem:[#allocation118_spill] sm:$0xff] %v5788_v57 }
 0x423   :  { %v1593_v14 = vmul.f32 1.442695, %v1527_v55 }
 0x425   :  { %4558 = vpow2.f32 %v1593_v14  ;;  %1266 = vperm.xlu2 %4452, %v5341_v50  }
 0x426   :  { %4453 = vset.pattern.permute.xlu1 %v5127_v47  ;;  %v5804_v55 = vpop.permute.xlu2 %1162 }
 0x427   :  { %9465 = vst [vmem:[#allocation121_spill] sm:$0xff] %v5804_v55 }
 0x429   :  { %v5801_v52 = vpop.permute.xlu0 %1493 }
 0x42a   :  { %9464 = vst [vmem:[#allocation120_spill] sm:$0xff] %v5801_v52 }
 0x42b   :  { %v5786_v18 = vpop.eup %4558 }
 0x42c   :  { %9461 = vst [vmem:[#allocation117_spill] sm:$0xff] %v5786_v18  ;;  %v5792_v14 = vmul.f32 %v5786_v18, %v5784_v63 }
 0x42d   :  { %4454 = vset.pattern.permute.xlu2 %v5044_v1 }
 0x42e   :  { %9463 = vst [vmem:[#allocation119_spill] sm:$0xff] %v5792_v14  ;;  %1272 = vperm.xlu1 %4453, %v5341_v50   ;;  %v1803_v31 = vsel %vm77_vm0, %v5792_v14, 0.0  ;;  %v996_v50 = vsel %vm46_vm1, %v5407_v8, %v5545_v35  ;;  %v5817_v30 = vpop.permute.xlu2 %1174  ;;  %v179_v8 = vrot.slane %v5756_v24, 1 }
 0x42f   :  { %1804 = vadd.xlane.f32.xlu0 %v1803_v31  ;;  %v1076_v31 = vmul.f32 %v5765_v17, %v996_v50  ;;  %9466 = vst [vmem:[#allocation122_spill] sm:$0xff] %v5817_v30  ;;  %v1002_v50 = vsel %vm46_vm1, %v5404_v7, %v5611_v56 }
 0x430   :  { %v5806_v18 = vpop.permute.xlu1 %1168 }
 0x431   :  { %v5813_v14 = vpop.permute.xlu0 %397 }
 0x435   :  { %1285 = vperm.xlu2 %4454, %v5269_v44  }
 0x436   :  { %4455 = vset.pattern.permute.xlu1 %v5113_v43  ;;  %v5822_v35 = vpop.permute.xlu2 %1193 }
 0x437   :  { %9467 = vst [vmem:[#allocation123_spill] sm:$0xff] %v5822_v35 }
 0x439   :  { %v5824_v55 = vpop.permute.xlu0 %1278 }
 0x43a   :  { %9468 = vst [vmem:[#allocation124_spill] sm:$0xff] %v5824_v55 }
 0x43d   :  { %4456 = vset.pattern.permute.xlu2 %v5065_v21 }
 0x43e   :  { %1291 = vperm.xlu1 %4455, %v5269_v44  }
 0x440   :  { %v1181_v15 = vpop.permute.xlu1 %1180 }
 0x441   :  { %v1532_v57 = vsub.f32 %v1076_v31, %v1181_v15  ;;  %v5832_v15 = vperm.slane %v179_v8, 0  ;;  %v5848_v8 = vpop.permute.xlu2 %1205 }
 0x443   :  { %v1603_v52 = vmul.f32 1.442695, %v1532_v57  ;;  %v999_v57 = vsel %vm46_vm1, %v5398_v61, %v5603_v6  ;;  %v1082_v31 = vmul.f32 %v5832_v15, %v1002_v50 }
 0x444   :  { %v1079_v56 = vmul.f32 %v5832_v15, %v999_v57  ;;  %v180_v57 = vrot.slane %v5756_v24, 2 }
 0x445   :  { %4560 = vpow2.f32 %v1603_v52  ;;  %1297 = vperm.xlu2 %4456, %v5269_v44   ;;  %v1538_v61 = vsub.f32 %v1082_v31, %v5743_v42 }
 0x446   :  { %4457 = vset.pattern.permute.xlu1 %v5086_v37  ;;  %v5866_v31 = vperm.slane %v180_v57, 0 }
 0x447   :  { %v1615_v50 = vmul.f32 1.442695, %v1538_v61 }
 0x44b   :  { %v5830_v30 = vpop.eup %4560 }
 0x44c   :  { %9469 = vst [vmem:[#allocation125_spill] sm:$0xff] %v5830_v30  ;;  %v5840_v52 = vmul.f32 %v5830_v30, %v5784_v63  ;;  %v5851_v30 = vpop.permute.xlu0 %1523  ;;  %v196_v63 = vrot.slane %v5779_v60, 1 }
 0x44d   :  { %4459 = vset.pattern.permute.xlu2 %v5093_v39  ;;  %9471 = vst [vmem:[#allocation127_spill] sm:$0xff] %v5851_v30 }
 0x44e   :  { %9470 = vst [vmem:[#allocation126_spill] sm:$0xff] %v5840_v52  ;;  %1303 = vperm.xlu1 %4457, %v5269_v44   ;;  %v1818_v7 = vsel %vm77_vm0, %v5840_v52, 0.0 }
 0x44f   :  { %1819 = vadd.xlane.f32.xlu0 %v1818_v7  ;;  %v5856_v52 = vpop.permute.xlu2 %1223  ;;  %v5859_v7 = vperm.slane %v196_v63, 0 }
 0x450   :  { %v1200_v55 = vpop.permute.xlu1 %1199 }
 0x451   :  { %v1535_v6 = vsub.f32 %v1079_v56, %v1200_v55 }
 0x453   :  { %v1609_v35 = vmul.f32 1.442695, %v1535_v6 }
 0x454   :  { %v307_v42 = vpop.permute.xlu0 %306  ;;  %v9657_v3 = vld [vmem:[#allocation127_spill] sm:$0xff] }
 0x455   :  { %4562 = vpow2.f32 %v1609_v35  ;;  %1315 = vperm.xlu2 %4459, %v5269_v44   ;;  %v1005_v35 = vsel %vm46_vm1, %v307_v42, %v5605_v36 }
 0x456   :  { %4460 = vset.pattern.permute.xlu1 %v5127_v47  ;;  %4564 = vpow2.f32 %v1615_v50  ;;  %v1085_v61 = vmul.f32 %v5866_v31, %v1005_v35 }
 0x45b   :  { %v5861_v55 = vpop.eup %4562 }
 0x45c   :  { %9472 = vst [vmem:[#allocation128_spill] sm:$0xff] %v5861_v55  ;;  %v5870_v56 = vmul.f32 %v5861_v55, %v5859_v7  ;;  %v5877_v6 = vpop.eup %4564  ;;  %v197_v55 = vrot.slane %v5779_v60, 2 }
 0x45d   :  { %4461 = vset.pattern.permute.xlu2 %v5103_v41  ;;  %9474 = vst [vmem:[#allocation130_spill] sm:$0xff] %v5877_v6  ;;  %v5881_v42 = vmul.f32 %v5877_v6, %v5859_v7 }
 0x45e   :  { %9473 = vst [vmem:[#allocation129_spill] sm:$0xff] %v5870_v56  ;;  %1321 = vperm.xlu1 %4460, %v5269_v44   ;;  %v1827_v63 = vsel %vm77_vm0, %v5870_v56, 0.0  ;;  %v5888_v56 = vperm.slane %v197_v55, 0 }
 0x45f   :  { %v1237_v50 = vpop.permute.xlu2 %1236  ;;  %1828 = vadd.xlane.f32.xlu0 %v1827_v63  ;;  %9475 = vst [vmem:[#allocation131_spill] sm:$0xff] %v5881_v42  ;;  %v1836_v35 = vsel %vm77_vm0, %v5881_v42, 0.0 }
 0x460   :  { %v1541_v36 = vsub.f32 %v1085_v61, %v1237_v50  ;;  %v1008_v61 = vsel %vm46_vm1, %v5437_v20, %v5613_v13 }
 0x462   :  { %v1621_v57 = vmul.f32 1.442695, %v1541_v36 }
 0x464   :  { %4566 = vpow2.f32 %v1621_v57 }
 0x465   :  { %1327 = vperm.xlu2 %4461, %v5269_v44   ;;  %v1088_v44 = vmul.f32 %v5866_v31, %v1008_v61 }
 0x466   :  { %4462 = vset.pattern.permute.xlu1 %v5044_v1 }
 0x467   :  { %1837 = vadd.xlane.f32.xlu0 %v1836_v35 }
 0x46a   :  { %v5890_v63 = vpop.eup %4566 }
 0x46b   :  { %9476 = vst [vmem:[#allocation132_spill] sm:$0xff] %v5890_v63  ;;  %v5898_v50 = vmul.f32 %v5890_v63, %v5888_v56 }
 0x46d   :  { %9477 = vst [vmem:[#allocation133_spill] sm:$0xff] %v5898_v50  ;;  %4464 = vset.pattern.permute.xlu2 %v5065_v21  ;;  %v1845_v55 = vsel %vm77_vm0, %v5898_v50, 0.0 }
 0x46e   :  { %1334 = vperm.xlu1 %4462, %v5280_v46  }
 0x46f   :  { %v1255_v36 = vpop.permute.xlu2 %1254  ;;  %1846 = vadd.xlane.f32.xlu0 %v1845_v55 }
 0x470   :  { %v1544_v57 = vsub.f32 %v1088_v44, %v1255_v36  ;;  %v5917_v44 = vpop.permute.xlu1 %1211 }
 0x472   :  { %v1627_v35 = vmul.f32 1.442695, %v1544_v57 }
 0x474   :  { %4568 = vpow2.f32 %v1627_v35  ;;  %v1011_v35 = vsel %vm46_vm1, %v5443_v25, %v5599_v27  ;;  %v1017_v25 = vsel %vm46_vm1, %v5440_v22, %v5657_v2 }
 0x475   :  { %1346 = vperm.xlu2 %4464, %v5280_v46  }
 0x476   :  { %4465 = vset.pattern.permute.xlu1 %v5086_v37 }
 0x478   :  { %v5921_v55 = vpop.permute.xlu1 %1229 }
 0x47a   :  { %v5907_v13 = vpop.eup %4568 }
 0x47b   :  { %9478 = vst [vmem:[#allocation134_spill] sm:$0xff] %v5907_v13  ;;  %v5911_v20 = vmul.f32 %v5907_v13, %v5888_v56 }
 0x47d   :  { %9479 = vst [vmem:[#allocation135_spill] sm:$0xff] %v5911_v20  ;;  %4466 = vset.pattern.permute.xlu2 %v5096_v40  ;;  %v1854_v61 = vsel %vm77_vm0, %v5911_v20, 0.0  ;;  %v181_v20 = vrot.slane %v5756_v24, 3 }
 0x47e   :  { %1855 = vadd.xlane.f32.xlu0 %v1854_v61  ;;  %1352 = vperm.xlu1 %4465, %v5280_v46   ;;  %v1091_v61 = vmul.f32 %v5866_v31, %v1011_v35 }
 0x47f   :  { %v5938_v13 = vpop.permute.xlu2 %1266  ;;  %v5951_v35 = vperm.slane %v181_v20, 0 }
 0x480   :  { %v5925_v36 = vpop.permute.xlu1 %1242 }
 0x485   :  { %1358 = vperm.xlu2 %4466, %v5280_v46  }
 0x486   :  { %4467 = vset.pattern.permute.xlu1 %v5093_v39 }
 0x48d   :  { %4469 = vset.pattern.permute.xlu2 %v5103_v41 }
 0x48e   :  { %1364 = vperm.xlu1 %4467, %v5280_v46  }
 0x48f   :  { %v5943_v50 = vpop.permute.xlu2 %1285 }
 0x490   :  { %v5929_v57 = vpop.permute.xlu1 %1260 }
 0x495   :  { %1376 = vperm.xlu2 %4469, %v5280_v46  }
 0x496   :  { %4470 = vset.pattern.permute.xlu1 %v5044_v1 }
 0x49d   :  { %4471 = vset.pattern.permute.xlu2 %v5113_v43 }
 0x49e   :  { %1383 = vperm.xlu1 %4470, %v5308_v29  }
 0x49f   :  { %v5967_v20 = vpop.permute.xlu2 %1297 }
 0x4a0   :  { %v1273_v63 = vpop.permute.xlu1 %1272 }
 0x4a1   :  { %v1547_v6 = vsub.f32 %v1091_v61, %v1273_v63  ;;  %v1097_v61 = vmul.f32 %v5951_v35, %v1017_v25  ;;  %v198_v25 = vrot.slane %v5779_v60, 3 }
 0x4a3   :  { %v1633_v46 = vmul.f32 1.442695, %v1547_v6  ;;  %v1014_v6 = vsel %vm46_vm1, %v5434_v19, %v5649_v10  ;;  %v1553_v10 = vsub.f32 %v1097_v61, %v5624_v12  ;;  %v1020_v12 = vsel %vm46_vm1, %v5813_v14, %v5651_v4 }
 0x4a4   :  { %v1094_v2 = vmul.f32 %v5951_v35, %v1014_v6  ;;  %v5975_v6 = vperm.slane %v198_v25, 0  ;;  %v1100_v61 = vmul.f32 %v5951_v35, %v1020_v12  ;;  %v1023_v12 = vsel %vm46_vm1, %v5481_v32, %v5659_v26 }
 0x4a5   :  { %4570 = vpow2.f32 %v1633_v46  ;;  %1389 = vperm.xlu2 %4471, %v5308_v29   ;;  %v1645_v42 = vmul.f32 1.442695, %v1553_v10  ;;  %v199_v32 = vrot.slane %v5779_v60, 4 }
 0x4a6   :  { %4472 = vset.pattern.permute.xlu1 %v5065_v21 }
 0x4a7   :  { %v6023_v26 = vperm.slane %v199_v32, 0 }
 0x4ab   :  { %v5949_v27 = vpop.eup %4570 }
 0x4ac   :  { %9480 = vst [vmem:[#allocation136_spill] sm:$0xff] %v5949_v27  ;;  %v5959_v63 = vmul.f32 %v5949_v27, %v5888_v56 }
 0x4ad   :  { %4474 = vset.pattern.permute.xlu2 %v5096_v40 }
 0x4ae   :  { %9481 = vst [vmem:[#allocation137_spill] sm:$0xff] %v5959_v63  ;;  %1395 = vperm.xlu1 %4472, %v5308_v29   ;;  %v1863_v22 = vsel %vm77_vm0, %v5959_v63, 0.0 }
 0x4af   :  { %1864 = vadd.xlane.f32.xlu0 %v1863_v22  ;;  %v5973_v30 = vpop.permute.xlu2 %1315 }
 0x4b0   :  { %v1292_v46 = vpop.permute.xlu1 %1291 }
 0x4b1   :  { %v1550_v19 = vsub.f32 %v1094_v2, %v1292_v46 }
 0x4b3   :  { %v1639_v27 = vmul.f32 1.442695, %v1550_v19  ;;  %v182_v19 = vrot.slane %v5756_v24, 4 }
 0x4b5   :  { %4572 = vpow2.f32 %v1639_v27  ;;  %1407 = vperm.xlu2 %4474, %v5308_v29  }
 0x4b6   :  { %4475 = vset.pattern.permute.xlu1 %v5093_v39  ;;  %4574 = vpow2.f32 %v1645_v42 }
 0x4bb   :  { %v5977_v63 = vpop.eup %4572 }
 0x4bc   :  { %9482 = vst [vmem:[#allocation138_spill] sm:$0xff] %v5977_v63  ;;  %v5985_v27 = vmul.f32 %v5977_v63, %v5975_v6  ;;  %v5992_v22 = vpop.eup %4574 }
 0x4bd   :  { %4476 = vset.pattern.permute.xlu2 %v5127_v47  ;;  %9484 = vst [vmem:[#allocation140_spill] sm:$0xff] %v5992_v22  ;;  %v5996_v4 = vmul.f32 %v5992_v22, %v5975_v6 }
 0x4be   :  { %9483 = vst [vmem:[#allocation139_spill] sm:$0xff] %v5985_v27  ;;  %1413 = vperm.xlu1 %4475, %v5308_v29   ;;  %v1872_v42 = vsel %vm77_vm0, %v5985_v27, 0.0  ;;  %v9557_v27 = vld [vmem:[#allocation118_spill] sm:$0xff] }
 0x4bf   :  { %v1328_v2 = vpop.permute.xlu2 %1327  ;;  %1873 = vadd.xlane.f32.xlu0 %v1872_v42  ;;  %9485 = vst [vmem:[#allocation141_spill] sm:$0xff] %v5996_v4  ;;  %v1881_v14 = vsel %vm77_vm0, %v5996_v4, 0.0  ;;  %v6013_v42 = vperm.slane %v182_v19, 0 }
 0x4c0   :  { %v1556_v46 = vsub.f32 %v1100_v61, %v1328_v2 }
 0x4c1   :  { %v1103_v2 = vmul.f32 %v6013_v42, %v1023_v12 }
 0x4c2   :  { %v1651_v10 = vmul.f32 1.442695, %v1556_v46 }
 0x4c4   :  { %4576 = vpow2.f32 %v1651_v10 }
 0x4c5   :  { %1419 = vperm.xlu2 %4476, %v5308_v29  }
 0x4c6   :  { %4477 = vset.pattern.permute.xlu1 %v5103_v41 }
 0x4c7   :  { %1882 = vadd.xlane.f32.xlu0 %v1881_v14 }
 0x4ca   :  { %v6003_v25 = vpop.eup %4576 }
 0x4cb   :  { %9486 = vst [vmem:[#allocation142_spill] sm:$0xff] %v6003_v25  ;;  %v6011_v61 = vmul.f32 %v6003_v25, %v5975_v6 }
 0x4cd   :  { %9487 = vst [vmem:[#allocation143_spill] sm:$0xff] %v6011_v61  ;;  %4478 = vset.pattern.permute.xlu2 %v5113_v43  ;;  %v1890_v46 = vsel %vm77_vm0, %v6011_v61, 0.0 }
 0x4ce   :  { %1425 = vperm.xlu1 %4477, %v5308_v29  }
 0x4cf   :  { %v1347_v10 = vpop.permute.xlu2 %1346  ;;  %1891 = vadd.xlane.f32.xlu0 %v1890_v46 }
 0x4d0   :  { %v1559_v14 = vsub.f32 %v1103_v2, %v1347_v10 }
 0x4d2   :  { %v1657_v22 = vmul.f32 1.442695, %v1559_v14  ;;  %v1026_v14 = vsel %vm46_vm1, %v5487_v45, %v5519_v33 }
 0x4d3   :  { %v1106_v32 = vmul.f32 %v6013_v42, %v1026_v14 }
 0x4d4   :  { %4578 = vpow2.f32 %v1657_v22  ;;  %v6035_v22 = vpop.permute.xlu1 %1303 }
 0x4d5   :  { %1438 = vperm.xlu2 %4478, %v5329_v49  }
 0x4d6   :  { %4479 = vset.pattern.permute.xlu1 %v5065_v21 }
 0x4da   :  { %v6025_v19 = vpop.eup %4578 }
 0x4db   :  { %9488 = vst [vmem:[#allocation144_spill] sm:$0xff] %v6025_v19  ;;  %v6029_v29 = vmul.f32 %v6025_v19, %v6023_v26 }
 0x4dc   :  { %v6039_v2 = vpop.permute.xlu1 %1321 }
 0x4dd   :  { %9489 = vst [vmem:[#allocation145_spill] sm:$0xff] %v6029_v29  ;;  %4480 = vset.pattern.permute.xlu2 %v5086_v37  ;;  %v1899_v12 = vsel %vm77_vm0, %v6029_v29, 0.0 }
 0x4de   :  { %1900 = vadd.xlane.f32.xlu0 %v1899_v12  ;;  %1444 = vperm.xlu1 %4479, %v5329_v49  }
 0x4df   :  { %v6056_v12 = vpop.permute.xlu2 %1358 }
 0x4e4   :  { %v6043_v46 = vpop.permute.xlu1 %1334 }
 0x4e5   :  { %1450 = vperm.xlu2 %4480, %v5329_v49  }
 0x4e6   :  { %4481 = vset.pattern.permute.xlu1 %v5096_v40 }
 0x4ed   :  { %4483 = vset.pattern.permute.xlu2 %v5127_v47 }
 0x4ee   :  { %1456 = vperm.xlu1 %4481, %v5329_v49  }
 0x4ef   :  { %v6061_v63 = vpop.permute.xlu2 %1376 }
 0x4f0   :  { %v6047_v10 = vpop.permute.xlu1 %1352 }
 0x4f5   :  { %1468 = vperm.xlu2 %4483, %v5329_v49  }
 0x4f6   :  { %4484 = vset.pattern.permute.xlu1 %v5103_v41  ;;  %v183_v41 = vrot.slane %v5756_v24, 5 }
 0x4f8   :  { %v6069_v33 = vperm.slane %v183_v41, 0 }
 0x4fd   :  { %4485 = vset.pattern.permute.xlu2 %v5044_v1 }
 0x4fe   :  { %1474 = vperm.xlu1 %4484, %v5329_v49   ;;  %v1032_v49 = vsel %vm46_vm1, %v5489_v62, %v5703_v5 }
 0x4ff   :  { %v6085_v5 = vpop.permute.xlu2 %1389 }
 0x500   :  { %v1365_v21 = vpop.permute.xlu1 %1364 }
 0x501   :  { %v1562_v19 = vsub.f32 %v1106_v32, %v1365_v21  ;;  %v1029_v21 = vsel %vm46_vm1, %v5483_v28, %v5695_v59 }
 0x502   :  { %v1109_v41 = vmul.f32 %v6069_v33, %v1029_v21 }
 0x503   :  { %v1663_v25 = vmul.f32 1.442695, %v1562_v19  ;;  %v1112_v19 = vmul.f32 %v6069_v33, %v1032_v49  ;;  %v200_v49 = vrot.slane %v5779_v60, 5 }
 0x505   :  { %4580 = vpow2.f32 %v1663_v25  ;;  %1481 = vperm.xlu2 %4485, %v5347_v51   ;;  %v1568_v59 = vsub.f32 %v1112_v19, %v5715_v48  ;;  %v6093_v21 = vperm.slane %v200_v49, 0  ;;  %v1035_v48 = vsel %vm46_vm1, %v5669_v16, %v5699_v23 }
 0x506   :  { %4486 = vset.pattern.permute.xlu1 %v5113_v43 }
 0x50b   :  { %v6067_v45 = vpop.eup %4580 }
 0x50c   :  { %9490 = vst [vmem:[#allocation146_spill] sm:$0xff] %v6067_v45  ;;  %v6077_v25 = vmul.f32 %v6067_v45, %v6023_v26  ;;  %v1675_v45 = vmul.f32 1.442695, %v1568_v59 }
 0x50d   :  { %4488 = vset.pattern.permute.xlu2 %v5086_v37 }
 0x50e   :  { %9491 = vst [vmem:[#allocation147_spill] sm:$0xff] %v6077_v25  ;;  %1487 = vperm.xlu1 %4486, %v5347_v51   ;;  %v1908_v62 = vsel %vm77_vm0, %v6077_v25, 0.0 }
 0x50f   :  { %1909 = vadd.xlane.f32.xlu0 %v1908_v62  ;;  %v6091_v37 = vpop.permute.xlu2 %1407  ;;  %v1115_v62 = vmul.f32 %v6069_v33, %v1035_v48  ;;  %v1038_v48 = vsel %vm46_vm1, %v5525_v38, %v5705_v0  ;;  %v989_v38 = vsel %vm46_vm1, %v5374_v53, %v5573_v11  ;;  %v201_v0 = vrot.slane %v5779_v60, 6 }
 0x510   :  { %v1384_v14 = vpop.permute.xlu1 %1383 }
 0x511   :  { %v1565_v28 = vsub.f32 %v1109_v41, %v1384_v14 }
 0x513   :  { %v1669_v32 = vmul.f32 1.442695, %v1565_v28 }
 0x515   :  { %4582 = vpow2.f32 %v1669_v32  ;;  %1499 = vperm.xlu2 %4488, %v5347_v51   ;;  %v184_v32 = vrot.slane %v5756_v24, 6 }
 0x516   :  { %4489 = vset.pattern.permute.xlu1 %v5096_v40  ;;  %4584 = vpow2.f32 %v1675_v45  ;;  %v9505_v40 = vld [vmem:[#allocation63_spill] sm:$0xff] }
 0x51b   :  { %v6095_v25 = vpop.eup %4582 }
 0x51c   :  { %9492 = vst [vmem:[#allocation148_spill] sm:$0xff] %v6095_v25  ;;  %v6103_v19 = vmul.f32 %v6095_v25, %v6093_v21  ;;  %v6110_v41 = vpop.eup %4584 }
 0x51d   :  { %4490 = vset.pattern.permute.xlu2 %v5093_v39  ;;  %9494 = vst [vmem:[#allocation150_spill] sm:$0xff] %v6110_v41  ;;  %v6114_v16 = vmul.f32 %v6110_v41, %v6093_v21  ;;  %v9506_v39 = vld [vmem:[#allocation19_spill] sm:$0xff] }
 0x51e   :  { %9493 = vst [vmem:[#allocation149_spill] sm:$0xff] %v6103_v19  ;;  %1505 = vperm.xlu1 %4489, %v5347_v51   ;;  %v1917_v45 = vsel %vm77_vm0, %v6103_v19, 0.0  ;;  %v9529_v19 = vld [vmem:[#allocation23_spill] sm:$0xff] }
 0x51f   :  { %v1420_v14 = vpop.permute.xlu2 %1419  ;;  %1918 = vadd.xlane.f32.xlu0 %v1917_v45  ;;  %9495 = vst [vmem:[#allocation151_spill] sm:$0xff] %v6114_v16  ;;  %v1926_v23 = vsel %vm77_vm0, %v6114_v16, 0.0  ;;  %v6131_v45 = vperm.slane %v184_v32, 0  ;;  %v1069_v32 = vmul.f32 %v5765_v17, %v989_v38  ;;  %v9528_v16 = vld [vmem:[#allocation61_spill] sm:$0xff] }
 0x520   :  { %v1571_v59 = vsub.f32 %v1115_v62, %v1420_v14 }
 0x521   :  { %v1118_v14 = vmul.f32 %v6131_v45, %v1038_v48  ;;  %v6146_v48 = vperm.slane %v201_v0, 0  ;;  %v9502_v0 = vld [vmem:[#allocation98_spill] sm:$0xff] }
 0x522   :  { %v1681_v28 = vmul.f32 1.442695, %v1571_v59 }
 0x524   :  { %4586 = vpow2.f32 %v1681_v28 }
 0x525   :  { %1511 = vperm.xlu2 %4490, %v5347_v51  }
 0x526   :  { %4491 = vset.pattern.permute.xlu1 %v5127_v47 }
 0x527   :  { %1927 = vadd.xlane.f32.xlu0 %v1926_v23 }
 0x52a   :  { %v6121_v49 = vpop.eup %4586 }
 0x52b   :  { %9496 = vst [vmem:[#allocation152_spill] sm:$0xff] %v6121_v49  ;;  %v6129_v62 = vmul.f32 %v6121_v49, %v6093_v21  ;;  %v9512_v49 = vld [vmem:[#allocation65_spill] sm:$0xff] }
 0x52d   :  { %9497 = vst [vmem:[#allocation153_spill] sm:$0xff] %v6129_v62  ;;  %4493 = vset.pattern.permute.xlu2 %v5044_v1  ;;  %v1935_v59 = vsel %vm77_vm0, %v6129_v62, 0.0  ;;  %v6169_v1 = vpop.permute.xlu0 %551 }
 0x52e   :  { %1517 = vperm.xlu1 %4491, %v5347_v51   ;;  %v1525_v51 = vsub.f32 %v1069_v32, %v5751_v34  ;;  %v6167_v32 = vpop.permute.xlu1 %1395 }
 0x52f   :  { %v1439_v28 = vpop.permute.xlu2 %1438  ;;  %1936 = vadd.xlane.f32.xlu0 %v1935_v59 }
 0x530   :  { %v1574_v23 = vsub.f32 %v1118_v14, %v1439_v28  ;;  %v992_v14 = vsel %vm46_vm1, %v5379_v54, %v5579_v9  ;;  %v1589_v11 = vmul.f32 1.442695, %v1525_v51  ;;  %v9500_v28 = vld [vmem:[#allocation60_spill] sm:$0xff] }
 0x531   :  { %v1072_v53 = vmul.f32 %v5765_v17, %v992_v14  ;;  %v9503_v14 = vld [vmem:[#allocation68_spill] sm:$0xff] }
 0x532   :  { %v1687_v47 = vmul.f32 1.442695, %v1574_v23  ;;  %v9501_v23 = vld [vmem:[#allocation79_spill] sm:$0xff] }
 0x533   :  { %v990_v34 = vsel %vm46_vm1, %v9501_v23, %v9500_v28  ;;  %v1528_v54 = vsub.f32 %v1072_v53, %v9502_v0  ;;  %v993_v53 = vsel %vm46_vm1, %v9506_v39, %v9505_v40  ;;  %v9510_v39 = vld [vmem:[#allocation71_spill] sm:$0xff]  ;;  %v9511_v40 = vld [vmem:[#allocation18_spill] sm:$0xff] }
 0x534   :  { %4588 = vpow2.f32 %v1687_v47  ;;  %v1070_v9 = vmul.f32 %v5765_v17, %v990_v34  ;;  %v1073_v0 = vmul.f32 %v5765_v17, %v993_v53  ;;  %v9513_v53 = vld [vmem:[#allocation86_spill] sm:$0xff] }
 0x535   :  { %4590 = vpow2.f32 %v1589_v11  ;;  %v1595_v23 = vmul.f32 1.442695, %v1528_v54  ;;  %v9509_v54 = vld [vmem:[#allocation121_spill] sm:$0xff] }
 0x536   :  { %4494 = vset.pattern.permute.xlu1 %v5113_v43  ;;  %v1526_v51 = vsub.f32 %v1070_v9, %v5798_v58  ;;  %v9504_v43 = vld [vmem:[#allocation17_spill] sm:$0xff]  ;;  %v6185_v9 = vpop.permute.xlu1 %1413 }
 0x537   :  { %v994_v28 = vsel %vm46_vm1, %v9504_v43, %v9503_v14  ;;  %4592 = vpow2.f32 %v1595_v23  ;;  %v1529_v14 = vsub.f32 %v1073_v0, %v9509_v54 }
 0x538   :  { %v1074_v11 = vmul.f32 %v5765_v17, %v994_v28  ;;  %v1591_v34 = vmul.f32 1.442695, %v1526_v51  ;;  %v997_v28 = vsel %vm46_vm1, %v9511_v40, %v9510_v39  ;;  %v1188_v51 = vpop.permute.xlu0 %1187 }
 0x539   :  { %v1597_v0 = vmul.f32 1.442695, %v1529_v14 }
 0x53a   :  { %v6152_v59 = vpop.eup %4588  ;;  %v1530_v58 = vsub.f32 %v1074_v11, %v5806_v18  ;;  %4594 = vpow2.f32 %v1591_v34  ;;  %v995_v18 = vsel %vm46_vm1, %v9513_v53, %v9512_v49  ;;  %v1077_v34 = vmul.f32 %v5832_v15, %v997_v28  ;;  %v9516_v53 = vld [vmem:[#allocation122_spill] sm:$0xff] }
 0x53b   :  { %9498 = vst [vmem:[#allocation154_spill] sm:$0xff] %v6152_v59  ;;  %v6156_v47 = vmul.f32 %v6152_v59, %v6146_v48  ;;  %v9508_v59 = vld [vmem:[#allocation116_spill] sm:$0xff]  ;;  %v1075_v39 = vmul.f32 %v5765_v17, %v995_v18 }
 0x53c   :  { %v1599_v23 = vmul.f32 1.442695, %v1530_v58  ;;  %v1533_v40 = vsub.f32 %v1077_v34, %v1188_v51  ;;  %v9519_v51 = vld [vmem:[#allocation67_spill] sm:$0xff] }
 0x53d   :  { %9499 = vst [vmem:[#allocation155_spill] sm:$0xff] %v6156_v47  ;;  %v1944_v38 = vsel %vm77_vm0, %v6156_v47, 0.0  ;;  %v1531_v25 = vsub.f32 %v1075_v39, %v9516_v53  ;;  %v9518_v47 = vld [vmem:[#allocation94_spill] sm:$0xff] }
 0x53e   :  { %1945 = vadd.xlane.f32.xlu0 %v1944_v38  ;;  %v6180_v38 = vpop.eup %4590  ;;  %4596 = vpow2.f32 %v1599_v23  ;;  %v1605_v17 = vmul.f32 1.442695, %v1533_v40  ;;  %v9520_v23 = vld [vmem:[#allocation21_spill] sm:$0xff] }
 0x53f   :  { %9507 = vst [vmem:[#allocation60_spill] sm:$0xff] %v6180_v38  ;;  %v6189_v43 = vmul.f32 %v6180_v38, %v9508_v59  ;;  %v6202_v41 = vpop.eup %4592  ;;  %4598 = vpow2.f32 %v1597_v0  ;;  %v9517_v38 = vld [vmem:[#allocation70_spill] sm:$0xff]  ;;  %v998_v18 = vsel %vm46_vm1, %v9520_v23, %v9519_v51 }
 0x540   :  { %9514 = vst [vmem:[#allocation79_spill] sm:$0xff] %v6202_v41  ;;  %v6205_v54 = vpop.eup %4594  ;;  %v6208_v58 = vpop.permute.xlu1 %1425  ;;  %v6212_v49 = vmul.f32 %v6202_v41, %v9508_v59  ;;  %v1000_v14 = vsel %vm46_vm1, %v9518_v47, %v9517_v38  ;;  %v1601_v47 = vmul.f32 1.442695, %v1531_v25  ;;  %v1078_v53 = vmul.f32 %v5832_v15, %v998_v18  ;;  %v9523_v25 = vld [vmem:[#allocation123_spill] sm:$0xff]  ;;  %v9525_v41 = vld [vmem:[#allocation25_spill] sm:$0xff] }
 0x541   :  { %v1797_v11 = vsel %vm77_vm0, %v6189_v43, 0.0  ;;  %9515 = vst [vmem:[#allocation98_spill] sm:$0xff] %v6205_v54  ;;  %v6221_v28 = vmul.f32 %v6205_v54, %v9508_v59  ;;  %v1080_v0 = vmul.f32 %v5832_v15, %v1000_v14  ;;  %v6232_v39 = vpop.permute.xlu0 %1432  ;;  %4600 = vpow2.f32 %v1605_v17  ;;  %v9524_v54 = vld [vmem:[#allocation72_spill] sm:$0xff]  ;;  %v9527_v18 = vld [vmem:[#allocation51_spill] sm:$0xff] }
 0x542   :  { %4602 = vpow2.f32 %v1601_v47  ;;  %v1003_v62 = vsel %vm46_vm1, %v9525_v41, %v9524_v54  ;;  %v1001_v47 = vsel %vm46_vm1, %v9529_v19, %v9528_v16 }
 0x543   :  { %v1800_v38 = vsel %vm77_vm0, %v6221_v28, 0.0  ;;  %v1536_v51 = vsub.f32 %v1080_v0, %v5848_v8  ;;  %v9526_v8 = vld [vmem:[#allocation64_spill] sm:$0xff]  ;;  %v1083_v41 = vmul.f32 %v5832_v15, %v1003_v62  ;;  %v1081_v19 = vmul.f32 %v5832_v15, %v1001_v47  ;;  %v9536_v47 = vld [vmem:[#allocation75_spill] sm:$0xff] }
 0x544   :  { %v6229_v34 = vpop.eup %4596  ;;  %v1041_v0 = vsel %vm46_vm1, %v9527_v18, %v9526_v8  ;;  %v6271_v8 = vpop.permute.xlu2 %1450 }
 0x545   :  { %9521 = vst [vmem:[#allocation68_spill] sm:$0xff] %v6229_v34  ;;  %v6236_v40 = vpop.eup %4598  ;;  %v6244_v14 = vmul.f32 %v6229_v34, %v9508_v59  ;;  %v1121_v29 = vmul.f32 %v6131_v45, %v1041_v0  ;;  %v1539_v16 = vsub.f32 %v1083_v41, %v5856_v52  ;;  %v1537_v0 = vsub.f32 %v1081_v19, %v5917_v44 }
 0x546   :  { %9522 = vst [vmem:[#allocation17_spill] sm:$0xff] %v6236_v40  ;;  %v6253_v17 = vmul.f32 %v6236_v40, %v9508_v59 }
 0x547   :  { %v1617_v52 = vmul.f32 1.442695, %v1539_v16 }
 0x549   :  { %v6268_v40 = vpop.xlane.xlu0 %1804 }
 0x54a   :  { %9531 = vst [vmem:[#allocation19_spill] sm:$0xff] %v6268_v40  ;;  %v9535_v40 = vld [vmem:[#allocation27_spill] sm:$0xff] }
 0x54e   :  { %1798 = vadd.xlane.f32.xlu2 %v1797_v11  ;;  %v1806_v11 = vsel %vm77_vm0, %v6212_v49, 0.0 }
 0x54f   :  { %v6304_v19 = vpop.permute.xlu2 %1468 }
 0x550   :  { %v6240_v23 = vpop.permute.xlu1 %1444 }
 0x556   :  { %1807 = vadd.xlane.f32.xlu2 %v1806_v11  ;;  %v1534_v11 = vsub.f32 %v1078_v53, %v9523_v25  ;;  %v1812_v53 = vsel %vm77_vm0, %v6244_v14, 0.0  ;;  %v6265_v25 = vpop.eup %4600 }
 0x557   :  { %9530 = vst [vmem:[#allocation63_spill] sm:$0xff] %v6265_v25  ;;  %v6275_v18 = vpop.eup %4602 }
 0x558   :  { %1801 = vadd.xlane.f32.xlu1 %v1800_v38  ;;  %v1611_v38 = vmul.f32 1.442695, %v1536_v51  ;;  %v1607_v54 = vmul.f32 1.442695, %v1534_v11  ;;  %v1809_v51 = vsel %vm77_vm0, %v6253_v17, 0.0  ;;  %9532 = vst [vmem:[#allocation116_spill] sm:$0xff] %v6275_v18  ;;  %v6281_v11 = vmul.f32 %v6265_v25, %v5859_v7 }
 0x55a   :  { %4604 = vpow2.f32 %v1611_v38  ;;  %9533 = vst [vmem:[#allocation121_spill] sm:$0xff] %v6281_v11  ;;  %v6290_v38 = vmul.f32 %v6275_v18, %v9508_v59  ;;  %v1821_v44 = vsel %vm77_vm0, %v6281_v11, 0.0  ;;  %v185_v59 = vrot.slane %v5756_v24, 7  ;;  %v9558_v11 = vld [vmem:[#allocation76_spill] sm:$0xff] }
 0x55b   :  { %4606 = vpow2.f32 %v1607_v54 }
 0x55c   :  { %v1815_v16 = vsel %vm77_vm0, %v6290_v38, 0.0 }
 0x55e   :  { %1813 = vadd.xlane.f32.xlu2 %v1812_v53  ;;  %v9534_v53 = vld [vmem:[#allocation66_spill] sm:$0xff] }
 0x55f   :  { %v1006_v61 = vsel %vm46_vm1, %v9535_v40, %v9534_v53  ;;  %v1613_v40 = vmul.f32 1.442695, %v1537_v0  ;;  %v9542_v0 = vld [vmem:[#allocation111_spill] sm:$0xff] }
 0x560   :  { %v1457_v34 = vpop.permute.xlu1 %1456  ;;  %1810 = vadd.xlane.f32.xlu1 %v1809_v51  ;;  %v6298_v41 = vpop.eup %4604  ;;  %v1086_v54 = vmul.f32 %v5866_v31, %v1006_v61 }
 0x561   :  { %v1577_v62 = vsub.f32 %v1121_v29, %v1457_v34  ;;  %v9537_v29 = vld [vmem:[#allocation20_spill] sm:$0xff]  ;;  %9538 = vst [vmem:[#allocation71_spill] sm:$0xff] %v6298_v41  ;;  %v6301_v51 = vpop.xlane.xlu0 %1819  ;;  %v6314_v61 = vmul.f32 %v6298_v41, %v5859_v7 }
 0x562   :  { %v1004_v34 = vsel %vm46_vm1, %v9537_v29, %v9536_v47  ;;  %9539 = vst [vmem:[#allocation18_spill] sm:$0xff] %v6301_v51  ;;  %v1542_v53 = vsub.f32 %v1086_v54, %v5925_v36  ;;  %v9543_v47 = vld [vmem:[#allocation52_spill] sm:$0xff]  ;;  %v6323_v51 = vperm.slane %v185_v59, 0 }
 0x563   :  { %v1693_v4 = vmul.f32 1.442695, %v1577_v62  ;;  %v6308_v62 = vpop.eup %4606  ;;  %9541 = vst [vmem:[#allocation86_spill] sm:$0xff] %v6314_v61  ;;  %v1047_v24 = vsel %vm46_vm1, %v9543_v47, %v9542_v0  ;;  %v9548_v54 = vld [vmem:[#allocation24_spill] sm:$0xff] }
 0x564   :  { %9540 = vst [vmem:[#allocation65_spill] sm:$0xff] %v6308_v62  ;;  %v6335_v0 = vmul.f32 %v6308_v62, %v5859_v7 }
 0x565   :  { %4608 = vpow2.f32 %v1693_v4  ;;  %v1084_v4 = vmul.f32 %v5832_v15, %v1004_v34  ;;  %v9545_v15 = vld [vmem:[#allocation77_spill] sm:$0xff]  ;;  %v9547_v34 = vld [vmem:[#allocation80_spill] sm:$0xff] }
 0x566   :  { %1822 = vadd.xlane.f32.xlu2 %v1821_v44  ;;  %4610 = vpow2.f32 %v1617_v52  ;;  %v9546_v52 = vld [vmem:[#allocation22_spill] sm:$0xff] }
 0x567   :  { %4612 = vpow2.f32 %v1613_v40  ;;  %v1540_v29 = vsub.f32 %v1084_v4, %v5921_v55  ;;  %v1007_v36 = vsel %vm46_vm1, %v9546_v52, %v9545_v15  ;;  %v9549_v40 = vld [vmem:[#allocation109_spill] sm:$0xff]  ;;  %v9550_v55 = vld [vmem:[#allocation50_spill] sm:$0xff]  ;;  %v1623_v4 = vmul.f32 1.442695, %v1542_v53 }
 0x568   :  { %1816 = vadd.xlane.f32.xlu1 %v1815_v16  ;;  %v1009_v16 = vsel %vm46_vm1, %v9548_v54, %v9547_v34  ;;  %v1044_v59 = vsel %vm46_vm1, %v9550_v55, %v9549_v40  ;;  %v1127_v15 = vmul.f32 %v6323_v51, %v1047_v24  ;;  %v1830_v52 = vsel %vm77_vm0, %v6314_v61, 0.0  ;;  %v6357_v55 = vpop.permute.xlu2 %1481 }
 0x569   :  { %v1087_v54 = vmul.f32 %v5866_v31, %v1007_v36  ;;  %v1089_v62 = vmul.f32 %v5866_v31, %v1009_v16  ;;  %v1619_v18 = vmul.f32 1.442695, %v1540_v29  ;;  %v6352_v41 = vpop.xlane.xlu0 %1828  ;;  %v1124_v40 = vmul.f32 %v6131_v45, %v1044_v59  ;;  %v9554_v16 = vld [vmem:[#allocation82_spill] sm:$0xff] }
 0x56a   :  { %9552 = vst [vmem:[#allocation94_spill] sm:$0xff] %v6352_v41  ;;  %v1824_v24 = vsel %vm77_vm0, %v6335_v0, 0.0  ;;  %4614 = vpow2.f32 %v1623_v4 }
 0x56b   :  { %v6321_v44 = vpop.eup %4608  ;;  %v1545_v36 = vsub.f32 %v1089_v62, %v5929_v57  ;;  %v1543_v61 = vsub.f32 %v1087_v54, %v9557_v27  ;;  %4616 = vpow2.f32 %v1619_v18 }
 0x56c   :  { %9544 = vst [vmem:[#allocation122_spill] sm:$0xff] %v6321_v44  ;;  %v6343_v47 = vmul.f32 %v6321_v44, %v6146_v48  ;;  %v6348_v34 = vpop.eup %4610 }
 0x56d   :  { %v6361_v44 = vpop.eup %4612 }
 0x56e   :  { %9551 = vst [vmem:[#allocation70_spill] sm:$0xff] %v6343_v47  ;;  %1831 = vadd.xlane.f32.xlu2 %v1830_v52  ;;  %v1953_v53 = vsel %vm77_vm0, %v6343_v47, 0.0  ;;  %v9555_v52 = vld [vmem:[#allocation26_spill] sm:$0xff]  ;;  %v9556_v47 = vld [vmem:[#allocation120_spill] sm:$0xff]  ;;  %v6376_v57 = vmul.f32 %v6361_v44, %v5859_v7 }
 0x56f   :  { %1954 = vadd.xlane.f32.xlu0 %v1953_v53  ;;  %9553 = vst [vmem:[#allocation67_spill] sm:$0xff] %v6361_v44  ;;  %v1012_v41 = vsel %vm46_vm1, %v9555_v52, %v9554_v16  ;;  %v1583_v59 = vsub.f32 %v1127_v15, %v9556_v47  ;;  %v6371_v53 = vmul.f32 %v6348_v34, %v5859_v7  ;;  %v9559_v16 = vld [vmem:[#allocation103_spill] sm:$0xff] }
 0x570   :  { %v1475_v29 = vpop.permute.xlu1 %1474  ;;  %1825 = vadd.xlane.f32.xlu1 %v1824_v24  ;;  %v1092_v62 = vmul.f32 %v5866_v31, %v1012_v41  ;;  %v1629_v24 = vmul.f32 1.442695, %v1545_v36  ;;  %v1010_v47 = vsel %vm46_vm1, %v9559_v16, %v9558_v11  ;;  %v6385_v27 = vpop.eup %4614  ;;  %v1833_v41 = vsel %vm77_vm0, %v6376_v57, 0.0  ;;  %v9561_v36 = vld [vmem:[#allocation124_spill] sm:$0xff] }
 0x571   :  { %v1580_v25 = vsub.f32 %v1124_v40, %v1475_v29  ;;  %v1705_v15 = vmul.f32 1.442695, %v1583_v59  ;;  %v1839_v40 = vsel %vm77_vm0, %v6371_v53, 0.0  ;;  %v6387_v18 = vpop.permute.xlu2 %1499  ;;  %v6391_v54 = vpop.eup %4616  ;;  %v1090_v11 = vmul.f32 %v5866_v31, %v1010_v47  ;;  %v9567_v47 = vld [vmem:[#allocation106_spill] sm:$0xff] }
 0x572   :  { %9560 = vst [vmem:[#allocation21_spill] sm:$0xff] %v6391_v54  ;;  %v1548_v29 = vsub.f32 %v1092_v62, %v9561_v36  ;;  %v6395_v52 = vpop.xlane.xlu0 %1837  ;;  %v202_v16 = vrot.slane %v5779_v60, 7  ;;  %v9565_v62 = vld [vmem:[#allocation114_spill] sm:$0xff]  ;;  %v9570_v36 = vld [vmem:[#allocation29_spill] sm:$0xff] }
 0x573   :  { %v1699_v4 = vmul.f32 1.442695, %v1580_v25  ;;  %v1625_v25 = vmul.f32 1.442695, %v1543_v61  ;;  %9562 = vst [vmem:[#allocation123_spill] sm:$0xff] %v6395_v52  ;;  %v6399_v61 = vmul.f32 %v6385_v27, %v5888_v56  ;;  %v1546_v59 = vsub.f32 %v1090_v11, %v5938_v13  ;;  %v9569_v60 = vld [vmem:[#allocation78_spill] sm:$0xff] }
 0x574   :  { %v1013_v11 = vsel %vm46_vm1, %v9570_v36, %v9569_v60 }
 0x575   :  { %4618 = vpow2.f32 %v1699_v4 }
 0x576   :  { %1840 = vadd.xlane.f32.xlu2 %v1839_v40  ;;  %4620 = vpow2.f32 %v1629_v24  ;;  %v9564_v40 = vld [vmem:[#allocation81_spill] sm:$0xff]  ;;  %v9566_v24 = vld [vmem:[#allocation110_spill] sm:$0xff] }
 0x577   :  { %4622 = vpow2.f32 %v1705_v15  ;;  %v1015_v31 = vsel %vm46_vm1, %v9565_v62, %v9564_v40  ;;  %v1050_v15 = vsel %vm46_vm1, %v9567_v47, %v9566_v24  ;;  %v1848_v40 = vsel %vm77_vm0, %v6399_v61, 0.0 }
 0x578   :  { %1834 = vadd.xlane.f32.xlu1 %v1833_v41  ;;  %4624 = vpow2.f32 %v1625_v25  ;;  %v6415_v41 = vmul.f32 %v6391_v54, %v5859_v7  ;;  %v1635_v25 = vmul.f32 1.442695, %v1548_v29  ;;  %v1095_v24 = vmul.f32 %v5951_v35, %v1015_v31 }
 0x579   :  { %v1130_v7 = vmul.f32 %v6323_v51, %v1050_v15  ;;  %v1631_v47 = vmul.f32 1.442695, %v1546_v59  ;;  %v1093_v31 = vmul.f32 %v5951_v35, %v1013_v11  ;;  %v9575_v11 = vld [vmem:[#allocation35_spill] sm:$0xff] }
 0x57a   :  { %v1842_v60 = vsel %vm77_vm0, %v6415_v41, 0.0  ;;  %4626 = vpow2.f32 %v1635_v25  ;;  %v1551_v59 = vsub.f32 %v1095_v24, %v5967_v20  ;;  %v9574_v25 = vld [vmem:[#allocation84_spill] sm:$0xff] }
 0x57b   :  { %v6402_v4 = vpop.eup %4618  ;;  %4628 = vpow2.f32 %v1631_v47  ;;  %v1018_v20 = vsel %vm46_vm1, %v9575_v11, %v9574_v25 }
 0x57c   :  { %9563 = vst [vmem:[#allocation72_spill] sm:$0xff] %v6402_v4  ;;  %v6419_v13 = vmul.f32 %v6402_v4, %v6146_v48  ;;  %v6427_v62 = vpop.eup %4620  ;;  %v6435_v4 = vperm.slane %v202_v16, 0  ;;  %v1549_v16 = vsub.f32 %v1093_v31, %v5943_v50  ;;  %v1641_v24 = vmul.f32 1.442695, %v1551_v59  ;;  %v9577_v50 = vld [vmem:[#allocation31_spill] sm:$0xff] }
 0x57d   :  { %v6433_v52 = vpop.eup %4622 }
 0x57e   :  { %9568 = vst [vmem:[#allocation25_spill] sm:$0xff] %v6419_v13  ;;  %1849 = vadd.xlane.f32.xlu2 %v1848_v40  ;;  %v1962_v29 = vsel %vm77_vm0, %v6419_v13, 0.0  ;;  %v6439_v36 = vpop.eup %4624  ;;  %v6445_v40 = vmul.f32 %v6427_v62, %v5888_v56  ;;  %v6452_v13 = vmul.f32 %v6433_v52, %v6435_v4 }
 0x57f   :  { %9571 = vst [vmem:[#allocation64_spill] sm:$0xff] %v6433_v52  ;;  %v1512_v54 = vpop.permute.xlu2 %1511  ;;  %1963 = vadd.xlane.f32.xlu0 %v1962_v29  ;;  %v6448_v29 = vpop.xlane.xlu0 %1846  ;;  %v9582_v52 = vld [vmem:[#allocation37_spill] sm:$0xff] }
 0x580   :  { %9572 = vst [vmem:[#allocation51_spill] sm:$0xff] %v6439_v36  ;;  %v1586_v15 = vsub.f32 %v1130_v7, %v1512_v54  ;;  %1843 = vadd.xlane.f32.xlu1 %v1842_v60  ;;  %v6460_v54 = vmul.f32 %v6439_v36, %v5888_v56  ;;  %v9576_v7 = vld [vmem:[#allocation42_spill] sm:$0xff]  ;;  %v1857_v60 = vsel %vm77_vm0, %v6445_v40, 0.0  ;;  %v6468_v31 = vpop.eup %4626  ;;  %v1971_v25 = vsel %vm77_vm0, %v6452_v13, 0.0 }
 0x581   :  { %9573 = vst [vmem:[#allocation61_spill] sm:$0xff] %v6448_v29  ;;  %v1016_v47 = vsel %vm46_vm1, %v9577_v50, %v9576_v7  ;;  %v1637_v29 = vmul.f32 1.442695, %v1549_v16  ;;  %v6475_v59 = vpop.eup %4628 }
 0x582   :  { %v1711_v44 = vmul.f32 1.442695, %v1586_v15  ;;  %v1098_v15 = vmul.f32 %v5951_v35, %v1018_v20  ;;  %9578 = vst [vmem:[#allocation23_spill] sm:$0xff] %v6475_v59  ;;  %v1096_v11 = vmul.f32 %v5951_v35, %v1016_v47  ;;  %v6481_v20 = vmul.f32 %v6468_v31, %v5888_v56 }
 0x584   :  { %4630 = vpow2.f32 %v1711_v44  ;;  %v1851_v44 = vsel %vm77_vm0, %v6460_v54, 0.0  ;;  %v1554_v7 = vsub.f32 %v1098_v15, %v5973_v30  ;;  %v1552_v50 = vsub.f32 %v1096_v11, %v6035_v22 }
 0x585   :  { %4632 = vpow2.f32 %v1641_v24  ;;  %v6498_v24 = vmul.f32 %v6475_v59, %v5888_v56  ;;  %v1866_v11 = vsel %vm77_vm0, %v6481_v20, 0.0  ;;  %v9589_v59 = vld [vmem:[#allocation34_spill] sm:$0xff] }
 0x586   :  { %1858 = vadd.xlane.f32.xlu2 %v1857_v60  ;;  %4634 = vpow2.f32 %v1637_v29  ;;  %v1647_v15 = vmul.f32 1.442695, %v1554_v7  ;;  %v9585_v29 = vld [vmem:[#allocation32_spill] sm:$0xff] }
 0x587   :  { %1972 = vadd.xlane.f32.xlu0 %v1971_v25  ;;  %v6486_v60 = vpop.xlane.xlu0 %1855  ;;  %v9581_v25 = vld [vmem:[#allocation45_spill] sm:$0xff]  ;;  %v1860_v56 = vsel %vm77_vm0, %v6498_v24, 0.0 }
 0x588   :  { %1852 = vadd.xlane.f32.xlu1 %v1851_v44  ;;  %9580 = vst [vmem:[#allocation27_spill] sm:$0xff] %v6486_v60  ;;  %v1021_v47 = vsel %vm46_vm1, %v9582_v52, %v9581_v25  ;;  %v9584_v44 = vld [vmem:[#allocation87_spill] sm:$0xff]  ;;  %v1643_v25 = vmul.f32 1.442695, %v1552_v50  ;;  %4636 = vpow2.f32 %v1647_v15 }
 0x589   :  { %v1019_v22 = vsel %vm46_vm1, %v9585_v29, %v9584_v44  ;;  %v1101_v52 = vmul.f32 %v6013_v42, %v1021_v47 }
 0x58a   :  { %v6483_v16 = vpop.eup %4630  ;;  %v1099_v44 = vmul.f32 %v5951_v35, %v1019_v22  ;;  %4638 = vpow2.f32 %v1643_v25  ;;  %v9591_v35 = vld [vmem:[#allocation36_spill] sm:$0xff] }
 0x58b   :  { %9579 = vst [vmem:[#allocation66_spill] sm:$0xff] %v6483_v16  ;;  %v6494_v30 = vmul.f32 %v6483_v16, %v6435_v4  ;;  %v6506_v60 = vpop.eup %4632  ;;  %v1557_v29 = vsub.f32 %v1101_v52, %v6043_v46 }
 0x58c   :  { %v6513_v7 = vpop.eup %4634  ;;  %v6519_v47 = vmul.f32 %v6506_v60, %v5975_v6  ;;  %v1555_v50 = vsub.f32 %v1099_v44, %v6039_v2 }
 0x58d   :  { %9583 = vst [vmem:[#allocation75_spill] sm:$0xff] %v6494_v30  ;;  %v1980_v16 = vsel %vm77_vm0, %v6494_v30, 0.0  ;;  %v9590_v30 = vld [vmem:[#allocation92_spill] sm:$0xff]  ;;  %v6534_v15 = vmul.f32 %v6513_v7, %v5975_v6  ;;  %v1653_v22 = vmul.f32 1.442695, %v1557_v29 }
 0x58e   :  { %1867 = vadd.xlane.f32.xlu2 %v1866_v11  ;;  %9586 = vst [vmem:[#allocation20_spill] sm:$0xff] %v6513_v7  ;;  %v1024_v46 = vsel %vm46_vm1, %v9591_v35, %v9590_v30  ;;  %v1875_v2 = vsel %vm77_vm0, %v6519_v47, 0.0  ;;  %v6538_v52 = vpop.eup %4636  ;;  %v9594_v35 = vld [vmem:[#allocation38_spill] sm:$0xff] }
 0x58f   :  { %1981 = vadd.xlane.f32.xlu0 %v1980_v16  ;;  %v6522_v11 = vpop.xlane.xlu0 %1864  ;;  %v9588_v16 = vld [vmem:[#allocation89_spill] sm:$0xff]  ;;  %v1869_v30 = vsel %vm77_vm0, %v6534_v15, 0.0  ;;  %4640 = vpow2.f32 %v1653_v22 }
 0x590   :  { %1861 = vadd.xlane.f32.xlu1 %v1860_v56  ;;  %9587 = vst [vmem:[#allocation111_spill] sm:$0xff] %v6522_v11  ;;  %v1022_v36 = vsel %vm46_vm1, %v9589_v59, %v9588_v16  ;;  %v1104_v56 = vmul.f32 %v6013_v42, %v1024_v46  ;;  %v1649_v59 = vmul.f32 1.442695, %v1555_v50  ;;  %v6545_v44 = vpop.eup %4638  ;;  %v9593_v16 = vld [vmem:[#allocation95_spill] sm:$0xff]  ;;  %v6554_v50 = vmul.f32 %v6538_v52, %v5975_v6  ;;  %v9595_v46 = vld [vmem:[#allocation85_spill] sm:$0xff]  ;;  %v9598_v11 = vld [vmem:[#allocation74_spill] sm:$0xff] }
 0x591   :  { %v1102_v25 = vmul.f32 %v6013_v42, %v1022_v36  ;;  %9592 = vst [vmem:[#allocation52_spill] sm:$0xff] %v6545_v44  ;;  %v1027_v36 = vsel %vm46_vm1, %v9594_v35, %v9593_v16  ;;  %v6561_v22 = vmul.f32 %v6545_v44, %v5975_v6 }
 0x592   :  { %v1560_v29 = vsub.f32 %v1104_v56, %v6047_v10  ;;  %4642 = vpow2.f32 %v1649_v59  ;;  %v1107_v10 = vmul.f32 %v6013_v42, %v1027_v36  ;;  %v1884_v35 = vsel %vm77_vm0, %v6554_v50, 0.0 }
 0x593   :  { %v1878_v59 = vsel %vm77_vm0, %v6561_v22, 0.0 }
 0x594   :  { %v1659_v56 = vmul.f32 1.442695, %v1560_v29  ;;  %v9600_v29 = vld [vmem:[#allocation91_spill] sm:$0xff] }
 0x595   :  { %v6570_v7 = vpop.eup %4640  ;;  %v1563_v36 = vsub.f32 %v1107_v10, %v9600_v29 }
 0x596   :  { %1876 = vadd.xlane.f32.xlu2 %v1875_v2  ;;  %4644 = vpow2.f32 %v1659_v56  ;;  %v9604_v56 = vld [vmem:[#allocation90_spill] sm:$0xff] }
 0x597   :  { %1989 = vadd.xlane.f32.xlu0 %v6189_v43  ;;  %v1558_v43 = vsub.f32 %v1102_v25, %v9595_v46  ;;  %v6557_v2 = vpop.xlane.xlu0 %1873  ;;  %v1665_v10 = vmul.f32 1.442695, %v1563_v36 }
 0x598   :  { %1870 = vadd.xlane.f32.xlu1 %v1869_v30  ;;  %9596 = vst [vmem:[#allocation77_spill] sm:$0xff] %v6557_v2  ;;  %v9597_v30 = vld [vmem:[#allocation88_spill] sm:$0xff]  ;;  %v6575_v46 = vpop.eup %4642 }
 0x599   :  { %v1025_v16 = vsel %vm46_vm1, %v9598_v11, %v9597_v30  ;;  %v1655_v25 = vmul.f32 1.442695, %v1558_v43  ;;  %9599 = vst [vmem:[#allocation22_spill] sm:$0xff] %v6575_v46  ;;  %v6581_v11 = vmul.f32 %v6570_v7, %v6023_v26  ;;  %v9601_v30 = vld [vmem:[#allocation93_spill] sm:$0xff]  ;;  %v6590_v44 = vmul.f32 %v6575_v46, %v5975_v6  ;;  %v9622_v46 = vld [vmem:[#allocation47_spill] sm:$0xff] }
 0x59a   :  { %v1105_v2 = vmul.f32 %v6013_v42, %v1025_v16 }
 0x59b   :  { %4646 = vpow2.f32 %v1655_v25  ;;  %v1887_v6 = vsel %vm77_vm0, %v6590_v44, 0.0 }
 0x59c   :  { %v1561_v43 = vsub.f32 %v1105_v2, %v6056_v12  ;;  %v1893_v12 = vsel %vm77_vm0, %v6581_v11, 0.0  ;;  %v6600_v2 = vpop.eup %4644  ;;  %4648 = vpow2.f32 %v1665_v10 }
 0x59e   :  { %1885 = vadd.xlane.f32.xlu2 %v1884_v35 }
 0x59f   :  { %1995 = vadd.xlane.f32.xlu0 %v6212_v49  ;;  %v9602_v49 = vld [vmem:[#allocation83_spill] sm:$0xff]  ;;  %v6592_v16 = vpop.xlane.xlu0 %1882 }
 0x5a0   :  { %1879 = vadd.xlane.f32.xlu1 %v1878_v59  ;;  %v1030_v35 = vsel %vm46_vm1, %v9602_v49, %v9601_v30  ;;  %9603 = vst [vmem:[#allocation80_spill] sm:$0xff] %v6592_v16  ;;  %v9605_v59 = vld [vmem:[#allocation40_spill] sm:$0xff]  ;;  %v1661_v30 = vmul.f32 1.442695, %v1561_v43 }
 0x5a1   :  { %v1028_v29 = vsel %vm46_vm1, %v9605_v59, %v9604_v56  ;;  %v1110_v25 = vmul.f32 %v6069_v33, %v1030_v35  ;;  %v6606_v36 = vpop.eup %4646  ;;  %v6612_v59 = vmul.f32 %v6600_v2, %v6023_v26  ;;  %v9607_v35 = vld [vmem:[#allocation96_spill] sm:$0xff] }
 0x5a2   :  { %9606 = vst [vmem:[#allocation24_spill] sm:$0xff] %v6606_v36  ;;  %v1108_v49 = vmul.f32 %v6013_v42, %v1028_v29  ;;  %4650 = vpow2.f32 %v1661_v30  ;;  %v6621_v10 = vmul.f32 %v6606_v36, %v6023_v26  ;;  %v9609_v29 = vld [vmem:[#allocation53_spill] sm:$0xff]  ;;  %v9621_v36 = vld [vmem:[#allocation104_spill] sm:$0xff] }
 0x5a3   :  { %v1566_v56 = vsub.f32 %v1110_v25, %v6085_v5  ;;  %v9610_v5 = vld [vmem:[#allocation43_spill] sm:$0xff]  ;;  %v1902_v30 = vsel %vm77_vm0, %v6612_v59, 0.0 }
 0x5a4   :  { %v1564_v43 = vsub.f32 %v1108_v49, %v6061_v63  ;;  %v1031_v25 = vsel %vm46_vm1, %v9610_v5, %v9609_v29  ;;  %v9613_v5 = vld [vmem:[#allocation58_spill] sm:$0xff] }
 0x5a5   :  { %v1671_v42 = vmul.f32 1.442695, %v1566_v56  ;;  %v1896_v56 = vsel %vm77_vm0, %v6621_v10, 0.0 }
 0x5a6   :  { %1894 = vadd.xlane.f32.xlu2 %v1893_v12  ;;  %v1667_v49 = vmul.f32 1.442695, %v1564_v43 }
 0x5a7   :  { %2001 = vadd.xlane.f32.xlu0 %v6290_v38  ;;  %v9608_v38 = vld [vmem:[#allocation46_spill] sm:$0xff]  ;;  %v6632_v16 = vpop.xlane.xlu0 %1891  ;;  %4652 = vpow2.f32 %v1671_v42 }
 0x5a8   :  { %1888 = vadd.xlane.f32.xlu1 %v1887_v6  ;;  %v1033_v12 = vsel %vm46_vm1, %v9608_v38, %v9607_v35  ;;  %v6629_v6 = vpop.eup %4648  ;;  %9611 = vst [vmem:[#allocation109_spill] sm:$0xff] %v6632_v16  ;;  %v1111_v38 = vmul.f32 %v6069_v33, %v1031_v25  ;;  %4654 = vpow2.f32 %v1667_v49  ;;  %v6650_v16 = vpop.permute.xlu1 %1487  ;;  %v9615_v25 = vld [vmem:[#allocation99_spill] sm:$0xff] }
 0x5a9   :  { %v1113_v63 = vmul.f32 %v6069_v33, %v1033_v12  ;;  %v6637_v35 = vpop.eup %4650  ;;  %v6643_v12 = vmul.f32 %v6629_v6, %v6023_v26 }
 0x5aa   :  { %9612 = vst [vmem:[#allocation50_spill] sm:$0xff] %v6637_v35  ;;  %v1567_v43 = vsub.f32 %v1111_v38, %v6167_v32  ;;  %v6654_v42 = vmul.f32 %v6637_v35, %v6023_v26 }
 0x5ab   :  { %v1569_v29 = vsub.f32 %v1113_v63, %v6091_v37  ;;  %v9616_v63 = vld [vmem:[#allocation41_spill] sm:$0xff]  ;;  %v1911_v32 = vsel %vm77_vm0, %v6643_v12, 0.0 }
 0x5ad   :  { %v1677_v37 = vmul.f32 1.442695, %v1569_v29  ;;  %v6662_v49 = vpop.eup %4652  ;;  %v1905_v29 = vsel %vm77_vm0, %v6654_v42, 0.0 }
 0x5ae   :  { %1903 = vadd.xlane.f32.xlu2 %v1902_v30  ;;  %v6670_v35 = vpop.eup %4654 }
 0x5af   :  { %2007 = vadd.xlane.f32.xlu0 %v6335_v0  ;;  %v9614_v0 = vld [vmem:[#allocation48_spill] sm:$0xff]  ;;  %9618 = vst [vmem:[#allocation26_spill] sm:$0xff] %v6670_v35  ;;  %4656 = vpow2.f32 %v1677_v37 }
 0x5b0   :  { %1897 = vadd.xlane.f32.xlu1 %v1896_v56  ;;  %v1036_v30 = vsel %vm46_vm1, %v9614_v0, %v9613_v5  ;;  %v1034_v56 = vsel %vm46_vm1, %v9616_v63, %v9615_v25  ;;  %v1673_v5 = vmul.f32 1.442695, %v1567_v43  ;;  %v6665_v0 = vpop.xlane.xlu0 %1900  ;;  %v6687_v37 = vpop.permute.xlu1 %1505 }
 0x5b1   :  { %v1116_v38 = vmul.f32 %v6069_v33, %v1036_v30  ;;  %9617 = vst [vmem:[#allocation82_spill] sm:$0xff] %v6665_v0  ;;  %v1114_v25 = vmul.f32 %v6069_v33, %v1034_v56  ;;  %v6676_v30 = vmul.f32 %v6662_v49, %v6093_v21  ;;  %v1039_v33 = vsel %vm46_vm1, %v9622_v46, %v9621_v36 }
 0x5b2   :  { %4658 = vpow2.f32 %v1673_v5 }
 0x5b3   :  { %v1572_v63 = vsub.f32 %v1116_v38, %v6208_v58  ;;  %v1570_v43 = vsub.f32 %v1114_v25, %v6185_v9  ;;  %v6691_v58 = vmul.f32 %v6670_v35, %v6023_v26  ;;  %v1920_v9 = vsel %vm77_vm0, %v6676_v30, 0.0 }
 0x5b5   :  { %v1683_v56 = vmul.f32 1.442695, %v1572_v63  ;;  %v6695_v38 = vpop.eup %4656  ;;  %v1679_v25 = vmul.f32 1.442695, %v1570_v43  ;;  %v1914_v26 = vsel %vm77_vm0, %v6691_v58, 0.0  ;;  %v9625_v63 = vld [vmem:[#allocation107_spill] sm:$0xff] }
 0x5b6   :  { %1912 = vadd.xlane.f32.xlu2 %v1911_v32  ;;  %v9619_v32 = vld [vmem:[#allocation101_spill] sm:$0xff] }
 0x5b7   :  { %2013 = vadd.xlane.f32.xlu0 %v6376_v57  ;;  %v9620_v57 = vld [vmem:[#allocation44_spill] sm:$0xff]  ;;  %4660 = vpow2.f32 %v1683_v56 }
 0x5b8   :  { %1906 = vadd.xlane.f32.xlu1 %v1905_v29  ;;  %v1037_v0 = vsel %vm46_vm1, %v9620_v57, %v9619_v32  ;;  %v1119_v29 = vmul.f32 %v6131_v45, %v1039_v33  ;;  %v6699_v32 = vpop.xlane.xlu0 %1909  ;;  %v6704_v46 = vpop.eup %4658  ;;  %v9626_v57 = vld [vmem:[#allocation49_spill] sm:$0xff]  ;;  %v6715_v33 = vmul.f32 %v6695_v38, %v6093_v21  ;;  %4662 = vpow2.f32 %v1679_v25 }
 0x5b9   :  { %v1117_v5 = vmul.f32 %v6131_v45, %v1037_v0  ;;  %9623 = vst [vmem:[#allocation120_spill] sm:$0xff] %v6699_v32  ;;  %v1042_v0 = vsel %vm46_vm1, %v9626_v57, %v9625_v63  ;;  %v9629_v63 = vld [vmem:[#allocation97_spill] sm:$0xff] }
 0x5ba   :  { %9624 = vst [vmem:[#allocation118_spill] sm:$0xff] %v6704_v46  ;;  %v1575_v36 = vsub.f32 %v1119_v29, %v6240_v23  ;;  %v6722_v23 = vmul.f32 %v6704_v46, %v6093_v21  ;;  %v1122_v56 = vmul.f32 %v6131_v45, %v1042_v0  ;;  %v1929_v32 = vsel %vm77_vm0, %v6715_v33, 0.0  ;;  %v9631_v0 = vld [vmem:[#allocation112_spill] sm:$0xff] }
 0x5bc   :  { %v1689_v29 = vmul.f32 1.442695, %v1575_v36  ;;  %v1923_v25 = vsel %vm77_vm0, %v6722_v23, 0.0  ;;  %v1578_v46 = vsub.f32 %v1122_v56, %v9631_v0 }
 0x5be   :  { %1921 = vadd.xlane.f32.xlu2 %v1920_v9  ;;  %v6718_v9 = vpop.permute.xlu1 %1517  ;;  %4664 = vpow2.f32 %v1689_v29  ;;  %v1695_v29 = vmul.f32 1.442695, %v1578_v46 }
 0x5bf   :  { %2019 = vadd.xlane.f32.xlu0 %v6415_v41  ;;  %v1573_v41 = vsub.f32 %v1117_v5, %v6232_v39 }
 0x5c0   :  { %1915 = vadd.xlane.f32.xlu1 %v1914_v26  ;;  %v9628_v26 = vld [vmem:[#allocation100_spill] sm:$0xff]  ;;  %v6733_v5 = vpop.xlane.xlu0 %1918 }
 0x5c1   :  { %v6711_v43 = vpop.xlane.xlu2 %1798  ;;  %v1040_v57 = vsel %vm46_vm1, %v9629_v63, %v9628_v26  ;;  %v1685_v39 = vmul.f32 1.442695, %v1573_v41  ;;  %9630 = vst [vmem:[#allocation103_spill] sm:$0xff] %v6733_v5 }
 0x5c2   :  { %9627 = vst [vmem:[#allocation76_spill] sm:$0xff] %v6711_v43  ;;  %v6731_v43 = vpop.eup %4660  ;;  %v1120_v26 = vmul.f32 %v6131_v45, %v1040_v57  ;;  %v9635_v57 = vld [vmem:[#allocation102_spill] sm:$0xff] }
 0x5c3   :  { %v6738_v36 = vpop.eup %4662  ;;  %v6746_v41 = vmul.f32 %v6731_v43, %v6093_v21  ;;  %4666 = vpow2.f32 %v1685_v39 }
 0x5c4   :  { %v6757_v56 = vmul.f32 %v6738_v36, %v6093_v21  ;;  %v6765_v39 = vpop.eup %4664  ;;  %4668 = vpow2.f32 %v1695_v29 }
 0x5c6   :  { %1930 = vadd.xlane.f32.xlu2 %v1929_v32  ;;  %v9633_v32 = vld [vmem:[#allocation105_spill] sm:$0xff]  ;;  %v1932_v21 = vsel %vm77_vm0, %v6757_v56, 0.0 }
 0x5c7   :  { %2025 = vadd.xlane.f32.xlu0 %v6460_v54  ;;  %v1576_v54 = vsub.f32 %v1120_v26, %v6271_v8  ;;  %v1045_v5 = vsel %vm46_vm1, %v6169_v1, %v9633_v32  ;;  %v1938_v8 = vsel %vm77_vm0, %v6746_v41, 0.0 }
 0x5c8   :  { %1924 = vadd.xlane.f32.xlu1 %v1923_v25  ;;  %v9636_v25 = vld [vmem:[#allocation54_spill] sm:$0xff]  ;;  %v1125_v26 = vmul.f32 %v6323_v51, %v1045_v5  ;;  %v6781_v5 = vmul.f32 %v6765_v39, %v6146_v48 }
 0x5c9   :  { %v6742_v63 = vpop.xlane.xlu2 %1807  ;;  %v1043_v0 = vsel %vm46_vm1, %v9636_v25, %v9635_v57  ;;  %v1691_v1 = vmul.f32 1.442695, %v1576_v54  ;;  %v6771_v46 = vpop.eup %4666  ;;  %v9639_v54 = vld [vmem:[#allocation108_spill] sm:$0xff] }
 0x5ca   :  { %9632 = vst [vmem:[#allocation124_spill] sm:$0xff] %v6742_v63  ;;  %v1123_v32 = vmul.f32 %v6131_v45, %v1043_v0  ;;  %v1581_v57 = vsub.f32 %v1125_v26, %v6357_v55  ;;  %v6775_v25 = vpop.xlane.xlu0 %1927  ;;  %v6792_v55 = vmul.f32 %v6771_v46, %v6146_v48  ;;  %v9642_v26 = vld [vmem:[#allocation69_spill] sm:$0xff] }
 0x5cb   :  { %v6753_v35 = vpop.xlane.xlu1 %1801  ;;  %9637 = vst [vmem:[#allocation114_spill] sm:$0xff] %v6775_v25  ;;  %4670 = vpow2.f32 %v1691_v1  ;;  %v6800_v1 = vpop.eup %4668  ;;  %v9647_v25 = vld [vmem:[#allocation62_spill] sm:$0xff]  ;;  %v9654_v63 = vld [vmem:[#allocation57_spill] sm:$0xff] }
 0x5cc   :  { %9634 = vst [vmem:[#allocation81_spill] sm:$0xff] %v6753_v35  ;;  %v1701_v0 = vmul.f32 1.442695, %v1581_v57 }
 0x5ce   :  { %1939 = vadd.xlane.f32.xlu2 %v1938_v8  ;;  %v9640_v8 = vld [vmem:[#allocation59_spill] sm:$0xff]  ;;  %4672 = vpow2.f32 %v1701_v0 }
 0x5cf   :  { %2031 = vadd.xlane.f32.xlu0 %v6498_v24  ;;  %v1579_v24 = vsub.f32 %v1123_v32, %v6304_v19  ;;  %v1048_v29 = vsel %vm46_vm1, %v9640_v8, %v9639_v54  ;;  %v1947_v19 = vsel %vm77_vm0, %v6781_v5, 0.0  ;;  %v1941_v8 = vsel %vm77_vm0, %v6792_v55, 0.0 }
 0x5d0   :  { %1933 = vadd.xlane.f32.xlu1 %v1932_v21  ;;  %v9643_v21 = vld [vmem:[#allocation56_spill] sm:$0xff]  ;;  %v1128_v32 = vmul.f32 %v6323_v51, %v1048_v29  ;;  %v6814_v29 = vmul.f32 %v6800_v1, %v6146_v48 }
 0x5d1   :  { %v6777_v35 = vpop.xlane.xlu2 %1813  ;;  %v1697_v54 = vmul.f32 1.442695, %v1579_v24  ;;  %v6806_v57 = vpop.eup %4670 }
 0x5d2   :  { %9638 = vst [vmem:[#allocation110_spill] sm:$0xff] %v6777_v35  ;;  %v1046_v35 = vsel %vm46_vm1, %v9643_v21, %v9642_v26  ;;  %v1584_v26 = vsub.f32 %v1128_v32, %v6387_v18  ;;  %v6817_v24 = vpop.xlane.xlu0 %1936  ;;  %v6827_v18 = vmul.f32 %v6806_v57, %v6146_v48 }
 0x5d3   :  { %v6788_v45 = vpop.xlane.xlu1 %1810  ;;  %4674 = vpow2.f32 %v1697_v54  ;;  %9645 = vst [vmem:[#allocation29_spill] sm:$0xff] %v6817_v24 }
 0x5d4   :  { %9641 = vst [vmem:[#allocation106_spill] sm:$0xff] %v6788_v45  ;;  %v1126_v45 = vmul.f32 %v6323_v51, %v1046_v35  ;;  %v1707_v32 = vmul.f32 1.442695, %v1584_v26 }
 0x5d6   :  { %1948 = vadd.xlane.f32.xlu2 %v1947_v19  ;;  %v9646_v19 = vld [vmem:[#allocation73_spill] sm:$0xff]  ;;  %4676 = vpow2.f32 %v1707_v32 }
 0x5d7   :  { %2037 = vadd.xlane.f32.xlu0 %v6534_v15  ;;  %v1582_v15 = vsub.f32 %v1126_v45, %v6650_v16  ;;  %v1051_v35 = vsel %vm46_vm1, %v9647_v25, %v9646_v19  ;;  %v1956_v16 = vsel %vm77_vm0, %v6814_v29, 0.0  ;;  %v6835_v45 = vpop.eup %4672  ;;  %v1950_v19 = vsel %vm77_vm0, %v6827_v18, 0.0 }
 0x5d8   :  { %1942 = vadd.xlane.f32.xlu1 %v1941_v8  ;;  %v9649_v8 = vld [vmem:[#allocation113_spill] sm:$0xff]  ;;  %v1131_v24 = vmul.f32 %v6323_v51, %v1051_v35  ;;  %v6849_v35 = vmul.f32 %v6835_v45, %v6435_v4 }
 0x5d9   :  { %v6810_v21 = vpop.xlane.xlu2 %1822  ;;  %v1703_v25 = vmul.f32 1.442695, %v1582_v15  ;;  %v6841_v26 = vpop.eup %4674 }
 0x5da   :  { %9644 = vst [vmem:[#allocation78_spill] sm:$0xff] %v6810_v21  ;;  %v9650_v21 = vld [vmem:[#allocation55_spill] sm:$0xff]  ;;  %v6852_v15 = vpop.xlane.xlu0 %1945 }
 0x5db   :  { %v6823_v0 = vpop.xlane.xlu1 %1816  ;;  %v1049_v54 = vsel %vm46_vm1, %v9650_v21, %v9649_v8  ;;  %v1587_v21 = vsub.f32 %v1131_v24, %v6718_v9  ;;  %4678 = vpow2.f32 %v1703_v25  ;;  %9652 = vst [vmem:[#allocation42_spill] sm:$0xff] %v6852_v15  ;;  %v6862_v9 = vmul.f32 %v6841_v26, %v6146_v48 }
 0x5dc   :  { %9648 = vst [vmem:[#allocation84_spill] sm:$0xff] %v6823_v0  ;;  %v1129_v0 = vmul.f32 %v6323_v51, %v1049_v54  ;;  %v6866_v25 = vpop.eup %4676 }
 0x5dd   :  { %v1713_v24 = vmul.f32 1.442695, %v1587_v21  ;;  %v6878_v21 = vmul.f32 %v6866_v25, %v6435_v4 }
 0x5de   :  { %1957 = vadd.xlane.f32.xlu2 %v1956_v16  ;;  %v9653_v16 = vld [vmem:[#allocation115_spill] sm:$0xff] }
 0x5df   :  { %2043 = vadd.xlane.f32.xlu0 %v6561_v22  ;;  %v1585_v22 = vsub.f32 %v1129_v0, %v6687_v37  ;;  %v1052_v54 = vsel %vm46_vm1, %v9654_v63, %v9653_v16  ;;  %v1959_v63 = vsel %vm77_vm0, %v6862_v9, 0.0  ;;  %4680 = vpow2.f32 %v1713_v24 }
 0x5e0   :  { %1951 = vadd.xlane.f32.xlu1 %v1950_v19  ;;  %v1965_v19 = vsel %vm77_vm0, %v6849_v35, 0.0  ;;  %v1132_v37 = vmul.f32 %v6323_v51, %v1052_v54  ;;  %v1974_v54 = vsel %vm77_vm0, %v6878_v21, 0.0  ;;  %vm4166_vm1 = vcmask 1045509  }
 0x5e1   :  { %v6845_v8 = vpop.xlane.xlu2 %1831  ;;  %v1709_v0 = vmul.f32 1.442695, %v1585_v22  ;;  %v6872_v16 = vpop.eup %4678 }
 0x5e2   :  { %9651 = vst [vmem:[#allocation35_spill] sm:$0xff] %v6845_v8  ;;  %v1588_v15 = vsub.f32 %v1132_v37, %v9657_v3  ;;  %v6881_v51 = vpop.xlane.xlu0 %1954 }
 0x5e3   :  { %v6858_v32 = vpop.xlane.xlu1 %1825  ;;  %4682 = vpow2.f32 %v1709_v0  ;;  %9658 = vst [vmem:[#allocation37_spill] sm:$0xff] %v6881_v51 }
 0x5e4   :  { %9655 = vst [vmem:[#allocation31_spill] sm:$0xff] %v6858_v32 }
 0x5e5   :  { %v6889_v24 = vpop.eup %4680 }
 0x5e6   :  { %1966 = vadd.xlane.f32.xlu2 %v1965_v19  ;;  %v1715_v19 = vmul.f32 1.442695, %v1588_v15  ;;  %v6899_v0 = vmul.f32 %v6889_v24, %v6435_v4 }
 0x5e7   :  { %2049 = vadd.xlane.f32.xlu0 %v6590_v44  ;;  %v1790_v44 = vmul.f32 %v6872_v16, %v6435_v4 }
 0x5e8   :  { %1960 = vadd.xlane.f32.xlu1 %v1959_v63  ;;  %4684 = vpow2.f32 %v1715_v19 }
 0x5e9   :  { %v6874_v48 = vpop.xlane.xlu2 %1840  ;;  %v1968_v63 = vsel %vm77_vm0, %v1790_v44, 0.0  ;;  %v6893_v3 = vpop.eup %4682 }
 0x5ea   :  { %9656 = vst [vmem:[#allocation45_spill] sm:$0xff] %v6874_v48  ;;  %v1793_v15 = vmul.f32 %v6893_v3, %v6435_v4 }
 0x5eb   :  { %v6883_v22 = vpop.xlane.xlu1 %1834 }
 0x5ec   :  { %9659 = vst [vmem:[#allocation87_spill] sm:$0xff] %v6883_v22 }
 0x5ee   :  { %1975 = vadd.xlane.f32.xlu2 %v1974_v54  ;;  %v1977_v54 = vsel %vm77_vm0, %v1793_v15, 0.0 }
 0x5ef   :  { %2055 = vadd.xlane.f32.xlu0 %v6621_v10  ;;  %v1983_v10 = vsel %vm77_vm0, %v6899_v0, 0.0 }
 0x5f0   :  { %1969 = vadd.xlane.f32.xlu1 %v1968_v63  ;;  %v6911_v63 = vpop.eup %4684 }
 0x5f1   :  { %v6895_v37 = vpop.xlane.xlu2 %1849  ;;  %v1796_v8 = vmul.f32 %v6911_v63, %v6435_v4 }
 0x5f2   :  { %9660 = vst [vmem:[#allocation32_spill] sm:$0xff] %v6895_v37  ;;  %v6901_v51 = vpop.xlane.xlu0 %1963 }
 0x5f3   :  { %9661 = vst [vmem:[#allocation89_spill] sm:$0xff] %v6901_v51  ;;  %v6903_v48 = vpop.xlane.xlu1 %1843 }
 0x5f4   :  { %9662 = vst [vmem:[#allocation34_spill] sm:$0xff] %v6903_v48 }
 0x5f6   :  { %1984 = vadd.xlane.f32.xlu2 %v1983_v10 }
 0x5f7   :  { %2061 = vadd.xlane.f32.xlu0 %v6654_v42  ;;  %v1986_v42 = vsel %vm77_vm0, %v1796_v8, 0.0 }
 0x5f8   :  { %1978 = vadd.xlane.f32.xlu1 %v1977_v54 }
 0x5f9   :  { %v6913_v37 = vpop.xlane.xlu2 %1858 }
 0x5fa   :  { %9663 = vst [vmem:[#allocation92_spill] sm:$0xff] %v6913_v37  ;;  %v6915_v19 = vpop.xlane.xlu0 %1972  ;;  %v9672_v37 = vld [vmem:[#allocation126_spill] sm:$0xff] }
 0x5fb   :  { %9664 = vst [vmem:[#allocation36_spill] sm:$0xff] %v6915_v19  ;;  %v6917_v51 = vpop.xlane.xlu1 %1852  ;;  %v9669_v19 = vld [vmem:[#allocation119_spill] sm:$0xff] }
 0x5fc   :  { %9665 = vst [vmem:[#allocation95_spill] sm:$0xff] %v6917_v51  ;;  %v9778_v51 = vld [vmem:[#allocation130_spill] sm:$0xff] }
 0x5fe   :  { %1991 = vadd.xlane.f32.xlu2 %v6221_v28 }
 0x5ff   :  { %2067 = vadd.xlane.f32.xlu0 %v6691_v58 }
 0x600   :  { %1987 = vadd.xlane.f32.xlu1 %v1986_v42 }
 0x601   :  { %v6924_v10 = vpop.xlane.xlu2 %1867 }
 0x602   :  { %9666 = vst [vmem:[#allocation38_spill] sm:$0xff] %v6924_v10  ;;  %v6926_v48 = vpop.xlane.xlu0 %1981 }
 0x603   :  { %9667 = vst [vmem:[#allocation85_spill] sm:$0xff] %v6926_v48  ;;  %v6928_v54 = vpop.xlane.xlu1 %1861 }
 0x604   :  { %9668 = vst [vmem:[#allocation88_spill] sm:$0xff] %v6928_v54 }
 0x606   :  { %1997 = vadd.xlane.f32.xlu2 %v6253_v17 }
 0x607   :  { %2073 = vadd.xlane.f32.xlu0 %v6722_v23  ;;  %v9676_v23 = vld [vmem:[#allocation129_spill] sm:$0xff] }
 0x608   :  { %1993 = vadd.xlane.f32.xlu1 %v9669_v19  ;;  %v9677_v19 = vld [vmem:[#allocation121_spill] sm:$0xff] }
 0x609   :  { %v6933_v4 = vpop.xlane.xlu2 %1876 }
 0x60a   :  { %9670 = vst [vmem:[#allocation74_spill] sm:$0xff] %v6933_v4  ;;  %v6935_v28 = vpop.xlane.xlu0 %1989 }
 0x60b   :  { %v6937_v58 = vpop.xlane.xlu1 %1870 }
 0x60c   :  { %9671 = vst [vmem:[#allocation91_spill] sm:$0xff] %v6937_v58 }
 0x60e   :  { %2003 = vadd.xlane.f32.xlu2 %v9672_v37 }
 0x60f   :  { %2079 = vadd.xlane.f32.xlu0 %v6757_v56  ;;  %v9681_v56 = vld [vmem:[#allocation131_spill] sm:$0xff] }
 0x610   :  { %1999 = vadd.xlane.f32.xlu1 %v6244_v14  ;;  %v9682_v14 = vld [vmem:[#allocation86_spill] sm:$0xff] }
 0x611   :  { %v6942_v42 = vpop.xlane.xlu2 %1885 }
 0x612   :  { %9673 = vst [vmem:[#allocation93_spill] sm:$0xff] %v6942_v42  ;;  %v6944_v48 = vpop.xlane.xlu0 %1995 }
 0x613   :  { %9674 = vst [vmem:[#allocation83_spill] sm:$0xff] %v6944_v48  ;;  %v6946_v17 = vpop.xlane.xlu1 %1879 }
 0x614   :  { %9675 = vst [vmem:[#allocation90_spill] sm:$0xff] %v6946_v17 }
 0x616   :  { %2009 = vadd.xlane.f32.xlu2 %v9676_v23 }
 0x617   :  { %2085 = vadd.xlane.f32.xlu0 %v6792_v55  ;;  %v9686_v55 = vld [vmem:[#allocation133_spill] sm:$0xff] }
 0x618   :  { %2005 = vadd.xlane.f32.xlu1 %v9677_v19 }
 0x619   :  { %v6951_v10 = vpop.xlane.xlu2 %1894 }
 0x61a   :  { %9678 = vst [vmem:[#allocation40_spill] sm:$0xff] %v6951_v10  ;;  %v6953_v4 = vpop.xlane.xlu0 %2001 }
 0x61b   :  { %9679 = vst [vmem:[#allocation96_spill] sm:$0xff] %v6953_v4  ;;  %v6955_v37 = vpop.xlane.xlu1 %1888 }
 0x61c   :  { %9680 = vst [vmem:[#allocation46_spill] sm:$0xff] %v6955_v37 }
 0x61e   :  { %2015 = vadd.xlane.f32.xlu2 %v9681_v56 }
 0x61f   :  { %2091 = vadd.xlane.f32.xlu0 %v6827_v18  ;;  %v9690_v18 = vld [vmem:[#allocation135_spill] sm:$0xff] }
 0x620   :  { %2011 = vadd.xlane.f32.xlu1 %v9682_v14 }
 0x621   :  { %v6960_v42 = vpop.xlane.xlu2 %1903 }
 0x622   :  { %9683 = vst [vmem:[#allocation53_spill] sm:$0xff] %v6960_v42  ;;  %v6962_v17 = vpop.xlane.xlu0 %2007 }
 0x623   :  { %9684 = vst [vmem:[#allocation43_spill] sm:$0xff] %v6962_v17  ;;  %v6964_v23 = vpop.xlane.xlu1 %1897 }
 0x624   :  { %9685 = vst [vmem:[#allocation58_spill] sm:$0xff] %v6964_v23 }
 0x626   :  { %2021 = vadd.xlane.f32.xlu2 %v9686_v55 }
 0x627   :  { %2097 = vadd.xlane.f32.xlu0 %v6862_v9  ;;  %v9694_v9 = vld [vmem:[#allocation137_spill] sm:$0xff] }
 0x628   :  { %2017 = vadd.xlane.f32.xlu1 %v6371_v53 }
 0x629   :  { %v6969_v19 = vpop.xlane.xlu2 %1912 }
 0x62a   :  { %9687 = vst [vmem:[#allocation48_spill] sm:$0xff] %v6969_v19  ;;  %v6971_v37 = vpop.xlane.xlu0 %2013 }
 0x62b   :  { %9688 = vst [vmem:[#allocation99_spill] sm:$0xff] %v6971_v37  ;;  %v6973_v56 = vpop.xlane.xlu1 %1906  ;;  %v9802_v37 = vld [vmem:[#allocation22_spill] sm:$0xff] }
 0x62c   :  { %9689 = vst [vmem:[#allocation41_spill] sm:$0xff] %v6973_v56 }
 0x62e   :  { %2027 = vadd.xlane.f32.xlu2 %v9690_v18 }
 0x62f   :  { %2103 = vadd.xlane.f32.xlu0 %v1790_v44  ;;  %v9698_v44 = vld [vmem:[#allocation139_spill] sm:$0xff] }
 0x630   :  { %2023 = vadd.xlane.f32.xlu1 %v6399_v61 }
 0x631   :  { %v6977_v14 = vpop.xlane.xlu2 %1921 }
 0x632   :  { %9691 = vst [vmem:[#allocation101_spill] sm:$0xff] %v6977_v14  ;;  %v6979_v42 = vpop.xlane.xlu0 %2019 }
 0x633   :  { %9692 = vst [vmem:[#allocation44_spill] sm:$0xff] %v6979_v42  ;;  %v6981_v55 = vpop.xlane.xlu1 %1915 }
 0x634   :  { %9693 = vst [vmem:[#allocation104_spill] sm:$0xff] %v6981_v55 }
 0x636   :  { %2033 = vadd.xlane.f32.xlu2 %v9694_v9 }
 0x637   :  { %2109 = vadd.xlane.f32.xlu0 %v1793_v15  ;;  %v9702_v15 = vld [vmem:[#allocation141_spill] sm:$0xff] }
 0x638   :  { %2029 = vadd.xlane.f32.xlu1 %v6445_v40  ;;  %v9703_v40 = vld [vmem:[#allocation117_spill] sm:$0xff] }
 0x639   :  { %v6985_v53 = vpop.xlane.xlu2 %1930  ;;  %v2187_v9 = vsel %vm77_vm0, %v9703_v40, 0.0 }
 0x63a   :  { %9695 = vst [vmem:[#allocation47_spill] sm:$0xff] %v6985_v53  ;;  %v6987_v19 = vpop.xlane.xlu0 %2025 }
 0x63b   :  { %9696 = vst [vmem:[#allocation107_spill] sm:$0xff] %v6987_v19  ;;  %v6989_v56 = vpop.xlane.xlu1 %1924  ;;  %v9777_v19 = vld [vmem:[#allocation21_spill] sm:$0xff] }
 0x63c   :  { %9697 = vst [vmem:[#allocation49_spill] sm:$0xff] %v6989_v56 }
 0x63e   :  { %2039 = vadd.xlane.f32.xlu2 %v9698_v44 }
 0x63f   :  { %2115 = vadd.xlane.f32.xlu0 %v1796_v8 }
 0x640   :  { %2035 = vadd.xlane.f32.xlu1 %v6481_v20  ;;  %v9707_v20 = vld [vmem:[#allocation143_spill] sm:$0xff] }
 0x641   :  { %v6993_v61 = vpop.xlane.xlu2 %1939 }
 0x642   :  { %9699 = vst [vmem:[#allocation100_spill] sm:$0xff] %v6993_v61  ;;  %v6995_v18 = vpop.xlane.xlu0 %2031  ;;  %v9708_v61 = vld [vmem:[#allocation68_spill] sm:$0xff] }
 0x643   :  { %9700 = vst [vmem:[#allocation97_spill] sm:$0xff] %v6995_v18  ;;  %v6997_v55 = vpop.xlane.xlu1 %1933  ;;  %v2196_v14 = vsel %vm77_vm0, %v9708_v61, 0.0 }
 0x644   :  { %9701 = vst [vmem:[#allocation112_spill] sm:$0xff] %v6997_v55 }
 0x646   :  { %2045 = vadd.xlane.f32.xlu2 %v9702_v15 }
 0x647   :  { %2188 = vadd.xlane.f32.xlu0 %v2187_v9 }
 0x648   :  { %2041 = vadd.xlane.f32.xlu1 %v6519_v47  ;;  %v9712_v47 = vld [vmem:[#allocation145_spill] sm:$0xff] }
 0x649   :  { %v7003_v53 = vpop.xlane.xlu2 %1948 }
 0x64a   :  { %9704 = vst [vmem:[#allocation105_spill] sm:$0xff] %v7003_v53  ;;  %v7005_v44 = vpop.xlane.xlu0 %2037  ;;  %v9713_v53 = vld [vmem:[#allocation63_spill] sm:$0xff] }
 0x64b   :  { %9705 = vst [vmem:[#allocation102_spill] sm:$0xff] %v7005_v44  ;;  %v7007_v8 = vpop.xlane.xlu1 %1942  ;;  %v2205_v56 = vsel %vm77_vm0, %v9713_v53, 0.0 }
 0x64c   :  { %9706 = vst [vmem:[#allocation54_spill] sm:$0xff] %v7007_v8 }
 0x64e   :  { %2051 = vadd.xlane.f32.xlu2 %v9707_v20 }
 0x64f   :  { %2197 = vadd.xlane.f32.xlu0 %v2196_v14 }
 0x650   :  { %2047 = vadd.xlane.f32.xlu1 %v6554_v50  ;;  %v9717_v50 = vld [vmem:[#allocation147_spill] sm:$0xff] }
 0x651   :  { %v7013_v15 = vpop.xlane.xlu2 %1957 }
 0x652   :  { %9709 = vst [vmem:[#allocation108_spill] sm:$0xff] %v7013_v15  ;;  %v7015_v55 = vpop.xlane.xlu0 %2043  ;;  %v9718_v15 = vld [vmem:[#allocation71_spill] sm:$0xff] }
 0x653   :  { %9710 = vst [vmem:[#allocation59_spill] sm:$0xff] %v7015_v55  ;;  %v7017_v9 = vpop.xlane.xlu1 %1951  ;;  %v2214_v23 = vsel %vm77_vm0, %v9718_v15, 0.0  ;;  %v9773_v55 = vld [vmem:[#allocation128_spill] sm:$0xff] }
 0x654   :  { %9711 = vst [vmem:[#allocation69_spill] sm:$0xff] %v7017_v9 }
 0x656   :  { %2057 = vadd.xlane.f32.xlu2 %v9712_v47 }
 0x657   :  { %2206 = vadd.xlane.f32.xlu0 %v2205_v56 }
 0x658   :  { %2053 = vadd.xlane.f32.xlu1 %v6581_v11  ;;  %v9722_v11 = vld [vmem:[#allocation149_spill] sm:$0xff] }
 0x659   :  { %v7023_v20 = vpop.xlane.xlu2 %1966 }
 0x65a   :  { %9714 = vst [vmem:[#allocation56_spill] sm:$0xff] %v7023_v20  ;;  %v7025_v8 = vpop.xlane.xlu0 %2049  ;;  %v2223_v20 = vsel %vm77_vm0, %v6348_v34, 0.0 }
 0x65b   :  { %9715 = vst [vmem:[#allocation73_spill] sm:$0xff] %v7025_v8  ;;  %v7027_v14 = vpop.xlane.xlu1 %1960 }
 0x65c   :  { %9716 = vst [vmem:[#allocation62_spill] sm:$0xff] %v7027_v14 }
 0x65e   :  { %2063 = vadd.xlane.f32.xlu2 %v9717_v50 }
 0x65f   :  { %2215 = vadd.xlane.f32.xlu0 %v2214_v23 }
 0x660   :  { %2059 = vadd.xlane.f32.xlu1 %v6612_v59  ;;  %v9726_v59 = vld [vmem:[#allocation151_spill] sm:$0xff] }
 0x661   :  { %v7033_v47 = vpop.xlane.xlu2 %1975 }
 0x662   :  { %9719 = vst [vmem:[#allocation113_spill] sm:$0xff] %v7033_v47  ;;  %v7035_v9 = vpop.xlane.xlu0 %2055  ;;  %v2232_v47 = vsel %vm77_vm0, %v6385_v27, 0.0 }
 0x663   :  { %9720 = vst [vmem:[#allocation55_spill] sm:$0xff] %v7035_v9  ;;  %v7037_v56 = vpop.xlane.xlu1 %1969 }
 0x664   :  { %9721 = vst [vmem:[#allocation115_spill] sm:$0xff] %v7037_v56 }
 0x666   :  { %2069 = vadd.xlane.f32.xlu2 %v9722_v11 }
 0x667   :  { %2224 = vadd.xlane.f32.xlu0 %v2223_v20 }
 0x668   :  { %2065 = vadd.xlane.f32.xlu1 %v6643_v12  ;;  %v9730_v12 = vld [vmem:[#allocation153_spill] sm:$0xff] }
 0x669   :  { %v7043_v50 = vpop.xlane.xlu2 %1984 }
 0x66a   :  { %9723 = vst [vmem:[#allocation57_spill] sm:$0xff] %v7043_v50  ;;  %v7045_v14 = vpop.xlane.xlu0 %2061  ;;  %v2241_v50 = vsel %vm77_vm0, %v6427_v62, 0.0 }
 0x66b   :  { %9724 = vst [vmem:[#allocation127_spill] sm:$0xff] %v7045_v14  ;;  %v7047_v23 = vpop.xlane.xlu1 %1978  ;;  %v9768_v14 = vld [vmem:[#allocation125_spill] sm:$0xff] }
 0x66c   :  { %9725 = vst [vmem:[#allocation119_spill] sm:$0xff] %v7047_v23 }
 0x66e   :  { %2075 = vadd.xlane.f32.xlu2 %v9726_v59 }
 0x66f   :  { %2233 = vadd.xlane.f32.xlu0 %v2232_v47 }
 0x670   :  { %2071 = vadd.xlane.f32.xlu1 %v6676_v30  ;;  %v9734_v30 = vld [vmem:[#allocation155_spill] sm:$0xff] }
 0x671   :  { %v7053_v11 = vpop.xlane.xlu2 %1991 }
 0x672   :  { %9727 = vst [vmem:[#allocation126_spill] sm:$0xff] %v7053_v11  ;;  %v7055_v56 = vpop.xlane.xlu0 %2067  ;;  %v9772_v11 = vld [vmem:[#allocation67_spill] sm:$0xff] }
 0x673   :  { %9728 = vst [vmem:[#allocation129_spill] sm:$0xff] %v7055_v56  ;;  %v7057_v20 = vpop.xlane.xlu1 %1987  ;;  %v2250_v56 = vsel %vm77_vm0, %v6468_v31, 0.0 }
 0x674   :  { %9729 = vst [vmem:[#allocation121_spill] sm:$0xff] %v7057_v20 }
 0x676   :  { %2081 = vadd.xlane.f32.xlu2 %v9730_v12 }
 0x677   :  { %2242 = vadd.xlane.f32.xlu0 %v2241_v50 }
 0x678   :  { %2077 = vadd.xlane.f32.xlu1 %v6715_v33  ;;  %v9738_v33 = vld [vmem:[#allocation70_spill] sm:$0xff] }
 0x679   :  { %v7063_v59 = vpop.xlane.xlu2 %1997 }
 0x67a   :  { %9731 = vst [vmem:[#allocation131_spill] sm:$0xff] %v7063_v59  ;;  %v7065_v23 = vpop.xlane.xlu0 %2073 }
 0x67b   :  { %9732 = vst [vmem:[#allocation86_spill] sm:$0xff] %v7065_v23  ;;  %v7067_v47 = vpop.xlane.xlu1 %1993  ;;  %v2259_v23 = vsel %vm77_vm0, %v6506_v60, 0.0 }
 0x67c   :  { %9733 = vst [vmem:[#allocation133_spill] sm:$0xff] %v7067_v47 }
 0x67e   :  { %2087 = vadd.xlane.f32.xlu2 %v9734_v30 }
 0x67f   :  { %2251 = vadd.xlane.f32.xlu0 %v2250_v56 }
 0x680   :  { %2083 = vadd.xlane.f32.xlu1 %v6746_v41  ;;  %v9742_v41 = vld [vmem:[#allocation25_spill] sm:$0xff] }
 0x681   :  { %v7073_v12 = vpop.xlane.xlu2 %2003 }
 0x682   :  { %9735 = vst [vmem:[#allocation135_spill] sm:$0xff] %v7073_v12  ;;  %v7075_v20 = vpop.xlane.xlu0 %2079 }
 0x683   :  { %9736 = vst [vmem:[#allocation137_spill] sm:$0xff] %v7075_v20  ;;  %v7077_v50 = vpop.xlane.xlu1 %1999  ;;  %v2268_v20 = vsel %vm77_vm0, %v6538_v52, 0.0 }
 0x684   :  { %9737 = vst [vmem:[#allocation139_spill] sm:$0xff] %v7077_v50 }
 0x686   :  { %2093 = vadd.xlane.f32.xlu2 %v9738_v33 }
 0x687   :  { %2260 = vadd.xlane.f32.xlu0 %v2259_v23 }
 0x688   :  { %2089 = vadd.xlane.f32.xlu1 %v6781_v5  ;;  %v2277_v5 = vsel %vm77_vm0, %v6570_v7, 0.0 }
 0x689   :  { %v7083_v30 = vpop.xlane.xlu2 %2009 }
 0x68a   :  { %9739 = vst [vmem:[#allocation141_spill] sm:$0xff] %v7083_v30  ;;  %v7085_v47 = vpop.xlane.xlu0 %2085 }
 0x68b   :  { %9740 = vst [vmem:[#allocation117_spill] sm:$0xff] %v7085_v47  ;;  %v7087_v56 = vpop.xlane.xlu1 %2005  ;;  %v9763_v47 = vld [vmem:[#allocation17_spill] sm:$0xff] }
 0x68c   :  { %9741 = vst [vmem:[#allocation143_spill] sm:$0xff] %v7087_v56 }
 0x68e   :  { %2099 = vadd.xlane.f32.xlu2 %v9742_v41 }
 0x68f   :  { %2269 = vadd.xlane.f32.xlu0 %v2268_v20 }
 0x690   :  { %2095 = vadd.xlane.f32.xlu1 %v6814_v29  ;;  %v9749_v29 = vld [vmem:[#allocation75_spill] sm:$0xff] }
 0x691   :  { %v7093_v33 = vpop.xlane.xlu2 %2015 }
 0x692   :  { %9743 = vst [vmem:[#allocation68_spill] sm:$0xff] %v7093_v33  ;;  %v7095_v50 = vpop.xlane.xlu0 %2091 }
 0x693   :  { %9744 = vst [vmem:[#allocation145_spill] sm:$0xff] %v7095_v50  ;;  %v7097_v23 = vpop.xlane.xlu1 %2011  ;;  %v2286_v50 = vsel %vm77_vm0, %v6600_v2, 0.0 }
 0x694   :  { %9745 = vst [vmem:[#allocation63_spill] sm:$0xff] %v7097_v23 }
 0x696   :  { %2105 = vadd.xlane.f32.xlu2 %v6452_v13 }
 0x697   :  { %2278 = vadd.xlane.f32.xlu0 %v2277_v5 }
 0x698   :  { %2101 = vadd.xlane.f32.xlu1 %v6849_v35  ;;  %v9753_v35 = vld [vmem:[#allocation60_spill] sm:$0xff] }
 0x699   :  { %v7103_v41 = vpop.xlane.xlu2 %2021 }
 0x69a   :  { %9746 = vst [vmem:[#allocation147_spill] sm:$0xff] %v7103_v41  ;;  %v7105_v56 = vpop.xlane.xlu0 %2097  ;;  %v2181_v41 = vsel %vm77_vm0, %v9753_v35, 0.0 }
 0x69b   :  { %9747 = vst [vmem:[#allocation71_spill] sm:$0xff] %v7105_v56  ;;  %v7107_v20 = vpop.xlane.xlu1 %2017 }
 0x69c   :  { %9748 = vst [vmem:[#allocation149_spill] sm:$0xff] %v7107_v20  ;;  %v2295_v20 = vsel %vm77_vm0, %v6629_v6, 0.0 }
 0x69e   :  { %2111 = vadd.xlane.f32.xlu2 %v9749_v29 }
 0x69f   :  { %2287 = vadd.xlane.f32.xlu0 %v2286_v50 }
 0x6a0   :  { %2107 = vadd.xlane.f32.xlu1 %v6878_v21 }
 0x6a1   :  { %v7113_v13 = vpop.xlane.xlu2 %2027 }
 0x6a2   :  { %9750 = vst [vmem:[#allocation151_spill] sm:$0xff] %v7113_v13  ;;  %v7115_v23 = vpop.xlane.xlu0 %2103  ;;  %v9757_v13 = vld [vmem:[#allocation79_spill] sm:$0xff] }
 0x6a3   :  { %9751 = vst [vmem:[#allocation153_spill] sm:$0xff] %v7115_v23  ;;  %v7117_v5 = vpop.xlane.xlu1 %2023  ;;  %v2190_v23 = vsel %vm77_vm0, %v9757_v13, 0.0 }
 0x6a4   :  { %9752 = vst [vmem:[#allocation155_spill] sm:$0xff] %v7117_v5  ;;  %v2304_v5 = vsel %vm77_vm0, %v6662_v49, 0.0 }
 0x6a6   :  { %2182 = vadd.xlane.f32.xlu2 %v2181_v41  ;;  %v9758_v41 = vld [vmem:[#allocation98_spill] sm:$0xff] }
 0x6a7   :  { %2296 = vadd.xlane.f32.xlu0 %v2295_v20  ;;  %v2184_v56 = vsel %vm77_vm0, %v9758_v41, 0.0 }
 0x6a8   :  { %2113 = vadd.xlane.f32.xlu1 %v6899_v0 }
 0x6a9   :  { %v7124_v29 = vpop.xlane.xlu2 %2033 }
 0x6aa   :  { %9754 = vst [vmem:[#allocation70_spill] sm:$0xff] %v7124_v29  ;;  %v7126_v50 = vpop.xlane.xlu0 %2109 }
 0x6ab   :  { %9755 = vst [vmem:[#allocation25_spill] sm:$0xff] %v7126_v50  ;;  %v7128_v21 = vpop.xlane.xlu1 %2029  ;;  %v9762_v50 = vld [vmem:[#allocation116_spill] sm:$0xff] }
 0x6ac   :  { %9756 = vst [vmem:[#allocation75_spill] sm:$0xff] %v7128_v21  ;;  %v2199_v21 = vsel %vm77_vm0, %v9762_v50, 0.0 }
 0x6ae   :  { %2191 = vadd.xlane.f32.xlu2 %v2190_v23  ;;  %v2313_v23 = vsel %vm77_vm0, %v6695_v38, 0.0 }
 0x6af   :  { %2305 = vadd.xlane.f32.xlu0 %v2304_v5  ;;  %v2193_v5 = vsel %vm77_vm0, %v9763_v47, 0.0 }
 0x6b0   :  { %2185 = vadd.xlane.f32.xlu1 %v2184_v56 }
 0x6b1   :  { %v7136_v20 = vpop.xlane.xlu2 %2039 }
 0x6b2   :  { %9759 = vst [vmem:[#allocation60_spill] sm:$0xff] %v7136_v20  ;;  %v7138_v0 = vpop.xlane.xlu0 %2115 }
 0x6b3   :  { %9760 = vst [vmem:[#allocation79_spill] sm:$0xff] %v7138_v0  ;;  %v7140_v29 = vpop.xlane.xlu1 %2035  ;;  %v9767_v0 = vld [vmem:[#allocation65_spill] sm:$0xff] }
 0x6b4   :  { %9761 = vst [vmem:[#allocation98_spill] sm:$0xff] %v7140_v29  ;;  %v2208_v29 = vsel %vm77_vm0, %v9767_v0, 0.0 }
 0x6b6   :  { %2200 = vadd.xlane.f32.xlu2 %v2199_v21  ;;  %v2322_v21 = vsel %vm77_vm0, %v6731_v43, 0.0 }
 0x6b7   :  { %2314 = vadd.xlane.f32.xlu0 %v2313_v23  ;;  %v2202_v23 = vsel %vm77_vm0, %v9768_v14, 0.0 }
 0x6b8   :  { %2194 = vadd.xlane.f32.xlu1 %v2193_v5 }
 0x6b9   :  { %v7148_v12 = vpop.xlane.xlu2 %2045 }
 0x6ba   :  { %9764 = vst [vmem:[#allocation116_spill] sm:$0xff] %v7148_v12  ;;  %v7150_v56 = vpop.xlane.xlu0 %2188  ;;  %v9788_v12 = vld [vmem:[#allocation134_spill] sm:$0xff] }
 0x6bb   :  { %9765 = vst [vmem:[#allocation17_spill] sm:$0xff] %v7150_v56  ;;  %v7152_v59 = vpop.xlane.xlu1 %2041 }
 0x6bc   :  { %9766 = vst [vmem:[#allocation156_spill] sm:$0xff] %v7152_v59  ;;  %v2217_v59 = vsel %vm77_vm0, %v9772_v11, 0.0 }
 0x6be   :  { %2209 = vadd.xlane.f32.xlu2 %v2208_v29  ;;  %v2331_v29 = vsel %vm77_vm0, %v6765_v39, 0.0 }
 0x6bf   :  { %2323 = vadd.xlane.f32.xlu0 %v2322_v21  ;;  %v2211_v21 = vsel %vm77_vm0, %v9773_v55, 0.0 }
 0x6c0   :  { %2203 = vadd.xlane.f32.xlu1 %v2202_v23 }
 0x6c1   :  { %v7160_v9 = vpop.xlane.xlu2 %2051 }
 0x6c2   :  { %9769 = vst [vmem:[#allocation65_spill] sm:$0xff] %v7160_v9  ;;  %v7162_v5 = vpop.xlane.xlu0 %2197 }
 0x6c3   :  { %9770 = vst [vmem:[#allocation125_spill] sm:$0xff] %v7162_v5  ;;  %v7164_v8 = vpop.xlane.xlu1 %2047  ;;  %v9783_v5 = vld [vmem:[#allocation132_spill] sm:$0xff] }
 0x6c4   :  { %9771 = vst [vmem:[#allocation157_spill] sm:$0xff] %v7164_v8  ;;  %v2226_v8 = vsel %vm77_vm0, %v9777_v19, 0.0 }
 0x6c6   :  { %2218 = vadd.xlane.f32.xlu2 %v2217_v59  ;;  %v2340_v59 = vsel %vm77_vm0, %v6800_v1, 0.0 }
 0x6c7   :  { %2332 = vadd.xlane.f32.xlu0 %v2331_v29  ;;  %v2220_v29 = vsel %vm77_vm0, %v9778_v51, 0.0 }
 0x6c8   :  { %2212 = vadd.xlane.f32.xlu1 %v2211_v21 }
 0x6c9   :  { %v7172_v18 = vpop.xlane.xlu2 %2057 }
 0x6ca   :  { %9774 = vst [vmem:[#allocation67_spill] sm:$0xff] %v7172_v18  ;;  %v7174_v23 = vpop.xlane.xlu0 %2206  ;;  %v9793_v18 = vld [vmem:[#allocation136_spill] sm:$0xff] }
 0x6cb   :  { %9775 = vst [vmem:[#allocation128_spill] sm:$0xff] %v7174_v23  ;;  %v7176_v54 = vpop.xlane.xlu1 %2053  ;;  %v9782_v23 = vld [vmem:[#allocation51_spill] sm:$0xff] }
 0x6cc   :  { %9776 = vst [vmem:[#allocation158_spill] sm:$0xff] %v7176_v54  ;;  %v2235_v32 = vsel %vm77_vm0, %v9782_v23, 0.0 }
 0x6ce   :  { %2227 = vadd.xlane.f32.xlu2 %v2226_v8  ;;  %v2349_v8 = vsel %vm77_vm0, %v6835_v45, 0.0 }
 0x6cf   :  { %2341 = vadd.xlane.f32.xlu0 %v2340_v59  ;;  %v2229_v59 = vsel %vm77_vm0, %v9783_v5, 0.0 }
 0x6d0   :  { %2221 = vadd.xlane.f32.xlu1 %v2220_v29 }
 0x6d1   :  { %v7184_v42 = vpop.xlane.xlu2 %2063 }
 0x6d2   :  { %9779 = vst [vmem:[#allocation21_spill] sm:$0xff] %v7184_v42  ;;  %v7186_v21 = vpop.xlane.xlu0 %2215 }
 0x6d3   :  { %9780 = vst [vmem:[#allocation130_spill] sm:$0xff] %v7186_v21  ;;  %v7188_v17 = vpop.xlane.xlu1 %2059  ;;  %v9787_v21 = vld [vmem:[#allocation23_spill] sm:$0xff] }
 0x6d4   :  { %9781 = vst [vmem:[#allocation159_spill] sm:$0xff] %v7188_v17  ;;  %v2244_v17 = vsel %vm77_vm0, %v9787_v21, 0.0 }
 0x6d6   :  { %2236 = vadd.xlane.f32.xlu2 %v2235_v32  ;;  %v2358_v32 = vsel %vm77_vm0, %v6866_v25, 0.0 }
 0x6d7   :  { %2350 = vadd.xlane.f32.xlu0 %v2349_v8  ;;  %v2238_v8 = vsel %vm77_vm0, %v9788_v12, 0.0 }
 0x6d8   :  { %2230 = vadd.xlane.f32.xlu1 %v2229_v59 }
 0x6d9   :  { %v7196_v56 = vpop.xlane.xlu2 %2069 }
 0x6da   :  { %9784 = vst [vmem:[#allocation51_spill] sm:$0xff] %v7196_v56  ;;  %v7198_v29 = vpop.xlane.xlu0 %2224 }
 0x6db   :  { %9785 = vst [vmem:[#allocation132_spill] sm:$0xff] %v7198_v29  ;;  %v7200_v42 = vpop.xlane.xlu1 %2065  ;;  %v9792_v29 = vld [vmem:[#allocation20_spill] sm:$0xff] }
 0x6dc   :  { %9786 = vst [vmem:[#allocation160_spill] sm:$0xff] %v7200_v42  ;;  %v2253_v42 = vsel %vm77_vm0, %v9792_v29, 0.0 }
 0x6de   :  { %2245 = vadd.xlane.f32.xlu2 %v2244_v17  ;;  %v2367_v17 = vsel %vm77_vm0, %v6889_v24, 0.0 }
 0x6df   :  { %2359 = vadd.xlane.f32.xlu0 %v2358_v32  ;;  %v2247_v32 = vsel %vm77_vm0, %v9793_v18, 0.0 }
 0x6e0   :  { %2239 = vadd.xlane.f32.xlu1 %v2238_v8 }
 0x6e1   :  { %v7208_v4 = vpop.xlane.xlu2 %2075 }
 0x6e2   :  { %9789 = vst [vmem:[#allocation23_spill] sm:$0xff] %v7208_v4  ;;  %v7210_v59 = vpop.xlane.xlu0 %2233 }
 0x6e3   :  { %9790 = vst [vmem:[#allocation134_spill] sm:$0xff] %v7210_v59  ;;  %v7212_v56 = vpop.xlane.xlu1 %2071  ;;  %v9797_v59 = vld [vmem:[#allocation52_spill] sm:$0xff] }
 0x6e4   :  { %9791 = vst [vmem:[#allocation161_spill] sm:$0xff] %v7212_v56  ;;  %v2262_v56 = vsel %vm77_vm0, %v9797_v59, 0.0 }
 0x6e6   :  { %2254 = vadd.xlane.f32.xlu2 %v2253_v42  ;;  %v9798_v42 = vld [vmem:[#allocation138_spill] sm:$0xff] }
 0x6e7   :  { %2368 = vadd.xlane.f32.xlu0 %v2367_v17  ;;  %v2256_v54 = vsel %vm77_vm0, %v9798_v42, 0.0 }
 0x6e8   :  { %2248 = vadd.xlane.f32.xlu1 %v2247_v32 }
 0x6e9   :  { %v7220_v33 = vpop.xlane.xlu2 %2081 }
 0x6ea   :  { %9794 = vst [vmem:[#allocation20_spill] sm:$0xff] %v7220_v33  ;;  %v7222_v8 = vpop.xlane.xlu0 %2242 }
 0x6eb   :  { %9795 = vst [vmem:[#allocation136_spill] sm:$0xff] %v7222_v8  ;;  %v7224_v4 = vpop.xlane.xlu1 %2077  ;;  %v2271_v8 = vsel %vm77_vm0, %v9802_v37, 0.0 }
 0x6ec   :  { %9796 = vst [vmem:[#allocation162_spill] sm:$0xff] %v7224_v4  ;;  %v9803_v4 = vld [vmem:[#allocation140_spill] sm:$0xff] }
 0x6ee   :  { %2263 = vadd.xlane.f32.xlu2 %v2262_v56  ;;  %v2265_v56 = vsel %vm77_vm0, %v9803_v4, 0.0 }
 0x6ef   :  { %2375 = vadd.xlane.f32.xlu0 %v9758_v41 }
 0x6f0   :  { %2257 = vadd.xlane.f32.xlu1 %v2256_v54 }
 0x6f1   :  { %v7231_v17 = vpop.xlane.xlu2 %2087 }
 0x6f2   :  { %9799 = vst [vmem:[#allocation52_spill] sm:$0xff] %v7231_v17  ;;  %v7233_v10 = vpop.xlane.xlu0 %2251  ;;  %v9807_v17 = vld [vmem:[#allocation24_spill] sm:$0xff] }
 0x6f3   :  { %9800 = vst [vmem:[#allocation138_spill] sm:$0xff] %v7233_v10  ;;  %v7235_v32 = vpop.xlane.xlu1 %2083  ;;  %v2280_v10 = vsel %vm77_vm0, %v9807_v17, 0.0 }
 0x6f4   :  { %9801 = vst [vmem:[#allocation163_spill] sm:$0xff] %v7235_v32  ;;  %v9808_v32 = vld [vmem:[#allocation142_spill] sm:$0xff] }
 0x6f6   :  { %2272 = vadd.xlane.f32.xlu2 %v2271_v8  ;;  %v2274_v8 = vsel %vm77_vm0, %v9808_v32, 0.0 }
 0x6f7   :  { %2381 = vadd.xlane.f32.xlu0 %v9763_v47 }
 0x6f8   :  { %2266 = vadd.xlane.f32.xlu1 %v2265_v56 }
 0x6f9   :  { %v7242_v41 = vpop.xlane.xlu2 %2093 }
 0x6fa   :  { %9804 = vst [vmem:[#allocation22_spill] sm:$0xff] %v7242_v41  ;;  %v7244_v22 = vpop.xlane.xlu0 %2260  ;;  %v9812_v41 = vld [vmem:[#allocation50_spill] sm:$0xff] }
 0x6fb   :  { %9805 = vst [vmem:[#allocation140_spill] sm:$0xff] %v7244_v22  ;;  %v7246_v54 = vpop.xlane.xlu1 %2089  ;;  %v2289_v22 = vsel %vm77_vm0, %v9812_v41, 0.0 }
 0x6fc   :  { %9806 = vst [vmem:[#allocation164_spill] sm:$0xff] %v7246_v54  ;;  %v9813_v54 = vld [vmem:[#allocation144_spill] sm:$0xff] }
 0x6fe   :  { %2281 = vadd.xlane.f32.xlu2 %v2280_v10  ;;  %v2283_v10 = vsel %vm77_vm0, %v9813_v54, 0.0 }
 0x6ff   :  { %2387 = vadd.xlane.f32.xlu0 %v9768_v14 }
 0x700   :  { %2275 = vadd.xlane.f32.xlu1 %v2274_v8 }
 0x701   :  { %v7253_v47 = vpop.xlane.xlu2 %2099 }
 0x702   :  { %9809 = vst [vmem:[#allocation24_spill] sm:$0xff] %v7253_v47  ;;  %v7255_v33 = vpop.xlane.xlu0 %2269  ;;  %v9817_v47 = vld [vmem:[#allocation26_spill] sm:$0xff] }
 0x703   :  { %9810 = vst [vmem:[#allocation142_spill] sm:$0xff] %v7255_v33  ;;  %v7257_v56 = vpop.xlane.xlu1 %2095  ;;  %v2298_v33 = vsel %vm77_vm0, %v9817_v47, 0.0 }
 0x704   :  { %9811 = vst [vmem:[#allocation165_spill] sm:$0xff] %v7257_v56  ;;  %v9818_v56 = vld [vmem:[#allocation146_spill] sm:$0xff] }
 0x706   :  { %2290 = vadd.xlane.f32.xlu2 %v2289_v22  ;;  %v2292_v22 = vsel %vm77_vm0, %v9818_v56, 0.0 }
 0x707   :  { %2393 = vadd.xlane.f32.xlu0 %v9773_v55 }
 0x708   :  { %2284 = vadd.xlane.f32.xlu1 %v2283_v10 }
 0x709   :  { %v7264_v14 = vpop.xlane.xlu2 %2105 }
 0x70a   :  { %9814 = vst [vmem:[#allocation50_spill] sm:$0xff] %v7264_v14  ;;  %v7266_v44 = vpop.xlane.xlu0 %2278  ;;  %v9822_v14 = vld [vmem:[#allocation118_spill] sm:$0xff] }
 0x70b   :  { %9815 = vst [vmem:[#allocation144_spill] sm:$0xff] %v7266_v44  ;;  %v7268_v8 = vpop.xlane.xlu1 %2101  ;;  %v2307_v44 = vsel %vm77_vm0, %v9822_v14, 0.0 }
 0x70c   :  { %9816 = vst [vmem:[#allocation166_spill] sm:$0xff] %v7268_v8  ;;  %v9823_v8 = vld [vmem:[#allocation148_spill] sm:$0xff] }
 0x70e   :  { %2299 = vadd.xlane.f32.xlu2 %v2298_v33  ;;  %v2301_v33 = vsel %vm77_vm0, %v9823_v8, 0.0 }
 0x70f   :  { %2399 = vadd.xlane.f32.xlu0 %v9778_v51 }
 0x710   :  { %2293 = vadd.xlane.f32.xlu1 %v2292_v22  ;;  %v2316_v22 = vsel %vm77_vm0, %v6738_v36, 0.0 }
 0x711   :  { %v7275_v55 = vpop.xlane.xlu2 %2111 }
 0x712   :  { %9819 = vst [vmem:[#allocation26_spill] sm:$0xff] %v7275_v55  ;;  %v7277_v58 = vpop.xlane.xlu0 %2287 }
 0x713   :  { %9820 = vst [vmem:[#allocation146_spill] sm:$0xff] %v7277_v58  ;;  %v7279_v10 = vpop.xlane.xlu1 %2107 }
 0x714   :  { %9821 = vst [vmem:[#allocation167_spill] sm:$0xff] %v7279_v10  ;;  %v9826_v10 = vld [vmem:[#allocation150_spill] sm:$0xff] }
 0x716   :  { %2308 = vadd.xlane.f32.xlu2 %v2307_v44  ;;  %v2310_v44 = vsel %vm77_vm0, %v9826_v10, 0.0 }
 0x717   :  { %2405 = vadd.xlane.f32.xlu0 %v9783_v5 }
 0x718   :  { %2302 = vadd.xlane.f32.xlu1 %v2301_v33  ;;  %v2325_v33 = vsel %vm77_vm0, %v6771_v46, 0.0 }
 0x719   :  { %v7286_v51 = vpop.xlane.xlu2 %2182 }
 0x71a   :  { %v7288_v20 = vpop.xlane.xlu0 %2296 }
 0x71b   :  { %9824 = vst [vmem:[#allocation118_spill] sm:$0xff] %v7288_v20  ;;  %v7292_v55 = vpop.xlane.xlu1 %2113  ;;  %v9828_v20 = vld [vmem:[#allocation152_spill] sm:$0xff] }
 0x71c   :  { %9825 = vst [vmem:[#allocation148_spill] sm:$0xff] %v7292_v55  ;;  %v2319_v55 = vsel %vm77_vm0, %v9828_v20, 0.0 }
 0x71e   :  { %2317 = vadd.xlane.f32.xlu2 %v2316_v22 }
 0x71f   :  { %2411 = vadd.xlane.f32.xlu0 %v9788_v12 }
 0x720   :  { %2311 = vadd.xlane.f32.xlu1 %v2310_v44  ;;  %v2334_v44 = vsel %vm77_vm0, %v6806_v57, 0.0 }
 0x721   :  { %v7297_v5 = vpop.xlane.xlu2 %2191 }
 0x722   :  { %v7299_v58 = vpop.xlane.xlu0 %2305 }
 0x723   :  { %9827 = vst [vmem:[#allocation150_spill] sm:$0xff] %v7299_v58  ;;  %v7306_v22 = vpop.xlane.xlu1 %2185  ;;  %v9832_v58 = vld [vmem:[#allocation154_spill] sm:$0xff] }
 0x724   :  { %9829 = vst [vmem:[#allocation152_spill] sm:$0xff] %v7306_v22 }
 0x726   :  { %2326 = vadd.xlane.f32.xlu2 %v2325_v33  ;;  %v2328_v33 = vsel %vm77_vm0, %v9832_v58, 0.0 }
 0x727   :  { %2417 = vadd.xlane.f32.xlu0 %v9793_v18 }
 0x728   :  { %2320 = vadd.xlane.f32.xlu1 %v2319_v55  ;;  %v2343_v55 = vsel %vm77_vm0, %v6841_v26, 0.0 }
 0x729   :  { %v7308_v12 = vpop.xlane.xlu2 %2200 }
 0x72a   :  { %9830 = vst [vmem:[#allocation168_spill] sm:$0xff] %v7308_v12  ;;  %v7310_v9 = vpop.xlane.xlu0 %2314 }
 0x72b   :  { %9831 = vst [vmem:[#allocation169_spill] sm:$0xff] %v7310_v9  ;;  %v7319_v48 = vpop.xlane.xlu1 %2194  ;;  %v9836_v9 = vld [vmem:[#allocation122_spill] sm:$0xff] }
 0x72c   :  { %9834 = vst [vmem:[#allocation170_spill] sm:$0xff] %v7319_v48  ;;  %v2352_v48 = vsel %vm77_vm0, %v6872_v16, 0.0 }
 0x72e   :  { %2335 = vadd.xlane.f32.xlu2 %v2334_v44  ;;  %v2337_v44 = vsel %vm77_vm0, %v9836_v9, 0.0 }
 0x72f   :  { %2423 = vadd.xlane.f32.xlu0 %v9798_v42 }
 0x730   :  { %2329 = vadd.xlane.f32.xlu1 %v2328_v33 }
 0x731   :  { %v7317_v18 = vpop.xlane.xlu2 %2209 }
 0x732   :  { %9833 = vst [vmem:[#allocation154_spill] sm:$0xff] %v7317_v18  ;;  %v7321_v22 = vpop.xlane.xlu0 %2323 }
 0x733   :  { %9835 = vst [vmem:[#allocation171_spill] sm:$0xff] %v7321_v22  ;;  %v7332_v33 = vpop.xlane.xlu1 %2203  ;;  %v9840_v22 = vld [vmem:[#allocation72_spill] sm:$0xff] }
 0x734   :  { %9839 = vst [vmem:[#allocation173_spill] sm:$0xff] %v7332_v33  ;;  %v9843_v33 = vld [vmem:[#allocation64_spill] sm:$0xff] }
 0x736   :  { %2344 = vadd.xlane.f32.xlu2 %v2343_v55  ;;  %v2346_v55 = vsel %vm77_vm0, %v9840_v22, 0.0 }
 0x737   :  { %2429 = vadd.xlane.f32.xlu0 %v9803_v4 }
 0x738   :  { %2338 = vadd.xlane.f32.xlu1 %v2337_v44  ;;  %v2361_v44 = vsel %vm77_vm0, %v6893_v3, 0.0 }
 0x739   :  { %v7328_v42 = vpop.xlane.xlu2 %2218 }
 0x73a   :  { %9837 = vst [vmem:[#allocation122_spill] sm:$0xff] %v7328_v42  ;;  %v7330_v12 = vpop.xlane.xlu0 %2332 }
 0x73b   :  { %9838 = vst [vmem:[#allocation172_spill] sm:$0xff] %v7330_v12  ;;  %v7345_v12 = vpop.xlane.xlu1 %2212 }
 0x73e   :  { %2353 = vadd.xlane.f32.xlu2 %v2352_v48  ;;  %v2355_v48 = vsel %vm77_vm0, %v9843_v33, 0.0 }
 0x73f   :  { %2435 = vadd.xlane.f32.xlu0 %v9808_v32 }
 0x740   :  { %2347 = vadd.xlane.f32.xlu1 %v2346_v55  ;;  %v2370_v55 = vsel %vm77_vm0, %v6911_v63, 0.0 }
 0x741   :  { %v7339_v4 = vpop.xlane.xlu2 %2227 }
 0x742   :  { %9841 = vst [vmem:[#allocation72_spill] sm:$0xff] %v7339_v4  ;;  %v7341_v18 = vpop.xlane.xlu0 %2341 }
 0x743   :  { %9842 = vst [vmem:[#allocation174_spill] sm:$0xff] %v7341_v18  ;;  %v9846_v18 = vld [vmem:[#allocation66_spill] sm:$0xff] }
 0x744   :  { %v2364_v4 = vsel %vm77_vm0, %v9846_v18, 0.0 }
 0x746   :  { %2362 = vadd.xlane.f32.xlu2 %v2361_v44  ;;  %v7359_v44 = vpop.xlane.xlu1 %2221 }
 0x747   :  { %2441 = vadd.xlane.f32.xlu0 %v9813_v54 }
 0x748   :  { %2356 = vadd.xlane.f32.xlu1 %v2355_v48 }
 0x749   :  { %v7350_v32 = vpop.xlane.xlu2 %2236 }
 0x74a   :  { %9844 = vst [vmem:[#allocation64_spill] sm:$0xff] %v7350_v32  ;;  %v7352_v42 = vpop.xlane.xlu0 %2350 }
 0x74b   :  { %9845 = vst [vmem:[#allocation175_spill] sm:$0xff] %v7352_v42  ;;  %v9908_v42 = vld [vmem:[#allocation16_spill] sm:$0xff] }
 0x74e   :  { %2371 = vadd.xlane.f32.xlu2 %v2370_v55  ;;  %v7370_v55 = vpop.xlane.xlu1 %2230 }
 0x74f   :  { %2447 = vadd.xlane.f32.xlu0 %v9818_v56  ;;  %9849 = vst [vmem:[#allocation177_spill] sm:$0xff] %v7370_v55 }
 0x750   :  { %2365 = vadd.xlane.f32.xlu1 %v2364_v4 }
 0x751   :  { %v7361_v54 = vpop.xlane.xlu2 %2245 }
 0x752   :  { %9847 = vst [vmem:[#allocation66_spill] sm:$0xff] %v7361_v54  ;;  %v7363_v30 = vpop.xlane.xlu0 %2359 }
 0x753   :  { %9848 = vst [vmem:[#allocation176_spill] sm:$0xff] %v7363_v30  ;;  %v9896_v30 = vld [vmem:[#allocation14_spill] sm:$0xff] }
 0x756   :  { %2377 = vadd.xlane.f32.xlu2 %v9703_v40  ;;  %v7381_v40 = vpop.xlane.xlu1 %2239 }
 0x757   :  { %2453 = vadd.xlane.f32.xlu0 %v9823_v8  ;;  %9852 = vst [vmem:[#allocation180_spill] sm:$0xff] %v7381_v40 }
 0x758   :  { %2373 = vadd.xlane.f32.xlu1 %v9753_v35 }
 0x759   :  { %v7368_v48 = vpop.xlane.xlu2 %2254 }
 0x75a   :  { %v7372_v56 = vpop.xlane.xlu0 %2368 }
 0x75b   :  { %9850 = vst [vmem:[#allocation178_spill] sm:$0xff] %v7372_v56 }
 0x75e   :  { %2383 = vadd.xlane.f32.xlu2 %v9708_v61  ;;  %v7390_v61 = vpop.xlane.xlu1 %2248 }
 0x75f   :  { %2459 = vadd.xlane.f32.xlu0 %v9826_v10  ;;  %9855 = vst [vmem:[#allocation183_spill] sm:$0xff] %v7390_v61 }
 0x760   :  { %2379 = vadd.xlane.f32.xlu1 %v9757_v13 }
 0x761   :  { %v7377_v4 = vpop.xlane.xlu2 %2263 }
 0x762   :  { %9851 = vst [vmem:[#allocation179_spill] sm:$0xff] %v7377_v4  ;;  %v7379_v54 = vpop.xlane.xlu0 %2375 }
 0x766   :  { %2389 = vadd.xlane.f32.xlu2 %v9713_v53  ;;  %v7401_v53 = vpop.xlane.xlu1 %2257 }
 0x767   :  { %2465 = vadd.xlane.f32.xlu0 %v9828_v20 }
 0x768   :  { %2385 = vadd.xlane.f32.xlu1 %v9762_v50 }
 0x769   :  { %v7386_v35 = vpop.xlane.xlu2 %2272 }
 0x76a   :  { %9853 = vst [vmem:[#allocation181_spill] sm:$0xff] %v7386_v35  ;;  %v7388_v8 = vpop.xlane.xlu0 %2381 }
 0x76b   :  { %9854 = vst [vmem:[#allocation182_spill] sm:$0xff] %v7388_v8 }
 0x76e   :  { %2395 = vadd.xlane.f32.xlu2 %v9718_v15  ;;  %v7413_v15 = vpop.xlane.xlu1 %2266 }
 0x76f   :  { %2471 = vadd.xlane.f32.xlu0 %v9832_v58 }
 0x770   :  { %2391 = vadd.xlane.f32.xlu1 %v9767_v0 }
 0x771   :  { %v7395_v13 = vpop.xlane.xlu2 %2281 }
 0x772   :  { %9856 = vst [vmem:[#allocation184_spill] sm:$0xff] %v7395_v13  ;;  %v7397_v10 = vpop.xlane.xlu0 %2387 }
 0x773   :  { %9857 = vst [vmem:[#allocation185_spill] sm:$0xff] %v7397_v10 }
 0x776   :  { %2401 = vadd.xlane.f32.xlu2 %v6348_v34 }
 0x777   :  { %2477 = vadd.xlane.f32.xlu0 %v9836_v9 }
 0x778   :  { %2397 = vadd.xlane.f32.xlu1 %v9772_v11 }
 0x779   :  { %v7404_v50 = vpop.xlane.xlu2 %2290 }
 0x77a   :  { %9858 = vst [vmem:[#allocation186_spill] sm:$0xff] %v7404_v50  ;;  %v7406_v20 = vpop.xlane.xlu0 %2393 }
 0x77e   :  { %2407 = vadd.xlane.f32.xlu2 %v6385_v27  ;;  %v7424_v27 = vpop.xlane.xlu1 %2275 }
 0x77f   :  { %2483 = vadd.xlane.f32.xlu0 %v9840_v22 }
 0x780   :  { %2403 = vadd.xlane.f32.xlu1 %v9777_v19 }
 0x781   :  { %v7411_v58 = vpop.xlane.xlu2 %2299 }
 0x782   :  { %9859 = vst [vmem:[#allocation187_spill] sm:$0xff] %v7411_v58  ;;  %v7415_v34 = vpop.xlane.xlu0 %2399 }
 0x786   :  { %2413 = vadd.xlane.f32.xlu2 %v6427_v62  ;;  %v7433_v62 = vpop.xlane.xlu1 %2284 }
 0x787   :  { %2489 = vadd.xlane.f32.xlu0 %v9843_v33 }
 0x788   :  { %2409 = vadd.xlane.f32.xlu1 %v9782_v23 }
 0x789   :  { %v7420_v9 = vpop.xlane.xlu2 %2308 }
 0x78a   :  { %9860 = vst [vmem:[#allocation188_spill] sm:$0xff] %v7420_v9  ;;  %v7422_v11 = vpop.xlane.xlu0 %2405 }
 0x78b   :  { %9861 = vst [vmem:[#allocation189_spill] sm:$0xff] %v7422_v11  ;;  %v7734_v11 = vstv %s7701_s16 }
 0x78e   :  { %2419 = vadd.xlane.f32.xlu2 %v6468_v31  ;;  %v7442_v31 = vpop.xlane.xlu1 %2293 }
 0x78f   :  { %2495 = vadd.xlane.f32.xlu0 %v9846_v18 }
 0x790   :  { %2415 = vadd.xlane.f32.xlu1 %v9787_v21 }
 0x791   :  { %v7429_v19 = vpop.xlane.xlu2 %2317 }
 0x792   :  { %9862 = vst [vmem:[#allocation190_spill] sm:$0xff] %v7429_v19  ;;  %v7431_v0 = vpop.xlane.xlu0 %2411 }
 0x793   :  { %9863 = vst [vmem:[#allocation191_spill] sm:$0xff] %v7431_v0 }
 0x796   :  { %2425 = vadd.xlane.f32.xlu2 %v6506_v60  ;;  %v4950_v60 = vld [vmem:[%s9066_s1] sm:$0xff]  ;;  %s7674_s1 = sld [smem:[#allocation2 + $0x6]] }
 0x798   :  { %2421 = vadd.xlane.f32.xlu1 %v9792_v29 }
 0x799   :  { %v7437_v23 = vpop.xlane.xlu2 %2326 }
 0x79a   :  { %9864 = vst [vmem:[#allocation192_spill] sm:$0xff] %v7437_v23  ;;  %v7439_v22 = vpop.xlane.xlu0 %2417 }
 0x79b   :  { %9865 = vst [vmem:[#allocation193_spill] sm:$0xff] %v7439_v22 }
 0x79e   :  { %2431 = vadd.xlane.f32.xlu2 %v6538_v52  ;;  %v7457_v52 = vpop.xlane.xlu1 %2302 }
 0x7a0   :  { %2427 = vadd.xlane.f32.xlu1 %v9797_v59 }
 0x7a1   :  { %v7445_v21 = vpop.xlane.xlu2 %2335 }
 0x7a2   :  { %9866 = vst [vmem:[#allocation194_spill] sm:$0xff] %v7445_v21  ;;  %v7447_v18 = vpop.xlane.xlu0 %2423 }
 0x7a3   :  { %3150 = vrot.lane.b32.xlu0 %v4950_v60, %s4992_s23  ;;  %s4276_s23 = sshll.u32 %s4995_s22, 4  ;;  %s4277_s23 = int_to_ptr.vmem [resolvable:$true] %s4276_s23 }
 0x7a6   :  { %2437 = vadd.xlane.f32.xlu2 %v6570_v7  ;;  %v7467_v19 = vpop.xlane.xlu1 %2311 }
 0x7a8   :  { %2433 = vadd.xlane.f32.xlu1 %v9802_v37 }
 0x7a9   :  { %v7455_v29 = vpop.xlane.xlu2 %2344 }
 0x7aa   :  { %9867 = vst [vmem:[#allocation195_spill] sm:$0xff] %v7455_v29  ;;  %v7459_v33 = vpop.xlane.xlu0 %2429 }
 0x7ae   :  { %2443 = vadd.xlane.f32.xlu2 %v6600_v2  ;;  %v7475_v56 = vpop.xlane.xlu1 %2320 }
 0x7b0   :  { %2439 = vadd.xlane.f32.xlu1 %v9807_v17 }
 0x7b1   :  { %v7463_v59 = vpop.xlane.xlu2 %2353 }
 0x7b2   :  { %9868 = vst [vmem:[#allocation196_spill] sm:$0xff] %v7463_v59  ;;  %v7465_v58 = vpop.xlane.xlu0 %2435 }
 0x7b6   :  { %2449 = vadd.xlane.f32.xlu2 %v6629_v6  ;;  %v7484_v59 = vpop.xlane.xlu1 %2329 }
 0x7b7   :  { %9871 = vst [vmem:[#allocation199_spill] sm:$0xff] %v7484_v59  ;;  %v9895_v59 = vld [vmem:[#allocation10_spill] sm:$0xff] }
 0x7b8   :  { %2445 = vadd.xlane.f32.xlu1 %v9812_v41 }
 0x7b9   :  { %v7471_v7 = vpop.xlane.xlu2 %2362 }
 0x7ba   :  { %9869 = vst [vmem:[#allocation197_spill] sm:$0xff] %v7471_v7  ;;  %v7473_v37 = vpop.xlane.xlu0 %2441 }
 0x7be   :  { %2455 = vadd.xlane.f32.xlu2 %v6662_v49  ;;  %v7493_v49 = vpop.xlane.xlu1 %2338 }
 0x7bf   :  { %9873 = vst [vmem:[#allocation201_spill] sm:$0xff] %v7493_v49 }
 0x7c0   :  { %2451 = vadd.xlane.f32.xlu1 %v9817_v47 }
 0x7c1   :  { %v7479_v2 = vpop.xlane.xlu2 %2371 }
 0x7c2   :  { %9870 = vst [vmem:[#allocation198_spill] sm:$0xff] %v7479_v2  ;;  %v7481_v17 = vpop.xlane.xlu0 %2447 }
 0x7c6   :  { %2461 = vadd.xlane.f32.xlu2 %v6695_v38 }
 0x7c8   :  { %2457 = vadd.xlane.f32.xlu1 %v9822_v14  ;;  %v7503_v14 = vpop.xlane.xlu1 %2347 }
 0x7c9   :  { %v7487_v6 = vpop.xlane.xlu2 %2377  ;;  %9875 = vst [vmem:[#allocation203_spill] sm:$0xff] %v7503_v14 }
 0x7ca   :  { %9872 = vst [vmem:[#allocation200_spill] sm:$0xff] %v7487_v6  ;;  %v7489_v41 = vpop.xlane.xlu0 %2453  ;;  %v95_v6 = vstv %s7674_s1 }
 0x7ce   :  { %2467 = vadd.xlane.f32.xlu2 %v6731_v43 }
 0x7d0   :  { %2463 = vadd.xlane.f32.xlu1 %v6738_v36  ;;  %v7511_v36 = vpop.xlane.xlu1 %2356 }
 0x7d1   :  { %v7497_v2 = vpop.xlane.xlu2 %2383  ;;  %9878 = vst [vmem:[#allocation206_spill] sm:$0xff] %v7511_v36 }
 0x7d2   :  { %v7495_v47 = vpop.xlane.xlu0 %2459  ;;  %9874 = vst [vmem:[#allocation202_spill] sm:$0xff] %v7497_v2 }
 0x7d6   :  { %2473 = vadd.xlane.f32.xlu2 %v6765_v39 }
 0x7d8   :  { %2469 = vadd.xlane.f32.xlu1 %v6771_v46  ;;  %v7520_v46 = vpop.xlane.xlu1 %2365 }
 0x7d9   :  { %v7505_v7 = vpop.xlane.xlu2 %2389  ;;  %9881 = vst [vmem:[#allocation209_spill] sm:$0xff] %v7520_v46 }
 0x7da   :  { %v7501_v38 = vpop.xlane.xlu0 %2465  ;;  %9876 = vst [vmem:[#allocation204_spill] sm:$0xff] %v7505_v7 }
 0x7de   :  { %2479 = vadd.xlane.f32.xlu2 %v6800_v1 }
 0x7e0   :  { %2475 = vadd.xlane.f32.xlu1 %v6806_v57 }
 0x7e1   :  { %v7514_v10 = vpop.xlane.xlu2 %2395 }
 0x7e2   :  { %v7509_v43 = vpop.xlane.xlu0 %2471  ;;  %9879 = vst [vmem:[#allocation207_spill] sm:$0xff] %v7514_v10 }
 0x7e3   :  { %9877 = vst [vmem:[#allocation205_spill] sm:$0xff] %v7509_v43 }
 0x7e6   :  { %2485 = vadd.xlane.f32.xlu2 %v6835_v45  ;;  %v7529_v45 = vpop.xlane.xlu1 %2373 }
 0x7e7   :  { %v2501_v40 = vsub.f32 %v7529_v45, %v7286_v51 }
 0x7e8   :  { %2481 = vadd.xlane.f32.xlu1 %v6841_v26 }
 0x7e9   :  { %v7523_v1 = vpop.xlane.xlu2 %2401 }
 0x7ea   :  { %v7518_v39 = vpop.xlane.xlu0 %2477  ;;  %9882 = vst [vmem:[#allocation210_spill] sm:$0xff] %v7523_v1 }
 0x7eb   :  { %9880 = vst [vmem:[#allocation208_spill] sm:$0xff] %v7518_v39 }
 0x7ee   :  { %2491 = vadd.xlane.f32.xlu2 %v6866_v25  ;;  %v7536_v25 = vpop.xlane.xlu1 %2379 }
 0x7f0   :  { %2487 = vadd.xlane.f32.xlu1 %v6872_v16 }
 0x7f1   :  { %v7531_v36 = vpop.xlane.xlu2 %2407 }
 0x7f2   :  { %v7527_v57 = vpop.xlane.xlu0 %2483  ;;  %9884 = vst [vmem:[#allocation212_spill] sm:$0xff] %v7531_v36 }
 0x7f3   :  { %9883 = vst [vmem:[#allocation211_spill] sm:$0xff] %v7527_v57 }
 0x7f6   :  { %2497 = vadd.xlane.f32.xlu2 %v6889_v24  ;;  %v7542_v9 = vpop.xlane.xlu1 %2385 }
 0x7f8   :  { %2493 = vadd.xlane.f32.xlu1 %v6893_v3 }
 0x7f9   :  { %v7538_v46 = vpop.xlane.xlu2 %2413 }
 0x7fa   :  { %v7534_v26 = vpop.xlane.xlu0 %2489  ;;  %9886 = vst [vmem:[#allocation214_spill] sm:$0xff] %v7538_v46  ;;  %v9902_v46 = vld [vmem:[#allocation8_spill] sm:$0xff] }
 0x7fb   :  { %9885 = vst [vmem:[#allocation213_spill] sm:$0xff] %v7534_v26 }
 0x7fe   :  { %v7548_v14 = vpop.xlane.xlu1 %2391 }
 0x800   :  { %2499 = vadd.xlane.f32.xlu1 %v6911_v63 }
 0x801   :  { %v7544_v24 = vpop.xlane.xlu2 %2419 }
 0x802   :  { %v7540_v16 = vpop.xlane.xlu0 %2495  ;;  %9888 = vst [vmem:[#allocation216_spill] sm:$0xff] %v7544_v24  ;;  %v9892_v24 = vld [vmem:[#allocation11_spill] sm:$0xff] }
 0x803   :  { %9887 = vst [vmem:[#allocation215_spill] sm:$0xff] %v7540_v16 }
 0x806   :  { %v7561_v16 = vpop.xlane.xlu1 %2397 }
 0x809   :  { %v7556_v26 = vpop.xlane.xlu2 %2425 }
 0x80a   :  { %9889 = vst [vmem:[#allocation217_spill] sm:$0xff] %v7556_v26  ;;  %v9901_v26 = vld [vmem:[#allocation15_spill] sm:$0xff] }
 0x80e   :  { %v7571_v61 = vpop.xlane.xlu1 %2403 }
 0x811   :  { %v7566_v22 = vpop.xlane.xlu2 %2431 }
 0x815   :  { %v3151_v3 = vpop.permute.xlu0 %3150 }
 0x816   :  { %v7546_v57 = vadd.f32 %v4950_v60, %v3151_v3  ;;  %v9890_v60 = vld [vmem:[#allocation12_spill] sm:$0xff]  ;;  %v9891_v3 = vld [vmem:[#allocation13_spill] sm:$0xff]  ;;  %v7578_v4 = vpop.xlane.xlu1 %2409 }
 0x817   :  { %9893 = vst [vmem:[#allocation12_spill] sm:$0xff] %v7566_v22 }
 0x818   :  { %v7551_v29 = vperm.slane %v7546_v57, 2  ;;  %v7554_v63 = vperm.slane %v7546_v57, 0  ;;  %9894 = vst [vmem:[#allocation13_spill] sm:$0xff] %v7571_v61  ;;  %v7588_v2 = vperm.slane %v7546_v57, 3 }
 0x819   :  { %v7573_v43 = vpop.xlane.xlu2 %2437  ;;  %9897 = vst [vmem:[#allocation11_spill] sm:$0xff] %v7578_v4 }
 0x81a   :  { %3258 = vperm.xlu0 %4492, %v7551_v29   ;;  %3166 = vperm.xlu1 %4494, %v7554_v63  }
 0x81b   :  { %3160 = vperm.xlu2 %4493, %v7554_v63  }
 0x81e   :  { %v7585_v22 = vpop.xlane.xlu1 %2415 }
 0x81f   :  { %9899 = vst [vmem:[#allocation14_spill] sm:$0xff] %v7585_v22 }
 0x821   :  { %v7580_v1 = vpop.xlane.xlu2 %2443 }
 0x822   :  { %4510 = vset.pattern.permute.xlu0 %v9890_v60  ;;  %4496 = vset.pattern.permute.xlu1 %v9891_v3  ;;  %9898 = vst [vmem:[#allocation10_spill] sm:$0xff] %v7580_v1  ;;  %v3204_v1 = vperm.slane %v7546_v57, 1 }
 0x823   :  { %4495 = vset.pattern.permute.xlu2 %v9892_v24 }
 0x826   :  { %v7596_v35 = vpop.xlane.xlu1 %2421 }
 0x829   :  { %v7590_v21 = vpop.xlane.xlu2 %2449 }
 0x82a   :  { %3288 = vperm.xlu0 %4510, %v7551_v29   ;;  %3184 = vperm.xlu1 %4496, %v7554_v63   ;;  %9900 = vst [vmem:[#allocation218_spill] sm:$0xff] %v7590_v21 }
 0x82b   :  { %3178 = vperm.xlu2 %4495, %v7554_v63  }
 0x82e   :  { %v7604_v21 = vpop.xlane.xlu1 %2427 }
 0x82f   :  { %9904 = vst [vmem:[#allocation8_spill] sm:$0xff] %v7604_v21 }
 0x831   :  { %v7599_v22 = vpop.xlane.xlu2 %2455 }
 0x832   :  { %4511 = vset.pattern.permute.xlu0 %v9895_v59  ;;  %4498 = vset.pattern.permute.xlu1 %v9896_v30  ;;  %9903 = vst [vmem:[#allocation15_spill] sm:$0xff] %v7599_v22  ;;  %v7614_v22 = vperm.slane %v7546_v57, 4 }
 0x833   :  { %4497 = vset.pattern.permute.xlu2 %v9890_v60 }
 0x836   :  { %v7609_v49 = vpop.xlane.xlu1 %2433 }
 0x837   :  { %9906 = vst [vmem:[#allocation220_spill] sm:$0xff] %v7609_v49  ;;  %v7625_v49 = vperm.slane %v7546_v57, 5 }
 0x839   :  { %v7606_v39 = vpop.xlane.xlu2 %2461 }
 0x83a   :  { %3172 = vperm.xlu0 %4511, %v7554_v63   ;;  %3202 = vperm.xlu1 %4498, %v7554_v63   ;;  %9905 = vst [vmem:[#allocation219_spill] sm:$0xff] %v7606_v39 }
 0x83b   :  { %3190 = vperm.xlu2 %4497, %v7554_v63  }
 0x83e   :  { %v7619_v21 = vpop.xlane.xlu1 %2439 }
 0x83f   :  { %9909 = vst [vmem:[#allocation16_spill] sm:$0xff] %v7619_v21 }
 0x841   :  { %v7611_v13 = vpop.xlane.xlu2 %2467 }
 0x842   :  { %3319 = vperm.xlu0 %4511, %v7588_v2   ;;  %4500 = vset.pattern.permute.xlu1 %v9901_v26  ;;  %9907 = vst [vmem:[#allocation221_spill] sm:$0xff] %v7611_v13 }
 0x843   :  { %4499 = vset.pattern.permute.xlu2 %v9902_v46 }
 0x846   :  { %v7627_v13 = vpop.xlane.xlu1 %2445 }
 0x847   :  { %9911 = vst [vmem:[#allocation223_spill] sm:$0xff] %v7627_v13 }
 0x849   :  { %v7621_v39 = vpop.xlane.xlu2 %2473 }
 0x84a   :  { %4520 = vset.pattern.permute.xlu0 %v9896_v30  ;;  %3215 = vperm.xlu1 %4500, %v3204_v1   ;;  %9910 = vst [vmem:[#allocation222_spill] sm:$0xff] %v7621_v39 }
 0x84b   :  { %3209 = vperm.xlu2 %4499, %v3204_v1  }
 0x84e   :  { %v7636_v39 = vpop.xlane.xlu1 %2451 }
 0x84f   :  { %9913 = vst [vmem:[#allocation225_spill] sm:$0xff] %v7636_v39 }
 0x851   :  { %v7632_v8 = vpop.xlane.xlu2 %2479 }
 0x852   :  { %3349 = vperm.xlu0 %4520, %v7588_v2   ;;  %4502 = vset.pattern.permute.xlu1 %v9891_v3  ;;  %9912 = vst [vmem:[#allocation224_spill] sm:$0xff] %v7632_v8  ;;  %v7647_v8 = vperm.slane %v7546_v57, 6 }
 0x853   :  { %4501 = vset.pattern.permute.xlu2 %v9895_v59 }
 0x856   :  { %v7642_v4 = vpop.xlane.xlu1 %2457 }
 0x857   :  { %9915 = vst [vmem:[#allocation227_spill] sm:$0xff] %v7642_v4  ;;  %v9919_v4 = vld [vmem:[#allocation39_spill] sm:$0xff] }
 0x859   :  { %v7638_v21 = vpop.xlane.xlu2 %2485 }
 0x85a   :  { %4525 = vset.pattern.permute.xlu0 %v9891_v3  ;;  %3233 = vperm.xlu1 %4502, %v3204_v1   ;;  %9914 = vst [vmem:[#allocation226_spill] sm:$0xff] %v7638_v21 }
 0x85b   :  { %3221 = vperm.xlu2 %4501, %v3204_v1  }
 0x85e   :  { %v7652_v39 = vpop.xlane.xlu1 %2463 }
 0x85f   :  { %9917 = vst [vmem:[#allocation229_spill] sm:$0xff] %v7652_v39 }
 0x861   :  { %v7644_v32 = vpop.xlane.xlu2 %2491 }
 0x862   :  { %3380 = vperm.xlu0 %4525, %v7614_v22   ;;  %4504 = vset.pattern.permute.xlu1 %v9908_v42  ;;  %9916 = vst [vmem:[#allocation228_spill] sm:$0xff] %v7644_v32  ;;  %v9920_v32 = vld [vmem:[#allocation28_spill] sm:$0xff] }
 0x863   :  { %4503 = vset.pattern.permute.xlu2 %v9890_v60  ;;  %v83_v0 = vsub.f32 %v9920_v32, %v9919_v4  ;;  %v9922_v32 = vld [vmem:[#allocation30_spill] sm:$0xff] }
 0x865   :  { %4686 = vrcp.f32 %v83_v0  ;;  %v9926_v0 = vld [vmem:[#allocation76_spill] sm:$0xff] }
 0x866   :  { %v7666_v36 = vpop.xlane.xlu1 %2469  ;;  %4688 = vrcp.f32 %v2501_v40 }
 0x867   :  { %9921 = vst [vmem:[#allocation39_spill] sm:$0xff] %v7666_v36  ;;  %4690 = vrcp.f32 %v9919_v4  ;;  %v2532_v36 = vsub.f32 %v7465_v58, %v7424_v27 }
 0x868   :  { %4692 = vrcp.f32 %v7286_v51 }
 0x869   :  { %v7657_v21 = vpop.xlane.xlu2 %2497 }
 0x86a   :  { %4530 = vset.pattern.permute.xlu0 %v9901_v26  ;;  %3245 = vperm.xlu1 %4504, %v3204_v1   ;;  %9918 = vst [vmem:[#allocation230_spill] sm:$0xff] %v7657_v21  ;;  %v2511_v21 = vsub.f32 %v7406_v20, %v7345_v12 }
 0x86b   :  { %3239 = vperm.xlu2 %4503, %v3204_v1   ;;  %v4687_v4 = vpop.eup %4686 }
 0x86c   :  { %v4689_v51 = vpop.eup %4688  ;;  %4694 = vrcp.f32 %v2511_v21  ;;  %v2504_v21 = vsub.f32 %v7536_v25, %v7297_v5  ;;  %v104_v25 = vstv %s7694_s0 }
 0x86d   :  { %v4691_v20 = vpop.eup %4690  ;;  %4696 = vrcp.f32 %v7345_v12  ;;  %v98_v12 = vstv %s7689_s13 }
 0x86e   :  { %v7692_v40 = vpop.xlane.xlu1 %2475  ;;  %v93_v61 = vmul.f32 %v4691_v20, %v9922_v32  ;;  %v9929_v20 = vld [vmem:[#allocation94_spill] sm:$0xff]  ;;  %4698 = vrcp.f32 %v2532_v36 }
 0x86f   :  { %9925 = vst [vmem:[#allocation30_spill] sm:$0xff] %v7692_v40  ;;  %v101_v40 = vstv %s7677_s11  ;;  %4700 = vrcp.f32 %v2504_v21 }
 0x870   :  { %v102_v58 = vmul.f32 %v101_v40, %v93_v61  ;;  %4702 = vrcp.f32 %v7297_v5 }
 0x871   :  { %4704 = vrcp.f32 %v7424_v27 }
 0x872   :  { %3411 = vperm.xlu0 %4530, %v7625_v49   ;;  %4506 = vset.pattern.permute.xlu1 %v9901_v26  ;;  %v105_v40 = vadd.f32 %v104_v25, %v102_v58  ;;  %v9934_v25 = vld [vmem:[#allocation124_spill] sm:$0xff] }
 0x873   :  { %4505 = vset.pattern.permute.xlu2 %v9896_v30 }
 0x875   :  { %v7668_v39 = vpop.permute.xlu2 %3160 }
 0x876   :  { %v7726_v7 = vpop.xlane.xlu1 %2481 }
 0x877   :  { %9931 = vst [vmem:[#allocation94_spill] sm:$0xff] %v7726_v7 }
 0x87a   :  { %4531 = vset.pattern.permute.xlu0 %v9892_v24  ;;  %3264 = vperm.xlu1 %4506, %v7551_v29  }
 0x87b   :  { %3251 = vperm.xlu2 %4505, %v3204_v1  }
 0x882   :  { %3227 = vperm.xlu0 %4531, %v3204_v1   ;;  %4508 = vset.pattern.permute.xlu1 %v9892_v24  ;;  %v7655_v1 = vperm.slane %v7546_v57, 7  ;;  %v9923_v57 = vld [vmem:[#allocation33_spill] sm:$0xff] }
 0x883   :  { %4507 = vset.pattern.permute.xlu2 %v9895_v59  ;;  %v89_v45 = vsub.f32 %v9923_v57, %v9922_v32  ;;  %v2117_v57 = vsub.f32 %v6935_v28, %v9926_v0 }
 0x885   :  { %v7683_v13 = vpop.permute.xlu2 %3178  ;;  %v2890_v10 = vmul.f32 %v4689_v51, %v2117_v57 }
 0x88a   :  { %3472 = vperm.xlu0 %4531, %v7647_v8   ;;  %3276 = vperm.xlu1 %4508, %v7551_v29  }
 0x88b   :  { %3270 = vperm.xlu2 %4507, %v7551_v29  }
 0x88c   :  { %v7685_v50 = vpop.permute.xlu0 %3258 }
 0x88d   :  { %9924 = vst [vmem:[#allocation28_spill] sm:$0xff] %v7685_v50  ;;  %v4693_v50 = vpop.eup %4692 }
 0x88e   :  { %v2630_v28 = vmul.f32 %v4693_v50, %v9926_v0  ;;  %v4695_v50 = vpop.eup %4694  ;;  %v9930_v0 = vld [vmem:[#allocation141_spill] sm:$0xff] }
 0x88f   :  { %v2127_v57 = vsub.f32 %v9930_v0, %v9929_v20  ;;  %v9937_v0 = vld [vmem:[#allocation65_spill] sm:$0xff] }
 0x892   :  { %3521 = vperm.xlu0 %4531, %v7655_v1   ;;  %4512 = vset.pattern.permute.xlu1 %v9908_v42 }
 0x893   :  { %4509 = vset.pattern.permute.xlu2 %v9891_v3 }
 0x89a   :  { %4544 = vset.pattern.permute.xlu0 %v9908_v42  ;;  %3294 = vperm.xlu1 %4512, %v7551_v29  }
 0x89b   :  { %3282 = vperm.xlu2 %4509, %v7551_v29  }
 0x89c   :  { %v7713_v32 = vpop.permute.xlu0 %3288 }
 0x89d   :  { %9928 = vst [vmem:[#allocation76_spill] sm:$0xff] %v7713_v32  ;;  %v4697_v32 = vpop.eup %4696 }
 0x89e   :  { %v4699_v5 = vpop.eup %4698 }
 0x8a2   :  { %3196 = vperm.xlu0 %4544, %v7554_v63   ;;  %4514 = vset.pattern.permute.xlu1 %v9902_v46  ;;  %v91_v63 = vmul.f32 %v4687_v4, %v89_v45  ;;  %v7709_v45 = vstv %s4314_s12  ;;  %v7711_v4 = vpop.permute.xlu2 %3190 }
 0x8a3   :  { %4513 = vset.pattern.permute.xlu2 %v9896_v30  ;;  %9927 = vst [vmem:[#allocation33_spill] sm:$0xff] %v7711_v4  ;;  %v2955_v51 = vmul.f32 %v7709_v45, %v2890_v10  ;;  %v7728_v10 = vstv %s4315_s15 }
 0x8a4   :  { %v96_v23 = vmul.f32 %v95_v6, %v91_v63  ;;  %v7720_v6 = vstv %s4312_s14 }
 0x8a5   :  { %v2695_v63 = vmul.f32 %v7720_v6, %v2630_v28  ;;  %v3021_v61 = vadd.f32 %v7728_v10, %v2955_v51  ;;  %v2640_v28 = vmul.f32 %v4697_v32, %v9929_v20  ;;  %v9935_v32 = vld [vmem:[#allocation83_spill] sm:$0xff]  ;;  %v9936_v20 = vld [vmem:[#allocation109_spill] sm:$0xff] }
 0x8a6   :  { %v99_v4 = vadd.f32 %v98_v12, %v96_v23 }
 0x8a7   :  { %v2761_v36 = vadd.f32 %v7734_v11, %v2695_v63 }
 0x8a8   :  { %v7738_v23 = vadd.f32 %v105_v40, %v99_v4  ;;  %v2120_v4 = vsub.f32 %v9935_v32, %v9934_v25  ;;  %v2705_v40 = vmul.f32 %v7720_v6, %v2640_v28  ;;  %v9343_v28 = vmov 0  }
 0x8a9   :  { %v3085_v51 = vadd.f32 %v3021_v61, %v2761_v36 }
 0x8aa   :  { %3441 = vperm.xlu0 %4544, %v7625_v49   ;;  %3307 = vperm.xlu1 %4514, %v7588_v2   ;;  %v7740_v21 = vpop.permute.xlu2 %3209 }
 0x8ab   :  { %3300 = vperm.xlu2 %4513, %v7551_v29   ;;  %v2900_v29 = vmul.f32 %v4695_v50, %v2127_v57  ;;  %9932 = vst [vmem:[#allocation141_spill] sm:$0xff] %v7740_v21  ;;  %v4701_v50 = vpop.eup %4700  ;;  %v2148_v57 = vsub.f32 %v9937_v0, %v9936_v20  ;;  %v3611_v63 = vadd.f32 %v7668_v39, %v3085_v51  ;;  %v7758_v21 = vpop.xlane.xlu1 %2487 }
 0x8ac   :  { %v7742_v12 = vpop.permute.xlu0 %3172  ;;  %v4703_v58 = vpop.eup %4702  ;;  %v2893_v36 = vmul.f32 %v4701_v50, %v2120_v4  ;;  %9938 = vst [vmem:[#allocation124_spill] sm:$0xff] %v7758_v21  ;;  %v2771_v0 = vadd.f32 %v7734_v11, %v2705_v40 }
 0x8ad   :  { %9933 = vst [vmem:[#allocation231_spill] sm:$0xff] %v7742_v12  ;;  %v2965_v27 = vmul.f32 %v7709_v45, %v2900_v29  ;;  %v4705_v7 = vpop.eup %4704  ;;  %v7755_v12 = vperm.slane %v7738_v23, 0  ;;  %v2921_v61 = vmul.f32 %v4699_v5, %v2148_v57  ;;  %v2633_v32 = vmul.f32 %v4703_v58, %v9934_v25 }
 0x8ae   :  { %v2661_v39 = vmul.f32 %v4705_v7, %v9936_v20  ;;  %v2958_v5 = vmul.f32 %v7709_v45, %v2893_v36  ;;  %v7775_v57 = vperm.slane %v7738_v23, 1 }
 0x8af   :  { %v3031_v29 = vadd.f32 %v7728_v10, %v2965_v27  ;;  %v3692_v55 = vadd.f32 %v7755_v12, %v3611_v63  ;;  %v2986_v27 = vmul.f32 %v7709_v45, %v2921_v61  ;;  %v2698_v58 = vmul.f32 %v7720_v6, %v2633_v32 }
 0x8b0   :  { %v2726_v7 = vmul.f32 %v7720_v6, %v2661_v39  ;;  %v3024_v20 = vadd.f32 %v7728_v10, %v2958_v5 }
 0x8b1   :  { %v3095_v50 = vadd.f32 %v3031_v29, %v2771_v0  ;;  %v3052_v63 = vadd.f32 %v7728_v10, %v2986_v27  ;;  %v2764_v40 = vadd.f32 %v7734_v11, %v2698_v58 }
 0x8b2   :  { %3490 = vperm.xlu0 %4544, %v7647_v8   ;;  %4516 = vset.pattern.permute.xlu1 %v9892_v24  ;;  %v2792_v61 = vadd.f32 %v7734_v11, %v2726_v7 }
 0x8b3   :  { %4515 = vset.pattern.permute.xlu2 %v9901_v26  ;;  %v7781_v36 = vpop.xlane.xlu1 %2493  ;;  %v3088_v29 = vadd.f32 %v3024_v20, %v2764_v40 }
 0x8b4   :  { %v7769_v4 = vpop.permute.xlu0 %3319  ;;  %9940 = vst [vmem:[#allocation109_spill] sm:$0xff] %v7781_v36  ;;  %v3116_v32 = vadd.f32 %v3052_v63, %v2792_v61  ;;  %v2526_v61 = vsub.f32 %v7447_v18, %v7401_v53  ;;  %v9955_v36 = vld [vmem:[#allocation122_spill] sm:$0xff] }
 0x8b5   :  { %v3222_v51 = vpop.permute.xlu2 %3221  ;;  %9939 = vst [vmem:[#allocation83_spill] sm:$0xff] %v7769_v4  ;;  %v3614_v39 = vadd.f32 %v7683_v13, %v3088_v29 }
 0x8b6   :  { %v3621_v25 = vadd.f32 %v3222_v51, %v3095_v50  ;;  %4706 = vrcp.f32 %v2526_v61  ;;  %v9953_v61 = vld [vmem:[#allocation77_spill] sm:$0xff] }
 0x8b7   :  { %v3695_v5 = vadd.f32 %v7755_v12, %v3614_v39  ;;  %4708 = vrcp.f32 %v7401_v53  ;;  %v2525_v39 = vsub.f32 %v7596_v35, %v7368_v48  ;;  %v9954_v53 = vld [vmem:[#allocation60_spill] sm:$0xff] }
 0x8ba   :  { %4549 = vset.pattern.permute.xlu0 %v9343_v28  ;;  %3325 = vperm.xlu1 %4516, %v7588_v2  }
 0x8bb   :  { %3313 = vperm.xlu2 %4515, %v7588_v2   ;;  %3833 = vperm.xlu0 %4549, %v3692_v55   ;;  %v3702_v55 = vadd.f32 %v7775_v57, %v3621_v25  ;;  %v7791_v50 = vpop.xlane.xlu1 %2499 }
 0x8bc   :  { %9942 = vst [vmem:[#allocation232_spill] sm:$0xff] %v7791_v50  ;;  %v4707_v28 = vpop.eup %4706  ;;  %v2142_v50 = vsub.f32 %v9954_v53, %v9953_v61 }
 0x8be   :  { %v2915_v35 = vmul.f32 %v4707_v28, %v2142_v50  ;;  %v9958_v28 = vld [vmem:[#allocation91_spill] sm:$0xff]  ;;  %v9959_v50 = vld [vmem:[#allocation102_spill] sm:$0xff] }
 0x8c2   :  { %4518 = vset.pattern.permute.xlu1 %v9890_v60 }
 0x8c3   :  { %4517 = vset.pattern.permute.xlu2 %v9891_v3  ;;  %3863 = vperm.xlu0 %4549, %v3702_v55   ;;  %v7795_v27 = vpop.permute.xlu1 %3166 }
 0x8c4   :  { %v3350_v0 = vpop.permute.xlu0 %3349 }
 0x8c5   :  { %v7786_v51 = vadd.f32 %v3350_v0, %v3116_v32  ;;  %v7811_v20 = vpop.permute.xlu2 %3239  ;;  %v2547_v0 = vsub.f32 %v7501_v38, %v7475_v56  ;;  %v4709_v38 = vpop.eup %4708 }
 0x8c6   :  { %v2655_v21 = vmul.f32 %v4709_v38, %v9953_v61 }
 0x8c7   :  { %9941 = vst [vmem:[#allocation65_spill] sm:$0xff] %v7786_v51  ;;  %4710 = vrcp.f32 %v2547_v0 }
 0x8c8   :  { %4712 = vrcp.f32 %v2525_v39 }
 0x8c9   :  { %4714 = vrcp.f32 %v7368_v48  ;;  %v2980_v48 = vmul.f32 %v7709_v45, %v2915_v35 }
 0x8ca   :  { %3337 = vperm.xlu1 %4518, %v7588_v2   ;;  %4716 = vrcp.f32 %v7475_v56 }
 0x8cb   :  { %3331 = vperm.xlu2 %4517, %v7588_v2   ;;  %3842 = vperm.xlu0 %4549, %v3695_v5   ;;  %v7799_v13 = vpop.permute.xlu1 %3184 }
 0x8cc   :  { %9943 = vst [vmem:[#allocation233_spill] sm:$0xff] %v7799_v13 }
 0x8cd   :  { %v4711_v0 = vpop.eup %4710 }
 0x8d2   :  { %4521 = vset.pattern.permute.xlu1 %v9902_v46 }
 0x8d3   :  { %4519 = vset.pattern.permute.xlu2 %v9908_v42  ;;  %v7803_v58 = vpop.permute.xlu1 %3202 }
 0x8d4   :  { %9944 = vst [vmem:[#allocation234_spill] sm:$0xff] %v7803_v58  ;;  %v7805_v25 = vpop.permute.xlu0 %3380  ;;  %v2513_v58 = vsub.f32 %v7561_v16, %v9955_v36  ;;  %v9960_v16 = vld [vmem:[#allocation29_spill] sm:$0xff] }
 0x8d5   :  { %9945 = vst [vmem:[#allocation235_spill] sm:$0xff] %v7805_v25  ;;  %v7819_v40 = vpop.permute.xlu2 %3251 }
 0x8d6   :  { %4718 = vrcp.f32 %v2513_v58 }
 0x8d7   :  { %4720 = vrcp.f32 %v9955_v36 }
 0x8da   :  { %3356 = vperm.xlu1 %4521, %v7614_v22  }
 0x8db   :  { %3343 = vperm.xlu2 %4519, %v7588_v2   ;;  %v7809_v7 = vpop.permute.xlu1 %3215 }
 0x8e2   :  { %4523 = vset.pattern.permute.xlu1 %v9895_v59 }
 0x8e3   :  { %4522 = vset.pattern.permute.xlu2 %v9901_v26  ;;  %v7817_v2 = vpop.permute.xlu1 %3233 }
 0x8e4   :  { %v7813_v63 = vpop.permute.xlu0 %3411 }
 0x8e5   :  { %9946 = vst [vmem:[#allocation236_spill] sm:$0xff] %v7813_v63  ;;  %v7829_v32 = vpop.permute.xlu2 %3270  ;;  %v4713_v63 = vpop.eup %4712 }
 0x8e6   :  { %9949 = vst [vmem:[#allocation239_spill] sm:$0xff] %v7829_v32  ;;  %v4715_v56 = vpop.eup %4714 }
 0x8e7   :  { %v4717_v61 = vpop.eup %4716  ;;  %v2654_v13 = vmul.f32 %v4715_v56, %v9958_v28 }
 0x8e8   :  { %v2676_v35 = vmul.f32 %v4717_v61, %v9960_v16  ;;  %v4719_v32 = vpop.eup %4718 }
 0x8e9   :  { %v4721_v36 = vpop.eup %4720 }
 0x8ea   :  { %3368 = vperm.xlu1 %4523, %v7614_v22  }
 0x8eb   :  { %3362 = vperm.xlu2 %4522, %v7614_v22   ;;  %v7827_v29 = vpop.permute.xlu1 %3245 }
 0x8ec   :  { %9948 = vst [vmem:[#allocation238_spill] sm:$0xff] %v7827_v29  ;;  %v2141_v29 = vsub.f32 %v9959_v50, %v9958_v28  ;;  %v9963_v50 = vld [vmem:[#allocation87_spill] sm:$0xff]  ;;  %v2741_v28 = vmul.f32 %v7720_v6, %v2676_v35 }
 0x8ee   :  { %v2914_v38 = vmul.f32 %v4713_v63, %v2141_v29 }
 0x8f2   :  { %4526 = vset.pattern.permute.xlu1 %v9890_v60 }
 0x8f3   :  { %4524 = vset.pattern.permute.xlu2 %v9892_v24  ;;  %v7840_v18 = vpop.permute.xlu1 %3264 }
 0x8f4   :  { %v7821_v55 = vpop.permute.xlu0 %3227  ;;  %9951 = vst [vmem:[#allocation241_spill] sm:$0xff] %v7840_v18 }
 0x8f5   :  { %9947 = vst [vmem:[#allocation237_spill] sm:$0xff] %v7821_v55  ;;  %v7842_v51 = vpop.permute.xlu2 %3282 }
 0x8f6   :  { %9952 = vst [vmem:[#allocation242_spill] sm:$0xff] %v7842_v51 }
 0x8fa   :  { %3386 = vperm.xlu1 %4526, %v7614_v22  }
 0x8fb   :  { %3374 = vperm.xlu2 %4524, %v7614_v22  }
 0x8fc   :  { %v7836_v5 = vpop.permute.xlu0 %3472  ;;  %v7853_v53 = vpop.permute.xlu1 %3276 }
 0x8fd   :  { %9950 = vst [vmem:[#allocation240_spill] sm:$0xff] %v7836_v5  ;;  %v9961_v5 = vld [vmem:[#allocation20_spill] sm:$0xff] }
 0x8fe   :  { %9956 = vst [vmem:[#allocation77_spill] sm:$0xff] %v7853_v53  ;;  %v2163_v4 = vsub.f32 %v9961_v5, %v9960_v16  ;;  %v2719_v16 = vmul.f32 %v7720_v6, %v2654_v13 }
 0x900   :  { %v2936_v58 = vmul.f32 %v4711_v0, %v2163_v4  ;;  %v2979_v4 = vmul.f32 %v7709_v45, %v2914_v38 }
 0x902   :  { %4528 = vset.pattern.permute.xlu1 %v9896_v30 }
 0x903   :  { %4527 = vset.pattern.permute.xlu2 %v9908_v42 }
 0x904   :  { %v7855_v39 = vpop.permute.xlu0 %3521 }
 0x905   :  { %9957 = vst [vmem:[#allocation60_spill] sm:$0xff] %v7855_v39  ;;  %v7862_v51 = vpop.permute.xlu2 %3300  ;;  %v3046_v39 = vadd.f32 %v7728_v10, %v2980_v48 }
 0x906   :  { %9962 = vst [vmem:[#allocation122_spill] sm:$0xff] %v7862_v51  ;;  %v9964_v51 = vld [vmem:[#allocation99_spill] sm:$0xff] }
 0x907   :  { %v2129_v53 = vsub.f32 %v9964_v51, %v9963_v50  ;;  %v2642_v51 = vmul.f32 %v4721_v36, %v9963_v50  ;;  %v7894_v50 = vperm.slane %v7738_v23, 3 }
 0x909   :  { %v2902_v48 = vmul.f32 %v4719_v32, %v2129_v53  ;;  %v2707_v32 = vmul.f32 %v7720_v6, %v2642_v51  ;;  %9967 = vst [vmem:[#allocation29_spill] sm:$0xff] %v7894_v50 }
 0x90a   :  { %3398 = vperm.xlu1 %4528, %v7614_v22  }
 0x90b   :  { %3392 = vperm.xlu2 %4527, %v7614_v22   ;;  %v2720_v22 = vmul.f32 %v7720_v6, %v2655_v21  ;;  %v3001_v21 = vmul.f32 %v7709_v45, %v2936_v58  ;;  %v3045_v58 = vadd.f32 %v7728_v10, %v2979_v4  ;;  %v2967_v38 = vmul.f32 %v7709_v45, %v2902_v48 }
 0x90c   :  { %v7876_v63 = vpop.permute.xlu1 %3294 }
 0x90d   :  { %v2786_v5 = vadd.f32 %v7734_v11, %v2720_v22  ;;  %9965 = vst [vmem:[#allocation91_spill] sm:$0xff] %v7876_v63  ;;  %v3067_v22 = vadd.f32 %v7728_v10, %v3001_v21  ;;  %v2807_v63 = vadd.f32 %v7734_v11, %v2741_v28  ;;  %v3033_v21 = vadd.f32 %v7728_v10, %v2967_v38 }
 0x90f   :  { %v3110_v0 = vadd.f32 %v3046_v39, %v2786_v5  ;;  %v2785_v39 = vadd.f32 %v7734_v11, %v2719_v16  ;;  %v3131_v13 = vadd.f32 %v3067_v22, %v2807_v63  ;;  %v9969_v16 = vld [vmem:[#allocation144_spill] sm:$0xff] }
 0x910   :  { %v2533_v51 = vsub.f32 %v7573_v43, %v9969_v16  ;;  %v9972_v43 = vld [vmem:[#allocation158_spill] sm:$0xff] }
 0x911   :  { %v3109_v53 = vadd.f32 %v3045_v58, %v2785_v39  ;;  %v9971_v58 = vld [vmem:[#allocation40_spill] sm:$0xff] }
 0x912   :  { %4532 = vset.pattern.permute.xlu1 %v9895_v59  ;;  %4722 = vrcp.f32 %v2533_v51  ;;  %v2149_v38 = vsub.f32 %v9972_v43, %v9971_v58  ;;  %v7943_v43 = vperm.slane %v7738_v23, 4 }
 0x913   :  { %4529 = vset.pattern.permute.xlu2 %v9902_v46  ;;  %4724 = vrcp.f32 %v9969_v16 }
 0x914   :  { %v7878_v29 = vpop.permute.xlu0 %3196  ;;  %9977 = vst [vmem:[#allocation144_spill] sm:$0xff] %v7943_v43 }
 0x915   :  { %v3314_v56 = vpop.permute.xlu2 %3313 }
 0x916   :  { %v7882_v61 = vadd.f32 %v3314_v56, %v3110_v0  ;;  %v2773_v0 = vadd.f32 %v7734_v11, %v2707_v32 }
 0x918   :  { %9966 = vst [vmem:[#allocation102_spill] sm:$0xff] %v7882_v61  ;;  %v3097_v56 = vadd.f32 %v3033_v21, %v2773_v0  ;;  %v10060_v61 = vld [vmem:[#allocation92_spill] sm:$0xff] }
 0x91a   :  { %3417 = vperm.xlu1 %4532, %v7625_v49   ;;  %v3623_v63 = vadd.f32 %v7817_v2, %v3097_v56  ;;  %v4723_v2 = vpop.eup %4722 }
 0x91b   :  { %3405 = vperm.xlu2 %4529, %v7625_v49   ;;  %v4725_v39 = vpop.eup %4724  ;;  %v2922_v32 = vmul.f32 %v4723_v2, %v2149_v38  ;;  %v9978_v38 = vld [vmem:[#allocation82_spill] sm:$0xff] }
 0x91c   :  { %v3442_v35 = vpop.permute.xlu0 %3441  ;;  %v3308_v5 = vpop.permute.xlu1 %3307  ;;  %v3704_v28 = vadd.f32 %v7775_v57, %v3623_v63  ;;  %v9976_v63 = vld [vmem:[#allocation168_spill] sm:$0xff] }
 0x91d   :  { %v7897_v4 = vadd.f32 %v3442_v35, %v3131_v13  ;;  %v3635_v36 = vadd.f32 %v3308_v5, %v3109_v53  ;;  %v2662_v13 = vmul.f32 %v4725_v39, %v9971_v58  ;;  %v9974_v35 = vld [vmem:[#allocation68_spill] sm:$0xff]  ;;  %v2987_v21 = vmul.f32 %v7709_v45, %v2922_v32  ;;  %v9979_v39 = vld [vmem:[#allocation67_spill] sm:$0xff] }
 0x91f   :  { %9968 = vst [vmem:[#allocation20_spill] sm:$0xff] %v7897_v4  ;;  %v3716_v48 = vadd.f32 %v7894_v50, %v3635_v36  ;;  %v10030_v4 = vld [vmem:[#allocation110_spill] sm:$0xff] }
 0x921   :  { %3905 = vperm.xlu0 %4549, %v3716_v48   ;;  %v2727_v48 = vmul.f32 %v7720_v6, %v2662_v13 }
 0x922   :  { %4534 = vset.pattern.permute.xlu1 %v9891_v3 }
 0x923   :  { %4533 = vset.pattern.permute.xlu2 %v9892_v24  ;;  %v2514_v24 = vsub.f32 %v7415_v34, %v7359_v44  ;;  %v2535_v34 = vsub.f32 %v7473_v37, %v7433_v62  ;;  %v3053_v37 = vadd.f32 %v7728_v10, %v2987_v21  ;;  %v2793_v51 = vadd.f32 %v7734_v11, %v2727_v48 }
 0x924   :  { %v2529_v21 = vsub.f32 %v7459_v33, %v7413_v15 }
 0x925   :  { %4726 = vrcp.f32 %v2514_v24  ;;  %v3117_v2 = vadd.f32 %v3053_v37, %v2793_v51  ;;  %v7949_v13 = vpop.permute.xlu2 %3331 }
 0x926   :  { %4728 = vrcp.f32 %v7359_v44 }
 0x927   :  { %4730 = vrcp.f32 %v2535_v34 }
 0x928   :  { %4732 = vrcp.f32 %v7433_v62 }
 0x929   :  { %3869 = vperm.xlu0 %4549, %v3704_v28   ;;  %v2507_v28 = vsub.f32 %v7542_v9, %v9976_v63  ;;  %v2151_v9 = vsub.f32 %v9979_v39, %v9978_v38 }
 0x92a   :  { %3429 = vperm.xlu1 %4534, %v7625_v49  }
 0x92b   :  { %3423 = vperm.xlu2 %4533, %v7625_v49   ;;  %v4727_v53 = vpop.eup %4726  ;;  %4734 = vrcp.f32 %v2507_v28  ;;  %v9981_v28 = vld [vmem:[#allocation96_spill] sm:$0xff] }
 0x92c   :  { %v7916_v22 = vpop.permute.xlu1 %3325  ;;  %v4729_v36 = vpop.eup %4728  ;;  %4736 = vrcp.f32 %v9976_v63  ;;  %v9980_v63 = vld [vmem:[#allocation84_spill] sm:$0xff] }
 0x92d   :  { %9970 = vst [vmem:[#allocation87_spill] sm:$0xff] %v7916_v22  ;;  %v4731_v58 = vpop.eup %4730  ;;  %4738 = vrcp.f32 %v2529_v21  ;;  %v10036_v22 = vld [vmem:[#allocation117_spill] sm:$0xff] }
 0x92e   :  { %v4733_v34 = vpop.eup %4732  ;;  %4740 = vrcp.f32 %v7413_v15 }
 0x931   :  { %v4735_v48 = vpop.eup %4734 }
 0x932   :  { %4536 = vset.pattern.permute.xlu1 %v9896_v30  ;;  %v4737_v37 = vpop.eup %4736 }
 0x933   :  { %4535 = vset.pattern.permute.xlu2 %v9890_v60  ;;  %v4739_v15 = vpop.eup %4738 }
 0x93a   :  { %3447 = vperm.xlu1 %4536, %v7625_v49  }
 0x93b   :  { %3435 = vperm.xlu2 %4535, %v7625_v49   ;;  %v9973_v49 = vld [vmem:[#allocation123_spill] sm:$0xff] }
 0x93c   :  { %v2130_v5 = vsub.f32 %v9974_v35, %v9973_v49  ;;  %v7929_v0 = vpop.permute.xlu1 %3337  ;;  %v2643_v56 = vmul.f32 %v4729_v36, %v9973_v49  ;;  %v2924_v49 = vmul.f32 %v4731_v58, %v2151_v9  ;;  %v2636_v58 = vmul.f32 %v4737_v37, %v9980_v63 }
 0x93d   :  { %9975 = vst [vmem:[#allocation99_spill] sm:$0xff] %v7929_v0  ;;  %v10032_v0 = vld [vmem:[#allocation132_spill] sm:$0xff] }
 0x93e   :  { %v2903_v44 = vmul.f32 %v4727_v53, %v2130_v5  ;;  %v2708_v24 = vmul.f32 %v7720_v6, %v2643_v56  ;;  %v2538_v56 = vsub.f32 %v7481_v17, %v7442_v31  ;;  %v2989_v33 = vmul.f32 %v7709_v45, %v2924_v49 }
 0x93f   :  { %v2701_v9 = vmul.f32 %v7720_v6, %v2636_v58 }
 0x940   :  { %v2968_v16 = vmul.f32 %v7709_v45, %v2903_v44  ;;  %v2774_v35 = vadd.f32 %v7734_v11, %v2708_v24  ;;  %v2664_v44 = vmul.f32 %v4733_v34, %v9978_v38  ;;  %4742 = vrcp.f32 %v2538_v56  ;;  %v9984_v34 = vld [vmem:[#allocation116_spill] sm:$0xff] }
 0x941   :  { %v3055_v38 = vadd.f32 %v7728_v10, %v2989_v33  ;;  %4744 = vrcp.f32 %v7442_v31 }
 0x942   :  { %4538 = vset.pattern.permute.xlu1 %v9901_v26  ;;  %v3034_v32 = vadd.f32 %v7728_v10, %v2968_v16  ;;  %v2123_v16 = vsub.f32 %v9981_v28, %v9980_v63  ;;  %v2729_v17 = vmul.f32 %v7720_v6, %v2664_v44  ;;  %v9986_v44 = vld [vmem:[#allocation21_spill] sm:$0xff] }
 0x943   :  { %4537 = vset.pattern.permute.xlu2 %v9902_v46 }
 0x944   :  { %v3098_v36 = vadd.f32 %v3034_v32, %v2774_v35  ;;  %v2896_v24 = vmul.f32 %v4735_v48, %v2123_v16  ;;  %v2795_v39 = vadd.f32 %v7734_v11, %v2729_v17  ;;  %v4741_v32 = vpop.eup %4740  ;;  %v2541_v35 = vsub.f32 %v7489_v41, %v7457_v52 }
 0x946   :  { %v3624_v51 = vadd.f32 %v7811_v20, %v3098_v36  ;;  %v2961_v20 = vmul.f32 %v7709_v45, %v2896_v24  ;;  %v3119_v31 = vadd.f32 %v3055_v38, %v2795_v39  ;;  %v9985_v36 = vld [vmem:[#allocation120_spill] sm:$0xff]  ;;  %4746 = vrcp.f32 %v2541_v35 }
 0x947   :  { %v2154_v48 = vsub.f32 %v9986_v44, %v9985_v36  ;;  %4748 = vrcp.f32 %v7457_v52  ;;  %v2544_v44 = vsub.f32 %v7495_v47, %v7467_v19 }
 0x948   :  { %v3027_v37 = vadd.f32 %v7728_v10, %v2961_v20 }
 0x949   :  { %4750 = vrcp.f32 %v2544_v44 }
 0x94a   :  { %3460 = vperm.xlu1 %4538, %v7647_v8   ;;  %4752 = vrcp.f32 %v7467_v19 }
 0x94b   :  { %3454 = vperm.xlu2 %4537, %v7647_v8  }
 0x94c   :  { %v3357_v62 = vpop.permute.xlu1 %3356 }
 0x94d   :  { %v3643_v53 = vadd.f32 %v3357_v62, %v3117_v2  ;;  %v7965_v2 = vpop.permute.xlu2 %3343  ;;  %v3705_v62 = vadd.f32 %v7775_v57, %v3624_v51  ;;  %v2767_v51 = vadd.f32 %v7734_v11, %v2701_v9 }
 0x94e   :  { %9982 = vst [vmem:[#allocation40_spill] sm:$0xff] %v7965_v2 }
 0x94f   :  { %v3724_v5 = vadd.f32 %v7943_v43, %v3643_v53  ;;  %v9983_v53 = vld [vmem:[#allocation80_spill] sm:$0xff]  ;;  %v3091_v17 = vadd.f32 %v3027_v37, %v2767_v51 }
 0x950   :  { %v2145_v49 = vsub.f32 %v9984_v34, %v9983_v53  ;;  %v2658_v41 = vmul.f32 %v4741_v32, %v9983_v53  ;;  %v9989_v53 = vld [vmem:[#allocation103_spill] sm:$0xff] }
 0x951   :  { %3929 = vperm.xlu0 %4549, %v3724_v5   ;;  %v4743_v5 = vpop.eup %4742  ;;  %v3617_v38 = vadd.f32 %v7878_v29, %v3091_v17  ;;  %v9990_v34 = vld [vmem:[#allocation51_spill] sm:$0xff] }
 0x952   :  { %4540 = vset.pattern.permute.xlu1 %v9891_v3  ;;  %v2918_v56 = vmul.f32 %v4739_v15, %v2145_v49  ;;  %v4745_v16 = vpop.eup %4744  ;;  %v2927_v33 = vmul.f32 %v4743_v5, %v2154_v48  ;;  %v2723_v20 = vmul.f32 %v7720_v6, %v2658_v41  ;;  %v2157_v49 = vsub.f32 %v9990_v34, %v9989_v53 }
 0x953   :  { %4539 = vset.pattern.permute.xlu2 %v9895_v59  ;;  %v4747_v15 = vpop.eup %4746 }
 0x954   :  { %v2983_v58 = vmul.f32 %v7709_v45, %v2918_v56  ;;  %v2992_v39 = vmul.f32 %v7709_v45, %v2927_v33  ;;  %v4749_v35 = vpop.eup %4748  ;;  %v2789_v29 = vadd.f32 %v7734_v11, %v2723_v20 }
 0x955   :  { %v7984_v63 = vpop.permute.xlu2 %3362  ;;  %v4751_v17 = vpop.eup %4750 }
 0x956   :  { %9987 = vst [vmem:[#allocation158_spill] sm:$0xff] %v7984_v63  ;;  %v3049_v9 = vadd.f32 %v7728_v10, %v2983_v58  ;;  %v10038_v63 = vld [vmem:[#allocation143_spill] sm:$0xff] }
 0x958   :  { %v3113_v5 = vadd.f32 %v3049_v9, %v2789_v29  ;;  %v9999_v29 = vld [vmem:[#allocation125_spill] sm:$0xff] }
 0x959   :  { %3872 = vperm.xlu0 %4549, %v3705_v62   ;;  %v2667_v62 = vmul.f32 %v4745_v16, %v9985_v36  ;;  %v2670_v36 = vmul.f32 %v4749_v35, %v9989_v53  ;;  %v9998_v35 = vld [vmem:[#allocation154_spill] sm:$0xff] }
 0x95a   :  { %3478 = vperm.xlu1 %4540, %v7647_v8   ;;  %v3639_v48 = vadd.f32 %v7949_v13, %v3113_v5  ;;  %v8051_v5 = vperm.slane %v7738_v23, 6 }
 0x95b   :  { %3466 = vperm.xlu2 %4539, %v7647_v8   ;;  %v2732_v32 = vmul.f32 %v7720_v6, %v2667_v62  ;;  %v2735_v33 = vmul.f32 %v7720_v6, %v2670_v36  ;;  %v9993_v62 = vld [vmem:[#allocation114_spill] sm:$0xff]  ;;  %v10001_v36 = vld [vmem:[#allocation31_spill] sm:$0xff] }
 0x95c   :  { %v3369_v21 = vpop.permute.xlu1 %3368  ;;  %v3720_v41 = vadd.f32 %v7894_v50, %v3639_v48  ;;  %v10003_v48 = vld [vmem:[#allocation34_spill] sm:$0xff] }
 0x95d   :  { %v3645_v28 = vadd.f32 %v3369_v21, %v3119_v31  ;;  %v7998_v52 = vpop.permute.xlu2 %3374  ;;  %v3058_v31 = vadd.f32 %v7728_v10, %v2992_v39  ;;  %v2798_v21 = vadd.f32 %v7734_v11, %v2732_v32  ;;  %v2801_v47 = vadd.f32 %v7734_v11, %v2735_v33  ;;  %v9996_v32 = vld [vmem:[#allocation152_spill] sm:$0xff] }
 0x95e   :  { %9988 = vst [vmem:[#allocation123_spill] sm:$0xff] %v7998_v52  ;;  %v2502_v19 = vsub.f32 %v7379_v54, %v9996_v32  ;;  %v2510_v54 = vsub.f32 %v7548_v14, %v9998_v35  ;;  %v10002_v14 = vld [vmem:[#allocation43_spill] sm:$0xff]  ;;  %v10056_v33 = vld [vmem:[#allocation32_spill] sm:$0xff] }
 0x95f   :  { %v3726_v24 = vadd.f32 %v7943_v43, %v3645_v28  ;;  %v3122_v56 = vadd.f32 %v3058_v31, %v2798_v21  ;;  %v8045_v31 = vperm.slane %v7738_v23, 2  ;;  %v2126_v44 = vsub.f32 %v10002_v14, %v10001_v36  ;;  %v10065_v43 = vld [vmem:[#allocation74_spill] sm:$0xff] }
 0x960   :  { %4754 = vrcp.f32 %v2502_v19 }
 0x961   :  { %3935 = vperm.xlu0 %4549, %v3726_v24   ;;  %4756 = vrcp.f32 %v9996_v32 }
 0x962   :  { %4542 = vset.pattern.permute.xlu1 %v9901_v26  ;;  %v3698_v26 = vadd.f32 %v7755_v12, %v3617_v38  ;;  %v9994_v38 = vld [vmem:[#allocation23_spill] sm:$0xff] }
 0x963   :  { %4541 = vset.pattern.permute.xlu2 %v9902_v46  ;;  %v2930_v46 = vmul.f32 %v4747_v15, %v2157_v49  ;;  %v2160_v20 = vsub.f32 %v9994_v38, %v9993_v62  ;;  %v4753_v15 = vpop.eup %4752  ;;  %v9997_v49 = vld [vmem:[#allocation17_spill] sm:$0xff] }
 0x964   :  { %4758 = vrcp.f32 %v9997_v49 }
 0x965   :  { %v2995_v28 = vmul.f32 %v7709_v45, %v2930_v46  ;;  %v8014_v16 = vpop.permute.xlu2 %3392  ;;  %v2933_v9 = vmul.f32 %v4751_v17, %v2160_v20  ;;  %4760 = vrcp.f32 %v9999_v29  ;;  %v8048_v46 = vperm.slane %v7738_v23, 5  ;;  %v10011_v20 = vld [vmem:[#allocation81_spill] sm:$0xff]  ;;  %v10020_v17 = vld [vmem:[#allocation127_spill] sm:$0xff]  ;;  %v10044_v29 = vld [vmem:[#allocation134_spill] sm:$0xff] }
 0x966   :  { %9991 = vst [vmem:[#allocation68_spill] sm:$0xff] %v8014_v16  ;;  %v4755_v21 = vpop.eup %4754  ;;  %v10035_v16 = vld [vmem:[#allocation54_spill] sm:$0xff] }
 0x967   :  { %v3061_v24 = vadd.f32 %v7728_v10, %v2995_v28  ;;  %10000 = vst [vmem:[#allocation67_spill] sm:$0xff] %v8048_v46  ;;  %v4757_v19 = vpop.eup %4756  ;;  %v10027_v46 = vld [vmem:[#allocation133_spill] sm:$0xff]  ;;  %v10055_v28 = vld [vmem:[#allocation151_spill] sm:$0xff] }
 0x968   :  { %v2631_v2 = vmul.f32 %v4757_v19, %v10011_v20  ;;  %v10046_v19 = vld [vmem:[#allocation39_spill] sm:$0xff] }
 0x969   :  { %3851 = vperm.xlu0 %4549, %v3698_v26   ;;  %v3125_v13 = vadd.f32 %v3061_v24, %v2801_v47 }
 0x96a   :  { %3509 = vperm.xlu1 %4542, %v7655_v1  }
 0x96b   :  { %3503 = vperm.xlu2 %4541, %v7655_v1  }
 0x96c   :  { %v3387_v37 = vpop.permute.xlu1 %3386 }
 0x96d   :  { %v8016_v51 = vadd.f32 %v3387_v37, %v3122_v56  ;;  %v10004_v56 = vld [vmem:[#allocation44_spill] sm:$0xff]  ;;  %v10052_v37 = vld [vmem:[#allocation45_spill] sm:$0xff] }
 0x96f   :  { %9992 = vst [vmem:[#allocation168_spill] sm:$0xff] %v8016_v51 }
 0x971   :  { %3917 = vperm.xlu0 %4549, %v3720_v41  }
 0x972   :  { %4545 = vset.pattern.permute.xlu1 %v9890_v60  ;;  %v2673_v60 = vmul.f32 %v4753_v15, %v9993_v62  ;;  %v10012_v15 = vld [vmem:[#allocation126_spill] sm:$0xff]  ;;  %v10033_v62 = vld [vmem:[#allocation177_spill] sm:$0xff] }
 0x973   :  { %4543 = vset.pattern.permute.xlu2 %v9895_v59  ;;  %v2998_v59 = vmul.f32 %v7709_v45, %v2933_v9  ;;  %v10013_v9 = vld [vmem:[#allocation128_spill] sm:$0xff] }
 0x974   :  { %v2738_v53 = vmul.f32 %v7720_v6, %v2673_v60  ;;  %4762 = vrcp.f32 %v10013_v9 }
 0x975   :  { %v3406_v58 = vpop.permute.xlu2 %3405  ;;  %v3064_v34 = vadd.f32 %v7728_v10, %v2998_v59  ;;  %4764 = vrcp.f32 %v2510_v54  ;;  %v10041_v54 = vld [vmem:[#allocation204_spill] sm:$0xff] }
 0x976   :  { %v8027_v39 = vadd.f32 %v3406_v58, %v3125_v13  ;;  %v2804_v26 = vadd.f32 %v7734_v11, %v2738_v53  ;;  %v4759_v13 = vpop.eup %4758  ;;  %v10026_v53 = vld [vmem:[#allocation19_spill] sm:$0xff]  ;;  %v2509_v60 = vsub.f32 %v10041_v54, %v10013_v9  ;;  %v10049_v9 = vld [vmem:[#allocation136_spill] sm:$0xff] }
 0x977   :  { %v2632_v54 = vmul.f32 %v4759_v13, %v10026_v53 }
 0x978   :  { %9995 = vst [vmem:[#allocation82_spill] sm:$0xff] %v8027_v39  ;;  %v3128_v24 = vadd.f32 %v3064_v34, %v2804_v26  ;;  %v10019_v26 = vld [vmem:[#allocation41_spill] sm:$0xff]  ;;  %v10037_v39 = vld [vmem:[#allocation78_spill] sm:$0xff] }
 0x979   :  { %v2697_v38 = vmul.f32 %v7720_v6, %v2632_v54 }
 0x97a   :  { %3484 = vperm.xlu1 %4545, %v7647_v8  }
 0x97b   :  { %3515 = vperm.xlu2 %4543, %v7655_v1  }
 0x982   :  { %3533 = vperm.xlu1 %4545, %v7655_v1  }
 0x983   :  { %4546 = vset.pattern.permute.xlu2 %v9891_v3  ;;  %v2118_v3 = vsub.f32 %v10012_v15, %v10011_v20  ;;  %v10023_v15 = vld [vmem:[#allocation130_spill] sm:$0xff]  ;;  %v10045_v20 = vld [vmem:[#allocation192_spill] sm:$0xff] }
 0x984   :  { %4766 = vrcp.f32 %v10023_v15  ;;  %v2549_v47 = vsub.f32 %v10046_v19, %v10045_v20  ;;  %v10063_v19 = vld [vmem:[#allocation13_spill] sm:$0xff] }
 0x985   :  { %v3424_v32 = vpop.permute.xlu2 %3423  ;;  %v2891_v52 = vmul.f32 %v4755_v21, %v2118_v3  ;;  %4768 = vrcp.f32 %v9998_v35  ;;  %v10034_v21 = vld [vmem:[#allocation189_spill] sm:$0xff] }
 0x986   :  { %v8071_v34 = vadd.f32 %v3424_v32, %v3128_v24  ;;  %v4761_v32 = vpop.eup %4760  ;;  %4770 = vrcp.f32 %v10032_v0  ;;  %v2517_v3 = vsub.f32 %v10034_v21, %v10033_v62  ;;  %v10043_v0 = vld [vmem:[#allocation63_spill] sm:$0xff]  ;;  %v10047_v35 = vld [vmem:[#allocation61_spill] sm:$0xff] }
 0x987   :  { %v4763_v58 = vpop.eup %4762  ;;  %4772 = vrcp.f32 %v10044_v29  ;;  %v2956_v50 = vmul.f32 %v7709_v45, %v2891_v52  ;;  %v10048_v24 = vld [vmem:[#allocation147_spill] sm:$0xff]  ;;  %v2696_v52 = vmul.f32 %v7720_v6, %v2631_v2 }
 0x988   :  { %10018 = vst [vmem:[#allocation84_spill] sm:$0xff] %v8071_v34  ;;  %v10042_v34 = vld [vmem:[#allocation35_spill] sm:$0xff]  ;;  %v4765_v59 = vpop.eup %4764  ;;  %v2133_v41 = vsub.f32 %v10048_v24, %v10047_v35  ;;  %4774 = vrcp.f32 %v10049_v9  ;;  %v2638_v13 = vmul.f32 %v4763_v58, %v10037_v39  ;;  %v10062_v58 = vld [vmem:[#allocation72_spill] sm:$0xff] }
 0x989   :  { %4776 = vrcp.f32 %v2517_v3  ;;  %v10057_v9 = vld [vmem:[#allocation155_spill] sm:$0xff]  ;;  %v3022_v51 = vadd.f32 %v7728_v10, %v2956_v50  ;;  %v2899_v3 = vmul.f32 %v4765_v59, %v2126_v44  ;;  %v2516_v25 = vsub.f32 %v10063_v19, %v10062_v58  ;;  %v10069_v19 = vld [vmem:[#allocation53_spill] sm:$0xff] }
 0x98a   :  { %4548 = vset.pattern.permute.xlu1 %v9908_v42  ;;  %v2635_v42 = vmul.f32 %v4761_v32, %v10030_v4  ;;  %v4767_v21 = vpop.eup %4766  ;;  %4778 = vrcp.f32 %v2509_v60  ;;  %v10061_v2 = vld [vmem:[#allocation75_spill] sm:$0xff] }
 0x98b   :  { %3527 = vperm.xlu2 %4546, %v7655_v1   ;;  %v4769_v18 = vpop.eup %4768  ;;  %4780 = vrcp.f32 %v2549_v47  ;;  %v2762_v47 = vadd.f32 %v7734_v11, %v2696_v52  ;;  %v10064_v59 = vld [vmem:[#allocation207_spill] sm:$0xff]  ;;  %v2641_v54 = vmul.f32 %v4767_v21, %v10042_v34  ;;  %v10067_v52 = vld [vmem:[#allocation200_spill] sm:$0xff]  ;;  %v8152_v21 = vadd.f32 %v7734_v11, %v2697_v38 }
 0x98c   :  { %v4771_v32 = vpop.eup %4770  ;;  %4782 = vrcp.f32 %v10033_v62  ;;  %v2700_v24 = vmul.f32 %v7720_v6, %v2635_v42  ;;  %v2639_v50 = vmul.f32 %v4769_v18, %v10001_v36  ;;  %v2512_v14 = vsub.f32 %v10064_v59, %v10023_v15 }
 0x98d   :  { %v4773_v60 = vpop.eup %4772  ;;  %4784 = vrcp.f32 %v10045_v20  ;;  %v2703_v62 = vmul.f32 %v7720_v6, %v2638_v13  ;;  %v2644_v42 = vmul.f32 %v4771_v32, %v10052_v37  ;;  %v2503_v4 = vsub.f32 %v10067_v52, %v9997_v49  ;;  %v10072_v52 = vld [vmem:[#allocation160_spill] sm:$0xff]  ;;  %v10076_v37 = vld [vmem:[#allocation223_spill] sm:$0xff] }
 0x98e   :  { %v4775_v44 = vpop.eup %4774  ;;  %v3086_v18 = vadd.f32 %v3022_v51, %v2762_v47  ;;  %v2964_v36 = vmul.f32 %v7709_v45, %v2899_v3  ;;  %4786 = vrcp.f32 %v10062_v58  ;;  %v8149_v13 = vadd.f32 %v7734_v11, %v2700_v24 }
 0x98f   :  { %v4777_v20 = vpop.eup %4776  ;;  %v2647_v32 = vmul.f32 %v4773_v60, %v10056_v33  ;;  %4788 = vrcp.f32 %v2516_v25  ;;  %v8160_v58 = vadd.f32 %v7734_v11, %v2703_v62  ;;  %v2709_v24 = vmul.f32 %v7720_v6, %v2644_v42  ;;  %v10071_v60 = vld [vmem:[#allocation48_spill] sm:$0xff] }
 0x990   :  { %v4779_v15 = vpop.eup %4778  ;;  %10068 = vst [vmem:[#allocation96_spill] sm:$0xff] %v8149_v13  ;;  %v3612_v51 = vadd.f32 %v7795_v27, %v3086_v18  ;;  %4790 = vrcp.f32 %v2512_v14  ;;  %v2706_v38 = vmul.f32 %v7720_v6, %v2641_v54  ;;  %v2906_v49 = vmul.f32 %v4777_v20, %v2133_v41  ;;  %v10075_v18 = vld [vmem:[#allocation186_spill] sm:$0xff] }
 0x991   :  { %v4781_v59 = vpop.eup %4780  ;;  %4792 = vrcp.f32 %v2503_v4  ;;  %v3030_v25 = vadd.f32 %v7728_v10, %v2964_v36  ;;  %v10073_v27 = vsub.f32 %v10038_v63, %v10037_v39  ;;  %v2712_v14 = vmul.f32 %v7720_v6, %v2647_v32  ;;  %v10077_v63 = vld [vmem:[#allocation101_spill] sm:$0xff]  ;;  %v10096_v13 = vld [vmem:[#allocation22_spill] sm:$0xff] }
 0x992   :  { %3539 = vperm.xlu1 %4548, %v7655_v1   ;;  %v4783_v3 = vpop.eup %4782  ;;  %v2650_v62 = vmul.f32 %v4775_v44, %v10060_v61  ;;  %v10074_v42 = vsub.f32 %v10036_v22, %v10035_v16  ;;  %v2537_v55 = vsub.f32 %v10076_v37, %v10075_v18  ;;  %v3693_v41 = vadd.f32 %v7755_v12, %v3612_v51  ;;  %v10078_v39 = vld [vmem:[#allocation161_spill] sm:$0xff] }
 0x993   :  { %4547 = vset.pattern.permute.xlu2 %v9896_v30  ;;  %v2704_v30 = vmul.f32 %v7720_v6, %v2639_v50  ;;  %v4785_v47 = vpop.eup %4784  ;;  %v2898_v50 = vmul.f32 %v4779_v15, %v10073_v27  ;;  %v2646_v4 = vmul.f32 %v4783_v3, %v10047_v35  ;;  %v8183_v32 = vadd.f32 %v7734_v11, %v2709_v24  ;;  %v10080_v35 = vld [vmem:[#allocation212_spill] sm:$0xff] }
 0x994   :  { %v2938_v54 = vmul.f32 %v4781_v59, %v10074_v42  ;;  %v4787_v36 = vpop.eup %4786  ;;  %v8186_v44 = vadd.f32 %v7734_v11, %v2706_v38  ;;  %v10079_v22 = vmov 0   ;;  %v2678_v37 = vmul.f32 %v4785_v47, %v10035_v16  ;;  %v10081_v38 = vld [vmem:[#allocation140_spill] sm:$0xff] }
 0x995   :  { %v2770_v20 = vadd.f32 %v7734_v11, %v2704_v30  ;;  %v4789_v59 = vpop.eup %4788  ;;  %v2518_v51 = vsub.f32 %v10080_v35, %v10044_v29  ;;  %v2971_v30 = vmul.f32 %v7709_v45, %v2906_v49  ;;  %v8194_v27 = vperm.slane %v7738_v23, 7 }
 0x996   :  { %v4791_v24 = vpop.eup %4790  ;;  %4794 = vrcp.f32 %v10081_v38  ;;  %v2963_v42 = vmul.f32 %v7709_v45, %v2898_v50  ;;  %v2715_v16 = vmul.f32 %v7720_v6, %v2650_v62  ;;  %v3003_v47 = vmul.f32 %v7709_v45, %v2938_v54 }
 0x997   :  { %v3094_v3 = vadd.f32 %v3030_v25, %v2770_v20  ;;  %v4793_v15 = vpop.eup %4792  ;;  %4796 = vrcp.f32 %v2537_v55  ;;  %v2711_v29 = vmul.f32 %v7720_v6, %v2646_v4  ;;  %v8204_v23 = vadd.f32 %v7734_v11, %v2712_v14  ;;  %v10095_v4 = vld [vmem:[#allocation37_spill] sm:$0xff] }
 0x998   :  { %4798 = vrcp.f32 %v10075_v18  ;;  %v2645_v25 = vmul.f32 %v4787_v36, %v10003_v48  ;;  %v10083_v50 = vsub.f32 %v10004_v56, %v10003_v48  ;;  %v2743_v54 = vmul.f32 %v7720_v6, %v2678_v37  ;;  %v10088_v37 = vld [vmem:[#allocation146_spill] sm:$0xff] }
 0x999   :  { %v3620_v49 = vadd.f32 %v7809_v7, %v3094_v3  ;;  %4800 = vrcp.f32 %v2518_v51  ;;  %v3037_v7 = vadd.f32 %v7728_v10, %v2971_v30  ;;  %v10086_v14 = vsub.f32 %v10043_v0, %v10042_v34  ;;  %v10090_v51 = vld [vmem:[#allocation191_spill] sm:$0xff] }
 0x99a   :  { %4550 = vset.pattern.permute.xlu1 %v10079_v22  ;;  %v2905_v62 = vmul.f32 %v4789_v59, %v10083_v50  ;;  %v3029_v18 = vadd.f32 %v7728_v10, %v2963_v42  ;;  %v10087_v36 = vsub.f32 %v10027_v46, %v10026_v53  ;;  %v8225_v48 = vadd.f32 %v7734_v11, %v2715_v16  ;;  %v10089_v59 = vld [vmem:[#allocation180_spill] sm:$0xff] }
 0x99b   :  { %3496 = vperm.xlu2 %4547, %v7647_v8   ;;  %3836 = vperm.xlu1 %4550, %v3693_v41   ;;  %v8206_v8 = vpop.permute.xlu2 %3435  ;;  %v2901_v20 = vmul.f32 %v4791_v24, %v10086_v14  ;;  %v3069_v56 = vadd.f32 %v7728_v10, %v3003_v47  ;;  %4802 = vrcp.f32 %v10088_v37  ;;  %v2520_v30 = vsub.f32 %v10090_v51, %v10089_v59  ;;  %v10091_v24 = vld [vmem:[#allocation170_spill] sm:$0xff]  ;;  %v10092_v16 = vld [vmem:[#allocation64_spill] sm:$0xff]  ;;  %v10093_v47 = vld [vmem:[#allocation11_spill] sm:$0xff] }
 0x99c   :  { %10082 = vst [vmem:[#allocation80_spill] sm:$0xff] %v8206_v8  ;;  %v2892_v35 = vmul.f32 %v4793_v15, %v10087_v36  ;;  %v2777_v3 = vadd.f32 %v7734_v11, %v2711_v29  ;;  %v3701_v0 = vadd.f32 %v7775_v57, %v3620_v49  ;;  %v4795_v34 = vpop.eup %4794  ;;  %4804 = vrcp.f32 %v10091_v24  ;;  %v10119_v8 = vld [vmem:[#allocation201_spill] sm:$0xff]  ;;  %v10129_v41 = vld [vmem:[#allocation167_spill] sm:$0xff] }
 0x99d   :  { %v2710_v46 = vmul.f32 %v7720_v6, %v2645_v25  ;;  %v2970_v53 = vmul.f32 %v7709_v45, %v2905_v62  ;;  %v2809_v15 = vadd.f32 %v7734_v11, %v2743_v54  ;;  %v4797_v42 = vpop.eup %4796  ;;  %4806 = vrcp.f32 %v10092_v16  ;;  %v8245_v54 = vpop.permute.xlu1 %3398 }
 0x99e   :  { %v2519_v50 = vsub.f32 %v10093_v47, %v10092_v16  ;;  %v3101_v14 = vadd.f32 %v3037_v7, %v2777_v3  ;;  %v2966_v29 = vmul.f32 %v7709_v45, %v2901_v20  ;;  %v4799_v49 = vpop.eup %4798  ;;  %4808 = vrcp.f32 %v10089_v59  ;;  %10094 = vst [vmem:[#allocation116_spill] sm:$0xff] %v8245_v54  ;;  %v10097_v7 = vld [vmem:[#allocation28_spill] sm:$0xff] }
 0x99f   :  { %v3093_v25 = vadd.f32 %v3029_v18, %v8160_v58  ;;  %v2957_v62 = vmul.f32 %v7709_v45, %v2892_v35  ;;  %v3133_v36 = vadd.f32 %v3069_v56, %v2809_v15  ;;  %v4801_v51 = vpop.eup %4800  ;;  %4810 = vrcp.f32 %v2520_v30 }
 0x9a0   :  { %v3627_v20 = vadd.f32 %v10097_v7, %v3101_v14  ;;  %v10099_v58 = vsub.f32 %v10020_v17, %v10019_v26  ;;  %v3036_v35 = vadd.f32 %v7728_v10, %v2970_v53  ;;  %4812 = vrcp.f32 %v2519_v50  ;;  %v10100_v7 = vld [vmem:[#allocation182_spill] sm:$0xff]  ;;  %v10124_v50 = vld [vmem:[#allocation181_spill] sm:$0xff] }
 0x9a1   :  { %v8256_v56 = vpop.eup %4802  ;;  %v2666_v15 = vmul.f32 %v4799_v49, %v10019_v26  ;;  %v2776_v30 = vadd.f32 %v7734_v11, %v2710_v46  ;;  %v3032_v14 = vadd.f32 %v7728_v10, %v2966_v29  ;;  %v10101_v17 = vsub.f32 %v10057_v9, %v10056_v33  ;;  %v10104_v49 = vld [vmem:[#allocation175_spill] sm:$0xff] }
 0x9a2   :  { %v2926_v18 = vmul.f32 %v4797_v42, %v10099_v58  ;;  %4814 = vrcp.f32 %v10104_v49  ;;  %v3708_v46 = vadd.f32 %v8045_v31, %v3627_v20 }
 0x9a3   :  { %3545 = vperm.xlu2 %4547, %v7655_v1   ;;  %3860 = vperm.xlu1 %4550, %v3701_v0   ;;  %v2656_v1 = vmul.f32 %v4795_v34, %v10065_v43  ;;  %v10098_v0 = vld [vmem:[#allocation141_spill] sm:$0xff]  ;;  %v4805_v34 = vpop.eup %4804  ;;  %v2907_v53 = vmul.f32 %v4801_v51, %v10101_v17  ;;  %v3100_v9 = vadd.f32 %v3036_v35, %v2776_v30  ;;  %v10108_v17 = vld [vmem:[#allocation226_spill] sm:$0xff] }
 0x9a4   :  { %v3619_v47 = vadd.f32 %v10098_v0, %v3093_v25  ;;  %v2505_v25 = vsub.f32 %v10100_v7, %v10091_v24  ;;  %v3023_v0 = vadd.f32 %v7728_v10, %v2957_v62  ;;  %v10105_v24 = vld [vmem:[#allocation184_spill] sm:$0xff]  ;;  %v2991_v33 = vmul.f32 %v7709_v45, %v2926_v18 }
 0x9a5   :  { %v3455_v3 = vpop.permute.xlu2 %3454  ;;  %v2721_v29 = vmul.f32 %v7720_v6, %v2656_v1  ;;  %v10106_v7 = vld [vmem:[#allocation16_spill] sm:$0xff]  ;;  %v2557_v26 = vsub.f32 %v10108_v17, %v10104_v49  ;;  %v2731_v20 = vmul.f32 %v7720_v6, %v2666_v15  ;;  %v3096_v1 = vadd.f32 %v3032_v14, %v8186_v44  ;;  %v8286_v30 = vpop.permute.xlu1 %3417  ;;  %v10127_v49 = vld [vmem:[#allocation214_spill] sm:$0xff] }
 0x9a6   :  { %v3659_v59 = vadd.f32 %v3455_v3, %v3133_v36  ;;  %v4807_v36 = vpop.eup %4806  ;;  %v2534_v62 = vsub.f32 %v10106_v7, %v10105_v24  ;;  %v3700_v16 = vadd.f32 %v7775_v57, %v3619_v47  ;;  %v3087_v47 = vadd.f32 %v3023_v0, %v8152_v21  ;;  %10109 = vst [vmem:[#allocation120_spill] sm:$0xff] %v8286_v30  ;;  %v10110_v7 = vld [vmem:[#allocation108_spill] sm:$0xff]  ;;  %v10114_v21 = vld [vmem:[#allocation166_spill] sm:$0xff]  ;;  %v10122_v30 = vld [vmem:[#allocation95_spill] sm:$0xff] }
 0x9a7   :  { %v4809_v58 = vpop.eup %4808  ;;  %v3626_v18 = vadd.f32 %v7819_v40, %v3100_v9  ;;  %v2972_v35 = vmul.f32 %v7709_v45, %v2907_v53  ;;  %v8292_v44 = vadd.f32 %v7734_v11, %v2721_v29  ;;  %v10113_v14 = vld [vmem:[#allocation56_spill] sm:$0xff]  ;;  %v10115_v40 = vld [vmem:[#allocation231_spill] sm:$0xff]  ;;  %v3057_v53 = vadd.f32 %v7728_v10, %v2991_v33 }
 0x9a8   :  { %v3740_v42 = vadd.f32 %v8051_v5, %v3659_v59  ;;  %v4811_v51 = vpop.eup %4810  ;;  %v10107_v59 = vld [vmem:[#allocation118_spill] sm:$0xff]  ;;  %v3613_v0 = vadd.f32 %v10115_v40, %v3087_v47  ;;  %v2797_v17 = vadd.f32 %v7734_v11, %v2731_v20  ;;  %v2648_v20 = vmul.f32 %v4807_v36, %v10122_v30  ;;  %v10130_v36 = vld [vmem:[#allocation217_spill] sm:$0xff] }
 0x9a9   :  { %4816 = vrcp.f32 %v10107_v59  ;;  %v3038_v33 = vadd.f32 %v7728_v10, %v2972_v35 }
 0x9aa   :  { %3977 = vperm.xlu0 %4549, %v3740_v42   ;;  %4818 = vrcp.f32 %v2505_v25  ;;  %v4813_v42 = vpop.eup %4812  ;;  %v2173_v25 = vsub.f32 %v10114_v21, %v10113_v14  ;;  %v3707_v21 = vadd.f32 %v7775_v57, %v3626_v18  ;;  %v3694_v55 = vadd.f32 %v7755_v12, %v3613_v0 }
 0x9ab   :  { %4551 = vset.pattern.permute.xlu2 %v10079_v22  ;;  %3881 = vperm.xlu1 %4550, %v3708_v46   ;;  %4820 = vrcp.f32 %v10105_v24  ;;  %v10112_v22 = vld [vmem:[#allocation237_spill] sm:$0xff]  ;;  %v10116_v46 = vld [vmem:[#allocation106_spill] sm:$0xff]  ;;  %v10117_v24 = vld [vmem:[#allocation27_spill] sm:$0xff] }
 0x9ac   :  { %3857 = vperm.xlu2 %4551, %v3700_v16   ;;  %v3622_v15 = vadd.f32 %v10112_v22, %v3096_v1  ;;  %4822 = vrcp.f32 %v2534_v62  ;;  %v4815_v16 = vpop.eup %4814  ;;  %v2634_v9 = vmul.f32 %v4805_v34, %v10116_v46  ;;  %v10118_v29 = vsub.f32 %v10055_v28, %v10117_v24  ;;  %v10120_v1 = vld [vmem:[#allocation208_spill] sm:$0xff]  ;;  %v10121_v62 = vld [vmem:[#allocation107_spill] sm:$0xff] }
 0x9ad   :  { %4824 = vrcp.f32 %v2557_v26  ;;  %v2553_v22 = vsub.f32 %v10120_v1, %v10119_v8  ;;  %v10123_v47 = vsub.f32 %v10121_v62, %v10122_v30  ;;  %v10125_v34 = vld [vmem:[#allocation220_spill] sm:$0xff]  ;;  %v3121_v62 = vadd.f32 %v3057_v53, %v2797_v17  ;;  %v8329_v53 = vpop.permute.xlu1 %3429 }
 0x9ae   :  { %v2909_v54 = vmul.f32 %v4811_v51, %v10118_v29  ;;  %v2531_v3 = vsub.f32 %v10125_v34, %v10124_v50  ;;  %v3703_v28 = vadd.f32 %v7775_v57, %v3622_v15  ;;  %v2649_v51 = vmul.f32 %v4809_v58, %v10117_v24  ;;  %v10126_v1 = vld [vmem:[#allocation136_spill] sm:$0xff] }
 0x9af   :  { %v2908_v40 = vmul.f32 %v4813_v42, %v10123_v47  ;;  %v4817_v26 = vpop.eup %4816  ;;  %v2521_v18 = vsub.f32 %v10127_v49, %v10126_v1  ;;  %v2686_v35 = vmul.f32 %v4815_v16, %v10113_v14  ;;  %v10128_v47 = vld [vmem:[#allocation113_spill] sm:$0xff]  ;;  %4826 = vrcp.f32 %v10124_v50  ;;  %v10131_v49 = vld [vmem:[#allocation235_spill] sm:$0xff] }
 0x9b0   :  { %v4819_v29 = vpop.eup %4818  ;;  %v2527_v30 = vsub.f32 %v10130_v36, %v10081_v38  ;;  %v2974_v58 = vmul.f32 %v7709_v45, %v2909_v54  ;;  %4828 = vrcp.f32 %v2553_v22  ;;  %v3647_v0 = vadd.f32 %v10131_v49, %v3121_v62  ;;  %v10132_v22 = vld [vmem:[#allocation241_spill] sm:$0xff] }
 0x9b1   :  { %v4821_v42 = vpop.eup %4820  ;;  %v2973_v17 = vmul.f32 %v7709_v45, %v2908_v40  ;;  %v3102_v14 = vadd.f32 %v3038_v33, %v8204_v23  ;;  %4830 = vrcp.f32 %v2531_v3  ;;  %v2699_v50 = vmul.f32 %v7720_v6, %v2634_v9  ;;  %v10133_v23 = vld [vmem:[#allocation131_spill] sm:$0xff] }
 0x9b2   :  { %3878 = vperm.xlu0 %4549, %v3707_v21   ;;  %v4823_v15 = vpop.eup %4822  ;;  %v2714_v38 = vmul.f32 %v7720_v6, %v2649_v51  ;;  %v2665_v54 = vmul.f32 %v8256_v56, %v10069_v19  ;;  %4832 = vrcp.f32 %v2521_v18  ;;  %v2713_v24 = vmul.f32 %v7720_v6, %v2648_v20  ;;  %v10135_v9 = vld [vmem:[#allocation55_spill] sm:$0xff]  ;;  %v10138_v56 = vld [vmem:[#allocation144_spill] sm:$0xff] }
 0x9b3   :  { %3866 = vperm.xlu1 %4550, %v3703_v28   ;;  %v4825_v16 = vpop.eup %4824  ;;  %v3628_v21 = vadd.f32 %v10132_v22, %v3102_v14  ;;  %v2751_v40 = vmul.f32 %v7720_v6, %v2686_v35  ;;  %4834 = vrcp.f32 %v2527_v30  ;;  %v3040_v3 = vadd.f32 %v7728_v10, %v2974_v58  ;;  %v10136_v28 = vld [vmem:[#allocation58_spill] sm:$0xff]  ;;  %v10142_v14 = vld [vmem:[#allocation29_spill] sm:$0xff] }
 0x9b4   :  { %3839 = vperm.xlu2 %4551, %v3694_v55   ;;  %v10134_v55 = vsub.f32 %v10133_v23, %v10116_v46  ;;  %v10137_v51 = vsub.f32 %v10135_v9, %v10136_v28  ;;  %4836 = vrcp.f32 %v10119_v8  ;;  %v3728_v18 = vadd.f32 %v10138_v56, %v3647_v0  ;;  %v10139_v35 = vld [vmem:[#allocation194_spill] sm:$0xff] }
 0x9b5   :  { %v3039_v20 = vadd.f32 %v7728_v10, %v2973_v17  ;;  %v2946_v62 = vmul.f32 %v4825_v16, %v2173_v25  ;;  %v4827_v36 = vpop.eup %4826  ;;  %v10140_v30 = vld [vmem:[#allocation30_spill] sm:$0xff]  ;;  %v2780_v46 = vadd.f32 %v7734_v11, %v2714_v38  ;;  %v2663_v22 = vmul.f32 %v4821_v42, %v10136_v28  ;;  %v10144_v38 = vld [vmem:[#allocation125_spill] sm:$0xff] }
 0x9b6   :  { %v2894_v33 = vmul.f32 %v4819_v29, %v10134_v55  ;;  %v2923_v1 = vmul.f32 %v4823_v15, %v10137_v51  ;;  %v2552_v49 = vsub.f32 %v10140_v30, %v10139_v35  ;;  %v10141_v29 = vld [vmem:[#allocation102_spill] sm:$0xff]  ;;  %v4829_v23 = vpop.eup %4828  ;;  %v2779_v15 = vadd.f32 %v7734_v11, %v2713_v24  ;;  %v8368_v30 = vpop.permute.xlu1 %3447 }
 0x9b7   :  { %v3717_v58 = vadd.f32 %v10142_v14, %v10141_v29  ;;  %v3709_v8 = vadd.f32 %v8045_v31, %v3628_v21  ;;  %v8357_v0 = vmul.f32 %v7720_v6, %v2665_v54  ;;  %v8360_v25 = vmul.f32 %v4817_v26, %v10071_v60  ;;  %v4831_v17 = vpop.eup %4830  ;;  %v10143_v16 = vld [vmem:[#allocation150_spill] sm:$0xff]  ;;  %v10146_v29 = vld [vmem:[#allocation77_spill] sm:$0xff] }
 0x9b8   :  { %4838 = vrcp.f32 %v10143_v16  ;;  %v10145_v55 = vld [vmem:[#allocation202_spill] sm:$0xff]  ;;  %v3104_v51 = vadd.f32 %v3040_v3, %v2780_v46  ;;  %v2988_v42 = vmul.f32 %v7709_v45, %v2923_v1  ;;  %v4833_v24 = vpop.eup %4832  ;;  %v2765_v21 = vadd.f32 %v7734_v11, %v2699_v50  ;;  %v8373_v46 = vpop.permute.xlu2 %3466  ;;  %v10147_v50 = vld [vmem:[#allocation239_spill] sm:$0xff] }
 0x9b9   :  { %v2506_v9 = vsub.f32 %v10145_v55, %v10144_v38  ;;  %v2959_v54 = vmul.f32 %v7709_v45, %v2894_v33  ;;  %v3103_v28 = vadd.f32 %v3039_v20, %v2779_v15  ;;  %v3011_v26 = vmul.f32 %v7709_v45, %v2946_v62  ;;  %v10148_v20 = vld [vmem:[#allocation46_spill] sm:$0xff] }
 0x9ba   :  { %3941 = vperm.xlu0 %4549, %v3728_v18   ;;  %v4835_v18 = vpop.eup %4834  ;;  %4840 = vrcp.f32 %v2552_v49  ;;  %v3630_v34 = vadd.f32 %v10146_v29, %v3104_v51  ;;  %v2728_v3 = vmul.f32 %v7720_v6, %v2663_v22  ;;  %v2817_v1 = vadd.f32 %v7734_v11, %v2751_v40  ;;  %v10154_v29 = vld [vmem:[#allocation210_spill] sm:$0xff] }
 0x9bb   :  { %3908 = vperm.xlu1 %4550, %v3717_v58   ;;  %v4837_v58 = vpop.eup %4836  ;;  %4842 = vrcp.f32 %v10139_v35  ;;  %v3629_v33 = vadd.f32 %v10147_v50, %v3103_v28  ;;  %v2660_v15 = vmul.f32 %v4827_v36, %v10148_v20  ;;  %v10151_v49 = vsub.f32 %v10096_v13, %v10095_v4  ;;  %v10153_v35 = vld [vmem:[#allocation132_spill] sm:$0xff]  ;;  %v10157_v13 = vld [vmem:[#allocation218_spill] sm:$0xff] }
 0x9bc   :  { %3884 = vperm.xlu2 %4551, %v3709_v8   ;;  %v10149_v8 = vld [vmem:[#allocation73_spill] sm:$0xff]  ;;  %4844 = vrcp.f32 %v2506_v9  ;;  %v10152_v55 = vsub.f32 %v10061_v2, %v10060_v61  ;;  %v3054_v51 = vadd.f32 %v7728_v10, %v2988_v42  ;;  %v2515_v28 = vsub.f32 %v10154_v29, %v10153_v35  ;;  %v10155_v50 = vld [vmem:[#allocation156_spill] sm:$0xff]  ;;  %v10160_v29 = vld [vmem:[#allocation158_spill] sm:$0xff] }
 0x9bd   :  { %v10150_v62 = vsub.f32 %v10149_v8, %v10148_v20  ;;  %v2942_v22 = vmul.f32 %v4829_v23, %v10151_v49  ;;  %v3025_v36 = vadd.f32 %v7728_v10, %v2959_v54  ;;  %v10156_v20 = vsub.f32 %v10155_v50, %v10065_v43 }
 0x9be   :  { %v2910_v40 = vmul.f32 %v4833_v24, %v10152_v55  ;;  %v3077_v9 = vadd.f32 %v7728_v10, %v3011_v26  ;;  %v4839_v8 = vpop.eup %4838  ;;  %v2539_v23 = vsub.f32 %v10157_v13, %v10107_v59  ;;  %v3711_v61 = vadd.f32 %v8045_v31, %v3630_v34  ;;  %v10158_v24 = vld [vmem:[#allocation179_spill] sm:$0xff]  ;;  %v10159_v26 = vld [vmem:[#allocation8_spill] sm:$0xff]  ;;  %v10162_v13 = vld [vmem:[#allocation145_spill] sm:$0xff] }
 0x9bf   :  { %v2920_v38 = vmul.f32 %v4831_v17, %v10150_v62  ;;  %v2916_v17 = vmul.f32 %v4835_v18, %v10156_v20  ;;  %v2794_v2 = vadd.f32 %v7734_v11, %v2728_v3  ;;  %v2682_v42 = vmul.f32 %v4837_v58, %v10095_v4  ;;  %v10161_v20 = vld [vmem:[#allocation233_spill] sm:$0xff] }
 0x9c0   :  { %4846 = vrcp.f32 %v10158_v24  ;;  %v3710_v54 = vadd.f32 %v8045_v31, %v3629_v33  ;;  %v2725_v62 = vmul.f32 %v7720_v6, %v2660_v15  ;;  %v4841_v18 = vpop.eup %4840  ;;  %v2528_v49 = vsub.f32 %v10159_v26, %v10158_v24  ;;  %v8410_v33 = vpop.permute.xlu1 %3460  ;;  %v10166_v24 = vld [vmem:[#allocation110_spill] sm:$0xff] }
 0x9c1   :  { %v2985_v43 = vmul.f32 %v7709_v45, %v2920_v38  ;;  %v2975_v59 = vmul.f32 %v7709_v45, %v2910_v40  ;;  %v3118_v55 = vadd.f32 %v3054_v51, %v2794_v2  ;;  %v3007_v34 = vmul.f32 %v7709_v45, %v2942_v22  ;;  %v4843_v3 = vpop.eup %4842  ;;  %v10165_v2 = vld [vmem:[#allocation139_spill] sm:$0xff] }
 0x9c2   :  { %4848 = vrcp.f32 %v2515_v28  ;;  %v3089_v4 = vadd.f32 %v3025_v36, %v2765_v21  ;;  %v2981_v58 = vmul.f32 %v7709_v45, %v2916_v17  ;;  %v3141_v15 = vadd.f32 %v3077_v9, %v2817_v1  ;;  %v4845_v38 = vpop.eup %4844  ;;  %v10163_v28 = vld [vmem:[#allocation69_spill] sm:$0xff] }
 0x9c3   :  { %3890 = vperm.xlu1 %4550, %v3711_v61   ;;  %4850 = vrcp.f32 %v2539_v23  ;;  %v2671_v35 = vmul.f32 %v4839_v8, %v10077_v63  ;;  %v3644_v50 = vadd.f32 %v10160_v29, %v3118_v55  ;;  %v2747_v51 = vmul.f32 %v7720_v6, %v2682_v42  ;;  %v10171_v29 = vld [vmem:[#allocation10_spill] sm:$0xff] }
 0x9c4   :  { %3887 = vperm.xlu2 %4551, %v3710_v54   ;;  %v3615_v22 = vadd.f32 %v10161_v20, %v3089_v4  ;;  %v10164_v21 = vsub.f32 %v10162_v13, %v10163_v28  ;;  %v3051_v17 = vadd.f32 %v7728_v10, %v2985_v43  ;;  %4852 = vrcp.f32 %v2528_v49  ;;  %v10168_v43 = vld [vmem:[#allocation174_spill] sm:$0xff]  ;;  %v10169_v49 = vld [vmem:[#allocation176_spill] sm:$0xff]  ;;  %v10172_v13 = vld [vmem:[#allocation15_spill] sm:$0xff] }
 0x9c5   :  { %v3504_v40 = vpop.permute.xlu2 %3503  ;;  %v3041_v1 = vadd.f32 %v7728_v10, %v2975_v59  ;;  %v2791_v9 = vadd.f32 %v7734_v11, %v2725_v62  ;;  %v3073_v8 = vadd.f32 %v7728_v10, %v3007_v34  ;;  %v10167_v42 = vsub.f32 %v10165_v2, %v10166_v24  ;;  %v10170_v4 = vld [vmem:[#allocation228_spill] sm:$0xff]  ;;  %v10174_v2 = vld [vmem:[#allocation242_spill] sm:$0xff] }
 0x9c6   :  { %v2941_v36 = vmul.f32 %v4841_v18, %v10164_v21  ;;  %v3667_v61 = vadd.f32 %v3504_v40, %v3141_v15  ;;  %v4847_v23 = vpop.eup %4846  ;;  %v3047_v26 = vadd.f32 %v7728_v10, %v2981_v58  ;;  %v2681_v55 = vmul.f32 %v4843_v3, %v10163_v28 }
 0x9c7   :  { %v2895_v54 = vmul.f32 %v4845_v38, %v10167_v42  ;;  %4854 = vrcp.f32 %v10168_v43  ;;  %v2560_v59 = vsub.f32 %v10170_v4, %v10169_v49  ;;  %v3725_v62 = vadd.f32 %v10138_v56, %v3644_v50 }
 0x9c8   :  { %v3748_v18 = vadd.f32 %v8194_v27, %v3667_v61  ;;  %v2813_v34 = vadd.f32 %v7734_v11, %v2747_v51  ;;  %v4849_v15 = vpop.eup %4848  ;;  %v2536_v40 = vsub.f32 %v10171_v29, %v10088_v37  ;;  %v3696_v38 = vadd.f32 %v7755_v12, %v3615_v22  ;;  %v10173_v61 = vld [vmem:[#allocation40_spill] sm:$0xff]  ;;  %v10180_v29 = vld [vmem:[#allocation59_spill] sm:$0xff] }
 0x9c9   :  { %v3006_v58 = vmul.f32 %v7709_v45, %v2941_v36  ;;  %v3115_v3 = vadd.f32 %v3051_v17, %v2791_v9  ;;  %v4851_v20 = vpop.eup %4850  ;;  %4856 = vrcp.f32 %v10169_v49  ;;  %v2542_v28 = vsub.f32 %v10172_v13, %v10143_v16 }
 0x9ca   :  { %4001 = vperm.xlu0 %4549, %v3748_v18   ;;  %v3105_v50 = vadd.f32 %v3041_v1, %v8225_v48  ;;  %v3137_v51 = vadd.f32 %v3073_v8, %v2813_v34  ;;  %v2960_v21 = vmul.f32 %v7709_v45, %v2895_v54  ;;  %v3111_v37 = vadd.f32 %v3047_v26, %v8292_v44  ;;  %v4853_v9 = vpop.eup %4852  ;;  %v10175_v1 = vld [vmem:[#allocation83_spill] sm:$0xff]  ;;  %v10178_v18 = vld [vmem:[#allocation45_spill] sm:$0xff] }
 0x9cb   :  { %3932 = vperm.xlu1 %4550, %v3725_v62   ;;  %v2746_v22 = vmul.f32 %v7720_v6, %v2681_v55  ;;  %v3641_v36 = vadd.f32 %v10173_v61, %v3115_v3  ;;  %4858 = vrcp.f32 %v2560_v59  ;;  %v2733_v16 = vmul.f32 %v7720_v6, %v8360_v25  ;;  %v10177_v55 = vld [vmem:[#allocation149_spill] sm:$0xff]  ;;  %v10183_v3 = vld [vmem:[#allocation199_spill] sm:$0xff]  ;;  %v10186_v61 = vld [vmem:[#allocation66_spill] sm:$0xff] }
 0x9cc   :  { %3845 = vperm.xlu2 %4551, %v3696_v38   ;;  %v3479_v17 = vpop.permute.xlu1 %3478  ;;  %v3631_v24 = vadd.f32 %v10174_v2, %v3105_v50  ;;  %4860 = vrcp.f32 %v2536_v40  ;;  %v3637_v8 = vadd.f32 %v10175_v1, %v3111_v37  ;;  %v3072_v44 = vadd.f32 %v7728_v10, %v3006_v58  ;;  %v10181_v40 = vld [vmem:[#allocation90_spill] sm:$0xff]  ;;  %v10190_v1 = vld [vmem:[#allocation240_spill] sm:$0xff] }
 0x9cd   :  { %v8449_v48 = vadd.f32 %v3479_v17, %v3137_v51  ;;  %v10176_v42 = vsub.f32 %v10072_v52, %v10071_v60  ;;  %v4855_v26 = vpop.eup %4854  ;;  %4862 = vrcp.f32 %v2542_v28  ;;  %v10179_v49 = vsub.f32 %v10177_v55, %v10178_v18  ;;  %v10185_v28 = vld [vmem:[#allocation224_spill] sm:$0xff] }
 0x9ce   :  { %v2736_v59 = vmul.f32 %v7720_v6, %v2671_v35  ;;  %v8462_v25 = vadd.f32 %v7734_v11, %v8357_v0  ;;  %v3026_v62 = vadd.f32 %v7728_v10, %v2960_v21  ;;  %v2812_v34 = vadd.f32 %v7734_v11, %v2746_v22 }
 0x9cf   :  { %v2928_v54 = vmul.f32 %v4851_v20, %v10176_v42  ;;  %v2904_v4 = vmul.f32 %v4849_v15, %v10179_v49  ;;  %v10182_v60 = vsub.f32 %v10180_v29, %v10181_v40  ;;  %v3722_v38 = vadd.f32 %v10142_v14, %v3641_v36  ;;  %v4857_v58 = vpop.eup %4856  ;;  %v10184_v20 = vld [vmem:[#allocation205_spill] sm:$0xff]  ;;  %v10187_v36 = vld [vmem:[#allocation14_spill] sm:$0xff] }
 0x9d0   :  { %v2550_v15 = vsub.f32 %v10184_v20, %v10183_v3  ;;  %v3712_v35 = vadd.f32 %v8045_v31, %v3631_v24  ;;  %v2657_v13 = vmul.f32 %v4847_v23, %v10181_v40  ;;  %v2799_v0 = vadd.f32 %v7734_v11, %v2733_v16  ;;  %v10189_v24 = vld [vmem:[#allocation96_spill] sm:$0xff]  ;;  %v10191_v49 = vld [vmem:[#allocation33_spill] sm:$0xff] }
 0x9d1   :  { %v2917_v52 = vmul.f32 %v4853_v9, %v10182_v60  ;;  %v2554_v50 = vsub.f32 %v10185_v28, %v10168_v43  ;;  %v3718_v51 = vadd.f32 %v10142_v14, %v3637_v8  ;;  %v3136_v21 = vadd.f32 %v3072_v44, %v2812_v34  ;;  %v4859_v22 = vpop.eup %4858  ;;  %v10188_v43 = vld [vmem:[#allocation183_spill] sm:$0xff]  ;;  %v10193_v29 = vld [vmem:[#allocation193_spill] sm:$0xff] }
 0x9d2   :  { %v2993_v37 = vmul.f32 %v7709_v45, %v2928_v54  ;;  %3923 = vperm.xlu0 %4549, %v3722_v38   ;;  %4864 = vrcp.f32 %v10186_v61  ;;  %v2522_v17 = vsub.f32 %v10187_v36, %v10186_v61  ;;  %v2969_v9 = vmul.f32 %v7709_v45, %v2904_v4  ;;  %v4861_v2 = vpop.eup %4860  ;;  %v10202_v61 = vld [vmem:[#allocation211_spill] sm:$0xff] }
 0x9d3   :  { %v8484_v23 = vadd.f32 %v7734_v11, %v2736_v59  ;;  %3893 = vperm.xlu1 %4550, %v3712_v35   ;;  %4866 = vrcp.f32 %v10188_v43  ;;  %v3090_v16 = vadd.f32 %v3026_v62, %v10189_v24  ;;  %v3662_v8 = vadd.f32 %v10190_v1, %v3136_v21  ;;  %v4863_v42 = vpop.eup %4862  ;;  %v10197_v35 = vld [vmem:[#allocation195_spill] sm:$0xff] }
 0x9d4   :  { %v2982_v44 = vmul.f32 %v7709_v45, %v2917_v52  ;;  %3911 = vperm.xlu2 %4551, %v3718_v51   ;;  %4868 = vrcp.f32 %v2550_v15  ;;  %v2689_v54 = vmul.f32 %v4857_v58, %v10128_v47  ;;  %v2722_v55 = vmul.f32 %v7720_v6, %v2657_v13  ;;  %v10194_v52 = vld [vmem:[#allocation159_spill] sm:$0xff]  ;;  %v10198_v13 = vld [vmem:[#allocation94_spill] sm:$0xff] }
 0x9d5   :  { %v2683_v18 = vmul.f32 %v4855_v26, %v10110_v7  ;;  %4870 = vrcp.f32 %v2554_v50  ;;  %v3616_v4 = vadd.f32 %v10191_v49, %v3090_v16  ;;  %v10192_v59 = vsub.f32 %v10129_v41, %v10128_v47  ;;  %v10200_v21 = vld [vmem:[#allocation67_spill] sm:$0xff]  ;;  %v10206_v49 = vld [vmem:[#allocation88_spill] sm:$0xff] }
 0x9d6   :  { %v3059_v34 = vadd.f32 %v7728_v10, %v2993_v37  ;;  %v2523_v40 = vsub.f32 %v10193_v29, %v10188_v43  ;;  %4872 = vrcp.f32 %v2522_v17  ;;  %v3035_v60 = vadd.f32 %v7728_v10, %v2969_v9  ;;  %v10204_v43 = vld [vmem:[#allocation227_spill] sm:$0xff] }
 0x9d7   :  { %v2949_v62 = vmul.f32 %v4859_v22, %v10192_v59  ;;  %v10195_v38 = vsub.f32 %v10194_v52, %v10069_v19  ;;  %4874 = vrcp.f32 %v10183_v3  ;;  %v10196_v26 = vsub.f32 %v10078_v39, %v10077_v63  ;;  %v10199_v19 = vld [vmem:[#allocation82_spill] sm:$0xff]  ;;  %v10201_v22 = vld [vmem:[#allocation203_spill] sm:$0xff] }
 0x9d8   :  { %v3743_v41 = vadd.f32 %v8051_v5, %v3662_v8  ;;  %v3048_v47 = vadd.f32 %v7728_v10, %v2982_v44  ;;  %v4865_v15 = vpop.eup %4864  ;;  %v2555_v28 = vsub.f32 %v10198_v13, %v10197_v35  ;;  %v2754_v50 = vmul.f32 %v7720_v6, %v2689_v54  ;;  %v10205_v54 = vld [vmem:[#allocation68_spill] sm:$0xff]  ;;  %v10207_v59 = vld [vmem:[#allocation238_spill] sm:$0xff]  ;;  %v10208_v52 = vld [vmem:[#allocation87_spill] sm:$0xff] }
 0x9d9   :  { %v2925_v58 = vmul.f32 %v4861_v2, %v10195_v38  ;;  %v2931_v20 = vmul.f32 %v4863_v42, %v10196_v26  ;;  %v2788_v51 = vadd.f32 %v7734_v11, %v2722_v55  ;;  %v3732_v37 = vadd.f32 %v10200_v21, %v10199_v19  ;;  %v4867_v3 = vpop.eup %4866  ;;  %v10203_v2 = vld [vmem:[#allocation188_spill] sm:$0xff]  ;;  %v10210_v26 = vld [vmem:[#allocation42_spill] sm:$0xff] }
 0x9da   :  { %v2556_v63 = vsub.f32 %v10202_v61, %v10201_v22  ;;  %v3697_v39 = vadd.f32 %v7755_v12, %v3616_v4  ;;  %v3014_v36 = vmul.f32 %v7709_v45, %v2949_v62  ;;  %v3123_v17 = vadd.f32 %v3059_v34, %v2799_v0  ;;  %3986 = vperm.xlu0 %4549, %v3743_v41   ;;  %v4869_v9 = vpop.eup %4868  ;;  %v8529_v34 = vpop.permute.xlu0 %3490 }
 0x9db   :  { %4876 = vrcp.f32 %v2523_v40  ;;  %v2543_v24 = vsub.f32 %v10204_v43, %v10203_v2  ;;  %v3099_v16 = vadd.f32 %v3035_v60, %v8183_v32  ;;  %v2990_v1 = vmul.f32 %v7709_v45, %v2925_v58  ;;  %3953 = vperm.xlu1 %4550, %v3732_v37   ;;  %v4871_v8 = vpop.eup %4870  ;;  %v10209_v58 = vld [vmem:[#allocation52_spill] sm:$0xff]  ;;  %v10218_v43 = vld [vmem:[#allocation111_spill] sm:$0xff] }
 0x9dc   :  { %4878 = vrcp.f32 %v10197_v35  ;;  %v2996_v44 = vmul.f32 %v7709_v45, %v2931_v20  ;;  %v3112_v42 = vadd.f32 %v3048_v47, %v2788_v51  ;;  %v3649_v55 = vadd.f32 %v10205_v54, %v3123_v17  ;;  %3848 = vperm.xlu2 %4551, %v3697_v39   ;;  %v4873_v0 = vpop.eup %4872  ;;  %v10217_v17 = vld [vmem:[#allocation185_spill] sm:$0xff] }
 0x9dd   :  { %4880 = vrcp.f32 %v2555_v28  ;;  %v2651_v4 = vmul.f32 %v4865_v15, %v10206_v49  ;;  %v3625_v62 = vadd.f32 %v10207_v59, %v3099_v16  ;;  %v2748_v32 = vmul.f32 %v7720_v6, %v2683_v18  ;;  %v4875_v29 = vpop.eup %4874  ;;  %v10212_v15 = vld [vmem:[#allocation165_spill] sm:$0xff]  ;;  %v10220_v59 = vld [vmem:[#allocation178_spill] sm:$0xff] }
 0x9de   :  { %4882 = vrcp.f32 %v2556_v63  ;;  %v2820_v40 = vadd.f32 %v7734_v11, %v2754_v50  ;;  %v3080_v60 = vadd.f32 %v7728_v10, %v3014_v36  ;;  %v3638_v38 = vadd.f32 %v10208_v52, %v3112_v42  ;;  %v10214_v18 = vld [vmem:[#allocation97_spill] sm:$0xff] }
 0x9df   :  { %v10211_v20 = vsub.f32 %v10209_v58, %v10210_v26  ;;  %4884 = vrcp.f32 %v2543_v24  ;;  %v3056_v47 = vadd.f32 %v7728_v10, %v2990_v1  ;;  %v10213_v35 = vsub.f32 %v10212_v15, %v10110_v7  ;;  %v10216_v36 = vld [vmem:[#allocation173_spill] sm:$0xff]  ;;  %v10226_v15 = vld [vmem:[#allocation70_spill] sm:$0xff] }
 0x9e0   :  { %4886 = vrcp.f32 %v10203_v2  ;;  %v10215_v28 = vsub.f32 %v10214_v18, %v10206_v49  ;;  %v3062_v51 = vadd.f32 %v7728_v10, %v2996_v44  ;;  %v3730_v19 = vadd.f32 %v10138_v56, %v3649_v55  ;;  %v10219_v55 = vld [vmem:[#allocation60_spill] sm:$0xff] }
 0x9e1   :  { %v2939_v41 = vmul.f32 %v4869_v9, %v10211_v20  ;;  %v2943_v13 = vmul.f32 %v4871_v8, %v10213_v35  ;;  %v4877_v37 = vpop.eup %4876  ;;  %4888 = vrcp.f32 %v10201_v22  ;;  %v2716_v61 = vmul.f32 %v7720_v6, %v2651_v4  ;;  %v10224_v20 = vld [vmem:[#allocation62_spill] sm:$0xff] }
 0x9e2   :  { %v2911_v50 = vmul.f32 %v4873_v0, %v10215_v28  ;;  %v3706_v63 = vadd.f32 %v7775_v57, %v3625_v62  ;;  %v2679_v7 = vmul.f32 %v4875_v29, %v10210_v26  ;;  %v4879_v39 = vpop.eup %4878  ;;  %v2508_v9 = vsub.f32 %v10217_v17, %v10216_v36  ;;  %3947 = vperm.xlu0 %4549, %v3730_v19   ;;  %v8563_v0 = vpop.permute.xlu1 %3509  ;;  %v10221_v62 = vld [vmem:[#allocation123_spill] sm:$0xff]  ;;  %v10228_v19 = vld [vmem:[#allocation24_spill] sm:$0xff] }
 0x9e3   :  { %v3144_v2 = vadd.f32 %v3080_v60, %v2820_v40  ;;  %v2652_v24 = vmul.f32 %v4867_v3, %v10218_v43  ;;  %v3719_v16 = vadd.f32 %v10142_v14, %v3638_v38  ;;  %v4881_v1 = vpop.eup %4880  ;;  %4890 = vrcp.f32 %v10216_v36  ;;  %v8570_v60 = vpop.permute.xlu2 %3515  ;;  %v10223_v26 = vld [vmem:[#allocation71_spill] sm:$0xff] }
 0x9e4   :  { %v3120_v22 = vadd.f32 %v3056_v47, %v8462_v25  ;;  %v3004_v8 = vmul.f32 %v7709_v45, %v2939_v41  ;;  %3875 = vperm.xlu1 %4550, %v3706_v63   ;;  %v3008_v57 = vmul.f32 %v7709_v45, %v2943_v13  ;;  %v4883_v44 = vpop.eup %4882  ;;  %v2976_v42 = vmul.f32 %v7709_v45, %v2911_v50  ;;  %v8581_v28 = vpop.permute.xlu0 %3833 }
 0x9e5   :  { %v3126_v54 = vadd.f32 %v3062_v51, %v8484_v23  ;;  %v3670_v3 = vadd.f32 %v10219_v55, %v3144_v2  ;;  %3914 = vperm.xlu2 %4551, %v3719_v16   ;;  %v2814_v49 = vadd.f32 %v7734_v11, %v2748_v32  ;;  %v4885_v4 = vpop.eup %4884  ;;  %4892 = vrcp.f32 %v10220_v59  ;;  %v10222_v23 = vld [vmem:[#allocation236_spill] sm:$0xff]  ;;  %v10232_v2 = vld [vmem:[#allocation49_spill] sm:$0xff] }
 0x9e6   :  { %v2782_v25 = vadd.f32 %v7734_v11, %v2716_v61  ;;  %v3646_v29 = vadd.f32 %v10221_v62, %v3120_v22  ;;  %v2744_v40 = vmul.f32 %v7720_v6, %v2679_v7  ;;  %v4887_v52 = vpop.eup %4886  ;;  %4894 = vrcp.f32 %v2508_v9  ;;  %v10229_v61 = vld [vmem:[#allocation89_spill] sm:$0xff]  ;;  %v10231_v9 = vld [vmem:[#allocation86_spill] sm:$0xff]  ;;  %v10235_v16 = vld [vmem:[#allocation124_spill] sm:$0xff] }
 0x9e7   :  { %v3652_v38 = vadd.f32 %v10222_v23, %v3126_v54  ;;  %v2717_v58 = vmul.f32 %v7720_v6, %v2652_v24  ;;  %v10225_v32 = vsub.f32 %v10223_v26, %v10224_v20  ;;  %v4889_v47 = vpop.eup %4888  ;;  %v10227_v35 = vsub.f32 %v10226_v15, %v10218_v43  ;;  %v10237_v62 = vld [vmem:[#allocation142_spill] sm:$0xff]  ;;  %v10238_v23 = vld [vmem:[#allocation12_spill] sm:$0xff] }
 0x9e8   :  { %v2684_v18 = vmul.f32 %v4879_v39, %v10224_v20  ;;  %v3070_v50 = vadd.f32 %v7728_v10, %v3004_v8  ;;  %v3074_v51 = vadd.f32 %v7728_v10, %v3008_v57  ;;  %v10230_v63 = vsub.f32 %v10228_v19, %v10229_v61  ;;  %v10234_v39 = vld [vmem:[#allocation196_spill] sm:$0xff] }
 0x9e9   :  { %v2944_v41 = vmul.f32 %v4881_v1, %v10225_v32  ;;  %v2912_v13 = vmul.f32 %v4877_v37, %v10227_v35  ;;  %v3042_v36 = vadd.f32 %v7728_v10, %v2976_v42  ;;  %v3751_v17 = vadd.f32 %v8194_v27, %v3670_v3  ;;  %v4891_v24 = vpop.eup %4890 }
 0x9ea   :  { %v2945_v7 = vmul.f32 %v4883_v44, %v10230_v63  ;;  %v10233_v43 = vsub.f32 %v10231_v9, %v10232_v2  ;;  %v2558_v1 = vsub.f32 %v10235_v16, %v10234_v39  ;;  %v3727_v22 = vadd.f32 %v10138_v56, %v3646_v29  ;;  %v10236_v44 = vld [vmem:[#allocation230_spill] sm:$0xff] }
 0x9eb   :  { %v2672_v8 = vmul.f32 %v4887_v52, %v10232_v2  ;;  %v2810_v57 = vadd.f32 %v7734_v11, %v2744_v40  ;;  %v2563_v54 = vsub.f32 %v10236_v44, %v10220_v59  ;;  %v3733_v42 = vadd.f32 %v10200_v21, %v3652_v38  ;;  %4010 = vperm.xlu0 %4549, %v3751_v17   ;;  %v8613_v19 = vpop.permute.xlu2 %3527 }
 0x9ec   :  { %v2932_v37 = vmul.f32 %v4885_v4, %v10233_v43  ;;  %v3009_v55 = vmul.f32 %v7709_v45, %v2944_v41  ;;  %v2685_v3 = vmul.f32 %v4889_v47, %v10229_v61  ;;  %v8603_v4 = vpop.eup %4892  ;;  %v2530_v26 = vsub.f32 %v10238_v23, %v10237_v62  ;;  %3938 = vperm.xlu1 %4550, %v3727_v22   ;;  %v3485_v41 = vpop.permute.xlu1 %3484  ;;  %v10241_v61 = vld [vmem:[#allocation18_spill] sm:$0xff] }
 0x9ed   :  { %v2977_v29 = vmul.f32 %v7709_v45, %v2912_v13  ;;  %v3134_v52 = vadd.f32 %v3070_v50, %v2810_v57  ;;  %v3138_v40 = vadd.f32 %v3074_v51, %v2814_v49  ;;  %v4895_v20 = vpop.eup %4894  ;;  %v3106_v32 = vadd.f32 %v3042_v36, %v2782_v25  ;;  %3956 = vperm.xlu2 %4551, %v3733_v42   ;;  %v10239_v49 = vld [vmem:[#allocation76_spill] sm:$0xff]  ;;  %v10240_v51 = vld [vmem:[#allocation135_spill] sm:$0xff]  ;;  %v8630_v16 = vpop.permute.xlu0 %3863  ;;  %v10244_v42 = vld [vmem:[#allocation222_spill] sm:$0xff] }
 0x9ee   :  { %v2749_v59 = vmul.f32 %v7720_v6, %v2684_v18  ;;  %v2997_v38 = vmul.f32 %v7709_v45, %v2932_v37  ;;  %v3010_v47 = vmul.f32 %v7709_v45, %v2945_v7  ;;  %4896 = vrcp.f32 %v2558_v1 }
 0x9ef   :  { %v2737_v15 = vmul.f32 %v7720_v6, %v2672_v8  ;;  %v3660_v35 = vadd.f32 %v8410_v33, %v3134_v52  ;;  %v3664_v13 = vadd.f32 %v3485_v41, %v3138_v40  ;;  %4898 = vrcp.f32 %v2563_v54  ;;  %v10243_v54 = vld [vmem:[#allocation172_spill] sm:$0xff]  ;;  %v10245_v52 = vld [vmem:[#allocation115_spill] sm:$0xff]  ;;  %v10246_v40 = vld [vmem:[#allocation153_spill] sm:$0xff] }
 0x9f0   :  { %v3632_v50 = vadd.f32 %v10239_v49, %v3106_v32  ;;  %v3075_v25 = vadd.f32 %v7728_v10, %v3009_v55  ;;  %v2750_v18 = vmul.f32 %v7720_v6, %v2685_v3  ;;  %4900 = vrcp.f32 %v2530_v26  ;;  %v10247_v32 = vld [vmem:[#allocation57_spill] sm:$0xff]  ;;  %v10249_v41 = vld [vmem:[#allocation91_spill] sm:$0xff] }
 0x9f1   :  { %v10242_v63 = vsub.f32 %v10240_v51, %v10241_v61  ;;  %v3043_v36 = vadd.f32 %v7728_v10, %v2977_v29  ;;  %v3745_v17 = vadd.f32 %v8051_v5, %v3664_v13  ;;  %4902 = vrcp.f32 %v10234_v39  ;;  %v10250_v13 = vld [vmem:[#allocation93_spill] sm:$0xff] }
 0x9f2   :  { %v2815_v33 = vadd.f32 %v7734_v11, %v2749_v59  ;;  %v3063_v9 = vadd.f32 %v7728_v10, %v2997_v38  ;;  %v3076_v2 = vadd.f32 %v7728_v10, %v3010_v47  ;;  %4904 = vrcp.f32 %v10237_v62  ;;  %v10248_v59 = vld [vmem:[#allocation148_spill] sm:$0xff]  ;;  %v10251_v49 = vld [vmem:[#allocation157_spill] sm:$0xff] }
 0x9f3   :  { %v2897_v7 = vmul.f32 %v4895_v20, %v10242_v63  ;;  %v2637_v43 = vmul.f32 %v4891_v24, %v10241_v61  ;;  %v2783_v37 = vadd.f32 %v7734_v11, %v2717_v58  ;;  %v3741_v1 = vadd.f32 %v8051_v5, %v3660_v35  ;;  %3992 = vperm.xlu0 %4549, %v3745_v17  }
 0x9f4   :  { %v3713_v22 = vadd.f32 %v8045_v31, %v3632_v50  ;;  %v3139_v8 = vadd.f32 %v3075_v25, %v2815_v33  ;;  %v2803_v39 = vadd.f32 %v7734_v11, %v2737_v15  ;;  %v2816_v57 = vadd.f32 %v7734_v11, %v2750_v18  ;;  %v4897_v44 = vpop.eup %4896 }
 0x9f5   :  { %v2551_v55 = vsub.f32 %v10244_v42, %v10243_v54  ;;  %v3107_v3 = vadd.f32 %v3043_v36, %v2783_v37  ;;  %3980 = vperm.xlu1 %4550, %v3741_v1   ;;  %v4899_v24 = vpop.eup %4898  ;;  %v2962_v58 = vmul.f32 %v7709_v45, %v2897_v7  ;;  %v2174_v20 = vsub.f32 %v10246_v40, %v10245_v52  ;;  %v3497_v15 = vpop.permute.xlu2 %3496  ;;  %v10253_v37 = vld [vmem:[#allocation206_spill] sm:$0xff]  ;;  %v10254_v1 = vld [vmem:[#allocation213_spill] sm:$0xff]  ;;  %v10256_v42 = vld [vmem:[#allocation216_spill] sm:$0xff] }
 0x9f6   :  { %v3665_v62 = vadd.f32 %v8529_v34, %v3139_v8  ;;  %v3127_v23 = vadd.f32 %v3063_v9, %v2803_v39  ;;  %3896 = vperm.xlu2 %4551, %v3713_v22   ;;  %v3140_v26 = vadd.f32 %v3076_v2, %v2816_v57  ;;  %v4901_v29 = vpop.eup %4900  ;;  %v2179_v38 = vsub.f32 %v10248_v59, %v10247_v32  ;;  %v10252_v34 = vld [vmem:[#allocation120_spill] sm:$0xff]  ;;  %v10257_v40 = vld [vmem:[#allocation105_spill] sm:$0xff]  ;;  %v10259_v59 = vld [vmem:[#allocation234_spill] sm:$0xff] }
 0x9f7   :  { %v3633_v47 = vadd.f32 %v10249_v41, %v3107_v3  ;;  %v4903_v35 = vpop.eup %4902  ;;  %v2146_v50 = vsub.f32 %v10251_v49, %v10250_v13  ;;  %v2702_v25 = vmul.f32 %v7720_v6, %v2637_v43  ;;  %4906 = vrcp.f32 %v2551_v55  ;;  %v8665_v55 = vpop.permute.xlu0 %3842 }
 0x9f8   :  { %v3653_v18 = vadd.f32 %v10252_v34, %v3127_v23  ;;  %v8649_v51 = vadd.f32 %v3497_v15, %v3140_v26  ;;  %v4905_v61 = vpop.eup %4904  ;;  %v2952_v63 = vmul.f32 %v4899_v24, %v2179_v38  ;;  %v2947_v7 = vmul.f32 %v4897_v44, %v2174_v20  ;;  %v10255_v44 = vld [vmem:[#allocation138_spill] sm:$0xff]  ;;  %v10258_v20 = vld [vmem:[#allocation164_spill] sm:$0xff] }
 0x9f9   :  { %v3028_v36 = vadd.f32 %v7728_v10, %v2962_v58  ;;  %v3746_v17 = vadd.f32 %v8051_v5, %v3665_v62  ;;  %v2919_v33 = vmul.f32 %v4901_v29, %v2146_v50  ;;  %4908 = vrcp.f32 %v10243_v54  ;;  %v8670_v62 = vpop.permute.xlu1 %3533  ;;  %v10260_v50 = vld [vmem:[#allocation84_spill] sm:$0xff] }
 0x9fa   :  { %v3714_v9 = vadd.f32 %v8045_v31, %v3633_v47  ;;  %v2687_v2 = vmul.f32 %v4903_v35, %v10245_v52  ;;  %v2692_v43 = vmul.f32 %v8603_v4, %v10247_v32  ;;  %v2559_v22 = vsub.f32 %v10254_v1, %v10253_v37 }
 0x9fb   :  { %v2768_v8 = vadd.f32 %v7734_v11, %v2702_v25  ;;  %v2659_v39 = vmul.f32 %v4905_v61, %v10250_v13  ;;  %v3734_v57 = vadd.f32 %v10200_v21, %v3653_v18  ;;  %3995 = vperm.xlu0 %4549, %v3746_v17   ;;  %v2524_v54 = vsub.f32 %v10256_v42, %v10255_v44  ;;  %v10261_v61 = vld [vmem:[#allocation190_spill] sm:$0xff] }
 0x9fc   :  { %v3012_v3 = vmul.f32 %v7709_v45, %v2947_v7  ;;  %v3017_v4 = vmul.f32 %v7709_v45, %v2952_v63  ;;  %v2984_v58 = vmul.f32 %v7709_v45, %v2919_v33  ;;  %4910 = vrcp.f32 %v10255_v44  ;;  %v10262_v63 = vld [vmem:[#allocation229_spill] sm:$0xff] }
 0x9fd   :  { %3899 = vperm.xlu1 %4550, %v3714_v9   ;;  %v3092_v24 = vadd.f32 %v3028_v36, %v2768_v8  ;;  %v4907_v23 = vpop.eup %4906  ;;  %v2752_v26 = vmul.f32 %v7720_v6, %v2687_v2  ;;  %v8674_v29 = vpop.permute.xlu2 %3545  ;;  %v2757_v52 = vmul.f32 %v7720_v6, %v2692_v43  ;;  %v2167_v32 = vsub.f32 %v10258_v20, %v10257_v40  ;;  %v10263_v2 = vld [vmem:[#allocation169_spill] sm:$0xff]  ;;  %v10264_v43 = vld [vmem:[#allocation219_spill] sm:$0xff] }
 0x9fe   :  { %3959 = vperm.xlu2 %4551, %v3734_v57   ;;  %4912 = vrcp.f32 %v2559_v22  ;;  %v2724_v41 = vmul.f32 %v7720_v6, %v2659_v39  ;;  %v3078_v15 = vadd.f32 %v7728_v10, %v3012_v3  ;;  %v3083_v35 = vadd.f32 %v7728_v10, %v3017_v4  ;;  %v10266_v3 = vld [vmem:[#allocation50_spill] sm:$0xff]  ;;  %v10269_v20 = vld [vmem:[#allocation99_spill] sm:$0xff] }
 0x9ff   :  { %v3618_v38 = vadd.f32 %v10259_v59, %v3092_v24  ;;  %v4909_v47 = vpop.eup %4908  ;;  %4914 = vrcp.f32 %v2524_v54  ;;  %v3050_v13 = vadd.f32 %v7728_v10, %v2984_v58  ;;  %v2940_v49 = vmul.f32 %v4907_v23, %v2167_v32  ;;  %v8696_v1 = vpop.permute.xlu0 %3905  ;;  %v10265_v54 = vld [vmem:[#allocation36_spill] sm:$0xff] }
 0xa00   :  { %4916 = vrcp.f32 %v10253_v37  ;;  %v3735_v25 = vadd.f32 %v10200_v21, %v10260_v50  ;;  %v2818_v34 = vadd.f32 %v7734_v11, %v2752_v26  ;;  %v2823_v18 = vadd.f32 %v7734_v11, %v2757_v52  ;;  %v10267_v26 = vld [vmem:[#allocation38_spill] sm:$0xff] }
 0xa01   :  { %v2546_v7 = vsub.f32 %v10262_v63, %v10261_v61  ;;  %v3699_v36 = vadd.f32 %v7755_v12, %v3618_v38  ;;  %v2790_v17 = vadd.f32 %v7734_v11, %v2724_v41  ;;  %v2680_v33 = vmul.f32 %v4909_v47, %v10257_v40  ;;  %v10268_v52 = vld [vmem:[#allocation98_spill] sm:$0xff] }
 0xa02   :  { %v4911_v9 = vpop.eup %4910  ;;  %v2545_v37 = vsub.f32 %v10264_v43, %v10263_v2  ;;  %v3142_v22 = vadd.f32 %v3078_v15, %v2818_v34  ;;  %v3147_v8 = vadd.f32 %v3083_v35, %v2823_v18  ;;  %v3005_v44 = vmul.f32 %v7709_v45, %v2940_v49  ;;  %v10271_v49 = vld [vmem:[#allocation225_spill] sm:$0xff] }
 0xa03   :  { %v3114_v57 = vadd.f32 %v3050_v13, %v2790_v17  ;;  %v2175_v4 = vsub.f32 %v10266_v3, %v10265_v54  ;;  %4918 = vrcp.f32 %v10263_v2  ;;  %v2140_v40 = vsub.f32 %v10268_v52, %v10267_v26  ;;  %v10270_v13 = vld [vmem:[#allocation187_spill] sm:$0xff]  ;;  %v10273_v17 = vld [vmem:[#allocation112_spill] sm:$0xff] }
 0xa04   :  { %v4913_v39 = vpop.eup %4912  ;;  %v3540_v42 = vpop.permute.xlu1 %3539  ;;  %v3668_v24 = vadd.f32 %v8563_v0, %v3142_v22  ;;  %4920 = vrcp.f32 %v2546_v7  ;;  %v2745_v59 = vmul.f32 %v7720_v6, %v2680_v33  ;;  %v2653_v0 = vmul.f32 %v4911_v9, %v10267_v26  ;;  %v10272_v7 = vld [vmem:[#allocation9_spill] sm:$0xff]  ;;  %v10276_v22 = vld [vmem:[#allocation162_spill] sm:$0xff] }
 0xa05   :  { %3962 = vperm.xlu1 %4550, %v3735_v25   ;;  %v4915_v12 = vpop.eup %4914  ;;  %v3673_v58 = vadd.f32 %v3540_v42, %v3147_v8  ;;  %v3640_v32 = vadd.f32 %v10269_v20, %v3114_v57  ;;  %v2948_v41 = vmul.f32 %v4913_v39, %v2175_v4  ;;  %4922 = vrcp.f32 %v2545_v37  ;;  %v10274_v33 = vld [vmem:[#allocation137_spill] sm:$0xff]  ;;  %v10275_v37 = vld [vmem:[#allocation47_spill] sm:$0xff] }
 0xa06   :  { %3854 = vperm.xlu2 %4551, %v3699_v36   ;;  %v4917_v23 = vpop.eup %4916  ;;  %v8707_v38 = vpop.permute.xlu2 %3857  ;;  %4924 = vrcp.f32 %v10261_v61  ;;  %v2913_v15 = vmul.f32 %v4915_v12, %v2140_v40  ;;  %v3071_v35 = vadd.f32 %v7728_v10, %v3005_v44  ;;  %v2540_v50 = vsub.f32 %v10271_v49, %v10270_v13 }
 0xa07   :  { %v3754_v47 = vadd.f32 %v8194_v27, %v3673_v58  ;;  %v2688_v25 = vmul.f32 %v4917_v23, %v10265_v54  ;;  %v3749_v34 = vadd.f32 %v8194_v27, %v3668_v24  ;;  %v3721_v18 = vadd.f32 %v10142_v14, %v3640_v32  ;;  %v8732_v54 = vpop.permute.xlu0 %3869 }
 0xa08   :  { %v2811_v63 = vadd.f32 %v7734_v11, %v2745_v59  ;;  %v8720_v36 = vadd.s32 4294967288, %v10272_v7  ;;  %v2162_v9 = vsub.f32 %v10274_v33, %v10273_v17  ;;  %v3013_v2 = vmul.f32 %v7709_v45, %v2948_v41 }
 0xa09   :  { %4019 = vperm.xlu0 %4549, %v3754_v47   ;;  %v4919_v61 = vpop.eup %4918  ;;  %v2161_v8 = vsub.f32 %v10276_v22, %v10275_v37  ;;  %v2718_v39 = vmul.f32 %v7720_v6, %v2653_v0  ;;  %v2978_v57 = vmul.f32 %v7709_v45, %v2913_v15  ;;  %4926 = vrcp.f32 %v2540_v50  ;;  %v10277_v0 = vld [vmem:[#allocation168_spill] sm:$0xff]  ;;  %v10278_v50 = vld [vmem:[#allocation197_spill] sm:$0xff] }
 0xa0a   :  { %v4921_v43 = vpop.eup %4920  ;;  %v3135_v44 = vadd.f32 %v3071_v35, %v2811_v63  ;;  %v8730_v12 = vadd.s32 4294967280, %v10272_v7  ;;  %v2753_v3 = vmul.f32 %v7720_v6, %v2688_v25  ;;  %v4024_v58 = vperm.slane %v8581_v28, %v10272_v7  ;;  %v10279_v25 = vld [vmem:[#allocation109_spill] sm:$0xff] }
 0xa0b   :  { %v4923_v42 = vpop.eup %4922  ;;  %v2935_v40 = vmul.f32 %v4921_v43, %v2162_v9  ;;  %v2674_v20 = vmul.f32 %v4919_v61, %v10275_v37  ;;  %v3079_v32 = vadd.f32 %v7728_v10, %v3013_v2  ;;  %4928 = vrcp.f32 %v10270_v13  ;;  %v10280_v2 = vld [vmem:[#allocation104_spill] sm:$0xff]  ;;  %v10281_v43 = vld [vmem:[#allocation129_spill] sm:$0xff] }
 0xa0c   :  { %v4925_v24 = vpop.eup %4924  ;;  %v3661_v23 = vadd.f32 %v8373_v46, %v3135_v44  ;;  %v3044_v41 = vadd.f32 %v7728_v10, %v2978_v57  ;;  %v2934_v47 = vmul.f32 %v4923_v42, %v2161_v8  ;;  %v3729_v46 = vadd.f32 %v10138_v56, %v10277_v0 }
 0xa0d   :  { %4004 = vperm.xlu1 %4550, %v3749_v34   ;;  %v3837_v4 = vpop.permute.xlu1 %3836  ;;  %v2675_v15 = vmul.f32 %v4925_v24, %v10273_v17  ;;  %v2819_v35 = vadd.f32 %v7734_v11, %v2753_v3  ;;  %v2561_v34 = vsub.f32 %v10279_v25, %v10278_v50  ;;  %v2784_v13 = vadd.f32 %v7734_v11, %v2718_v39  ;;  %v10282_v3 = vld [vmem:[#allocation122_spill] sm:$0xff] }
 0xa0e   :  { %3920 = vperm.xlu2 %4551, %v3721_v18   ;;  %v4026_v26 = vperm.slane %v3837_v4, %v8720_v36  ;;  %v3840_v52 = vpop.permute.xlu2 %3839  ;;  %v3742_v18 = vadd.f32 %v8051_v5, %v3661_v23  ;;  %v3000_v61 = vmul.f32 %v7709_v45, %v2935_v40  ;;  %v2999_v17 = vmul.f32 %v7709_v45, %v2934_v47 }
 0xa0f   :  { %v4030_v59 = vperm.slane %v3840_v52, %v8730_v12  ;;  %v4927_v63 = vpop.eup %4926  ;;  %v3143_v33 = vadd.f32 %v3079_v32, %v2819_v35  ;;  %v3108_v9 = vadd.f32 %v3044_v41, %v2784_v13  ;;  %v2156_v37 = vsub.f32 %v10281_v43, %v10280_v2  ;;  %v8762_v57 = vpop.permute.xlu0 %3929  ;;  %v10285_v13 = vld [vmem:[#allocation119_spill] sm:$0xff] }
 0xa10   :  { %v4028_v28 = vsel %vm4027_vm5, %v4026_v26, %v4024_v58  ;;  %v2740_v22 = vmul.f32 %v7720_v6, %v2675_v15  ;;  %v2739_v8 = vmul.f32 %v7720_v6, %v2674_v20  ;;  %4930 = vrcp.f32 %v2561_v34  ;;  %v10284_v20 = vld [vmem:[#allocation215_spill] sm:$0xff] }
 0xa11   :  { %v8750_v49 = vsel %vm4031_vm6, %v4030_v59, %v4028_v28  ;;  %v3669_v39 = vadd.f32 %v8570_v60, %v3143_v33  ;;  %v4929_v42 = vpop.eup %4928  ;;  %v3634_v4 = vadd.f32 %v10282_v3, %v3108_v9  ;;  %v4053_v24 = vperm.slane %v8707_v38, %v10272_v7  ;;  %v10283_v60 = vld [vmem:[#allocation209_spill] sm:$0xff]  ;;  %v10287_v33 = vld [vmem:[#allocation80_spill] sm:$0xff] }
 0xa12   :  { %4932 = vrcp.f32 %v10278_v50  ;;  %v4056_v26 = vperm.slane %v8630_v16, %v8730_v12  ;;  %v2929_v52 = vmul.f32 %v4927_v63, %v2156_v37  ;;  %v3066_v40 = vadd.f32 %v7728_v10, %v3000_v61 }
 0xa13   :  { %v2562_v32 = vsub.f32 %v10284_v20, %v10283_v60  ;;  %v3065_v59 = vadd.f32 %v7728_v10, %v2999_v17  ;;  %v2669_v38 = vmul.f32 %v4929_v42, %v10280_v2  ;;  %v2806_v47 = vadd.f32 %v7734_v11, %v2740_v22  ;;  %v10291_v20 = vld [vmem:[#allocation26_spill] sm:$0xff] }
 0xa14   :  { %v3750_v28 = vadd.f32 %v8194_v27, %v3669_v39  ;;  %v3715_v16 = vadd.f32 %v8045_v31, %v3634_v4  ;;  %v2994_v15 = vmul.f32 %v7709_v45, %v2929_v52  ;;  %v10288_v4 = vld [vmem:[#allocation171_spill] sm:$0xff] }
 0xa15   :  { %3944 = vperm.xlu1 %4550, %v3729_v46   ;;  %v3861_v44 = vpop.permute.xlu1 %3860  ;;  %v2805_v46 = vadd.f32 %v7734_v11, %v2739_v8  ;;  %v3130_v35 = vadd.f32 %v3066_v40, %v2806_v47  ;;  %4934 = vrcp.f32 %v2562_v32  ;;  %v2734_v61 = vmul.f32 %v7720_v6, %v2669_v38  ;;  %v10290_v40 = vld [vmem:[#allocation85_spill] sm:$0xff] }
 0xa16   :  { %3983 = vperm.xlu2 %4551, %v3742_v18   ;;  %v4054_v58 = vperm.slane %v3861_v44, %v8720_v36  ;;  %v3885_v23 = vpop.permute.xlu2 %3884  ;;  %v4931_v50 = vpop.eup %4930  ;;  %v10286_v18 = vld [vmem:[#allocation25_spill] sm:$0xff]  ;;  %v3060_v8 = vadd.f32 %v7728_v10, %v2994_v15  ;;  %4936 = vrcp.f32 %v10283_v60  ;;  %v2178_v32 = vsub.f32 %v10291_v20, %v10290_v40  ;;  %v10293_v60 = vld [vmem:[#allocation232_spill] sm:$0xff] }
 0xa17   :  { %v3129_v25 = vadd.f32 %v3065_v59, %v2805_v46  ;;  %v2177_v63 = vsub.f32 %v10286_v18, %v10285_v13  ;;  %v3656_v9 = vadd.f32 %v10287_v33, %v3130_v35  ;;  %v4069_v2 = vperm.slane %v3885_v23, %v8720_v36  ;;  %v3873_v39 = vpop.permute.xlu0 %3872  ;;  %v10292_v59 = vld [vmem:[#allocation198_spill] sm:$0xff] }
 0xa18   :  { %v4055_v41 = vsel %vm4027_vm5, %v4054_v58, %v4053_v24  ;;  %v4933_v34 = vpop.eup %4932  ;;  %v10289_v24 = vld [vmem:[#allocation221_spill] sm:$0xff]  ;;  %v2800_v58 = vadd.f32 %v7734_v11, %v2734_v61  ;;  %v8808_v38 = vadd.s32 4294967272, %v10272_v7  ;;  %4938 = vrcp.f32 %v10288_v4 }
 0xa19   :  { %v4057_v0 = vsel %vm4031_vm6, %v4056_v26, %v4055_v41  ;;  %v3655_v31 = vadd.f32 %v8329_v53, %v3129_v25  ;;  %v2950_v22 = vmul.f32 %v4931_v50, %v2177_v63  ;;  %v2690_v42 = vmul.f32 %v4933_v34, %v10285_v13  ;;  %v10294_v25 = vld [vmem:[#allocation116_spill] sm:$0xff] }
 0xa1a   :  { %v2548_v53 = vsub.f32 %v10289_v24, %v10288_v4  ;;  %v3737_v23 = vadd.f32 %v10200_v21, %v3656_v9  ;;  %v2564_v41 = vsub.f32 %v10293_v60, %v10292_v59  ;;  %4940 = vrcp.f32 %v10292_v59  ;;  %v10298_v60 = vld [vmem:[#allocation100_spill] sm:$0xff] }
 0xa1b   :  { %v4935_v52 = vpop.eup %4934  ;;  %v3736_v47 = vadd.f32 %v10200_v21, %v3655_v31  ;;  %v3015_v46 = vmul.f32 %v7709_v45, %v2950_v22  ;;  %v8818_v15 = vadd.s32 4294967256, %v10272_v7  ;;  %v2755_v35 = vmul.f32 %v7720_v6, %v2690_v42 }
 0xa1c   :  { %v2951_v50 = vmul.f32 %v4935_v52, %v2178_v32  ;;  %4942 = vrcp.f32 %v2548_v53  ;;  %v4937_v18 = vpop.eup %4936  ;;  %v4034_v63 = vperm.slane %v8665_v55, %v8808_v38  ;;  %v10297_v52 = vld [vmem:[#allocation79_spill] sm:$0xff] }
 0xa1d   :  { %4007 = vperm.xlu1 %4550, %v3750_v28   ;;  %v3882_v17 = vpop.permute.xlu1 %3881  ;;  %v3124_v28 = vadd.f32 %v3060_v8, %v2800_v58  ;;  %4944 = vrcp.f32 %v2564_v41 }
 0xa1e   :  { %3902 = vperm.xlu2 %4551, %v3715_v16   ;;  %v4068_v43 = vperm.slane %v3882_v17, %v10272_v7  ;;  %v3888_v37 = vpop.permute.xlu2 %3887  ;;  %v8813_v16 = vadd.s32 4294967264, %v10272_v7  ;;  %v3081_v17 = vadd.f32 %v7728_v10, %v3015_v46  ;;  %v4036_v55 = vsel %vm4035_vm7, %v4034_v63, %v8750_v49  ;;  %v4939_v22 = vpop.eup %4938 }
 0xa1f   :  { %v4071_v44 = vperm.slane %v3888_v37, %v8730_v12  ;;  %v3650_v34 = vadd.f32 %v10294_v25, %v3124_v28  ;;  %v3016_v58 = vmul.f32 %v7709_v45, %v2951_v50 }
 0xa20   :  { %v4070_v3 = vsel %vm4027_vm5, %v4069_v2, %v4068_v43  ;;  %v4060_v9 = vperm.slane %v8732_v54, %v8813_v16  ;;  %v4062_v2 = vperm.slane %v3873_v39, %v8818_v15  ;;  %v2821_v43 = vadd.f32 %v7734_v11, %v2755_v35  ;;  %v4941_v4 = vpop.eup %4940  ;;  %v10295_v39 = vld [vmem:[#allocation65_spill] sm:$0xff] }
 0xa21   :  { %v8801_v26 = vsel %vm4031_vm6, %v4071_v44, %v4070_v3  ;;  %v3731_v8 = vadd.f32 %v10138_v56, %v3650_v34  ;;  %v8835_v44 = vpop.permute.xlu0 %3935  ;;  %v2691_v54 = vmul.f32 %v4937_v18, %v10290_v40  ;;  %v3723_v24 = vadd.f32 %v10142_v14, %v10295_v39  ;;  %v10299_v14 = vld [vmem:[#allocation163_spill] sm:$0xff] }
 0xa22   :  { %v4943_v53 = vpop.eup %4942  ;;  %v3145_v49 = vadd.f32 %v3081_v17, %v2821_v43  ;;  %v2164_v41 = vsub.f32 %v10299_v14, %v10298_v60  ;;  %v3082_v50 = vadd.f32 %v7728_v10, %v3016_v58  ;;  %v8868_v43 = vadd.s32 4294967248, %v10272_v7 }
 0xa23   :  { %v4945_v56 = vpop.eup %4944  ;;  %v2756_v32 = vmul.f32 %v7720_v6, %v2691_v54 }
 0xa24   :  { %v3671_v20 = vadd.f32 %v8613_v19, %v3145_v49  ;;  %v2937_v34 = vmul.f32 %v4943_v53, %v2164_v41  ;;  %v10300_v49 = vld [vmem:[#allocation20_spill] sm:$0xff] }
 0xa25   :  { %3968 = vperm.xlu1 %4550, %v3737_v23   ;;  %v3867_v13 = vpop.permute.xlu1 %3866  ;;  %v10296_v23 = vld [vmem:[#allocation121_spill] sm:$0xff]  ;;  %v2822_v18 = vadd.f32 %v7734_v11, %v2756_v32  ;;  %v3738_v58 = vadd.f32 %v10200_v21, %v10300_v49 }
 0xa26   :  { %3965 = vperm.xlu2 %4551, %v3736_v47   ;;  %v4058_v61 = vperm.slane %v3867_v13, %v8808_v38  ;;  %v3846_v33 = vpop.permute.xlu2 %3845  ;;  %v2180_v40 = vsub.f32 %v10297_v52, %v10296_v23  ;;  %v4083_v47 = vperm.slane %v8696_v1, %v10272_v7  ;;  %v3752_v13 = vadd.f32 %v8194_v27, %v3671_v20 }
 0xa27   :  { %v4038_v31 = vperm.slane %v3846_v33, %v8813_v16  ;;  %v2693_v63 = vmul.f32 %v4941_v4, %v10296_v23  ;;  %v2677_v1 = vmul.f32 %v4939_v22, %v10298_v60  ;;  %v3744_v33 = vadd.f32 %v8051_v5, %v8449_v48 }
 0xa28   :  { %v4059_v37 = vsel %vm4035_vm7, %v4058_v61, %v4057_v0  ;;  %v2953_v35 = vmul.f32 %v4945_v56, %v2180_v40  ;;  %v3146_v17 = vadd.f32 %v3082_v50, %v2822_v18 }
 0xa29   :  { %v4061_v42 = vsel %vm4039_vm8, %v4060_v9, %v4059_v37  ;;  %v4040_v3 = vsel %vm4039_vm8, %v4038_v31, %v4036_v55  ;;  %v3852_v9 = vpop.permute.xlu0 %3851  ;;  %v2758_v55 = vmul.f32 %v7720_v6, %v2693_v63  ;;  %v2742_v22 = vmul.f32 %v7720_v6, %v2677_v1 }
 0xa2a   :  { %v8843_v0 = vsel %vm4043_vm9, %v4062_v2, %v4061_v42  ;;  %v3018_v31 = vmul.f32 %v7709_v45, %v2953_v35  ;;  %v3002_v2 = vmul.f32 %v7709_v45, %v2937_v34  ;;  %v3672_v37 = vadd.f32 %v8670_v62, %v3146_v17 }
 0xa2b   :  { %v4046_v39 = vperm.slane %v3852_v9, %v8868_v43  ;;  %v2824_v53 = vadd.f32 %v7734_v11, %v2758_v55  ;;  %v2808_v56 = vadd.f32 %v7734_v11, %v2742_v22  ;;  %v4101_v11 = vperm.slane %v8835_v44, %v8730_v12 }
 0xa2c   :  { %v3084_v42 = vadd.f32 %v7728_v10, %v3018_v31  ;;  %v3068_v45 = vadd.f32 %v7728_v10, %v3002_v2  ;;  %v3747_v34 = vadd.f32 %v8051_v5, %v8649_v51 }
 0xa2d   :  { %3950 = vperm.xlu1 %4550, %v3731_v8   ;;  %v3909_v59 = vpop.permute.xlu1 %3908 }
 0xa2e   :  { %3926 = vperm.xlu2 %4551, %v3723_v24   ;;  %v4084_v28 = vperm.slane %v3909_v59, %v8720_v36  ;;  %v3912_v46 = vpop.permute.xlu2 %3911  ;;  %v3753_v24 = vadd.f32 %v8194_v27, %v3672_v37  ;;  %v3148_v52 = vadd.f32 %v3084_v42, %v2824_v53  ;;  %v3132_v10 = vadd.f32 %v3068_v45, %v2808_v56 }
 0xa2f   :  { %v4086_v25 = vperm.slane %v3912_v46, %v8730_v12 }
 0xa30   :  { %v4085_v19 = vsel %vm4027_vm5, %v4084_v28, %v4083_v47  ;;  %v3658_v32 = vadd.f32 %v8368_v30, %v3132_v10 }
 0xa31   :  { %v4087_v61 = vsel %vm4031_vm6, %v4086_v25, %v4085_v19  ;;  %v3918_v40 = vpop.permute.xlu0 %3917 }
 0xa32   :  { %v4090_v41 = vperm.slane %v3918_v40, %v8813_v16 }
 0xa35   :  { %4013 = vperm.xlu1 %4550, %v3752_v13   ;;  %v3891_v8 = vpop.permute.xlu1 %3890 }
 0xa36   :  { %3989 = vperm.xlu2 %4551, %v3744_v33   ;;  %v4073_v48 = vperm.slane %v3891_v8, %v8808_v38  ;;  %v3849_v54 = vpop.permute.xlu2 %3848  ;;  %v8912_v33 = vadd.s32 4294967240, %v10272_v7 }
 0xa37   :  { %v4042_v4 = vperm.slane %v3849_v54, %v8818_v15 }
 0xa38   :  { %v4074_v62 = vsel %vm4035_vm7, %v4073_v48, %v8801_v26  ;;  %v3674_v26 = vadd.f32 %v8674_v29, %v3148_v52 }
 0xa39   :  { %v4044_v6 = vsel %vm4043_vm9, %v4042_v4, %v4040_v3  ;;  %v4098_v3 = vperm.slane %v8762_v57, %v10272_v7  ;;  %v3739_v57 = vadd.f32 %v10200_v21, %v3658_v32 }
 0xa3a   :  { %v4048_v23 = vsel %vm4047_vm10, %v4046_v39, %v4044_v6  ;;  %v3755_v29 = vadd.f32 %v8194_v27, %v3674_v26  ;;  %v3978_v27 = vpop.permute.xlu0 %3977 }
 0xa3d   :  { %4016 = vperm.xlu1 %4550, %v3753_v24   ;;  %v3933_v20 = vpop.permute.xlu1 %3932  ;;  %v4128_v24 = vperm.slane %v3978_v27, %v10272_v7 }
 0xa3e   :  { %3971 = vperm.xlu2 %4551, %v3738_v58   ;;  %v4099_v59 = vperm.slane %v3933_v20, %v8720_v36 }
 0xa3f   :  { %v3915_v60 = vpop.permute.xlu2 %3914 }
 0xa40   :  { %v4088_v14 = vperm.slane %v3915_v60, %v8808_v38  ;;  %v4100_v47 = vsel %vm4027_vm5, %v4099_v59, %v4098_v3 }
 0xa41   :  { %v4102_v30 = vsel %vm4031_vm6, %v4101_v11, %v4100_v47 }
 0xa42   :  { %v4089_v28 = vsel %vm4035_vm7, %v4088_v14, %v4087_v61  ;;  %v3879_v9 = vpop.permute.xlu0 %3878 }
 0xa43   :  { %v4091_v46 = vsel %vm4039_vm8, %v4090_v41, %v4089_v28  ;;  %v4066_v31 = vperm.slane %v3879_v9, %v8912_v33 }
 0xa45   :  { %4022 = vperm.xlu1 %4550, %v3755_v29   ;;  %v3894_v35 = vpop.permute.xlu1 %3893 }
 0xa46   :  { %3974 = vperm.xlu2 %4551, %v3739_v57   ;;  %v4075_v44 = vperm.slane %v3894_v35, %v8813_v16 }
 0xa47   :  { %v3957_v50 = vpop.permute.xlu2 %3956 }
 0xa48   :  { %v4076_v25 = vsel %vm4039_vm8, %v4075_v44, %v4074_v62  ;;  %v4114_v13 = vperm.slane %v3957_v50, %v8720_v36 }
 0xa4a   :  { %v8924_v42 = vpop.permute.xlu0 %3941 }
 0xa4d   :  { %v3954_v19 = vpop.permute.xlu1 %3953 }
 0xa4e   :  { %3998 = vperm.xlu2 %4551, %v3747_v34   ;;  %v4113_v21 = vperm.slane %v3954_v19, %v10272_v7  ;;  %v3762_v34 = vld [vmem:[%s9067_s2 + $0x30] sm:$0xff] }
 0xa50   :  { %v3897_v18 = vpop.permute.xlu2 %3896  ;;  %v4115_v61 = vsel %vm4027_vm5, %v4114_v13, %v4113_v21  ;;  %v3761_v21 = vld [vmem:[%s9067_s2 + $0x28] sm:$0xff] }
 0xa51   :  { %v4077_v63 = vperm.slane %v3897_v18, %v8818_v15  ;;  %v3760_v18 = vld [vmem:[%s9067_s2 + $0x20] sm:$0xff] }
 0xa52   :  { %v8933_v49 = vpop.permute.xlu0 %4001 }
 0xa53   :  { %v4078_v1 = vsel %vm4043_vm9, %v4077_v63, %v4076_v25  ;;  %v3763_v25 = vld [vmem:[%s9067_s2 + $0x38] sm:$0xff] }
 0xa54   :  { %4182 = vmatpush.msra.mxu0 %v3763_v25  ;;  %v3759_v63 = vld [vmem:[%s9067_s2 + $0x18] sm:$0xff] }
 0xa56   :  { %v3876_v17 = vpop.permute.xlu1 %3875  ;;  %4183 = vmatpush.msra.mxu0 %v3762_v34  ;;  %v4143_v34 = vperm.slane %v8933_v49, %v10272_v7 }
 0xa57   :  { %v4064_v5 = vperm.slane %v3876_v17, %v8868_v43  ;;  %v3757_v17 = vld [vmem:[%s9067_s2 + $0x8] sm:$0xff] }
 0xa58   :  { %v3960_v51 = vpop.permute.xlu2 %3959  ;;  %4184 = vmatpush.msra.mxu0 %v3761_v21 }
 0xa59   :  { %v4116_v2 = vperm.slane %v3960_v51, %v8730_v12  ;;  %v4065_v37 = vsel %vm4047_vm10, %v4064_v5, %v8843_v0 }
 0xa5a   :  { %v4067_v55 = vsel %vm4051_vm11, %v4066_v31, %v4065_v37  ;;  %v3924_v26 = vpop.permute.xlu0 %3923  ;;  %4185 = vmatpush.msra.mxu0 %v3760_v18  ;;  %v4105_v37 = vperm.slane %v8924_v42, %v8813_v16 }
 0xa5b   :  { %v8921_v8 = vsel %vm4031_vm6, %v4116_v2, %v4115_v61  ;;  %v3758_v61 = vld [vmem:[%s9067_s2 + $0x10] sm:$0xff]  ;;  %v3756_v2 = vld [vmem:[%s9067_s2] sm:$0xff] }
 0xa5c   :  { %4186 = vmatpush.msra.mxu0 %v3759_v63 }
 0xa5e   :  { %v3939_v22 = vpop.permute.xlu1 %3938  ;;  %4187 = vmatpush.msra.mxu0 %v3758_v61 }
 0xa5f   :  { %v4103_v48 = vperm.slane %v3939_v22, %v8808_v38 }
 0xa60   :  { %v3855_v54 = vpop.permute.xlu2 %3854  ;;  %4188 = vmatpush.msra.mxu0 %v3757_v17 }
 0xa61   :  { %v4050_v4 = vperm.slane %v3855_v54, %v8912_v33  ;;  %v8928_v45 = vsel %vm4035_vm7, %v4103_v48, %v4102_v30  ;;  %v4094_v30 = vperm.slane %v3924_v26, %v8868_v43 }
 0xa62   :  { %v8942_v60 = vpop.permute.xlu0 %3986  ;;  %4189 = vmatpush.msra.mxu0 %v3756_v2 }
 0xa63   :  { %v4052_v39 = vsel %vm4051_vm11, %v4050_v4, %v4048_v23  ;;  %v4106_v4 = vsel %vm4039_vm8, %v4105_v37, %v8928_v45 }
 0xa64   :  { %v4159_v0 = vsel %vm4158_vm12, %v4067_v55, %v4052_v39 }
 0xa67   :  { %v3981_v62 = vpop.permute.xlu1 %3980 }
 0xa68   :  { %v4129_v53 = vperm.slane %v3981_v62, %v8720_v36  ;;  %v3921_v6 = vpop.permute.xlu2 %3920 }
 0xa69   :  { %v4092_v41 = vperm.slane %v3921_v6, %v8818_v15 }
 0xa6a   :  { %v8936_v58 = vsel %vm4027_vm5, %v4129_v53, %v4128_v24  ;;  %v3948_v47 = vpop.permute.xlu0 %3947 }
 0xa6b   :  { %v4093_v29 = vsel %vm4043_vm9, %v4092_v41, %v4091_v46  ;;  %v4109_v42 = vperm.slane %v3948_v47, %v8868_v43 }
 0xa6c   :  { %v4095_v44 = vsel %vm4047_vm10, %v4094_v30, %v4093_v29 }
 0xa6f   :  { %v3900_v56 = vpop.permute.xlu1 %3899 }
 0xa70   :  { %v4079_v52 = vperm.slane %v3900_v56, %v8868_v43  ;;  %v3984_v10 = vpop.permute.xlu2 %3983 }
 0xa71   :  { %v4131_v48 = vperm.slane %v3984_v10, %v8730_v12 }
 0xa72   :  { %v4080_v40 = vsel %vm4047_vm10, %v4079_v52, %v4078_v1  ;;  %v8960_v13 = vpop.permute.xlu0 %4010  ;;  %v4133_v52 = vperm.slane %v8942_v60, %v8808_v38 }
 0xa73   :  { %v4132_v6 = vsel %vm4031_vm6, %v4131_v48, %v8936_v58  ;;  %v4148_v63 = vperm.slane %v8960_v13, %v8808_v38 }
 0xa74   :  { %v4134_v58 = vsel %vm4035_vm7, %v4133_v52, %v4132_v6 }
 0xa77   :  { %v3963_v23 = vpop.permute.xlu1 %3962 }
 0xa78   :  { %v3903_v20 = vpop.permute.xlu2 %3902  ;;  %v4118_v5 = vperm.slane %v3963_v23, %v8808_v38 }
 0xa79   :  { %v4081_v32 = vperm.slane %v3903_v20, %v8912_v33 }
 0xa7a   :  { %v3993_v55 = vpop.permute.xlu0 %3992  ;;  %v4119_v54 = vsel %vm4035_vm7, %v4118_v5, %v8921_v8  ;;  %v4994_v5 = vmov 30.0  }
 0xa7b   :  { %v4082_v3 = vsel %vm4051_vm11, %v4081_v32, %v4080_v40  ;;  %4946 = vrcp.f32 %v4994_v5 }
 0xa7c   :  { %v4161_v59 = vsel %vm4160_vm13, %v4082_v3, %v4159_v0 }
 0xa7f   :  { %v8944_v11 = vpop.permute.xlu1 %4004 }
 0xa80   :  { %v3966_v14 = vpop.permute.xlu2 %3965 }
 0xa81   :  { %v4120_v51 = vperm.slane %v3966_v14, %v8813_v16  ;;  %v4137_v14 = vperm.slane %v3993_v55, %v8818_v15 }
 0xa82   :  { %v3996_v60 = vpop.permute.xlu0 %3995 }
 0xa83   :  { %v4121_v39 = vsel %vm4039_vm8, %v4120_v51, %v4119_v54  ;;  %v4139_v29 = vperm.slane %v3996_v60, %v8868_v43  ;;  %v4555_v60 = vld [vmem:[%s9072_s7] ss:$0 sm:$0xff] }
 0xa87   :  { %v3945_v28 = vpop.permute.xlu1 %3944 }
 0xa88   :  { %v3927_v57 = vpop.permute.xlu2 %3926  ;;  %v4107_v31 = vperm.slane %v3945_v28, %v8818_v15 }
 0xa89   :  { %v4096_v35 = vperm.slane %v3927_v57, %v8912_v33 }
 0xa8a   :  { %v4108_v0 = vsel %vm4043_vm9, %v4107_v31, %v4106_v4 }
 0xa8b   :  { %v4097_v50 = vsel %vm4051_vm11, %v4096_v35, %v4095_v44  ;;  %v4110_v10 = vsel %vm4047_vm10, %v4109_v42, %v4108_v0  ;;  %v4144_v44 = vperm.slane %v8944_v11, %v8720_v36  ;;  %v4020_v36 = vpop.permute.xlu0 %4019  ;;  %v4238_v0 = vld [vmem:[%s9071_s6 + $0x18] sm:$0x3f]  ;;  %v4236_v42 = vld [vmem:[%s9071_s6 + $0x8] sm:$0xff] }
 0xa8c   :  { %v4163_v46 = vsel %vm4162_vm14, %v4097_v50, %v4161_v59  ;;  %v4154_v7 = vperm.slane %v4020_v36, %v8868_v43 }
 0xa8f   :  { %v8958_v27 = vpop.permute.xlu1 %4007 }
 0xa90   :  { %v3990_v19 = vpop.permute.xlu2 %3989  ;;  %v4146_v25 = vperm.slane %v8958_v27, %v8730_v12 }
 0xa91   :  { %v4135_v8 = vperm.slane %v3990_v19, %v8813_v16  ;;  %v4145_v19 = vsel %vm4027_vm5, %v4144_v44, %v4143_v34 }
 0xa92   :  { %v4147_v21 = vsel %vm4031_vm6, %v4146_v25, %v4145_v19 }
 0xa93   :  { %v4136_v3 = vsel %vm4039_vm8, %v4135_v8, %v4134_v58  ;;  %v4149_v11 = vsel %vm4035_vm7, %v4148_v63, %v4147_v21 }
 0xa94   :  { %v4138_v41 = vsel %vm4043_vm9, %v4137_v14, %v4136_v3 }
 0xa95   :  { %v4140_v57 = vsel %vm4047_vm10, %v4139_v29, %v4138_v41 }
 0xa97   :  { %v3969_v1 = vpop.permute.xlu1 %3968 }
 0xa98   :  { %v3972_v9 = vpop.permute.xlu2 %3971  ;;  %v4122_v22 = vperm.slane %v3969_v1, %v8818_v15 }
 0xa99   :  { %v4124_v62 = vperm.slane %v3972_v9, %v8868_v43 }
 0xa9a   :  { %v4123_v24 = vsel %vm4043_vm9, %v4122_v22, %v4121_v39 }
 0xa9b   :  { %v4125_v26 = vsel %vm4047_vm10, %v4124_v62, %v4123_v24  ;;  %v4237_v62 = vld [vmem:[%s9071_s6 + $0x10] sm:$0xff]  ;;  %v4235_v24 = vld [vmem:[%s9071_s6] sm:$0xff] }
 0xa9f   :  { %v3951_v53 = vpop.permute.xlu1 %3950 }
 0xaa0   :  { %v4111_v45 = vperm.slane %v3951_v53, %v8912_v33  ;;  %v3975_v56 = vpop.permute.xlu2 %3974 }
 0xaa1   :  { %v4126_v40 = vperm.slane %v3975_v56, %v8912_v33 }
 0xaa2   :  { %v4112_v23 = vsel %vm4051_vm11, %v4111_v45, %v4110_v10 }
 0xaa3   :  { %v4165_v20 = vsel %vm4164_vm15, %v4112_v23, %v4163_v46  ;;  %v4127_v32 = vsel %vm4051_vm11, %v4126_v40, %v4125_v26  ;;  %v4553_v23 = vld [vmem:[%s9069_s4] ss:$0 sm:$0xff]  ;;  %s4278_s4 = sshll.u32 %s9073_s8, 4  ;;  %s4279_s4 = int_to_ptr.hbm [resolvable:$true] %s4278_s4 }
 0xaa4   :  { %v4167_v59 = vsel %vm4166_vm1, %v4127_v32, %v4165_v20  ;;  %v4554_v32 = vld [vmem:[%s9070_s5] ss:$0 sm:$0xff] }
 0xaa7   :  { %v4014_v47 = vpop.permute.xlu1 %4013 }
 0xaa8   :  { %v3999_v28 = vpop.permute.xlu2 %3998  ;;  %v4150_v18 = vperm.slane %v4014_v47, %v8813_v16 }
 0xaa9   :  { %v4141_v30 = vperm.slane %v3999_v28, %v8912_v33 }
 0xaaa   :  { %v4151_v12 = vsel %vm4039_vm8, %v4150_v18, %v4149_v11 }
 0xaab   :  { %v4142_v35 = vsel %vm4051_vm11, %v4141_v30, %v4140_v57 }
 0xaac   :  { %v4169_v50 = vsel %vm4168_vm2, %v4142_v35, %v4167_v59 }
 0xaaf   :  { %v4017_v46 = vpop.permute.xlu1 %4016 }
 0xab0   :  { %v4152_v61 = vperm.slane %v4017_v46, %v8818_v15  ;;  %v4552_v15 = vld [vmem:[%s9068_s3] ss:$0 sm:$0xff] }
 0xab2   :  { %v4153_v27 = vsel %vm4043_vm9, %v4152_v61, %v4151_v12 }
 0xab3   :  { %v4155_v16 = vsel %vm4047_vm10, %v4154_v7, %v4153_v27 }
 0xab7   :  { %v4023_v49 = vpop.permute.xlu1 %4022 }
 0xab8   :  { %v4156_v1 = vperm.slane %v4023_v49, %v8912_v33  ;;  %v4947_v33 = vpop.eup %4946 }
 0xab9   :  { %v4199_v51 = vmul.f32 30.0, %v4947_v33  ;;  %vm4203_vm5 = vweird.f32 %v4947_v33 }
 0xaba   :  { %v4157_v9 = vsel %vm4051_vm11, %v4156_v1, %v4155_v16 }
 0xabb   :  { %v4171_v38 = vsel %vm4170_vm3, %v4157_v9, %v4169_v50  ;;  %v4200_v31 = vsub.f32 1.0, %v4199_v51 }
 0xabc   :  { %4316 = vmatmul.msk.f32.vlgmr.msra.gmra.mxu0 %vm77_vm0, %v4171_v38  ;;  %vm4246_vm0 = vcmask 1045504  }
 0xabd   :  { %v4201_v2 = vmul.f32 %v4947_v33, %v4200_v31  ;;  %4317 = vmatpush.msk.msra.mxu1 %vm4246_vm0, %v4238_v0 }
 0xabf   :  { %v4202_v37 = vadd.f32 %v4947_v33, %v4201_v2  ;;  %4263 = vmatpush.msra.mxu1 %v4237_v62 }
 0xac1   :  { %v4204_v55 = vsel %vm4203_vm5, %v4947_v33, %v4202_v37  ;;  %4264 = vmatpush.msra.mxu1 %v4236_v42 }
 0xac3   :  { %4265 = vmatpush.msra.mxu1 %v4235_v24 }
 0xb39   :  { %v4191_v13 = vpop.f32.mrf.mxu0 }
 0xb3a   :  { %v4192_v17 = vadd.f32 %v4552_v15, %v4191_v13 }
 0xb3c   :  { %v4195_v43 = vsel %vm4194_vm4, %v4192_v17, 0.0 }
 0xb3d   :  { %4196 = vadd.xlane.f32.xlu2 %v4195_v43 }
 0xbb0   :  { %v4197_v22 = vpop.xlane.xlu2 %4196 }
 0xbb1   :  { %v4205_v48 = vmul.f32 %v4204_v55, %v4197_v22 }
 0xbb3   :  { %v4206_v54 = vsub.f32 %v4192_v17, %v4205_v48 }
 0xbb5   :  { %v4207_v4 = vmul.f32 %v4206_v54, %v4206_v54 }
 0xbb7   :  { %v4208_v39 = vsel %vm4194_vm4, %v4207_v4, 0.0 }
 0xbb8   :  { %4209 = vadd.xlane.f32.xlu0 %v4208_v39 }
 0xc2b   :  { %v4210_v53 = vpop.xlane.xlu0 %4209 }
 0xc2c   :  { %v4211_v6 = vmul.f32 %v4210_v53, %v4204_v55 }
 0xc2e   :  { %v4212_v8 = vadd.f32 1e-05, %v4211_v6 }
 0xc30   :  { %4948 = vrsqrt.f32 %v4212_v8  ;;  %vm4219_vm7 = vweird.f32 %v4212_v8 }
 0xc36   :  { %v4949_v45 = vpop.eup %4948 }
 0xc37   :  { %v4214_v56 = vmul.f32 %v4949_v45, %v4212_v8  ;;  %vm4220_vm6 = vweird.f32 %v4949_v45 }
 0xc38   :  { %vm4221_vm8 = vmor %vm4219_vm7, %vm4220_vm6 }
 0xc39   :  { %v4215_v52 = vmul.f32 %v4949_v45, %v4214_v56 }
 0xc3b   :  { %v4216_v10 = vmul.f32 0.5, %v4215_v52 }
 0xc3d   :  { %v4217_v40 = vsub.f32 1.5, %v4216_v10 }
 0xc3f   :  { %v4218_v26 = vmul.f32 %v4949_v45, %v4217_v40 }
 0xc41   :  { %v4222_v58 = vsel %vm4221_vm8, %v4949_v45, %v4218_v26 }
 0xc42   :  { %v4223_v20 = vmul.f32 %v4222_v58, %v4206_v54 }
 0xc44   :  { %v4228_v3 = vmul.f32 %v4553_v23, %v4223_v20 }
 0xc46   :  { %v4233_v59 = vadd.f32 %v4554_v32, %v4228_v3 }
 0xc48   :  { %v4234_v14 = vmax.f32 %v4233_v59, 0.0 }
 0xc4a   :  { %4318 = vmatmul.msk.f32.vlgmr.msra.gmra.mxu1 %vm4194_vm4, %v4234_v14 }
 0xcc7   :  { %v4267_v41 = vpop.f32.mrf.mxu1 }
 0xcc8   :  { %v4268_v47 = vadd.f32 %v4555_v60, %v4267_v41 }
 0xcca   :  { %4270 = vst [vmem:[#allocation5] sm:$0xff] %v4268_v47 }
 0xccb   :  { %4281 = dma.vmem_to_hbm [thread:$0]  %s4277_s23, 128, %s4279_s4, [#allocation3]  }
 0xccc   :  { %4989 = dma.done.wait [#allocation3], 128  }
 0xccd   :  { %4990 = vsyncadd [#allocation3], 4294967168 }
 0xcce   :  { %4286 = vsyncpa [#allocation3], 1 }
 0xccf   :  { %4287 = vsyncpa [#allocation4], 1 }

</bundles_post_ra>
